<compile_context>
chip_gen: v5e
topology: v5e:2x2
jax: 0.10.0
libtpu: 0.0.40
codegen_flags: <defaults>
</compile_context>

<pallas_src>
import functools
import numpy as np
import jax
import jax.numpy as jnp
from jax import lax
from jax.experimental import pallas as pl
from jax.experimental.pallas import tpu as pltpu

# ---- module configuration (nb_filts = [32, 64], first=False) ----
B = 2
C_IN, C_OUT = 32, 64
H, W = 16, 16
HW = H * W                    # rows per image at the output resolution
R1 = (H + 1) * W              # rows of the conv1 output (height grows by 1)
BN_EPS = 1e-5
SELU_ALPHA = 1.6732632423543772848170429916717
SELU_SCALE = 1.0507009873554804934193349852946


# ----------------------------- Pallas kernel --------------------------------
def residual_block_kernel(x_ref, wA_ref, wB_ref, wd_ref, bias_ref, out_ref, *, nb):
    """Processes `nb` images per grid step.  Rows are flattened (h, w) positions
    (h-major, w-minor); lanes are channels, so each conv tap is one MXU matmul."""
    bf16 = jnp.bfloat16

    def mm(a, b):
        # bf16 x bf16 -> f32 accumulation: guaranteed single-pass MXU on every generation.
        return jnp.dot(a.astype(bf16), b, preferred_element_type=jnp.float32)

    def keep_masks(rows):
        # (rows, 1) bool masks, lane-broadcast by jnp.where (no full-size f32 mask arrays).
        col = lax.broadcasted_iota(jnp.int32, (rows, 1), 0) % W
        return col != 0, col != (W - 1)

    def shift_prev(a, keep):   # value at column j-1, zero at j == 0   (non-negative roll)
        return jnp.where(keep, pltpu.roll(a, shift=1, axis=0), 0.0)

    def shift_next(a, keep):   # value at column j+1, zero at j == W-1 (non-negative roll)
        return jnp.where(keep, pltpu.roll(a, shift=a.shape[0] - 1, axis=0), 0.0)

    rows_a = nb * R1
    rows_b = nb * HW
    kpA, knA = keep_masks(rows_a)
    kpB, knB = keep_masks(rows_b)

    x_all = x_ref[...].reshape(rows_b, C_IN)                        # (nb*HW, C_IN) f32

    # ---- stage-A operand: per image, lane-concat of conv1's two kh taps (K-fusion) ----
    #      lanes 0:C_IN      = x[h-1, w]  (kh = 0, zero row for h == 0)
    #      lanes C_IN:2*C_IN = x[h,   w]  (kh = 1, zero row for h == H)
    zW = jnp.zeros((W, C_IN), jnp.float32)
    parts = []
    for i in range(nb):                                             # nb is a static int
        xi = x_all[i * HW:(i + 1) * HW]
        xpad = jnp.concatenate([zW, xi, zW], axis=0)                # (HW + 2W, C_IN)
        parts.append(jnp.concatenate([xpad[:R1], xpad[W:]], axis=1))    # (R1, 2*C_IN)
    xcat = parts[0] if nb == 1 else jnp.concatenate(parts, axis=0)      # (rows_a, 2*C_IN)
    # No cross-image leakage from the rolls: every image-boundary row has col == 0
    # (masked in shift_prev) or col == W-1 (masked in shift_next).

    # ---- conv1 (k=(2,3), pad=(1,1)) with bn2 folded in, then SELU ----
    zA = mm(xcat, wA_ref[1])                                        # kw = 1 (center)
    zA += mm(shift_prev(xcat, kpA), wA_ref[0])                      # kw = 0 (col j-1)
    zA += mm(shift_next(xcat, knA), wA_ref[2])                      # kw = 2 (col j+1)
    zA += bias_ref[0:1, :]                                          # conv1 bias + folded bn2
    h1 = SELU_SCALE * jnp.where(zA > 0.0, zA, SELU_ALPHA * (jnp.exp(zA) - 1.0))

    # ---- stage-B operand: per image, lane-concat of conv2's two kh taps (K = 128) ----
    parts = []
    for i in range(nb):
        base = i * R1
        parts.append(jnp.concatenate([h1[base:base + HW],           # h1[h]   (kh = 0)
                                      h1[base + W:base + R1]],      # h1[h+1] (kh = 1)
                                     axis=1))                       # (HW, 2*C_OUT)
    ycat = parts[0] if nb == 1 else jnp.concatenate(parts, axis=0)  # (rows_b, 2*C_OUT)

    # ---- conv2 (k=(2,3), pad=(0,1)) + residual conv_downsample (k=(1,3), pad=(0,1)) ----
    out = mm(ycat, wB_ref[1]) + mm(x_all, wd_ref[1])
    out += mm(shift_prev(ycat, kpB), wB_ref[0]) + mm(shift_prev(x_all, kpB), wd_ref[0])
    out += mm(shift_next(ycat, knB), wB_ref[2]) + mm(shift_next(x_all, knB), wd_ref[2])
    out += bias_ref[1:2, :]                                         # conv2 + downsample bias

    # NOTE: C_OUT = 64 < 128 lanes -> masked stores; acceptable at this size (see header).
    out_ref[...] = out.reshape(nb, HW, C_OUT)


# -------------------------- parameter construction --------------------------
def make_params(key):
    ks = iter(jax.random.split(key, 12))

    def nrm(shape, s=0.1):
        return (s * jax.random.normal(next(ks), shape)).astype(jnp.float32)

    p = {}
    p['w1'] = nrm((C_OUT, C_IN, 2, 3)); p['b1'] = nrm((C_OUT,))
    p['bn2_gamma'] = 1.0 + nrm((C_OUT,)); p['bn2_beta'] = nrm((C_OUT,))
    p['bn2_mean'] = nrm((C_OUT,)); p['bn2_var'] = 0.5 + jnp.abs(nrm((C_OUT,)))
    p['w2'] = nrm((C_OUT, C_OUT, 2, 3)); p['b2'] = nrm((C_OUT,))
    p['wd'] = nrm((C_OUT, C_IN, 1, 3)); p['bd'] = nrm((C_OUT,))
    # bn1 exists in the module but its output is discarded by the original forward.
    return p


def kernel_args(p):
    # Fold BatchNorm2d (inference) into conv1:  bn2(conv1(x)) = conv(x; w1*s2) + b1_eff
    s2 = p['bn2_gamma'] / jnp.sqrt(p['bn2_var'] + BN_EPS)
    w1f = p['w1'] * s2[:, None, None, None]                       # (C_OUT, C_IN, 2, 3)
    b1_eff = (p['b1'] - p['bn2_mean']) * s2 + p['bn2_beta']

    w1t = jnp.transpose(w1f, (2, 3, 1, 0))                        # (kh, kw, C_IN, C_OUT)
    wA = jnp.concatenate([w1t[0], w1t[1]], axis=1)                # (3, 2*C_IN, C_OUT)
    w2t = jnp.transpose(p['w2'], (2, 3, 1, 0))                    # (kh, kw, C_OUT, C_OUT)
    wB = jnp.concatenate([w2t[0], w2t[1]], axis=1)                # (3, 2*C_OUT, C_OUT)
    wd = jnp.transpose(p['wd'][:, :, 0, :], (2, 1, 0))            # (3, C_IN, C_OUT)
    biases = jnp.stack([b1_eff, p['b2'] + p['bd']], axis=0)       # (2, C_OUT) f32
    return [wA.astype(jnp.bfloat16), wB.astype(jnp.bfloat16),
            wd.astype(jnp.bfloat16), biases.astype(jnp.float32)]


# ------------------------------ wrapper --------------------------------------
def pick_images_per_step():
    """Images handled per grid step: 1 on dual-TensorCore chips (parallel across cores),
    all B on single-TC chips (one collapsed grid step, larger M per matmul)."""
    try:
        kind = jax.devices()[0].device_kind.lower()
    except Exception:
        return B
    if any(tag in kind for tag in ("v7", "7x", "v4", "v5p")):
        return 1
    return B


def residual_block_forward(x_nhwc, kargs, images_per_step=None):
    wA, wB, wd, biases = kargs
    nb = images_per_step if images_per_step is not None else pick_images_per_step()
    assert B % nb == 0
    # NHWC -> (B, H*W, C) is a row-major reshape (bitcast); no transposes on this path.
    x_rows = x_nhwc.reshape(B, HW, C_IN)
    kernel = functools.partial(residual_block_kernel, nb=nb)
    out_rows = pl.pallas_call(
        kernel,
        out_shape=jax.ShapeDtypeStruct((B, HW, C_OUT), jnp.float32),
        grid=(B // nb,),
        in_specs=[
            pl.BlockSpec((nb, HW, C_IN), lambda g: (g, 0, 0)),
            pl.BlockSpec(wA.shape, lambda g: (0, 0, 0)),          # weights stay resident
            pl.BlockSpec(wB.shape, lambda g: (0, 0, 0)),
            pl.BlockSpec(wd.shape, lambda g: (0, 0, 0)),
            pl.BlockSpec(biases.shape, lambda g: (0, 0)),
        ],
        out_specs=pl.BlockSpec((nb, HW, C_OUT), lambda g: (g, 0, 0)),
        compiler_params=pltpu.CompilerParams(dimension_semantics=("parallel",)),
    )(x_rows, wA, wB, wd, biases)
    return out_rows.reshape(B, H, W, C_OUT)                        # bitcast reshape


# -------------------------- pure-JAX reference (NHWC) -------------------------
def ref_forward(x_nhwc, p):
    dn = ('NHWC', 'HWIO', 'NHWC')

    def conv(a, w_oihw, b, pad):
        w = jnp.transpose(w_oihw, (2, 3, 1, 0))                   # OIHW -> HWIO
        o = lax.conv_general_dilated(a, w, (1, 1), pad, dimension_numbers=dn)
        return o + b

    # bn1 + selu pre-activation is discarded by the original forward (out = conv1(x)).
    h = conv(x_nhwc, p['w1'], p['b1'], ((1, 1), (1, 1)))
    s = p['bn2_gamma'] / jnp.sqrt(p['bn2_var'] + BN_EPS)
    h = (h - p['bn2_mean']) * s + p['bn2_beta']
    h = jax.nn.selu(h)
    out = conv(h, p['w2'], p['b2'], ((0, 0), (1, 1)))
    ident = conv(x_nhwc, p['wd'], p['bd'], ((0, 0), (1, 1)))
    return out + ident


# ------------------------------------ main -----------------------------------
if __name__ == "__main__":
    key = jax.random.PRNGKey(0)
    kx, kp = jax.random.split(key)
    x = jax.random.normal(kx, (B, H, W, C_IN), dtype=jnp.float32)   # channels-last input
    params = make_params(kp)
    args = kernel_args(params)

    out = residual_block_forward(x, args)
    out = jax.block_until_ready(out)
    assert out.shape == (B, H, W, C_OUT)

    ref = ref_forward(x, params)
    if not np.allclose(np.asarray(out), np.asarray(ref), atol=5e-2, rtol=5e-2):
        err = float(jnp.max(jnp.abs(out - ref)))
        raise AssertionError(f"Pallas kernel mismatch vs reference, max abs err={err}")

    print("KERNEL_OK")
</pallas_src>

<mosaic_0001>
module attributes {stable_mosaic.version = 11 : i64} {
  func.func @residual_block_kernel(%arg0: i32, %arg1: memref<2x256x32xf32, #tpu.memory_space<vmem>>, %arg2: memref<3x64x64xbf16, #tpu.memory_space<vmem>>, %arg3: memref<3x128x64xbf16, #tpu.memory_space<vmem>>, %arg4: memref<3x32x64xbf16, #tpu.memory_space<vmem>>, %arg5: memref<2x64xf32, #tpu.memory_space<vmem>>, %arg6: memref<2x256x64xf32, #tpu.memory_space<vmem>>) attributes {dimension_semantics = [#tpu.dimension_semantics<parallel>], iteration_bounds = array<i64: 1>, scalar_prefetch = 0 : i64, scratch_operands = 0 : i64, tpu.core_type = #tpu.core_type<tc>, window_params = [{transform_indices = @transform_0, window_bounds = array<i64: 2, 256, 32>}, {pipeline_mode = #tpu.pipeline_mode<synchronous>, transform_indices = @transform_1, window_bounds = array<i64: 3, 64, 64>}, {pipeline_mode = #tpu.pipeline_mode<synchronous>, transform_indices = @transform_2, window_bounds = array<i64: 3, 128, 64>}, {pipeline_mode = #tpu.pipeline_mode<synchronous>, transform_indices = @transform_3, window_bounds = array<i64: 3, 32, 64>}, {pipeline_mode = #tpu.pipeline_mode<synchronous>, transform_indices = @transform_4, window_bounds = array<i64: 2, 64>}, {transform_indices = @transform_5, window_bounds = array<i64: 2, 256, 64>}]} {
    %0 = tpu.iota {dimensions = array<i32: 0>} : vector<544x1xi32>
    %c16_i32 = arith.constant 16 : i32
    %c0_i32 = arith.constant 0 : i32
    %1 = arith.cmpi eq, %c16_i32, %c0_i32 : i32
    %c1_i32 = arith.constant 1 : i32
    %2 = arith.select %1, %c1_i32, %c16_i32 : i32
    %3 = vector.broadcast %2 : i32 to vector<544x1xi32>
    %4 = arith.remsi %0, %3 : vector<544x1xi32>
    %c0_i32_0 = arith.constant 0 : i32
    %5 = vector.broadcast %c0_i32_0 : i32 to vector<544x1xi32>
    %6 = arith.cmpi ne, %4, %5 : vector<544x1xi32>
    %c0_i32_1 = arith.constant 0 : i32
    %7 = vector.broadcast %c0_i32_1 : i32 to vector<544x1xi32>
    %8 = arith.cmpi slt, %4, %7 : vector<544x1xi32>
    %c0_i32_2 = arith.constant 0 : i32
    %9 = arith.cmpi slt, %2, %c0_i32_2 : i32
    %10 = vector.broadcast %9 : i1 to vector<544x1xi1>
    %11 = vector.broadcast %10 : vector<544x1xi1> to vector<544x1xi1>
    %12 = arith.xori %8, %11 : vector<544x1xi1>
    %13 = arith.andi %12, %6 : vector<544x1xi1>
    %14 = vector.broadcast %2 : i32 to vector<544x1xi32>
    %15 = arith.addi %4, %14 : vector<544x1xi32>
    %16 = arith.select %13, %15, %4 : vector<544x1xi1>, vector<544x1xi32>
    %c0_i32_3 = arith.constant 0 : i32
    %17 = vector.broadcast %c0_i32_3 : i32 to vector<544x1xi32>
    %18 = arith.cmpi ne, %16, %17 : vector<544x1xi32>
    %c15_i32 = arith.constant 15 : i32
    %19 = vector.broadcast %c15_i32 : i32 to vector<544x1xi32>
    %20 = arith.cmpi ne, %16, %19 : vector<544x1xi32>
    %21 = tpu.iota {dimensions = array<i32: 0>} : vector<512x1xi32>
    %c16_i32_4 = arith.constant 16 : i32
    %c0_i32_5 = arith.constant 0 : i32
    %22 = arith.cmpi eq, %c16_i32_4, %c0_i32_5 : i32
    %c1_i32_6 = arith.constant 1 : i32
    %23 = arith.select %22, %c1_i32_6, %c16_i32_4 : i32
    %24 = vector.broadcast %23 : i32 to vector<512x1xi32>
    %25 = arith.remsi %21, %24 : vector<512x1xi32>
    %c0_i32_7 = arith.constant 0 : i32
    %26 = vector.broadcast %c0_i32_7 : i32 to vector<512x1xi32>
    %27 = arith.cmpi ne, %25, %26 : vector<512x1xi32>
    %c0_i32_8 = arith.constant 0 : i32
    %28 = vector.broadcast %c0_i32_8 : i32 to vector<512x1xi32>
    %29 = arith.cmpi slt, %25, %28 : vector<512x1xi32>
    %c0_i32_9 = arith.constant 0 : i32
    %30 = arith.cmpi slt, %23, %c0_i32_9 : i32
    %31 = vector.broadcast %30 : i1 to vector<512x1xi1>
    %32 = vector.broadcast %31 : vector<512x1xi1> to vector<512x1xi1>
    %33 = arith.xori %29, %32 : vector<512x1xi1>
    %34 = arith.andi %33, %27 : vector<512x1xi1>
    %35 = vector.broadcast %23 : i32 to vector<512x1xi32>
    %36 = arith.addi %25, %35 : vector<512x1xi32>
    %37 = arith.select %34, %36, %25 : vector<512x1xi1>, vector<512x1xi32>
    %c0_i32_10 = arith.constant 0 : i32
    %38 = vector.broadcast %c0_i32_10 : i32 to vector<512x1xi32>
    %39 = arith.cmpi ne, %37, %38 : vector<512x1xi32>
    %c15_i32_11 = arith.constant 15 : i32
    %40 = vector.broadcast %c15_i32_11 : i32 to vector<512x1xi32>
    %41 = arith.cmpi ne, %37, %40 : vector<512x1xi32>
    %c0 = arith.constant 0 : index
    %c0_12 = arith.constant 0 : index
    %c0_13 = arith.constant 0 : index
    %42 = vector.load %arg1[%c0, %c0_12, %c0_13] : memref<2x256x32xf32, #tpu.memory_space<vmem>>, vector<2x256x32xf32>
    %43 = vector.shape_cast %42 : vector<2x256x32xf32> to vector<512x32xf32>
    %cst = arith.constant 0.000000e+00 : f32
    %44 = vector.broadcast %cst : f32 to vector<16x32xf32>
    %45 = vector.extract_strided_slice %43 {offsets = [0, 0], sizes = [256, 32], strides = [1, 1]} : vector<512x32xf32> to vector<256x32xf32>
    %46 = tpu.concatenate %44, %45, %44 in 0 : vector<16x32xf32>, vector<256x32xf32>, vector<16x32xf32> -> vector<288x32xf32>
    %47 = vector.extract_strided_slice %46 {offsets = [0, 0], sizes = [272, 32], strides = [1, 1]} : vector<288x32xf32> to vector<272x32xf32>
    %48 = vector.extract_strided_slice %46 {offsets = [16, 0], sizes = [272, 32], strides = [1, 1]} : vector<288x32xf32> to vector<272x32xf32>
    %49 = tpu.concatenate %47, %48 in 1 : vector<272x32xf32>, vector<272x32xf32> -> vector<272x64xf32>
    %50 = vector.extract_strided_slice %43 {offsets = [256, 0], sizes = [256, 32], strides = [1, 1]} : vector<512x32xf32> to vector<256x32xf32>
    %51 = tpu.concatenate %44, %50, %44 in 0 : vector<16x32xf32>, vector<256x32xf32>, vector<16x32xf32> -> vector<288x32xf32>
    %52 = vector.extract_strided_slice %51 {offsets = [0, 0], sizes = [272, 32], strides = [1, 1]} : vector<288x32xf32> to vector<272x32xf32>
    %53 = vector.extract_strided_slice %51 {offsets = [16, 0], sizes = [272, 32], strides = [1, 1]} : vector<288x32xf32> to vector<272x32xf32>
    %54 = tpu.concatenate %52, %53 in 1 : vector<272x32xf32>, vector<272x32xf32> -> vector<272x64xf32>
    %55 = tpu.concatenate %49, %54 in 0 : vector<272x64xf32>, vector<272x64xf32> -> vector<544x64xf32>
    %c1 = arith.constant 1 : index
    %c0_14 = arith.constant 0 : index
    %c0_15 = arith.constant 0 : index
    %56 = vector.load %arg2[%c1, %c0_14, %c0_15] : memref<3x64x64xbf16, #tpu.memory_space<vmem>>, vector<1x64x64xbf16>
    %57 = vector.shape_cast %56 : vector<1x64x64xbf16> to vector<64x64xbf16>
    %58 = arith.truncf %55 : vector<544x64xf32> to vector<544x64xbf16>
    %cst_16 = arith.constant dense<0.000000e+00> : vector<544x64xf32>
    %59 = tpu.matmul %58, %57, %cst_16 {dimension_numbers = #tpu.dot_dimension_numbers<[1], [0], [0], [1], [0, 0, 1, 1], [], []>} : vector<544x64xbf16>, vector<64x64xbf16>, vector<544x64xf32> -> vector<544x64xf32>
    %c1_i32_17 = arith.constant 1 : i32
    %60 = tpu.dynamic_rotate %55 by %c1_i32_17 dim 0 : vector<544x64xf32>, i32 -> vector<544x64xf32>
    %cst_18 = arith.constant 0.000000e+00 : f32
    %61 = vector.shape_cast %18 : vector<544x1xi1> to vector<544x1xi1>
    %62 = vector.broadcast %61 : vector<544x1xi1> to vector<544x64xi1>
    %63 = vector.broadcast %cst_18 : f32 to vector<544x64xf32>
    %64 = arith.select %62, %60, %63 : vector<544x64xi1>, vector<544x64xf32>
    %c0_19 = arith.constant 0 : index
    %c0_20 = arith.constant 0 : index
    %c0_21 = arith.constant 0 : index
    %65 = vector.load %arg2[%c0_19, %c0_20, %c0_21] : memref<3x64x64xbf16, #tpu.memory_space<vmem>>, vector<1x64x64xbf16>
    %66 = vector.shape_cast %65 : vector<1x64x64xbf16> to vector<64x64xbf16>
    %67 = arith.truncf %64 : vector<544x64xf32> to vector<544x64xbf16>
    %cst_22 = arith.constant dense<0.000000e+00> : vector<544x64xf32>
    %68 = tpu.matmul %67, %66, %cst_22 {dimension_numbers = #tpu.dot_dimension_numbers<[1], [0], [0], [1], [0, 0, 1, 1], [], []>} : vector<544x64xbf16>, vector<64x64xbf16>, vector<544x64xf32> -> vector<544x64xf32>
    %69 = arith.addf %59, %68 : vector<544x64xf32>
    %c543_i32 = arith.constant 543 : i32
    %70 = tpu.dynamic_rotate %55 by %c543_i32 dim 0 : vector<544x64xf32>, i32 -> vector<544x64xf32>
    %cst_23 = arith.constant 0.000000e+00 : f32
    %71 = vector.shape_cast %20 : vector<544x1xi1> to vector<544x1xi1>
    %72 = vector.broadcast %71 : vector<544x1xi1> to vector<544x64xi1>
    %73 = vector.broadcast %cst_23 : f32 to vector<544x64xf32>
    %74 = arith.select %72, %70, %73 : vector<544x64xi1>, vector<544x64xf32>
    %c2 = arith.constant 2 : index
    %c0_24 = arith.constant 0 : index
    %c0_25 = arith.constant 0 : index
    %75 = vector.load %arg2[%c2, %c0_24, %c0_25] : memref<3x64x64xbf16, #tpu.memory_space<vmem>>, vector<1x64x64xbf16>
    %76 = vector.shape_cast %75 : vector<1x64x64xbf16> to vector<64x64xbf16>
    %77 = arith.truncf %74 : vector<544x64xf32> to vector<544x64xbf16>
    %cst_26 = arith.constant dense<0.000000e+00> : vector<544x64xf32>
    %78 = tpu.matmul %77, %76, %cst_26 {dimension_numbers = #tpu.dot_dimension_numbers<[1], [0], [0], [1], [0, 0, 1, 1], [], []>} : vector<544x64xbf16>, vector<64x64xbf16>, vector<544x64xf32> -> vector<544x64xf32>
    %79 = arith.addf %69, %78 : vector<544x64xf32>
    %c0_27 = arith.constant 0 : index
    %c0_28 = arith.constant 0 : index
    %80 = vector.load %arg5[%c0_27, %c0_28] : memref<2x64xf32, #tpu.memory_space<vmem>>, vector<1x64xf32>
    %81 = vector.broadcast %80 : vector<1x64xf32> to vector<544x64xf32>
    %82 = arith.addf %79, %81 : vector<544x64xf32>
    %cst_29 = arith.constant 0.000000e+00 : f32
    %83 = vector.broadcast %cst_29 : f32 to vector<544x64xf32>
    %84 = arith.cmpf ogt, %82, %83 : vector<544x64xf32>
    %85 = math.exp %82 : vector<544x64xf32>
    %cst_30 = arith.constant 1.000000e+00 : f32
    %86 = vector.broadcast %cst_30 : f32 to vector<544x64xf32>
    %87 = arith.subf %85, %86 : vector<544x64xf32>
    %cst_31 = arith.constant 1.67326319 : f32
    %88 = vector.broadcast %cst_31 : f32 to vector<544x64xf32>
    %89 = arith.mulf %88, %87 : vector<544x64xf32>
    %90 = arith.select %84, %82, %89 : vector<544x64xi1>, vector<544x64xf32>
    %cst_32 = arith.constant 1.05070102 : f32
    %91 = vector.broadcast %cst_32 : f32 to vector<544x64xf32>
    %92 = arith.mulf %91, %90 : vector<544x64xf32>
    %93 = vector.extract_strided_slice %92 {offsets = [0, 0], sizes = [256, 64], strides = [1, 1]} : vector<544x64xf32> to vector<256x64xf32>
    %94 = vector.extract_strided_slice %92 {offsets = [16, 0], sizes = [256, 64], strides = [1, 1]} : vector<544x64xf32> to vector<256x64xf32>
    %95 = tpu.concatenate %93, %94 in 1 : vector<256x64xf32>, vector<256x64xf32> -> vector<256x128xf32>
    %96 = vector.extract_strided_slice %92 {offsets = [272, 0], sizes = [256, 64], strides = [1, 1]} : vector<544x64xf32> to vector<256x64xf32>
    %97 = vector.extract_strided_slice %92 {offsets = [288, 0], sizes = [256, 64], strides = [1, 1]} : vector<544x64xf32> to vector<256x64xf32>
    %98 = tpu.concatenate %96, %97 in 1 : vector<256x64xf32>, vector<256x64xf32> -> vector<256x128xf32>
    %99 = tpu.concatenate %95, %98 in 0 : vector<256x128xf32>, vector<256x128xf32> -> vector<512x128xf32>
    %c1_33 = arith.constant 1 : index
    %c0_34 = arith.constant 0 : index
    %c0_35 = arith.constant 0 : index
    %100 = vector.load %arg3[%c1_33, %c0_34, %c0_35] : memref<3x128x64xbf16, #tpu.memory_space<vmem>>, vector<1x128x64xbf16>
    %101 = vector.shape_cast %100 : vector<1x128x64xbf16> to vector<128x64xbf16>
    %102 = arith.truncf %99 : vector<512x128xf32> to vector<512x128xbf16>
    %cst_36 = arith.constant dense<0.000000e+00> : vector<512x64xf32>
    %103 = tpu.matmul %102, %101, %cst_36 {dimension_numbers = #tpu.dot_dimension_numbers<[1], [0], [0], [1], [0, 0, 1, 1], [], []>} : vector<512x128xbf16>, vector<128x64xbf16>, vector<512x64xf32> -> vector<512x64xf32>
    %c1_37 = arith.constant 1 : index
    %c0_38 = arith.constant 0 : index
    %c0_39 = arith.constant 0 : index
    %104 = vector.load %arg4[%c1_37, %c0_38, %c0_39] : memref<3x32x64xbf16, #tpu.memory_space<vmem>>, vector<1x32x64xbf16>
    %105 = vector.shape_cast %104 : vector<1x32x64xbf16> to vector<32x64xbf16>
    %106 = arith.truncf %43 : vector<512x32xf32> to vector<512x32xbf16>
    %cst_40 = arith.constant dense<0.000000e+00> : vector<512x64xf32>
    %107 = tpu.matmul %106, %105, %cst_40 {dimension_numbers = #tpu.dot_dimension_numbers<[1], [0], [0], [1], [0, 0, 1, 1], [], []>} : vector<512x32xbf16>, vector<32x64xbf16>, vector<512x64xf32> -> vector<512x64xf32>
    %108 = arith.addf %103, %107 : vector<512x64xf32>
    %c1_i32_41 = arith.constant 1 : i32
    %109 = tpu.dynamic_rotate %99 by %c1_i32_41 dim 0 : vector<512x128xf32>, i32 -> vector<512x128xf32>
    %cst_42 = arith.constant 0.000000e+00 : f32
    %110 = vector.shape_cast %39 : vector<512x1xi1> to vector<512x1xi1>
    %111 = vector.broadcast %110 : vector<512x1xi1> to vector<512x128xi1>
    %112 = vector.broadcast %cst_42 : f32 to vector<512x128xf32>
    %113 = arith.select %111, %109, %112 : vector<512x128xi1>, vector<512x128xf32>
    %c0_43 = arith.constant 0 : index
    %c0_44 = arith.constant 0 : index
    %c0_45 = arith.constant 0 : index
    %114 = vector.load %arg3[%c0_43, %c0_44, %c0_45] : memref<3x128x64xbf16, #tpu.memory_space<vmem>>, vector<1x128x64xbf16>
    %115 = vector.shape_cast %114 : vector<1x128x64xbf16> to vector<128x64xbf16>
    %116 = arith.truncf %113 : vector<512x128xf32> to vector<512x128xbf16>
    %cst_46 = arith.constant dense<0.000000e+00> : vector<512x64xf32>
    %117 = tpu.matmul %116, %115, %cst_46 {dimension_numbers = #tpu.dot_dimension_numbers<[1], [0], [0], [1], [0, 0, 1, 1], [], []>} : vector<512x128xbf16>, vector<128x64xbf16>, vector<512x64xf32> -> vector<512x64xf32>
    %c1_i32_47 = arith.constant 1 : i32
    %118 = tpu.dynamic_rotate %43 by %c1_i32_47 dim 0 : vector<512x32xf32>, i32 -> vector<512x32xf32>
    %cst_48 = arith.constant 0.000000e+00 : f32
    %119 = vector.shape_cast %39 : vector<512x1xi1> to vector<512x1xi1>
    %120 = vector.broadcast %119 : vector<512x1xi1> to vector<512x32xi1>
    %121 = vector.broadcast %cst_48 : f32 to vector<512x32xf32>
    %122 = arith.select %120, %118, %121 : vector<512x32xi1>, vector<512x32xf32>
    %c0_49 = arith.constant 0 : index
    %c0_50 = arith.constant 0 : index
    %c0_51 = arith.constant 0 : index
    %123 = vector.load %arg4[%c0_49, %c0_50, %c0_51] : memref<3x32x64xbf16, #tpu.memory_space<vmem>>, vector<1x32x64xbf16>
    %124 = vector.shape_cast %123 : vector<1x32x64xbf16> to vector<32x64xbf16>
    %125 = arith.truncf %122 : vector<512x32xf32> to vector<512x32xbf16>
    %cst_52 = arith.constant dense<0.000000e+00> : vector<512x64xf32>
    %126 = tpu.matmul %125, %124, %cst_52 {dimension_numbers = #tpu.dot_dimension_numbers<[1], [0], [0], [1], [0, 0, 1, 1], [], []>} : vector<512x32xbf16>, vector<32x64xbf16>, vector<512x64xf32> -> vector<512x64xf32>
    %127 = arith.addf %117, %126 : vector<512x64xf32>
    %128 = arith.addf %108, %127 : vector<512x64xf32>
    %c511_i32 = arith.constant 511 : i32
    %129 = tpu.dynamic_rotate %99 by %c511_i32 dim 0 : vector<512x128xf32>, i32 -> vector<512x128xf32>
    %cst_53 = arith.constant 0.000000e+00 : f32
    %130 = vector.shape_cast %41 : vector<512x1xi1> to vector<512x1xi1>
    %131 = vector.broadcast %130 : vector<512x1xi1> to vector<512x128xi1>
    %132 = vector.broadcast %cst_53 : f32 to vector<512x128xf32>
    %133 = arith.select %131, %129, %132 : vector<512x128xi1>, vector<512x128xf32>
    %c2_54 = arith.constant 2 : index
    %c0_55 = arith.constant 0 : index
    %c0_56 = arith.constant 0 : index
    %134 = vector.load %arg3[%c2_54, %c0_55, %c0_56] : memref<3x128x64xbf16, #tpu.memory_space<vmem>>, vector<1x128x64xbf16>
    %135 = vector.shape_cast %134 : vector<1x128x64xbf16> to vector<128x64xbf16>
    %136 = arith.truncf %133 : vector<512x128xf32> to vector<512x128xbf16>
    %cst_57 = arith.constant dense<0.000000e+00> : vector<512x64xf32>
    %137 = tpu.matmul %136, %135, %cst_57 {dimension_numbers = #tpu.dot_dimension_numbers<[1], [0], [0], [1], [0, 0, 1, 1], [], []>} : vector<512x128xbf16>, vector<128x64xbf16>, vector<512x64xf32> -> vector<512x64xf32>
    %c511_i32_58 = arith.constant 511 : i32
    %138 = tpu.dynamic_rotate %43 by %c511_i32_58 dim 0 : vector<512x32xf32>, i32 -> vector<512x32xf32>
    %cst_59 = arith.constant 0.000000e+00 : f32
    %139 = vector.shape_cast %41 : vector<512x1xi1> to vector<512x1xi1>
    %140 = vector.broadcast %139 : vector<512x1xi1> to vector<512x32xi1>
    %141 = vector.broadcast %cst_59 : f32 to vector<512x32xf32>
    %142 = arith.select %140, %138, %141 : vector<512x32xi1>, vector<512x32xf32>
    %c2_60 = arith.constant 2 : index
    %c0_61 = arith.constant 0 : index
    %c0_62 = arith.constant 0 : index
    %143 = vector.load %arg4[%c2_60, %c0_61, %c0_62] : memref<3x32x64xbf16, #tpu.memory_space<vmem>>, vector<1x32x64xbf16>
    %144 = vector.shape_cast %143 : vector<1x32x64xbf16> to vector<32x64xbf16>
    %145 = arith.truncf %142 : vector<512x32xf32> to vector<512x32xbf16>
    %cst_63 = arith.constant dense<0.000000e+00> : vector<512x64xf32>
    %146 = tpu.matmul %145, %144, %cst_63 {dimension_numbers = #tpu.dot_dimension_numbers<[1], [0], [0], [1], [0, 0, 1, 1], [], []>} : vector<512x32xbf16>, vector<32x64xbf16>, vector<512x64xf32> -> vector<512x64xf32>
    %147 = arith.addf %137, %146 : vector<512x64xf32>
    %148 = arith.addf %128, %147 : vector<512x64xf32>
    %c1_64 = arith.constant 1 : index
    %c0_65 = arith.constant 0 : index
    %149 = vector.load %arg5[%c1_64, %c0_65] : memref<2x64xf32, #tpu.memory_space<vmem>>, vector<1x64xf32>
    %150 = vector.broadcast %149 : vector<1x64xf32> to vector<512x64xf32>
    %151 = arith.addf %148, %150 : vector<512x64xf32>
    %152 = vector.shape_cast %151 : vector<512x64xf32> to vector<2x256x64xf32>
    %c0_66 = arith.constant 0 : index
    %c0_67 = arith.constant 0 : index
    %c0_68 = arith.constant 0 : index
    %153 = vector.load %arg6[%c0_66, %c0_67, %c0_68] : memref<2x256x64xf32, #tpu.memory_space<vmem>>, vector<2x256x64xf32>
    tpu.vector_store %arg6[%c0_66, %c0_67, %c0_68], %152 {strides = array<i32>} : memref<2x256x64xf32, #tpu.memory_space<vmem>>, vector<2x256x64xf32>,
    return
  }
  func.func @transform_0(%arg0: i32) -> (i32, i32, i32) {
    %c0_i32 = arith.constant 0 : i32
    %c0_i32_0 = arith.constant 0 : i32
    %c0_i32_1 = arith.constant 0 : i32
    return %arg0, %c0_i32, %c0_i32_0 : i32, i32, i32
  }
  func.func @transform_1(%arg0: i32) -> (i32, i32, i32) {
    %c0_i32 = arith.constant 0 : i32
    %c0_i32_0 = arith.constant 0 : i32
    %c0_i32_1 = arith.constant 0 : i32
    %c0_i32_2 = arith.constant 0 : i32
    return %c0_i32, %c0_i32_0, %c0_i32_1 : i32, i32, i32
  }
  func.func @transform_2(%arg0: i32) -> (i32, i32, i32) {
    %c0_i32 = arith.constant 0 : i32
    %c0_i32_0 = arith.constant 0 : i32
    %c0_i32_1 = arith.constant 0 : i32
    %c0_i32_2 = arith.constant 0 : i32
    return %c0_i32, %c0_i32_0, %c0_i32_1 : i32, i32, i32
  }
  func.func @transform_3(%arg0: i32) -> (i32, i32, i32) {
    %c0_i32 = arith.constant 0 : i32
    %c0_i32_0 = arith.constant 0 : i32
    %c0_i32_1 = arith.constant 0 : i32
    %c0_i32_2 = arith.constant 0 : i32
    return %c0_i32, %c0_i32_0, %c0_i32_1 : i32, i32, i32
  }
  func.func @transform_4(%arg0: i32) -> (i32, i32) {
    %c0_i32 = arith.constant 0 : i32
    %c0_i32_0 = arith.constant 0 : i32
    %c0_i32_1 = arith.constant 0 : i32
    return %c0_i32, %c0_i32_0 : i32, i32
  }
  func.func @transform_5(%arg0: i32) -> (i32, i32, i32) {
    %c0_i32 = arith.constant 0 : i32
    %c0_i32_0 = arith.constant 0 : i32
    %c0_i32_1 = arith.constant 0 : i32
    return %arg0, %c0_i32, %c0_i32_0 : i32, i32, i32
  }
}

</mosaic_0001>

<bundles_post_ra>
// kernel: tpu_custom_call.1
= control target key start
LH: loop header
LB: loop body
LE: loop exit
PB: predicated region body
PF: predicated region fallthrough
CT: control target
= control target key end

     0   :  { %s8193_s26 = smov 32   ;;  %v8194_v41 = vmov 0.0   ;;  %vm14515_vm0 = vcmask 261120   ;;  %vm14514_vm4 = vcmask 523264   ;;  %s8195_s19 = smov 64   ;;  %s14456_s0 = inlined_call_operand.vmem [shape: f32[2,256,32], index: 0, kind: input, shape index: {}]   ;;  %s14457_s1 = inlined_call_operand.vmem [shape: bf16[3,64,64], index: 1, kind: input, shape index: {}]   ;;  %s14458_s4 = inlined_call_operand.vmem [shape: f32[2,64], index: 4, kind: input, shape index: {}]   ;;  %s14459_s3 = inlined_call_operand.vmem [shape: bf16[3,32,64], index: 3, kind: input, shape index: {}]   ;;  %s14460_s2 = inlined_call_operand.vmem [shape: bf16[3,128,64], index: 2, kind: input, shape index: {}]   ;;  %s14461_s5 = inlined_call_operand.vmem [shape: f32[2,256,64], index: 5, kind: output, shape index: {}]  }
   0x1   :  { %v8230_v0 = vld [vmem:[%s14456_s0 + $0x140] sm:$0xff]  ;;  %v8235_v1 = vld [vmem:[%s14456_s0 + $0x148] sm:$0xff]  ;;  %v8247_v4 = vld [vmem:[%s14456_s0 + $0x130] sm:$0xff] }
   0x2   :  { %v8240_v2 = vld [vmem:[%s14456_s0 + $0x128] sm:$0xff]  ;;  %v7606_v3 = vpack.i.bf16 %v8235_v1, %v8230_v0  ;;  %v8261_v7 = vld [vmem:[%s14456_s0 + $0x1b0] sm:$0xff]  ;;  %v8271_v9 = vld [vmem:[%s14456_s0 + $0x1b8] sm:$0xff] }
   0x3   :  { %v7601_v5 = vpack.i.bf16 %v8247_v4, %v8240_v2  ;;  %v8256_v6 = vld [vmem:[%s14456_s0 + $0x1a8] sm:$0xff]  ;;  %v8266_v8 = vld [vmem:[%s14456_s0 + $0x150] sm:$0xff]  ;;  %v8281_v12 = vld [vmem:[%s14456_s0 + $0x138] sm:$0xff] }
   0x4   :  { %7607 = vrot.lane.b32.xlu1 %v7606_v3, %s8193_s26  ;;  %v7616_v10 = vpack.i.bf16 %v8266_v8, %v8271_v9  ;;  %v7611_v11 = vpack.i.bf16 %v8261_v7, %v8256_v6  ;;  %v8289_v13 = vld [vmem:[%s14456_s0 + $0x160] sm:$0xff]  ;;  %v8294_v14 = vld [vmem:[%s14456_s0 + $0x168] sm:$0xff]  ;;  %v8309_v17 = vld [vmem:[%s14456_s0 + $0x158] sm:$0xff] }
   0x5   :  { %7602 = vrot.lane.b32.xlu0 %v7601_v5, %s8193_s26  ;;  %v8299_v15 = vld [vmem:[%s14456_s0 + $0x1c0] sm:$0xff]  ;;  %v8304_v16 = vld [vmem:[%s14456_s0 + $0x1c8] sm:$0xff]  ;;  %v7626_v18 = vpack.i.bf16 %v8294_v14, %v8289_v13  ;;  %v8320_v20 = vld [vmem:[%s14456_s0 + $0x1d0] sm:$0xff] }
   0x6   :  { %7617 = vrot.lane.b32.xlu2 %v7616_v10, %s8193_s26  ;;  %v7621_v19 = vpack.i.bf16 %v8304_v16, %v8299_v15  ;;  %v8325_v21 = vld [vmem:[%s14456_s0 + $0x1d8] sm:$0xff]  ;;  %v8332_v22 = vld [vmem:[%s14456_s0 + $0x1e0] sm:$0xff]  ;;  %v8337_v23 = vld [vmem:[%s14456_s0 + $0x1e8] sm:$0xff] }
   0x7   :  { %v7631_v24 = vpack.i.bf16 %v8325_v21, %v8320_v20  ;;  %v8344_v25 = vld [vmem:[%s14456_s0 + $0x170] sm:$0xff]  ;;  %v8349_v26 = vld [vmem:[%s14456_s0 + $0x178] sm:$0xff]  ;;  %v7641_v27 = vpack.i.bf16 %v8337_v23, %v8332_v22  ;;  %v8359_v29 = vld [vmem:[%s14456_s0 + $0x180] sm:$0xff] }
   0x8   :  { %v7636_v28 = vpack.i.bf16 %v8349_v26, %v8344_v25  ;;  %v8364_v30 = vld [vmem:[%s14456_s0 + $0x188] sm:$0xff]  ;;  %v8371_v31 = vld [vmem:[%s14456_s0 + $0x190] sm:$0xff]  ;;  %v8376_v32 = vld [vmem:[%s14456_s0 + $0x198] sm:$0xff] }
   0x9   :  { %v7646_v33 = vpack.i.bf16 %v8364_v30, %v8359_v29  ;;  %v8383_v34 = vld [vmem:[%s14456_s0 + $0x1f0] sm:$0xff]  ;;  %v8388_v35 = vld [vmem:[%s14456_s0 + $0x1f8] sm:$0xff]  ;;  %v7656_v36 = vpack.i.bf16 %v8376_v32, %v8371_v31  ;;  %v8400_v38 = vld [vmem:[%s14456_s0 + $0x8] sm:$0xff] }
   0xa   :  { %v7651_v37 = vpack.i.bf16 %v8388_v35, %v8383_v34  ;;  %v8405_v39 = vld [vmem:[%s14456_s0 + $0x10] sm:$0xff]  ;;  %v8413_v42 = vld [vmem:[%s14456_s0 + $0x1a0] sm:$0xff]  ;;  %v8421_v43 = vld [vmem:[%s14456_s0 + $0x28] sm:$0xff] }
   0xb   :  { %v7661_v40 = vpack.i.bf16 %v8405_v39, %v8400_v38  ;;  %v8426_v44 = vld [vmem:[%s14456_s0 + $0x30] sm:$0xff]  ;;  %v8431_v45 = vld [vmem:[%s14456_s0 + $0x18] sm:$0xff]  ;;  %v8436_v46 = vld [vmem:[%s14456_s0 + $0x20] sm:$0xff] }
   0xc   :  { %7612 = vrot.lane.b32.xlu1 %v7611_v11, %s8193_s26  ;;  %v8441_v47 = vld [vmem:[%s14456_s0] sm:$0xff]  ;;  %v7671_v48 = vpack.i.bf16 %v8426_v44, %v8421_v43  ;;  %v7666_v49 = vpack.i.bf16 %v8436_v46, %v8431_v45  ;;  %v8453_v50 = vld [vmem:[%s14456_s0 + $0x48] sm:$0xff]  ;;  %v8459_v51 = vld [vmem:[%s14456_s0 + $0x58] sm:$0xff] }
   0xd   :  { %1319 = vrot.lane.b32.xlu0 %v8281_v12, %s8193_s26  ;;  %14884 = vst [vmem:[#allocation2_spill] sm:$0xff] %v8459_v51  ;;  %v8464_v52 = vld [vmem:[%s14456_s0 + $0x60] sm:$0xff]  ;;  %v8469_v53 = vld [vmem:[%s14456_s0 + $0x38] sm:$0xff]  ;;  %v8474_v54 = vld [vmem:[%s14456_s0 + $0x50] sm:$0xff] }
   0xe   :  { %1327 = vrot.lane.b32.xlu2 %v8309_v17, %s8193_s26  ;;  %14885 = vst [vmem:[#allocation3_spill] sm:$0xff] %v8464_v52  ;;  %v8479_v55 = vld [vmem:[%s14456_s0 + $0x40] sm:$0xff]  ;;  %v7552_v56 = vld [vmem:[%s14457_s1 + $0x18] sm:$0xff]  ;;  %v7686_v58 = vpack.i.bf16 %v8464_v52, %v8459_v51  ;;  %v7681_v59 = vpack.i.bf16 %v8474_v54, %v8453_v50  ;;  %v1059_v60 = vld [vmem:[%s14456_s0 + $0x88] sm:$0xff] }
   0xf   :  { %v7676_v57 = vpack.i.bf16 %v8479_v55, %v8469_v53  ;;  %7587 = vmatpush.bf16.msra.mxu1 %v7552_v56  ;;  %7588 = vmatpush.bf16.msra.mxu2 %v7552_v56  ;;  %v1060_v61 = vld [vmem:[%s14456_s0 + $0x90] sm:$0xff]  ;;  %v8502_v62 = vld [vmem:[%s14456_s0 + $0x78] sm:$0xff]  ;;  %v1058_v63 = vld [vmem:[%s14456_s0 + $0x80] sm:$0xff] }
  0x10   :  { %1992 = vmatpush.bf16.msra.mxu0 %v7552_v56  ;;  %14886 = vst [vmem:[#allocation4_spill] sm:$0xff] %v8502_v62  ;;  %v7701_v3 = vpack.i.bf16 %v1060_v61, %v1059_v60  ;;  %v7696_v5 = vpack.i.bf16 %v1058_v63, %v8502_v62  ;;  %v1065_v10 = vld [vmem:[%s14456_s0 + $0xb8] sm:$0xff]  ;;  %v1066_v11 = vld [vmem:[%s14456_s0 + $0xc0] sm:$0xff]  ;;  %v7550_v56 = vld [vmem:[%s14457_s1 + $0x8] sm:$0xff] }
  0x14   :  { %7627 = vrot.lane.b32.xlu1 %v7626_v18, %s8193_s26  ;;  %v1063_v18 = vld [vmem:[%s14456_s0 + $0xa8] sm:$0xff] }
  0x15   :  { %7622 = vrot.lane.b32.xlu0 %v7621_v19, %s8193_s26  ;;  %v1064_v19 = vld [vmem:[%s14456_s0 + $0xb0] sm:$0xff] }
  0x16   :  { %7632 = vrot.lane.b32.xlu2 %v7631_v24, %s8193_s26  ;;  %v7716_v24 = vpack.i.bf16 %v1066_v11, %v1065_v10  ;;  %v21_v10 = vlaneseq }
  0x18   :  { %v8564_v11 = vshrl.u32 %v21_v10, 7 }
  0x1a   :  { %vm14535_vm1 = vcmp.lt.s32.totalorder %v8564_v11, 1  ;;  %v66_v62 = vadd.s32 352, %v8564_v11  ;;  %vm14510_vm10 = vcmp.lt.s32.totalorder %v8564_v11, 7 }
  0x1c   :  { %7642 = vrot.lane.b32.xlu1 %v7641_v27, %s8193_s26  ;;  %v7711_v27 = vpack.i.bf16 %v1064_v19, %v1063_v18 }
  0x1d   :  { %7637 = vrot.lane.b32.xlu0 %v7636_v28, %s8193_s26  ;;  %v1069_v28 = vld [vmem:[%s14456_s0 + $0xd8] sm:$0xff] }
  0x1e   :  { %7647 = vrot.lane.b32.xlu2 %v7646_v33, %s8193_s26  ;;  %v1070_v33 = vld [vmem:[%s14456_s0 + $0xe0] sm:$0xff] }
  0x24   :  { %7657 = vrot.lane.b32.xlu1 %v7656_v36, %s8193_s26  ;;  %v7726_v36 = vpack.i.bf16 %v1070_v33, %v1069_v28  ;;  %v62_v33 = vadd.s32 320, %v8564_v11 }
  0x25   :  { %7652 = vrot.lane.b32.xlu0 %v7651_v37, %s8193_s26  ;;  %v1071_v37 = vld [vmem:[%s14456_s0 + $0xe8] sm:$0xff] }
  0x26   :  { %1203 = vrot.lane.b32.xlu2 %v8194_v41, %s8193_s26 }
  0x2c   :  { %7662 = vrot.lane.b32.xlu1 %v7661_v40, %s8193_s26  ;;  %v1072_v40 = vld [vmem:[%s14456_s0 + $0xf0] sm:$0xff] }
  0x2d   :  { %1345 = vrot.lane.b32.xlu0 %v8413_v42, %s8193_s26  ;;  %v7731_v41 = vpack.i.bf16 %v1072_v40, %v1071_v37  ;;  %v78_v37 = vadd.s32 448, %v8564_v11 }
  0x2e   :  { %1139 = vrot.lane.b32.xlu2 %v8441_v47, %s8193_s26 }
  0x34   :  { %7672 = vrot.lane.b32.xlu1 %v7671_v48, %s8193_s26  ;;  %v1073_v48 = vld [vmem:[%s14456_s0 + $0xf8] sm:$0xff] }
  0x35   :  { %7667 = vrot.lane.b32.xlu0 %v7666_v49, %s8193_s26  ;;  %v7551_v49 = vld [vmem:[%s14457_s1 + $0x10] sm:$0xff] }
  0x36   :  { %7677 = vrot.lane.b32.xlu2 %v7676_v57, %s8193_s26  ;;  %7589 = vmatpush.bf16.msra.mxu1 %v7551_v49 }
  0x37   :  { %7590 = vmatpush.bf16.msra.mxu2 %v7551_v49  ;;  %1993 = vmatpush.bf16.msra.mxu0 %v7551_v49 }
  0x3a   :  { %7591 = vmatpush.bf16.msra.mxu1 %v7550_v56 }
  0x3b   :  { %7592 = vmatpush.bf16.msra.mxu2 %v7550_v56  ;;  %1994 = vmatpush.bf16.msra.mxu0 %v7550_v56  ;;  %v374_v56 = vand.u32 15, %v62_v33 }
  0x3c   :  { %7687 = vrot.lane.b32.xlu1 %v7686_v58, %s8193_s26  ;;  %v7549_v58 = vld [vmem:[%s14457_s1] sm:$0xff] }
  0x3d   :  { %7682 = vrot.lane.b32.xlu0 %v7681_v59, %s8193_s26  ;;  %v7548_v59 = vld [vmem:[%s14457_s1 + $0x38] sm:$0xff]  ;;  %vm8596_vm2 = vcmp.ne.s32.totalorder %v374_v56, 0 }
  0x3e   :  { %7593 = vmatpush.bf16.msra.mxu1 %v7549_v58 }
  0x3f   :  { %7594 = vmatpush.bf16.msra.mxu2 %v7549_v58  ;;  %1995 = vmatpush.bf16.msra.mxu0 %v7549_v58 }
  0x42   :  { %2297 = vmatpush.bf16.msrb.mxu1 %v7548_v59  ;;  %v486_v59 = vand.u32 15, %v78_v37 }
  0x44   :  { %7702 = vrot.lane.b32.xlu1 %v7701_v3, %s8193_s26  ;;  %vm8617_vm3 = vcmp.ne.s32.totalorder %v486_v59, 0 }
  0x45   :  { %7697 = vrot.lane.b32.xlu0 %v7696_v5, %s8193_s26  ;;  %v7556_v5 = vld [vmem:[%s14457_s1 + $0x58] sm:$0xff] }
  0x46   :  { %2986 = vmatpush.bf16.msrb.mxu2 %v7556_v5  ;;  %v8664_v5 = vld [vmem:[%s14456_s0 + $0x70] sm:$0xff] }
  0x47   :  { %14899 = vst [vmem:[#allocation13_spill] sm:$0xff] %v8664_v5 }
  0x4c   :  { %7717 = vrot.lane.b32.xlu1 %v7716_v24, %s8193_s26 }
  0x4d   :  { %7712 = vrot.lane.b32.xlu0 %v7711_v27, %s8193_s26 }
  0x54   :  { %7732 = vrot.lane.b32.xlu1 %v7731_v41, %s8193_s26 }
  0x55   :  { %7727 = vrot.lane.b32.xlu0 %v7726_v36, %s8193_s26 }
  0x5d   :  { %1201 = vrot.lane.b32.xlu0 %v1073_v48, %s8193_s26 }
  0x60   :  { %v7618_v57 = vpop.permute.xlu2 %7617 }
  0x61   :  { %v7620_v60 = vunpack.i.h.bf16 %v7618_v57  ;;  %v7619_v36 = vunpack.i.l.bf16 %v7618_v57 }
  0x63   :  { %v8556_v63 = vsel %vm14515_vm0, %v8230_v0, %v7620_v60  ;;  %v1077_v0 = vld [vmem:[%s14456_s0 + $0x118] sm:$0xff]  ;;  %v8586_v58 = vsel %vm14515_vm0, %v8256_v6, %v7619_v36 }
  0x64   :  { %14888 = vst [vmem:[#allocation6_spill] sm:$0xff] %v8586_v58 }
  0x68   :  { %v1328_v61 = vpop.permute.xlu2 %1327 }
  0x69   :  { %v8560_v3 = vsel %vm14515_vm0, %v8235_v1, %v1328_v61  ;;  %v1078_v1 = vld [vmem:[%s14456_s0 + $0x120] sm:$0xff] }
  0x70   :  { %v8566_v18 = vpop.permute.xlu2 %7632 }
  0x76   :  { %v7608_v19 = vpop.permute.xlu1 %7607 }
  0x77   :  { %v7603_v24 = vpop.permute.xlu0 %7602 }
  0x78   :  { %v7605_v27 = vunpack.i.h.bf16 %v7603_v24  ;;  %v7604_v28 = vunpack.i.l.bf16 %v7603_v24  ;;  %v8589_v24 = vpop.permute.xlu2 %7647 }
  0x7a   :  { %v8577_v40 = vsel %vm14515_vm0, %v1077_v0, %v7604_v28  ;;  %v8580_v41 = vsel %vm14515_vm0, %v1078_v1, %v7605_v27  ;;  %v1535_v27 = vrot.slane %v8586_v58, 7  ;;  %v14889_v0 = vmov 0 }
  0x7b   :  { %14887 = vst [vmem:[#allocation5_spill] sm:$0xff] %v8577_v40  ;;  %v14462_v48 = vrot.slane %v8577_v40, 7  ;;  %v1518_v49 = vrot.slane %v8580_v41, 7  ;;  %v14890_v0 = vsel %vm8596_vm2, 4294967295, %v14889_v0 }
  0x7c   :  { %14891 = vst [vmem:[#allocation7_spill] sm:$0xff] %v14890_v0 }
  0x7d   :  { %v1574_v6 = vsel %vm14535_vm1, %v14462_v48, %v1518_v49  ;;  %v80_v48 = vadd.s32 464, %v8564_v11 }
  0x7e   :  { %v7613_v57 = vpop.permute.xlu1 %7612 }
  0x7f   :  { %v7615_v60 = vunpack.i.h.bf16 %v7613_v57  ;;  %v7614_v61 = vunpack.i.l.bf16 %v7613_v57  ;;  %v1320_v10 = vpop.permute.xlu0 %1319  ;;  %v14894_v57 = vmov 0  ;;  %v500_v58 = vand.u32 15, %v80_v48 }
  0x80   :  { %v8594_v28 = vsel %vm14515_vm0, %v8240_v2, %v1320_v10  ;;  %v14895_v57 = vsel %vm8617_vm3, 4294967295, %v14894_v57  ;;  %v7609_v10 = vunpack.i.l.bf16 %v7608_v19  ;;  %v7610_v2 = vunpack.i.h.bf16 %v7608_v19 }
  0x81   :  { %v8606_v1 = vsel %vm14515_vm0, %v8413_v42, %v7615_v60  ;;  %v8610_v33 = vsel %vm14515_vm0, %v8376_v32, %v7614_v61  ;;  %v1519_v36 = vrot.slane %v8594_v28, 7  ;;  %14896 = vst [vmem:[#allocation10_spill] sm:$0xff] %v14895_v57  ;;  %v1791_v32 = vsel %vm8596_vm2, %v1574_v6, 0.0 }
  0x82   :  { %14892 = vst [vmem:[#allocation8_spill] sm:$0xff] %v8606_v1  ;;  %v1534_v37 = vrot.slane %v8606_v1, 7  ;;  %v14463_v56 = vrot.slane %v8610_v33, 7  ;;  %vm8687_vm6 = vcmp.ne.s32.totalorder %v500_v58, 0 }
  0x83   :  { %14893 = vst [vmem:[#allocation9_spill] sm:$0xff] %v8610_v33  ;;  %v1573_v42 = vsel %vm14535_vm1, %v1518_v49, %v1519_v36 }
  0x84   :  { %v1847_v60 = vpack.c.bf16 %v1573_v42, %v1791_v32  ;;  %v1557_v61 = vsel %vm14535_vm1, %v1534_v37, %v1535_v27  ;;  %v1558_v59 = vsel %vm14535_vm1, %v14463_v56, %v1534_v37  ;;  %v64_v32 = vadd.s32 336, %v8564_v11  ;;  %v7547_v37 = vld [vmem:[%s14457_s1 + $0x30] sm:$0xff] }
  0x85   :  { %v1807_v49 = vsel %vm8617_vm3, %v1558_v59, 0.0  ;;  %v8646_v56 = vsel %vm14515_vm0, %v8247_v4, %v7609_v10  ;;  %2298 = vmatpush.bf16.msrb.mxu1 %v7547_v37  ;;  %v8659_v4 = vld [vmem:[%s14456_s0 + $0x68] sm:$0xff]  ;;  %v14902_v37 = vmov 0 }
  0x86   :  { %6907 = vmatmul.msk.bf16.vlgmr.msra.gmra.mxu1 %vm14514_vm4, %v1847_v60  ;;  %v8637_v6 = vpop.permute.xlu1 %7627  ;;  %v1855_v42 = vpack.c.bf16 %v1557_v61, %v1807_v49  ;;  %v8649_v60 = vpop.permute.xlu2 %1203  ;;  %v8653_v61 = vsel %vm14515_vm0, %v8281_v12, %v7610_v2  ;;  %v1520_v49 = vrot.slane %v8646_v56, 7  ;;  %v388_v0 = vand.u32 15, %v64_v32  ;;  %14898 = vst [vmem:[#allocation12_spill] sm:$0xff] %v8659_v4 }
  0x87   :  { %v7623_v57 = vpop.permute.xlu0 %7622  ;;  %14897 = vst [vmem:[#allocation11_spill] sm:$0xff] %v8653_v61  ;;  %v1521_v2 = vrot.slane %v8653_v61, 7 }
  0x88   :  { %v7625_v19 = vunpack.i.h.bf16 %v7623_v57  ;;  %v7624_v59 = vunpack.i.l.bf16 %v7623_v57  ;;  %6915 = vmatmul.msk.bf16.vlgmr.msra.gmra.mxu2 %vm14514_vm4, %v1855_v42  ;;  %v7691_v42 = vpack.i.bf16 %v8664_v5, %v8659_v4  ;;  %vm8681_vm5 = vcmp.ne.s32.totalorder %v388_v0, 0 }
  0x89   :  { %v14903_v37 = vsel %vm8681_vm5, 4294967295, %v14902_v37  ;;  %v1571_v0 = vsel %vm14535_vm1, %v1520_v49, %v1521_v2  ;;  %v14915_v5 = vmov 0 }
  0x8a   :  { %v8668_v57 = vsel %vm14515_vm0, %v8271_v9, %v7625_v19  ;;  %v8672_v12 = vsel %vm14515_vm0, %v8261_v7, %v7624_v59  ;;  %14904 = vst [vmem:[#allocation16_spill] sm:$0xff] %v14903_v37  ;;  %v1572_v9 = vsel %vm14535_vm1, %v1519_v36, %v1520_v49  ;;  %v14905_v7 = vmov 0  ;;  %7692 = vrot.lane.b32.xlu2 %v7691_v42, %s8193_s26 }
  0x8b   :  { %14900 = vst [vmem:[#allocation14_spill] sm:$0xff] %v8668_v57  ;;  %v1536_v48 = vrot.slane %v8672_v12, 7  ;;  %v1537_v10 = vrot.slane %v8668_v57, 7  ;;  %v14906_v7 = vsel %vm8687_vm6, 4294967295, %v14905_v7  ;;  %v1793_v57 = vsel %vm8681_vm5, %v1572_v9, 0.0 }
  0x8c   :  { %14901 = vst [vmem:[#allocation15_spill] sm:$0xff] %v8672_v12  ;;  %v7634_v12 = vunpack.i.l.bf16 %v8566_v18  ;;  %v7635_v42 = vunpack.i.h.bf16 %v8566_v18  ;;  %v402_v18 = vand.u32 15, %v66_v62 }
  0x8d   :  { %14907 = vst [vmem:[#allocation17_spill] sm:$0xff] %v14906_v7  ;;  %v1556_v19 = vsel %vm14535_vm1, %v1535_v27, %v1536_v48  ;;  %v1555_v36 = vsel %vm14535_vm1, %v1536_v48, %v1537_v10  ;;  %v1848_v27 = vpack.c.bf16 %v1571_v0, %v1793_v57  ;;  %v8713_v48 = vsel %vm14515_vm0, %v8388_v35, %v8649_v60 }
  0x8e   :  { %v8679_v32 = vpop.permute.xlu1 %7642  ;;  %v1809_v58 = vsel %vm8687_vm6, %v1556_v19, 0.0  ;;  %v1140_v61 = vpop.permute.xlu2 %1139  ;;  %14908 = vst [vmem:[#allocation18_spill] sm:$0xff] %v8713_v48  ;;  %v82_v19 = vadd.s32 480, %v8564_v11  ;;  %v8721_v57 = vsel %vm14515_vm0, %v8299_v15, %v7634_v12  ;;  %v1522_v35 = vrot.slane %v8556_v63, 7 }
  0x8f   :  { %v8693_v59 = vpop.permute.xlu0 %7637  ;;  %v1856_v40 = vpack.c.bf16 %v1555_v36, %v1809_v58  ;;  %v8716_v9 = vsel %vm14515_vm0, 0.0, %v1140_v61  ;;  %14910 = vst [vmem:[#allocation20_spill] sm:$0xff] %v8721_v57  ;;  %v7555_v36 = vld [vmem:[%s14457_s1 + $0x50] sm:$0xff]  ;;  %v8735_v15 = vsel %vm14515_vm0, %v8304_v16, %v7635_v42  ;;  %v1538_v12 = vrot.slane %v8721_v57, 7 }
  0x90   :  { %14909 = vst [vmem:[#allocation19_spill] sm:$0xff] %v8716_v9  ;;  %v1478_v58 = vrot.slane %v8716_v9, 7  ;;  %2987 = vmatpush.bf16.msrb.mxu2 %v7555_v36  ;;  %vm8739_vm7 = vcmp.ne.s32.totalorder %v402_v18, 0  ;;  %v14912_v7 = vmov 0  ;;  %v1570_v37 = vsel %vm14535_vm1, %v1521_v2, %v1522_v35 }
  0x91   :  { %14911 = vst [vmem:[#allocation21_spill] sm:$0xff] %v8735_v15  ;;  %v14913_v7 = vsel %vm8739_vm7, 4294967295, %v14912_v7  ;;  %v14918_v16 = vrot.slane %v8713_v48, 7  ;;  %v14919_v18 = vmov 0  ;;  %v1554_v36 = vsel %vm14535_vm1, %v1537_v10, %v1538_v12 }
  0x92   :  { %14914 = vst [vmem:[#allocation22_spill] sm:$0xff] %v14913_v7  ;;  %v14922_v2 = vrot.slane %v8560_v3, 7  ;;  %v7629_v10 = vunpack.i.l.bf16 %v8637_v6  ;;  %v7644_v7 = vunpack.i.l.bf16 %v8679_v32  ;;  %vm14971_vm6 = vcmp.lt.s32.totalorder %v8564_v11, 7 }
  0x93   :  { %v1614_v42 = vsel %vm14535_vm1, %v14918_v16, %v1478_v58  ;;  %vm14973_vm3 = vmmov %vm14971_vm6 }
  0x96   :  { %6908 = vmatmul.msk.bf16.gmra.mxu1 %vm14514_vm4, %v1848_v27  ;;  %v8708_v49 = vpop.permute.xlu1 %7657  ;;  %v94_v27 = vand.u32 15, %v8564_v11 }
  0x97   :  { %v8723_v0 = vpop.permute.xlu0 %7652 }
  0x98   :  { %6916 = vmatmul.msk.bf16.gmra.mxu2 %vm14514_vm4, %v1856_v40  ;;  %v514_v40 = vand.u32 15, %v82_v19  ;;  %vm8746_vm8 = vcmp.ne.s32.totalorder %v94_v27, 0  ;;  %v1569_v27 = vsel %vm14535_vm1, %v1522_v35, %v14922_v2  ;;  %v14924_v35 = vrot.slane %v8735_v15, 7 }
  0x99   :  { %v14916_v5 = vsel %vm8746_vm8, 4294967295, %v14915_v5  ;;  %v1751_v4 = vsel %vm8746_vm8, %v1614_v42, 0.0 }
  0x9a   :  { %14917 = vst [vmem:[#allocation23_spill] sm:$0xff] %v14916_v5  ;;  %vm8754_vm9 = vcmp.ne.s32.totalorder %v514_v40, 0  ;;  %v1795_v40 = vsel %vm8739_vm7, %v1570_v37, 0.0 }
  0x9b   :  { %v14920_v18 = vsel %vm8754_vm9, 4294967295, %v14919_v18 }
  0x9c   :  { %14921 = vst [vmem:[#allocation24_spill] sm:$0xff] %v14920_v18  ;;  %v7645_v18 = vunpack.i.h.bf16 %v8679_v32  ;;  %v8816_v32 = vsel %vm14515_vm0, %v8320_v20, %v7644_v7  ;;  %v7554_v20 = vld [vmem:[%s14457_s1 + $0x48] sm:$0xff] }
  0x9d   :  { %14926 = vst [vmem:[#allocation26_spill] sm:$0xff] %v8816_v32  ;;  %2988 = vmatpush.bf16.msrb.mxu2 %v7554_v20 }
  0x9e   :  { %v7663_v19 = vpop.permute.xlu1 %7662 }
  0x9f   :  { %v1346_v61 = vpop.permute.xlu0 %1345  ;;  %v7664_v62 = vunpack.i.l.bf16 %v7663_v19  ;;  %v7665_v2 = vunpack.i.h.bf16 %v7663_v19 }
  0xa0   :  { %v8766_v57 = vsel %vm14515_vm0, %v8371_v31, %v1346_v61  ;;  %v1553_v31 = vsel %vm14535_vm1, %v1538_v12, %v14924_v35  ;;  %v1811_v61 = vsel %vm8754_vm9, %v1554_v36, 0.0  ;;  %v14925_v12 = vrot.slane %v8716_v9, 1 }
  0xa1   :  { %14923 = vst [vmem:[#allocation25_spill] sm:$0xff] %v8766_v57  ;;  %v8776_v52 = vsel %vm14515_vm0, 0.0, %v7664_v62  ;;  %v7630_v62 = vunpack.i.h.bf16 %v8637_v6  ;;  %v1849_v36 = vpack.c.bf16 %v1569_v27, %v1795_v40  ;;  %v1857_v42 = vpack.c.bf16 %v1553_v31, %v1811_v61 }
  0xa2   :  { %v1479_v37 = vrot.slane %v8776_v52, 7  ;;  %v14497_v16 = vrot.slane %v8776_v52, 1  ;;  %v24_v6 = vadd.s32 16, %v8564_v11  ;;  %v8806_v51 = vsel %vm14515_vm0, %v8441_v47, %v7665_v2 }
  0xa3   :  { %v68_v9 = vadd.s32 368, %v8564_v11  ;;  %v8821_v47 = vsel %vm14515_vm0, %v8309_v17, %v7630_v62  ;;  %v8825_v27 = vsel %vm14515_vm0, %v8266_v8, %v7629_v10  ;;  %v1480_v17 = vrot.slane %v8806_v51, 7 }
  0xa4   :  { %v8798_v19 = vsel %vm14510_vm10, %v14925_v12, %v14497_v16  ;;  %v1613_v35 = vsel %vm14535_vm1, %v1478_v58, %v1479_v37  ;;  %v84_v12 = vadd.s32 496, %v8564_v11  ;;  %v7546_v58 = vld [vmem:[%s14457_s1 + $0x28] sm:$0xff]  ;;  %v1524_v7 = vrot.slane %v8825_v27, 7 }
  0xa5   :  { %v1827_v5 = vpack.c.bf16 %v1613_v35, %v1751_v4  ;;  %2299 = vmatpush.bf16.msrb.mxu1 %v7546_v58  ;;  %v108_v31 = vand.u32 15, %v24_v6  ;;  %v1540_v8 = vrot.slane %v8816_v32, 7  ;;  %v416_v61 = vand.u32 15, %v68_v9 }
  0xa6   :  { %6909 = vmatmul.msk.bf16.gmra.mxu1 %vm14514_vm4, %v1849_v36  ;;  %v528_v2 = vand.u32 15, %v84_v12  ;;  %v1525_v62 = vrot.slane %v8821_v47, 7  ;;  %v14931_v35 = vmov 0  ;;  %v14935_v6 = vmov 0 }
  0xa7   :  { %6887 = vmatmul.msk.bf16.vlgmr.msra.gmra.mxu0 %vm14514_vm4, %v1827_v5  ;;  %v7668_v4 = vpop.permute.xlu0 %7667  ;;  %v8834_v5 = vsel %vm14515_vm0, %v8325_v21, %v7645_v18  ;;  %vm8845_vm11 = vcmp.ne.s32.totalorder %v108_v31, 0  ;;  %v14928_v21 = vmov 0  ;;  %v1612_v18 = vsel %vm14535_vm1, %v1479_v37, %v1480_v17 }
  0xa8   :  { %6917 = vmatmul.msk.bf16.gmra.mxu2 %vm14514_vm4, %v1857_v42  ;;  %v7669_v40 = vunpack.i.l.bf16 %v7668_v4  ;;  %14927 = vst [vmem:[#allocation27_spill] sm:$0xff] %v8834_v5  ;;  %v1541_v36 = vrot.slane %v8834_v5, 7  ;;  %v14929_v21 = vsel %vm8845_vm11, 4294967295, %v14928_v21  ;;  %vm8851_vm12 = vcmp.ne.s32.totalorder %v416_v61, 0 }
  0xa9   :  { %14930 = vst [vmem:[#allocation28_spill] sm:$0xff] %v14929_v21  ;;  %v14932_v35 = vsel %vm8851_vm12, 4294967295, %v14931_v35  ;;  %vm8859_vm13 = vcmp.ne.s32.totalorder %v528_v2, 0  ;;  %v14938_v12 = vrot.slane %v8735_v15, 7  ;;  %v7639_v37 = vunpack.i.l.bf16 %v8693_v59 }
  0xaa   :  { %v8840_v10 = vsel %vm14515_vm0, %v8400_v38, %v7669_v40  ;;  %14933 = vst [vmem:[#allocation29_spill] sm:$0xff] %v14932_v35  ;;  %v14934_v38 = vrot.slane %v8560_v3, 7  ;;  %v14936_v6 = vsel %vm8859_vm13, 4294967295, %v14935_v6  ;;  %v1753_v20 = vsel %vm8845_vm11, %v1612_v18, 0.0  ;;  %v7673_v18 = vpop.permute.xlu1 %7672 }
  0xab   :  { %v1481_v42 = vrot.slane %v8840_v10, 7  ;;  %14937 = vst [vmem:[#allocation30_spill] sm:$0xff] %v14936_v6  ;;  %v1552_v58 = vsel %vm14535_vm1, %v14938_v12, %v1540_v8  ;;  %v1567_v31 = vsel %vm14535_vm1, %v1524_v7, %v1525_v62  ;;  %v1551_v2 = vsel %vm14535_vm1, %v1540_v8, %v1541_v36  ;;  %v8883_v12 = vld [vmem:[%s14456_s0 + $0x98] sm:$0xff] }
  0xac   :  { %v1568_v9 = vsel %vm14535_vm1, %v14934_v38, %v1524_v7  ;;  %v1813_v38 = vsel %vm8859_vm13, %v1552_v58, 0.0  ;;  %v7670_v7 = vunpack.i.h.bf16 %v7668_v4  ;;  %v7640_v8 = vunpack.i.h.bf16 %v8693_v59 }
  0xad   :  { %v1611_v40 = vsel %vm14535_vm1, %v1480_v17, %v1481_v42  ;;  %v1797_v61 = vsel %vm8851_vm12, %v1568_v9, 0.0  ;;  %v8888_v17 = vld [vmem:[%s14456_s0 + $0xa0] sm:$0xff]  ;;  %v7654_v9 = vunpack.i.l.bf16 %v8723_v0  ;;  %v1858_v6 = vpack.c.bf16 %v1551_v2, %v1813_v38 }
  0xae   :  { %v1828_v16 = vpack.c.bf16 %v1611_v40, %v1753_v20  ;;  %v1850_v35 = vpack.c.bf16 %v1567_v31, %v1797_v61  ;;  %v7706_v58 = vpack.i.bf16 %v8888_v17, %v8883_v12  ;;  %v8896_v21 = vsel %vm14515_vm0, %v8289_v13, %v7639_v37 }
  0xaf   :  { %v7674_v5 = vunpack.i.l.bf16 %v7673_v18  ;;  %v26_v32 = vadd.s32 32, %v8564_v11  ;;  %v7655_v4 = vunpack.i.h.bf16 %v8723_v0  ;;  %v8902_v15 = vsel %vm14515_vm0, %v8405_v39, %v7670_v7 }
  0xb0   :  { %v70_v59 = vadd.s32 384, %v8564_v11  ;;  %v86_v40 = vadd.s32 512, %v8564_v11  ;;  %7707 = vrot.lane.b32.xlu2 %v7706_v58, %s8193_s26  ;;  %v8910_v13 = vsel %vm14515_vm0, %v8332_v22, %v7654_v9  ;;  %v8915_v0 = vsel %vm14515_vm0, %v8294_v14, %v7640_v8 }
  0xb1   :  { %14939 = vst [vmem:[#allocation31_spill] sm:$0xff] %v8910_v13  ;;  %v1526_v39 = vrot.slane %v8896_v21, 7  ;;  %v8922_v37 = vsel %vm14515_vm0, %v8431_v45, %v7674_v5  ;;  %v122_v20 = vand.u32 15, %v26_v32  ;;  %v8926_v22 = vsel %vm14515_vm0, %v8337_v23, %v7655_v4 }
  0xb2   :  { %14940 = vst [vmem:[#allocation32_spill] sm:$0xff] %v8926_v22  ;;  %v430_v31 = vand.u32 15, %v70_v59  ;;  %v542_v14 = vand.u32 15, %v86_v40  ;;  %v7660_v61 = vunpack.i.h.bf16 %v8708_v49  ;;  %v14513_v2 = vrot.slane %v8922_v37, 7 }
  0xb3   :  { %v14511_v38 = vrot.slane %v8926_v22, 7  ;;  %v1532_v45 = vrot.slane %v8766_v57, 7  ;;  %vm8934_vm14 = vcmp.ne.s32.totalorder %v122_v20, 0  ;;  %v14941_v32 = vmov 0 }
  0xb4   :  { %v14942_v32 = vsel %vm8934_vm14, 4294967295, %v14941_v32  ;;  %vm8940_vm15 = vcmp.ne.s32.totalorder %v430_v31, 0  ;;  %v14944_v5 = vmov 0  ;;  %v1566_v7 = vsel %vm14535_vm1, %v1525_v62, %v1526_v39 }
  0xb5   :  { %14943 = vst [vmem:[#allocation33_spill] sm:$0xff] %v14942_v32  ;;  %v14945_v5 = vsel %vm8940_vm15, 4294967295, %v14944_v5  ;;  %vm8946_vm10 = vcmp.ne.s32.totalorder %v542_v14, 0  ;;  %v7649_v58 = vunpack.i.l.bf16 %v8589_v24  ;;  %v8955_v4 = vsel %vm14515_vm0, %v8364_v30, %v7660_v61 }
  0xb6   :  { %6910 = vmatmul.msk.bf16.gmra.mxu1 %vm14514_vm4, %v1850_v35  ;;  %v1482_v35 = vrot.slane %v8902_v15, 7  ;;  %14946 = vst [vmem:[#allocation34_spill] sm:$0xff] %v14945_v5  ;;  %v1799_v40 = vsel %vm8940_vm15, %v1566_v7, 0.0  ;;  %v14512_v31 = vrot.slane %v8955_v4, 7  ;;  %v76_v61 = vadd.s32 432, %v8564_v11 }
  0xb7   :  { %6888 = vmatmul.msk.bf16.gmra.mxu0 %vm14514_vm4, %v1828_v16  ;;  %v1542_v16 = vrot.slane %v8910_v13, 7  ;;  %14949 = vst [vmem:[#allocation35_spill] sm:$0xff] %v8955_v4  ;;  %v14975_v32 = vrot.slane %v8713_v48, 7  ;;  %v1445_v48 = vpack.c.bf16 %v8840_v10, %v8806_v51 }
  0xb8   :  { %6918 = vmatmul.msk.bf16.gmra.mxu2 %vm14514_vm4, %v1858_v6  ;;  %v1527_v6 = vrot.slane %v8915_v0, 7  ;;  %v1610_v23 = vsel %vm14535_vm1, %v1481_v42, %v1482_v35  ;;  %v7675_v42 = vunpack.i.h.bf16 %v7673_v18  ;;  %v1609_v62 = vsel %vm14535_vm1, %v1482_v35, %v14513_v2  ;;  %v8979_v35 = vpop.permute.xlu2 %7677 }
  0xb9   :  { %v1550_v8 = vsel %vm14535_vm1, %v1541_v36, %v1542_v16  ;;  %v1755_v36 = vsel %vm8934_vm14, %v1610_v23, 0.0  ;;  %v1549_v30 = vsel %vm14535_vm1, %v1542_v16, %v14511_v38  ;;  %v7650_v23 = vunpack.i.h.bf16 %v8589_v24 }
  0xba   :  { %v1565_v59 = vsel %vm14535_vm1, %v1526_v39, %v1527_v6  ;;  %v1815_v18 = vsel %vm8946_vm10, %v1550_v8, 0.0  ;;  %v14950_v39 = vrot.slane %v8610_v33, 7  ;;  %v1829_v14 = vpack.c.bf16 %v1609_v62, %v1755_v36 }
  0xbb   :  { %v8986_v16 = vsel %vm14515_vm0, %v8344_v25, %v7649_v58  ;;  %v1851_v7 = vpack.c.bf16 %v1565_v59, %v1799_v40  ;;  %v1859_v9 = vpack.c.bf16 %v1549_v30, %v1815_v18  ;;  %v8991_v8 = vsel %vm14515_vm0, %v8383_v34, %v8649_v60  ;;  %v7545_v34 = vld [vmem:[%s14457_s1 + $0x20] sm:$0xff] }
  0xbc   :  { %v1559_v20 = vsel %vm14535_vm1, %v1532_v45, %v14950_v39  ;;  %14951 = vst [vmem:[#allocation36_spill] sm:$0xff] %v8991_v8  ;;  %v8995_v39 = vsel %vm14515_vm0, %v8436_v46, %v7675_v42  ;;  %v7679_v62 = vunpack.i.l.bf16 %v8979_v35  ;;  %v28_v36 = vadd.s32 48, %v8564_v11  ;;  %v7553_v46 = vld [vmem:[%s14457_s1 + $0x40] sm:$0xff]  ;;  %2300 = vmatpush.bf16.msrb.mxu1 %v7545_v34 }
  0xbd   :  { %v14516_v25 = vrot.slane %v8806_v51, 1  ;;  %v72_v58 = vadd.s32 400, %v8564_v11  ;;  %v88_v59 = vadd.s32 528, %v8564_v11  ;;  %v23_v40 = vadd.s32 8, %v8564_v11  ;;  %2989 = vmatpush.bf16.msrb.mxu2 %v7553_v46 }
  0xbe   :  { %v472_v30 = vand.u32 15, %v76_v61  ;;  %v1560_v18 = vsel %vm14535_vm1, %v14512_v31, %v1532_v45  ;;  %v1528_v24 = vrot.slane %v8986_v16, 7  ;;  %v1544_v38 = vrot.slane %v8991_v8, 7 }
  0xbf   :  { %v1484_v42 = vrot.slane %v8995_v39, 7  ;;  %v136_v61 = vand.u32 15, %v28_v36  ;;  %v101_v45 = vand.u32 15, %v23_v40  ;;  %v14953_v31 = vmov 0 }
  0xc0   :  { %vm9029_vm10 = vcmp.ne.s32.totalorder %v472_v30, 0  ;;  %v14956_v2 = vrot.slane %v8776_v52, 1  ;;  %v2513_v34 = vrot.slane %v8594_v28, 1  ;;  %v14961_v30 = vmov 0 }
  0xc1   :  { %v14954_v31 = vsel %vm9029_vm10, 4294967295, %v14953_v31  ;;  %v2527_v36 = vrot.slane %v8610_v33, 1 }
  0xc2   :  { %14955 = vst [vmem:[#allocation38_spill] sm:$0xff] %v14954_v31 }
  0xc6   :  { %6911 = vmatmul.msk.bf16.gmra.mxu1 %vm14514_vm4, %v1851_v7  ;;  %v9019_v7 = vsel %vm14515_vm0, %v8349_v26, %v7650_v23  ;;  %v444_v26 = vand.u32 15, %v72_v58  ;;  %v556_v23 = vand.u32 15, %v88_v59  ;;  %v1564_v59 = vsel %vm14535_vm1, %v1527_v6, %v1528_v24 }
  0xc7   :  { %6889 = vmatmul.msk.bf16.gmra.mxu0 %vm14514_vm4, %v1829_v14  ;;  %14952 = vst [vmem:[#allocation37_spill] sm:$0xff] %v9019_v7  ;;  %v9027_v14 = vsel %vm14515_vm0, %v8421_v43, %v7679_v62  ;;  %v1805_v43 = vsel %vm9029_vm10, %v1560_v18, 0.0  ;;  %v14529_v62 = vrot.slane %v8646_v56, 1  ;;  %vm9050_vm0 = vcmp.ne.s32.totalorder %v101_v45, 15  ;;  %vm14985_vm10 = vmmov %vm14971_vm6 }
  0xc8   :  { %6919 = vmatmul.msk.bf16.gmra.mxu2 %vm14514_vm4, %v1859_v9  ;;  %vm14957_vm4 = vcmp.lt.s32.totalorder %v8564_v11, 7  ;;  %v14532_v58 = vrot.slane %v9027_v14, 7  ;;  %v9054_v40 = vpack.c.bf16 %v1559_v20, %v1805_v43  ;;  %v14964_v18 = vrot.slane %v8922_v37, 7  ;;  %vm14994_vm15 = vmmov %vm14985_vm10 }
  0xc9   :  { %v2606_v9 = vsel %vm14957_vm4, %v14956_v2, %v14516_v25  ;;  %v14958_v2 = vmov 0  ;;  %vm9056_vm4 = vcmp.ne.s32.totalorder %v136_v61, 0  ;;  %v63_v6 = vadd.s32 328, %v8564_v11 }
  0xca   :  { %v14959_v2 = vsel %vm9050_vm0, 4294967295, %v14958_v2  ;;  %v14962_v30 = vsel %vm9056_vm4, 4294967295, %v14961_v30  ;;  %v1608_v25 = vsel %vm14535_vm1, %v14964_v18, %v1484_v42  ;;  %v2746_v46 = vsel %vm9050_vm0, %v2606_v9, 0.0 }
  0xcb   :  { %14960 = vst [vmem:[#allocation39_spill] sm:$0xff] %v14959_v2  ;;  %vm9067_vm13 = vcmp.ne.s32.totalorder %v444_v26, 0  ;;  %v14965_v45 = vmov 0  ;;  %vm9071_vm9 = vcmp.ne.s32.totalorder %v556_v23, 0  ;;  %v14970_v61 = vrot.slane %v8926_v22, 7  ;;  %v15047_v2 = vld [vmem:[#allocation3_spill] sm:$0xff] }
  0xcc   :  { %14963 = vst [vmem:[#allocation40_spill] sm:$0xff] %v14962_v30  ;;  %v14966_v45 = vsel %vm9067_vm13, 4294967295, %v14965_v45  ;;  %v9080_v18 = vpack.c.bf16 %v2746_v46, %v8798_v19  ;;  %v2566_v26 = vsel %vm14971_vm6, %v2513_v34, %v14529_v62  ;;  %v7680_v23 = vunpack.i.h.bf16 %v8979_v35 }
  0xcd   :  { %14967 = vst [vmem:[#allocation41_spill] sm:$0xff] %v14966_v45  ;;  %v1548_v43 = vsel %vm14535_vm1, %v14970_v61, %v1544_v38  ;;  %v1607_v31 = vsel %vm14535_vm1, %v1484_v42, %v14532_v58  ;;  %v1757_v19 = vsel %vm9056_vm4, %v1608_v25, 0.0  ;;  %v381_v46 = vand.u32 15, %v63_v6  ;;  %v7683_v58 = vpop.permute.xlu0 %7682 }
  0xce   :  { %v14972_v61 = vrot.slane %v8580_v41, 1  ;;  %v14974_v5 = vrot.slane %v9019_v7, 7  ;;  %v1801_v35 = vsel %vm9067_vm13, %v1564_v59, 0.0  ;;  %v1547_v42 = vsel %vm14535_vm1, %v1544_v38, %v14975_v32 }
  0xcf   :  { %v1817_v25 = vsel %vm9071_vm9, %v1548_v43, 0.0  ;;  %v1830_v59 = vpack.c.bf16 %v1607_v31, %v1757_v19  ;;  %v67_v38 = vadd.s32 360, %v8564_v11  ;;  %vm14981_vm9 = vcmask 261120  }
  0xd0   :  { %v2567_v9 = vsel %vm14973_vm3, %v14972_v61, %v2513_v34  ;;  %v1563_v62 = vsel %vm14535_vm1, %v1528_v24, %v14974_v5  ;;  %v7659_v34 = vunpack.i.l.bf16 %v8708_v49  ;;  %vm9114_vm3 = vcmp.ne.s32.totalorder %v381_v46, 15 }
  0xd1   :  { %v14976_v5 = vmov 0  ;;  %v7684_v24 = vunpack.i.l.bf16 %v7683_v58  ;;  %v2786_v45 = vsel %vm9114_vm3, %v2566_v26, 0.0  ;;  %v1852_v32 = vpack.c.bf16 %v1563_v62, %v1801_v35 }
  0xd2   :  { %v14977_v5 = vsel %vm9114_vm3, 4294967295, %v14976_v5  ;;  %v1860_v20 = vpack.c.bf16 %v1547_v42, %v1817_v25  ;;  %v9121_v43 = vpack.c.bf16 %v2786_v45, %v2567_v9  ;;  %v14979_v49 = vrot.slane %v8560_v3, 1 }
  0xd3   :  { %14978 = vst [vmem:[#allocation42_spill] sm:$0xff] %v14977_v5  ;;  %v14980_v61 = vrot.slane %v8556_v63, 1  ;;  %v9131_v6 = vsel %vm14981_vm9, %v8426_v44, %v7680_v23  ;;  %v30_v31 = vadd.s32 64, %v8564_v11  ;;  %v409_v26 = vand.u32 15, %v67_v38 }
  0xd4   :  { %v77_v19 = vadd.s32 440, %v8564_v11  ;;  %vm14982_vm1 = vcmask 523264   ;;  %v74_v62 = vadd.s32 416, %v8564_v11  ;;  %v14983_v45 = vrot.slane %v8825_v27, 1 }
  0xd5   :  { %v2563_v46 = vsel %vm14971_vm6, %v14980_v61, %v14979_v49  ;;  %v14984_v9 = vmov %v14979_v49  ;;  %vm14986_vm6 = vmmov %vm14981_vm9  ;;  %v1486_v23 = vrot.slane %v9131_v6, 7  ;;  %v14990_v42 = vmov 0 }
  0xd6   :  { %6912 = vmatmul.msk.bf16.gmra.mxu1 %vm14982_vm1, %v1852_v32  ;;  %v2562_v35 = vsel %vm14985_vm10, %v14984_v9, %v14983_v45  ;;  %v9145_v44 = vsel %vm14986_vm6, %v8359_v29, %v7659_v34  ;;  %vm14988_vm9 = vmmov %vm14982_vm1  ;;  %v479_v25 = vand.u32 15, %v77_v19  ;;  %v14993_v61 = vrot.slane %v8606_v1, 1 }
  0xd7   :  { %14987 = vst [vmem:[#allocation43_spill] sm:$0xff] %v9145_v44  ;;  %6890 = vmatmul.msk.bf16.gmra.mxu0 %vm14988_vm9, %v1830_v59  ;;  %vm14989_vm13 = vmmov %vm14982_vm1  ;;  %vm9150_vm1 = vcmp.ne.s32.totalorder %v409_v26, 15  ;;  %v150_v34 = vand.u32 15, %v30_v31  ;;  %v14996_v32 = vrot.slane %v8766_v57, 1  ;;  %v1530_v49 = vrot.slane %v9145_v44, 7 }
  0xd8   :  { %6920 = vmatmul.msk.bf16.gmra.mxu2 %vm14989_vm13, %v1860_v20  ;;  %v14991_v42 = vsel %vm9150_vm1, 4294967295, %v14990_v42  ;;  %v2552_v38 = vsel %vm14994_vm15, %v2527_v36, %v14993_v61  ;;  %vm14995_vm10 = vmmov %vm14986_vm6  ;;  %v2790_v59 = vsel %vm9150_vm1, %v2562_v35, 0.0  ;;  %v458_v26 = vand.u32 15, %v74_v62  ;;  %v9199_v61 = vld [vmem:[%s14456_s0 + $0xc8] sm:$0xff] }
  0xd9   :  { %14992 = vst [vmem:[#allocation44_spill] sm:$0xff] %v14991_v42  ;;  %v9160_v29 = vsel %vm14995_vm10, %v8469_v53, %v7684_v24  ;;  %vm14997_vm13 = vmmov %vm14994_vm15  ;;  %v9169_v19 = vpack.c.bf16 %v2790_v59, %v2563_v46  ;;  %vm9171_vm6 = vcmp.ne.s32.totalorder %v479_v25, 15  ;;  %v14998_v45 = vmov 0 }
  0xda   :  { %v2553_v20 = vsel %vm14997_vm13, %v14996_v32, %v2527_v36  ;;  %v14999_v45 = vsel %vm9171_vm6, 4294967295, %v14998_v45  ;;  %v2800_v53 = vsel %vm9171_vm6, %v2552_v38, 0.0  ;;  %v1487_v24 = vrot.slane %v9160_v29, 7  ;;  %v9204_v38 = vld [vmem:[%s14456_s0 + $0xd0] sm:$0xff] }
  0xdb   :  { %15000 = vst [vmem:[#allocation45_spill] sm:$0xff] %v14999_v45  ;;  %v9178_v31 = vpack.c.bf16 %v2800_v53, %v2553_v20  ;;  %vm9180_vm15 = vcmp.ne.s32.totalorder %v150_v34, 0  ;;  %v15002_v9 = vmov 0  ;;  %v15005_v36 = vrot.slane %v9027_v14, 7  ;;  %v7688_v45 = vpop.permute.xlu1 %7687 }
  0xdc   :  { %v15003_v9 = vsel %vm9180_vm15, 4294967295, %v15002_v9  ;;  %vm15006_vm9 = vcmp.lt.s32.totalorder %v8564_v11, 1  ;;  %vm9188_vm10 = vcmp.ne.s32.totalorder %v458_v26, 0  ;;  %v15007_v62 = vmov 0 }
  0xdd   :  { %15001 = vst [vmem:[#allocation46_spill] sm:$0xff] %v9178_v31  ;;  %v1606_v46 = vsel %vm15006_vm9, %v15005_v36, %v1486_v23  ;;  %v15008_v62 = vsel %vm9188_vm10, 4294967295, %v15007_v62  ;;  %v15010_v35 = vrot.slane %v9019_v7, 7  ;;  %vm15011_vm13 = vmmov %vm15006_vm9  ;;  %v1605_v34 = vsel %vm15006_vm9, %v1486_v23, %v1487_v24 }
  0xde   :  { %15004 = vst [vmem:[#allocation47_spill] sm:$0xff] %v15003_v9  ;;  %v1759_v59 = vsel %vm9180_vm15, %v1606_v46, 0.0  ;;  %v15012_v32 = vrot.slane %v8955_v4, 7  ;;  %v7685_v53 = vunpack.i.h.bf16 %v7683_v58  ;;  %v7689_v5 = vunpack.i.l.bf16 %v7688_v45 }
  0xdf   :  { %15009 = vst [vmem:[#allocation48_spill] sm:$0xff] %v15008_v62  ;;  %v1562_v25 = vsel %vm15011_vm13, %v15010_v35, %v1530_v49  ;;  %vm15013_vm13 = vmmov %vm15006_vm9  ;;  %v1831_v36 = vpack.c.bf16 %v1605_v34, %v1759_v59  ;;  %v7721_v35 = vpack.i.bf16 %v9204_v38, %v9199_v61  ;;  %v32_v23 = vadd.s32 80, %v8564_v11 }
  0xe0   :  { %v1561_v20 = vsel %vm15013_vm13, %v1530_v49, %v15012_v32  ;;  %v1803_v26 = vsel %vm9188_vm10, %v1562_v25, 0.0  ;;  %vm15014_vm9 = vcmask 261120   ;;  %vm15015_vm13 = vcmask 523264  }
  0xe1   :  { %v1853_v42 = vpack.c.bf16 %v1561_v20, %v1803_v26  ;;  %7722 = vrot.lane.b32.xlu2 %v7721_v35, %s8193_s26  ;;  %v9222_v46 = vsel %vm15014_vm9, %v8479_v55, %v7685_v53  ;;  %v25_v49 = vadd.s32 24, %v8564_v11  ;;  %vm15016_vm6 = vmmov %vm15015_vm13  ;;  %v164_v34 = vand.u32 15, %v32_v23 }
  0xe2   :  { %vm15017_vm10 = vmmov %vm15016_vm6  ;;  %v1488_v58 = vrot.slane %v9222_v46, 7  ;;  %v2475_v59 = vrot.slane %v8840_v10, 1  ;;  %v2476_v55 = vrot.slane %v8902_v15, 1  ;;  %v15019_v20 = vmov 0 }
  0xe3   :  { %vm15018_vm12 = vmmov %vm15014_vm9  ;;  %v115_v32 = vand.u32 15, %v25_v49  ;;  %vm9237_vm9 = vcmp.ne.s32.totalorder %v164_v34, 0  ;;  %v15023_v26 = vmov 0  ;;  %v7690_v23 = vunpack.i.h.bf16 %v7688_v45 }
  0xe4   :  { %v9232_v25 = vsel %vm15018_vm12, %v8453_v50, %v7689_v5  ;;  %v15020_v20 = vsel %vm9237_vm9, 4294967295, %v15019_v20  ;;  %vm15026_vm12 = vcmp.lt.s32.totalorder %v8564_v11, 7  ;;  %v7693_v49 = vpop.permute.xlu2 %7692  ;;  %v34_v9 = vadd.s32 96, %v8564_v11 }
  0xe5   :  { %15021 = vst [vmem:[#allocation49_spill] sm:$0xff] %v15020_v20  ;;  %v2604_v50 = vsel %vm15026_vm12, %v2475_v59, %v2476_v55  ;;  %vm15029_vm1 = vmmov %vm15026_vm12  ;;  %v7694_v62 = vunpack.i.l.bf16 %v7693_v49  ;;  %vm15031_vm12 = vcmask 523264   ;;  %v1446_v22 = vpack.c.bf16 %v8922_v37, %v8902_v15 }
  0xe6   :  { %6913 = vmatmul.msk.bf16.gmra.mxu1 %vm15015_vm13, %v1853_v42  ;;  %v1489_v42 = vrot.slane %v9232_v25, 7 }
  0xe7   :  { %6891 = vmatmul.msk.bf16.gmra.mxu0 %vm15016_vm6, %v1831_v36  ;;  %vm15022_vm6 = vcmp.lt.s32.totalorder %v8564_v11, 1  ;;  %v15028_v36 = vrot.slane %v8806_v51, 1 }
  0xe8   :  { %6995 = vmatmul.msk.bf16.vlgmr.msrb.gmra.mxu2 %vm15017_vm10, %v9080_v18  ;;  %v1604_v18 = vsel %vm15022_vm6, %v1487_v24, %v1488_v58  ;;  %vm9243_vm10 = vcmp.ne.s32.totalorder %v115_v32, 15  ;;  %vm15027_vm13 = vmmov %vm15022_vm6  ;;  %vm15030_vm6 = vcmask 261120  }
  0xe9   :  { %v15024_v26 = vsel %vm9243_vm10, 4294967295, %v15023_v26  ;;  %v1603_v5 = vsel %vm15027_vm13, %v1488_v58, %v1489_v42  ;;  %v1761_v53 = vsel %vm9237_vm9, %v1604_v18, 0.0  ;;  %v2605_v35 = vsel %vm15029_vm1, %v15028_v36, %v2475_v59  ;;  %vm15032_vm1 = vmmov %vm15031_vm12  ;;  %v15034_v59 = vld [vmem:[#allocation2_spill] sm:$0xff] }
  0xea   :  { %15025 = vst [vmem:[#allocation50_spill] sm:$0xff] %v15024_v26  ;;  %v2748_v24 = vsel %vm9243_vm10, %v2604_v50, 0.0  ;;  %v1832_v34 = vpack.c.bf16 %v1603_v5, %v1761_v53  ;;  %v9262_v58 = vsel %vm15030_vm6, %v8474_v54, %v7690_v23  ;;  %v27_v18 = vadd.s32 40, %v8564_v11  ;;  %vm15033_vm13 = vmmov %vm15032_vm1 }
  0xeb   :  { %v2823_v32 = vpack.c.bf16 %v2748_v24, %v2605_v35  ;;  %v1490_v45 = vrot.slane %v9262_v58, 7  ;;  %vm15035_vm7 = vmmov %vm15030_vm6  ;;  %v178_v5 = vand.u32 15, %v34_v9  ;;  %v2478_v53 = vrot.slane %v8995_v39, 1 }
  0xec   :  { %v9272_v50 = vsel %vm15035_vm7, %v15034_v59, %v7694_v62  ;;  %v2477_v54 = vrot.slane %v8922_v37, 1  ;;  %v129_v36 = vand.u32 15, %v27_v18  ;;  %v15036_v35 = vmov 0  ;;  %v8045_v37 = vld [vmem:[%s14456_s0 + $0x88] sm:$0xff] }
  0xed   :  { %vm9277_vm6 = vcmp.ne.s32.totalorder %v178_v5, 0  ;;  %v15040_v23 = vmov 0  ;;  %vm15043_vm7 = vcmp.lt.s32.totalorder %v8564_v11, 7  ;;  %v36_v26 = vadd.s32 112, %v8564_v11 }
  0xee   :  { %v15037_v35 = vsel %vm9277_vm6, 4294967295, %v15036_v35  ;;  %v2602_v9 = vsel %vm15043_vm7, %v2477_v54, %v2478_v53  ;;  %vm15045_vm5 = vmmov %vm15043_vm7 }
  0xef   :  { %15038 = vst [vmem:[#allocation2_spill] sm:$0xff] %v15037_v35 }
  0xf6   :  { %6914 = vmatmul.msk.bf16.gmra.mxu1 %vm15031_vm12, %v9054_v40  ;;  %v1491_v40 = vrot.slane %v9272_v50, 7  ;;  %vm15039_vm12 = vcmp.lt.s32.totalorder %v8564_v11, 1 }
  0xf7   :  { %6892 = vmatmul.msk.bf16.gmra.mxu0 %vm15032_vm1, %v1832_v34  ;;  %v1602_v24 = vsel %vm15039_vm12, %v1489_v42, %v1490_v45  ;;  %vm9283_vm1 = vcmp.ne.s32.totalorder %v129_v36, 15  ;;  %v7695_v42 = vunpack.i.h.bf16 %v7693_v49  ;;  %v7698_v36 = vpop.permute.xlu0 %7697  ;;  %v15054_v49 = vld [vmem:[#allocation12_spill] sm:$0xff] }
  0xf8   :  { %6996 = vmatmul.msk.bf16.gmra.mxu2 %vm15033_vm13, %v2823_v32  ;;  %v15041_v23 = vsel %vm9283_vm1, 4294967295, %v15040_v23  ;;  %vm15044_vm13 = vmmov %vm15039_vm12  ;;  %v1763_v34 = vsel %vm9277_vm6, %v1602_v24, 0.0  ;;  %v2603_v32 = vsel %vm15045_vm5, %v2476_v55, %v2477_v54  ;;  %v2750_v18 = vsel %vm9283_vm1, %v2602_v9, 0.0  ;;  %v15049_v24 = vld [vmem:[#allocation19_spill] sm:$0xff] }
  0xf9   :  { %15042 = vst [vmem:[#allocation51_spill] sm:$0xff] %v15041_v23  ;;  %v1601_v62 = vsel %vm15044_vm13, %v1490_v45, %v1491_v40  ;;  %v2824_v20 = vpack.c.bf16 %v2750_v18, %v2603_v32  ;;  %v7699_v30 = vunpack.i.l.bf16 %v7698_v36  ;;  %vm15048_vm12 = vcmask 261120  }
  0xfa   :  { %v1833_v5 = vpack.c.bf16 %v1601_v62, %v1763_v34  ;;  %v9302_v45 = vsel %vm15048_vm12, %v15047_v2, %v7695_v42  ;;  %v15050_v35 = vpack.c.bf16 %v8776_v52, %v15049_v24  ;;  %vm15051_vm5 = vcmask 523264   ;;  %vm15055_vm3 = vmmov %vm15048_vm12  ;;  %v7703_v24 = vpop.permute.xlu1 %7702 }
  0xfb   :  { %v29_v55 = vadd.s32 56, %v8564_v11  ;;  %vm15052_vm7 = vmmov %vm15051_vm5  ;;  %v9313_v54 = vsel %vm15055_vm3, %v15054_v49, %v7699_v30  ;;  %v1492_v9 = vrot.slane %v9302_v45, 7  ;;  %v192_v62 = vand.u32 15, %v36_v26 }
  0xfc   :  { %vm15053_vm13 = vmmov %vm15051_vm5  ;;  %v2480_v2 = vrot.slane %v9131_v6, 1  ;;  %v2479_v34 = vrot.slane %v9027_v14, 1  ;;  %v1493_v18 = vrot.slane %v9313_v54, 7  ;;  %vm15061_vm3 = vcmp.lt.s32.totalorder %v8564_v11, 1 }
  0xfd   :  { %v143_v52 = vand.u32 15, %v29_v55  ;;  %vm9323_vm12 = vcmp.ne.s32.totalorder %v192_v62, 0  ;;  %v1600_v30 = vsel %vm15061_vm3, %v1491_v40, %v1492_v9  ;;  %v15062_v26 = vmov 0 }
  0xfe   :  { %v1765_v55 = vsel %vm9323_vm12, %v1600_v30, 0.0  ;;  %v7700_v40 = vunpack.i.h.bf16 %v7698_v36  ;;  %v7704_v8 = vunpack.i.l.bf16 %v7703_v24  ;;  %v38_v30 = vadd.s32 128, %v8564_v11 }
  0xff   :  { %v31_v36 = vadd.s32 72, %v8564_v11 }
 0x100   :  { %v206_v10 = vand.u32 15, %v38_v30 }
 0x103   :  { %v9297_v59 = vpop.f32.mrf.mxu1 }
 0x104   :  { %15046 = vst [vmem:[#allocation52_spill] sm:$0xff] %v9297_v59 }
 0x106   :  { %6937 = vmatmul.msk.bf16.vlgmr.msrb.gmra.mxu1 %vm15051_vm5, %v15050_v35  ;;  %vm9329_vm5 = vcmp.ne.s32.totalorder %v143_v52, 15 }
 0x107   :  { %6893 = vmatmul.msk.bf16.gmra.mxu0 %vm15052_vm7, %v1833_v5  ;;  %v15063_v26 = vsel %vm9329_vm5, 4294967295, %v15062_v26  ;;  %vm15065_vm7 = vcmp.lt.s32.totalorder %v8564_v11, 7 }
 0x108   :  { %6997 = vmatmul.msk.bf16.gmra.mxu2 %vm15053_vm13, %v2824_v20  ;;  %v15058_v20 = vmov 0  ;;  %15064 = vst [vmem:[#allocation54_spill] sm:$0xff] %v15063_v26  ;;  %v2600_v42 = vsel %vm15065_vm7, %v2479_v34, %v2480_v2  ;;  %vm15066_vm13 = vmmov %vm15061_vm3  ;;  %vm15071_vm3 = vcmask 261120  }
 0x109   :  { %v15059_v20 = vsel %vm9323_vm12, 4294967295, %v15058_v20  ;;  %v1599_v5 = vsel %vm15066_vm13, %v1492_v9, %v1493_v18  ;;  %vm15067_vm2 = vmmov %vm15065_vm7  ;;  %v2752_v62 = vsel %vm9329_vm5, %v2600_v42, 0.0  ;;  %v15075_v42 = vld [vmem:[#allocation4_spill] sm:$0xff] }
 0x10a   :  { %15060 = vst [vmem:[#allocation53_spill] sm:$0xff] %v15059_v20  ;;  %v2601_v49 = vsel %vm15067_vm2, %v2478_v53, %v2479_v34  ;;  %v15070_v20 = vld [vmem:[#allocation13_spill] sm:$0xff]  ;;  %vm15072_vm2 = vcmask 523264   ;;  %vm15076_vm12 = vmmov %vm15071_vm3 }
 0x10b   :  { %v9318_v32 = vpop.f32.mrf.mxu1  ;;  %v9320_v35 = vpop.f32.mrf.mxu2  ;;  %v2825_v9 = vpack.c.bf16 %v2752_v62, %v2601_v49  ;;  %v9352_v53 = vsel %vm15071_vm3, %v15070_v20, %v7700_v40  ;;  %vm15073_vm7 = vmmov %vm15072_vm2  ;;  %v9361_v51 = vsel %vm15076_vm12, %v15075_v42, %v7704_v8  ;;  %v2481_v20 = vrot.slane %v9160_v29, 1 }
 0x10c   :  { %15056 = vst [vmem:[#allocation3_spill] sm:$0xff] %v9318_v32  ;;  %vm15074_vm13 = vmmov %vm15072_vm2  ;;  %v1494_v34 = vrot.slane %v9352_v53, 7  ;;  %vm9370_vm3 = vcmp.ne.s32.totalorder %v206_v10, 0  ;;  %v15079_v62 = vmov 0  ;;  %v15083_v40 = vmov 0 }
 0x10d   :  { %15057 = vst [vmem:[#allocation12_spill] sm:$0xff] %v9320_v35  ;;  %v1834_v35 = vpack.c.bf16 %v1599_v5, %v1765_v55  ;;  %v2482_v5 = vrot.slane %v9222_v46, 1  ;;  %v157_v55 = vand.u32 15, %v31_v36  ;;  %v15080_v62 = vsel %vm9370_vm3, 4294967295, %v15079_v62 }
 0x10e   :  { %15081 = vst [vmem:[#allocation57_spill] sm:$0xff] %v15080_v62 }
 0x10f   :  { %vm9376_vm12 = vcmp.ne.s32.totalorder %v157_v55, 15  ;;  %v7708_v55 = vpop.permute.xlu2 %7707 }
 0x110   :  { %v15084_v40 = vsel %vm9376_vm12, 4294967295, %v15083_v40  ;;  %v7709_v13 = vunpack.i.l.bf16 %v7708_v55 }
 0x111   :  { %15085 = vst [vmem:[#allocation58_spill] sm:$0xff] %v15084_v40 }
 0x113   :  { %v9343_v52 = vpop.f32.mrf.mxu1  ;;  %v9345_v23 = vpop.f32.mrf.mxu2 }
 0x114   :  { %15068 = vst [vmem:[#allocation55_spill] sm:$0xff] %v9343_v52 }
 0x115   :  { %15069 = vst [vmem:[#allocation56_spill] sm:$0xff] %v9345_v23 }
 0x116   :  { %6938 = vmatmul.msk.bf16.gmra.mxu1 %vm15072_vm2, %v1445_v48  ;;  %vm15082_vm2 = vcmp.lt.s32.totalorder %v8564_v11, 1 }
 0x117   :  { %6894 = vmatmul.msk.bf16.gmra.mxu0 %vm15073_vm7, %v1834_v35  ;;  %v1495_v35 = vrot.slane %v9361_v51, 7  ;;  %v1598_v8 = vsel %vm15082_vm2, %v1493_v18, %v1494_v34  ;;  %vm15086_vm7 = vcmp.lt.s32.totalorder %v8564_v11, 7  ;;  %v7705_v18 = vunpack.i.h.bf16 %v7703_v24 }
 0x118   :  { %6998 = vmatmul.msk.bf16.gmra.mxu2 %vm15074_vm13, %v2825_v9  ;;  %v2598_v9 = vsel %vm15086_vm7, %v2481_v20, %v2482_v5  ;;  %vm15087_vm13 = vmmov %vm15082_vm2  ;;  %v1767_v36 = vsel %vm9370_vm3, %v1598_v8, 0.0  ;;  %v40_v8 = vadd.s32 144, %v8564_v11  ;;  %vm15092_vm2 = vcmask 523264  }
 0x119   :  { %v1597_v30 = vsel %vm15087_vm13, %v1494_v34, %v1495_v35  ;;  %vm15088_vm6 = vmmov %vm15086_vm7  ;;  %v2754_v10 = vsel %vm9376_vm12, %v2598_v9, 0.0  ;;  %v33_v24 = vadd.s32 88, %v8564_v11 }
 0x11a   :  { %v2599_v42 = vsel %vm15088_vm6, %v2480_v2, %v2481_v20  ;;  %v1835_v23 = vpack.c.bf16 %v1597_v30, %v1767_v36  ;;  %v8044_v2 = vld [vmem:[%s14456_s0 + $0x80] sm:$0xff]  ;;  %vm15091_vm6 = vcmask 261120   ;;  %vm15093_vm7 = vmmov %vm15092_vm2  ;;  %v220_v30 = vand.u32 15, %v40_v8 }
 0x11b   :  { %v9365_v49 = vpop.f32.mrf.mxu1  ;;  %v9367_v48 = vpop.f32.mrf.mxu2  ;;  %v2826_v34 = vpack.c.bf16 %v2754_v10, %v2599_v42  ;;  %v9401_v20 = vsel %vm15091_vm6, %v8044_v2, %v7705_v18  ;;  %vm15094_vm13 = vmmov %vm15092_vm2  ;;  %v2484_v36 = vrot.slane %v9262_v58, 1  ;;  %v171_v42 = vand.u32 15, %v33_v24 }
 0x11c   :  { %15077 = vst [vmem:[#allocation13_spill] sm:$0xff] %v9365_v49  ;;  %v1496_v15 = vrot.slane %v9401_v20, 7  ;;  %vm15095_vm3 = vmmov %vm15091_vm6  ;;  %vm9421_vm6 = vcmp.ne.s32.totalorder %v220_v30, 0  ;;  %v15102_v8 = vmov 0  ;;  %v48_v49 = vadd.s32 208, %v8564_v11 }
 0x11d   :  { %15078 = vst [vmem:[#allocation4_spill] sm:$0xff] %v9367_v48  ;;  %v9412_v9 = vsel %vm15095_vm3, %v8045_v37, %v7709_v13  ;;  %vm9427_vm3 = vcmp.ne.s32.totalorder %v171_v42, 15 }
 0x11e   :  { %v1497_v18 = vrot.slane %v9412_v9, 7  ;;  %v15103_v8 = vsel %vm9427_vm3, 4294967295, %v15102_v8 }
 0x11f   :  { %15104 = vst [vmem:[#allocation64_spill] sm:$0xff] %v15103_v8 }
 0x123   :  { %v9390_v26 = vpop.f32.mrf.mxu1  ;;  %v9392_v48 = vpop.f32.mrf.mxu2 }
 0x124   :  { %15089 = vst [vmem:[#allocation59_spill] sm:$0xff] %v9390_v26 }
 0x125   :  { %15090 = vst [vmem:[#allocation60_spill] sm:$0xff] %v9392_v48  ;;  %v7713_v48 = vpop.permute.xlu0 %7712 }
 0x126   :  { %6939 = vmatmul.msk.bf16.gmra.mxu1 %vm15092_vm2, %v1446_v22  ;;  %v2483_v22 = vrot.slane %v9232_v25, 1  ;;  %vm15101_vm2 = vcmp.lt.s32.totalorder %v8564_v11, 1  ;;  %v7714_v26 = vunpack.i.l.bf16 %v7713_v48 }
 0x127   :  { %6895 = vmatmul.msk.bf16.gmra.mxu0 %vm15093_vm7, %v1835_v23  ;;  %v1596_v13 = vsel %vm15101_vm2, %v1495_v35, %v1496_v15  ;;  %vm15105_vm7 = vcmp.lt.s32.totalorder %v8564_v11, 7  ;;  %v7710_v35 = vunpack.i.h.bf16 %v7708_v55  ;;  %v35_v55 = vadd.s32 104, %v8564_v11 }
 0x128   :  { %6999 = vmatmul.msk.bf16.gmra.mxu2 %vm15094_vm13, %v2826_v34  ;;  %v15098_v34 = vmov 0  ;;  %v2596_v2 = vsel %vm15105_vm7, %v2483_v22, %v2484_v36  ;;  %vm15106_vm13 = vmmov %vm15101_vm2  ;;  %v1769_v37 = vsel %vm9421_vm6, %v1596_v13, 0.0  ;;  %v42_v13 = vadd.s32 160, %v8564_v11 }
 0x129   :  { %v15099_v34 = vsel %vm9421_vm6, 4294967295, %v15098_v34  ;;  %v1595_v24 = vsel %vm15106_vm13, %v1496_v15, %v1497_v18  ;;  %vm15107_vm9 = vmmov %vm15105_vm7  ;;  %v2756_v62 = vsel %vm9427_vm3, %v2596_v2, 0.0  ;;  %vm15111_vm2 = vcmask 523264  }
 0x12a   :  { %15100 = vst [vmem:[#allocation63_spill] sm:$0xff] %v15099_v34  ;;  %v2597_v30 = vsel %vm15107_vm9, %v2482_v5, %v2483_v22  ;;  %v8046_v5 = vld [vmem:[%s14456_s0 + $0x90] sm:$0xff]  ;;  %vm15110_vm9 = vcmask 261120   ;;  %vm15112_vm7 = vmmov %vm15111_vm2  ;;  %v2486_v2 = vrot.slane %v9302_v45, 1 }
 0x12b   :  { %v9416_v10 = vpop.f32.mrf.mxu1  ;;  %v9418_v23 = vpop.f32.mrf.mxu2  ;;  %v2827_v15 = vpack.c.bf16 %v2756_v62, %v2597_v30  ;;  %v9452_v22 = vsel %vm15110_vm9, %v8046_v5, %v7710_v35  ;;  %vm15113_vm13 = vmmov %vm15111_vm2  ;;  %v234_v62 = vand.u32 15, %v42_v13  ;;  %v15117_v35 = vmov 0 }
 0x12c   :  { %15096 = vst [vmem:[#allocation61_spill] sm:$0xff] %v9416_v10  ;;  %v1447_v10 = vpack.c.bf16 %v9027_v14, %v8995_v39  ;;  %vm15114_vm6 = vmmov %vm15110_vm9  ;;  %v1498_v14 = vrot.slane %v9452_v22, 7 }
 0x12d   :  { %15097 = vst [vmem:[#allocation62_spill] sm:$0xff] %v9418_v23  ;;  %v1836_v23 = vpack.c.bf16 %v1595_v24, %v1769_v37  ;;  %v9460_v39 = vsel %vm15114_vm6, %v8883_v12, %v7714_v26  ;;  %v2485_v24 = vrot.slane %v9272_v50, 1  ;;  %v185_v37 = vand.u32 15, %v35_v55 }
 0x12e   :  { %vm9470_vm9 = vcmp.ne.s32.totalorder %v234_v62, 0  ;;  %vm15120_vm6 = vcmp.lt.s32.totalorder %v8564_v11, 1  ;;  %v15121_v26 = vmov 0 }
 0x12f   :  { %v15118_v35 = vsel %vm9470_vm9, 4294967295, %v15117_v35  ;;  %v1594_v12 = vsel %vm15120_vm6, %v1497_v18, %v1498_v14  ;;  %v7715_v18 = vunpack.i.h.bf16 %v7713_v48  ;;  %v37_v48 = vadd.s32 120, %v8564_v11 }
 0x130   :  { %15119 = vst [vmem:[#allocation69_spill] sm:$0xff] %v15118_v35  ;;  %v1771_v5 = vsel %vm9470_vm9, %v1594_v12, 0.0 }
 0x133   :  { %v9441_v42 = vpop.f32.mrf.mxu1  ;;  %v9443_v40 = vpop.f32.mrf.mxu2 }
 0x134   :  { %15108 = vst [vmem:[#allocation65_spill] sm:$0xff] %v9441_v42  ;;  %v7728_v42 = vpop.permute.xlu0 %7727 }
 0x135   :  { %15109 = vst [vmem:[#allocation66_spill] sm:$0xff] %v9443_v40  ;;  %v9494_v40 = vpop.f32.mrf.mxu0 }
 0x136   :  { %6940 = vmatmul.msk.bf16.gmra.mxu1 %vm15111_vm2, %v1447_v10  ;;  %vm9476_vm2 = vcmp.ne.s32.totalorder %v185_v37, 15 }
 0x137   :  { %6896 = vmatmul.msk.bf16.gmra.mxu0 %vm15112_vm7, %v1836_v23  ;;  %v1499_v23 = vrot.slane %v9460_v39, 7  ;;  %v15122_v26 = vsel %vm9476_vm2, 4294967295, %v15121_v26  ;;  %vm15124_vm7 = vcmp.lt.s32.totalorder %v8564_v11, 7 }
 0x138   :  { %7000 = vmatmul.msk.bf16.gmra.mxu2 %vm15113_vm13, %v2827_v15  ;;  %15123 = vst [vmem:[#allocation70_spill] sm:$0xff] %v15122_v26  ;;  %v2594_v15 = vsel %vm15124_vm7, %v2485_v24, %v2486_v2  ;;  %vm15125_vm13 = vmmov %vm15120_vm6  ;;  %vm15130_vm6 = vcmask 523264  }
 0x139   :  { %v1593_v13 = vsel %vm15125_vm13, %v1498_v14, %v1499_v23  ;;  %vm15126_vm3 = vmmov %vm15124_vm7  ;;  %v2758_v62 = vsel %vm9476_vm2, %v2594_v15, 0.0  ;;  %v1448_v14 = vpack.c.bf16 %v9160_v29, %v9131_v6  ;;  %v8047_v6 = vld [vmem:[%s14456_s0 + $0xa8] sm:$0xff] }
 0x13a   :  { %v2595_v55 = vsel %vm15126_vm3, %v2484_v36, %v2485_v24  ;;  %v1837_v8 = vpack.c.bf16 %v1593_v13, %v1771_v5  ;;  %vm15129_vm3 = vcmask 261120   ;;  %vm15131_vm7 = vmmov %vm15130_vm6  ;;  %v2487_v13 = vrot.slane %v9313_v54, 1 }
 0x13b   :  { %v9465_v30 = vpop.f32.mrf.mxu1  ;;  %v9467_v10 = vpop.f32.mrf.mxu2  ;;  %v2828_v35 = vpack.c.bf16 %v2758_v62, %v2595_v55  ;;  %v9501_v36 = vsel %vm15129_vm3, %v8888_v17, %v7715_v18  ;;  %vm15132_vm13 = vmmov %vm15130_vm6  ;;  %v2488_v17 = vrot.slane %v9352_v53, 1  ;;  %v199_v5 = vand.u32 15, %v37_v48  ;;  %v7566_v62 = vld [vmem:[%s14459_s3 + $0x18] sm:$0xff] }
 0x13c   :  { %15115 = vst [vmem:[#allocation67_spill] sm:$0xff] %v9465_v30  ;;  %v44_v30 = vadd.s32 176, %v8564_v11  ;;  %v1500_v24 = vrot.slane %v9501_v36, 7  ;;  %vm15133_vm9 = vmmov %vm15129_vm3  ;;  %v15136_v18 = vmov 0  ;;  %7595 = vmatpush.bf16.msra.mxu3 %v7566_v62  ;;  %4295 = vmatpush.bf16.msrb.mxu0 %v7566_v62 }
 0x13d   :  { %15116 = vst [vmem:[#allocation68_spill] sm:$0xff] %v9467_v10  ;;  %v7718_v10 = vpop.permute.xlu1 %7717 }
 0x13e   :  { %v7719_v12 = vunpack.i.l.bf16 %v7718_v10  ;;  %v248_v15 = vand.u32 15, %v44_v30 }
 0x140   :  { %v9512_v29 = vsel %vm15133_vm9, %v8047_v6, %v7719_v12  ;;  %vm9524_vm3 = vcmp.ne.s32.totalorder %v248_v15, 0  ;;  %vm15139_vm9 = vcmp.lt.s32.totalorder %v8564_v11, 1  ;;  %v15140_v12 = vmov 0  ;;  %v7565_v6 = vld [vmem:[%s14459_s3 + $0x10] sm:$0xff] }
 0x141   :  { %v15137_v18 = vsel %vm9524_vm3, 4294967295, %v15136_v18  ;;  %v1592_v30 = vsel %vm15139_vm9, %v1499_v23, %v1500_v24  ;;  %7596 = vmatpush.bf16.msra.mxu3 %v7565_v6  ;;  %4296 = vmatpush.bf16.msrb.mxu0 %v7565_v6 }
 0x142   :  { %15138 = vst [vmem:[#allocation75_spill] sm:$0xff] %v15137_v18  ;;  %v1773_v23 = vsel %vm9524_vm3, %v1592_v30, 0.0  ;;  %v8048_v30 = vld [vmem:[%s14456_s0 + $0x160] sm:$0xff]  ;;  %v15155_v18 = vmov 0 }
 0x143   :  { %v9490_v37 = vpop.f32.mrf.mxu1  ;;  %v9492_v34 = vpop.f32.mrf.mxu2 }
 0x144   :  { %15127 = vst [vmem:[#allocation71_spill] sm:$0xff] %v9490_v37 }
 0x145   :  { %15128 = vst [vmem:[#allocation72_spill] sm:$0xff] %v9492_v34  ;;  %v1449_v34 = vpack.c.bf16 %v9232_v25, %v9222_v46  ;;  %v46_v46 = vadd.s32 192, %v8564_v11  ;;  %v8050_v25 = vld [vmem:[%s14456_s0 + $0xb0] sm:$0xff]  ;;  %v7733_v52 = vpop.permute.xlu1 %7732 }
 0x146   :  { %6941 = vmatmul.msk.bf16.gmra.mxu1 %vm15130_vm6, %v1448_v14  ;;  %v9530_v14 = vpop.f32.mrf.mxu0  ;;  %vm9532_vm6 = vcmp.ne.s32.totalorder %v199_v5, 15  ;;  %v7734_v32 = vunpack.i.l.bf16 %v7733_v52  ;;  %v7735_v59 = vunpack.i.h.bf16 %v7733_v52  ;;  %v45_v52 = vadd.s32 184, %v8564_v11 }
 0x147   :  { %6897 = vmatmul.msk.bf16.gmra.mxu0 %vm15131_vm7, %v1837_v8  ;;  %v15141_v12 = vsel %vm9532_vm6, 4294967295, %v15140_v12  ;;  %vm15143_vm7 = vcmp.lt.s32.totalorder %v8564_v11, 7 }
 0x148   :  { %7001 = vmatmul.msk.bf16.gmra.mxu2 %vm15132_vm13, %v2828_v35  ;;  %v1501_v35 = vrot.slane %v9512_v29, 7  ;;  %15142 = vst [vmem:[#allocation76_spill] sm:$0xff] %v15141_v12  ;;  %v2592_v48 = vsel %vm15143_vm7, %v2487_v13, %v2488_v17  ;;  %vm15144_vm13 = vmmov %vm15139_vm9 }
 0x149   :  { %vm15145_vm9 = vmmov %vm15143_vm7  ;;  %v2760_v26 = vsel %vm9532_vm6, %v2592_v48, 0.0  ;;  %vm15148_vm7 = vcmask 261120  }
 0x14a   :  { %v1591_v15 = vsel %vm15144_vm13, %v1500_v24, %v1501_v35  ;;  %v2593_v5 = vsel %vm15145_vm9, %v2486_v2, %v2487_v13  ;;  %v8049_v2 = vld [vmem:[%s14456_s0 + $0x168] sm:$0xff]  ;;  %vm15149_vm13 = vmmov %vm15148_vm7  ;;  %vm15150_vm9 = vcmask 523264  }
 0x14b   :  { %v9516_v55 = vpop.f32.mrf.mxu1  ;;  %v9518_v8 = vpop.f32.mrf.mxu2  ;;  %v1838_v24 = vpack.c.bf16 %v1591_v15, %v1773_v23  ;;  %v2829_v13 = vpack.c.bf16 %v2760_v26, %v2593_v5  ;;  %v39_v15 = vadd.s32 136, %v8564_v11  ;;  %vm15151_vm3 = vmmov %vm15150_vm9  ;;  %v8051_v5 = vld [vmem:[%s14456_s0 + $0xb8] sm:$0xff] }
 0x14c   :  { %15134 = vst [vmem:[#allocation73_spill] sm:$0xff] %v9516_v55  ;;  %v7723_v55 = vpop.permute.xlu2 %7722  ;;  %vm15152_vm6 = vmmov %vm15151_vm3 }
 0x14d   :  { %15135 = vst [vmem:[#allocation74_spill] sm:$0xff] %v9518_v8  ;;  %v7720_v8 = vunpack.i.h.bf16 %v7718_v10  ;;  %v4171_v10 = vpack.c.bf16 %v8049_v2, %v8048_v30  ;;  %v7724_v48 = vunpack.i.l.bf16 %v7723_v55  ;;  %v2489_v2 = vrot.slane %v9361_v51, 1 }
 0x14e   :  { %v9572_v23 = vpop.f32.mrf.mxu0 }
 0x14f   :  { %7147 = vmatmul.msk.bf16.vlgmr.msra.gmra.mxu3 %vm15148_vm7, %v4171_v10  ;;  %v9567_v6 = vsel %vm15149_vm13, %v8050_v25, %v7720_v8  ;;  %v9580_v30 = vsel %vm15148_vm7, %v8051_v5, %v7724_v48  ;;  %v262_v8 = vand.u32 15, %v46_v46  ;;  %v213_v10 = vand.u32 15, %v39_v15 }
 0x150   :  { %v1502_v26 = vrot.slane %v9567_v6, 7  ;;  %v15159_v46 = vmov 0 }
 0x151   :  { %vm9595_vm13 = vcmp.ne.s32.totalorder %v213_v10, 15  ;;  %v7725_v10 = vunpack.i.h.bf16 %v7723_v55 }
 0x152   :  { %v15160_v46 = vsel %vm9595_vm13, 4294967295, %v15159_v46 }
 0x153   :  { %v9551_v62 = vpop.f32.mrf.mxu1  ;;  %v9553_v37 = vpop.f32.mrf.mxu2  ;;  %15161 = vst [vmem:[#allocation82_spill] sm:$0xff] %v15160_v46 }
 0x154   :  { %15146 = vst [vmem:[#allocation77_spill] sm:$0xff] %v9551_v62 }
 0x155   :  { %15147 = vst [vmem:[#allocation78_spill] sm:$0xff] %v9553_v37  ;;  %v1450_v37 = vpack.c.bf16 %v9272_v50, %v9262_v58  ;;  %v41_v58 = vadd.s32 152, %v8564_v11 }
 0x156   :  { %6942 = vmatmul.msk.bf16.gmra.mxu1 %vm15150_vm9, %v1449_v34  ;;  %v2490_v34 = vrot.slane %v9401_v20, 1  ;;  %vm15162_vm9 = vcmp.lt.s32.totalorder %v8564_v11, 7 }
 0x157   :  { %6898 = vmatmul.msk.bf16.gmra.mxu0 %vm15151_vm3, %v1838_v24  ;;  %vm9589_vm3 = vcmp.ne.s32.totalorder %v262_v8, 0  ;;  %vm15164_vm2 = vmmov %vm15162_vm9 }
 0x158   :  { %7002 = vmatmul.msk.bf16.gmra.mxu2 %vm15152_vm6, %v2829_v13  ;;  %v1503_v13 = vrot.slane %v9580_v30, 7  ;;  %v15156_v18 = vsel %vm9589_vm3, 4294967295, %v15155_v18  ;;  %vm15158_vm6 = vcmp.lt.s32.totalorder %v8564_v11, 1  ;;  %v2590_v15 = vsel %vm15162_vm9, %v2489_v2, %v2490_v34 }
 0x159   :  { %15157 = vst [vmem:[#allocation81_spill] sm:$0xff] %v15156_v18  ;;  %v1590_v48 = vsel %vm15158_vm6, %v1501_v35, %v1502_v26  ;;  %vm15163_vm7 = vmmov %vm15158_vm6  ;;  %v2591_v8 = vsel %vm15164_vm2, %v2488_v17, %v2489_v2  ;;  %v9609_v35 = vpop.f32.mrf.mxu0  ;;  %v8052_v17 = vld [vmem:[%s14456_s0 + $0xc0] sm:$0xff]  ;;  %vm15167_vm2 = vcmask 261120   ;;  %vm15168_vm6 = vcmask 523264  }
 0x15a   :  { %v1589_v5 = vsel %vm15163_vm7, %v1502_v26, %v1503_v13  ;;  %v1775_v12 = vsel %vm9589_vm3, %v1590_v48, 0.0  ;;  %v7729_v48 = vunpack.i.l.bf16 %v7728_v42  ;;  %v9622_v2 = vsel %vm15167_vm2, %v8052_v17, %v7725_v10  ;;  %vm15169_vm9 = vmmov %vm15168_vm6 }
 0x15b   :  { %v9584_v24 = vpop.f32.mrf.mxu1  ;;  %v9586_v25 = vpop.f32.mrf.mxu2  ;;  %v1839_v26 = vpack.c.bf16 %v1589_v5, %v1775_v12  ;;  %vm15170_vm7 = vmmov %vm15168_vm6  ;;  %v1504_v55 = vrot.slane %v9622_v2, 7  ;;  %v276_v12 = vand.u32 15, %v48_v49  ;;  %v227_v5 = vand.u32 15, %v41_v58 }
 0x15c   :  { %15153 = vst [vmem:[#allocation79_spill] sm:$0xff] %v9584_v24  ;;  %vm15171_vm3 = vmmov %vm15167_vm2  ;;  %v15177_v49 = vmov 0 }
 0x15d   :  { %15154 = vst [vmem:[#allocation80_spill] sm:$0xff] %v9586_v25  ;;  %v2762_v25 = vsel %vm9595_vm13, %v2590_v15, 0.0  ;;  %v9630_v50 = vsel %vm15171_vm3, %v9199_v61, %v7729_v48  ;;  %v2491_v15 = vrot.slane %v9412_v9, 1  ;;  %vm9640_vm2 = vcmp.ne.s32.totalorder %v276_v12, 0 }
 0x15e   :  { %v2830_v18 = vpack.c.bf16 %v2762_v25, %v2591_v8  ;;  %v2492_v25 = vrot.slane %v9452_v22, 1  ;;  %v1505_v10 = vrot.slane %v9630_v50, 7  ;;  %vm15176_vm3 = vcmp.lt.s32.totalorder %v8564_v11, 1 }
 0x15f   :  { %v1588_v61 = vsel %vm15176_vm3, %v1503_v13, %v1504_v55  ;;  %v7730_v13 = vunpack.i.h.bf16 %v7728_v42 }
 0x160   :  { %v1777_v58 = vsel %vm9640_vm2, %v1588_v61, 0.0 }
 0x163   :  { %v9613_v24 = vpop.f32.mrf.mxu1  ;;  %v9615_v62 = vpop.f32.mrf.mxu2 }
 0x164   :  { %15165 = vst [vmem:[#allocation83_spill] sm:$0xff] %v9613_v24 }
 0x165   :  { %15166 = vst [vmem:[#allocation84_spill] sm:$0xff] %v9615_v62 }
 0x166   :  { %6943 = vmatmul.msk.bf16.gmra.mxu1 %vm15168_vm6, %v1450_v37  ;;  %vm9646_vm6 = vcmp.ne.s32.totalorder %v227_v5, 15  ;;  %v1451_v5 = vpack.c.bf16 %v9313_v54, %v9302_v45  ;;  %v8053_v45 = vld [vmem:[%s14456_s0 + $0x170] sm:$0xff]  ;;  %v8054_v54 = vld [vmem:[%s14456_s0 + $0x178] sm:$0xff] }
 0x167   :  { %6899 = vmatmul.msk.bf16.gmra.mxu0 %vm15169_vm9, %v1839_v26  ;;  %v9638_v26 = vpop.f32.mrf.mxu0  ;;  %v15178_v49 = vsel %vm9646_vm6, 4294967295, %v15177_v49  ;;  %vm15180_vm9 = vcmp.lt.s32.totalorder %v8564_v11, 7  ;;  %v4172_v42 = vpack.c.bf16 %v8054_v54, %v8053_v45  ;;  %v15190_v54 = vmov 0 }
 0x168   :  { %7003 = vmatmul.msk.bf16.gmra.mxu2 %vm15170_vm7, %v2830_v18  ;;  %v15173_v18 = vmov 0  ;;  %15179 = vst [vmem:[#allocation87_spill] sm:$0xff] %v15178_v49  ;;  %v2588_v48 = vsel %vm15180_vm9, %v2491_v15, %v2492_v25  ;;  %vm15181_vm7 = vmmov %vm15176_vm3  ;;  %vm15184_vm3 = vcmask 261120  }
 0x169   :  { %v15174_v18 = vsel %vm9640_vm2, 4294967295, %v15173_v18  ;;  %v1587_v17 = vsel %vm15181_vm7, %v1504_v55, %v1505_v10  ;;  %vm15182_vm13 = vmmov %vm15180_vm9  ;;  %v2764_v46 = vsel %vm9646_vm6, %v2588_v48, 0.0  ;;  %v9668_v61 = vsel %vm15184_vm3, %v9204_v38, %v7730_v13 }
 0x16a   :  { %15175 = vst [vmem:[#allocation86_spill] sm:$0xff] %v15174_v18  ;;  %v2589_v12 = vsel %vm15182_vm13, %v2490_v34, %v2491_v15  ;;  %v1840_v24 = vpack.c.bf16 %v1587_v17, %v1777_v58  ;;  %vm15185_vm13 = vcmask 523264   ;;  %v50_v38 = vadd.s32 224, %v8564_v11  ;;  %v8055_v15 = vld [vmem:[%s14456_s0 + $0xd8] sm:$0xff] }
 0x16b   :  { %v9635_v8 = vpop.f32.mrf.mxu1  ;;  %v2991_v37 = vpop.f32.mrf.mxu2  ;;  %v2831_v55 = vpack.c.bf16 %v2764_v46, %v2589_v12  ;;  %vm15186_vm9 = vmmov %vm15185_vm13  ;;  %v1506_v46 = vrot.slane %v9668_v61, 7  ;;  %v43_v48 = vadd.s32 168, %v8564_v11  ;;  %v2494_v17 = vrot.slane %v9501_v36, 1 }
 0x16c   :  { %15172 = vst [vmem:[#allocation85_spill] sm:$0xff] %v9635_v8  ;;  %vm15187_vm7 = vmmov %vm15186_vm9  ;;  %v2493_v58 = vrot.slane %v9460_v39, 1  ;;  %v290_v12 = vand.u32 15, %v50_v38 }
 0x16f   :  { %v9670_v34 = vpop.f32.mrf.mxu0 }
 0x173   :  { %v9662_v62 = vpop.f32.mrf.mxu1  ;;  %v9664_v8 = vpop.f32.mrf.mxu2 }
 0x174   :  { %15183 = vst [vmem:[#allocation88_spill] sm:$0xff] %v9662_v62 }
 0x176   :  { %6944 = vmatmul.msk.bf16.gmra.mxu1 %vm15185_vm13, %v1451_v5  ;;  %vm15188_vm13 = vmmov %vm15184_vm3 }
 0x177   :  { %6900 = vmatmul.msk.bf16.gmra.mxu0 %vm15186_vm9, %v1840_v24  ;;  %v9687_v24 = vsel %vm15184_vm3, %v8055_v15, %v7734_v32  ;;  %7148 = vmatmul.msk.bf16.gmra.mxu3 %vm15188_vm13, %v4172_v42  ;;  %vm9696_vm9 = vcmp.ne.s32.totalorder %v290_v12, 0  ;;  %v15194_v15 = vmov 0  ;;  %vm15197_vm13 = vcmp.lt.s32.totalorder %v8564_v11, 7  ;;  %v9708_v38 = vpop.f32.mrf.mxu0 }
 0x178   :  { %7004 = vmatmul.msk.bf16.gmra.mxu2 %vm15187_vm7, %v2831_v55  ;;  %v241_v55 = vand.u32 15, %v43_v48  ;;  %v1507_v45 = vrot.slane %v9687_v24, 7  ;;  %v15191_v54 = vsel %vm9696_vm9, 4294967295, %v15190_v54  ;;  %vm15193_vm7 = vcmp.lt.s32.totalorder %v8564_v11, 1  ;;  %vm15199_vm6 = vmmov %vm15197_vm13 }
 0x179   :  { %15192 = vst [vmem:[#allocation90_spill] sm:$0xff] %v15191_v54  ;;  %v1586_v32 = vsel %vm15193_vm7, %v1505_v10, %v1506_v46  ;;  %v2586_v42 = vsel %vm15197_vm13, %v2493_v58, %v2494_v17  ;;  %vm15198_vm2 = vmmov %vm15193_vm7  ;;  %v2587_v18 = vsel %vm15199_vm6, %v2492_v25, %v2493_v58  ;;  %v52_v54 = vadd.s32 240, %v8564_v11  ;;  %v8056_v25 = vld [vmem:[%s14456_s0 + $0x180] sm:$0xff] }
 0x17a   :  { %vm9702_vm3 = vcmp.ne.s32.totalorder %v241_v55, 15  ;;  %v1585_v48 = vsel %vm15198_vm2, %v1506_v46, %v1507_v45  ;;  %v1779_v12 = vsel %vm9696_vm9, %v1586_v32, 0.0  ;;  %v1452_v55 = vpack.c.bf16 %v9361_v51, %v9352_v53  ;;  %v8057_v53 = vld [vmem:[%s14456_s0 + $0x188] sm:$0xff] }
 0x17b   :  { %v9693_v13 = vpop.f32.mrf.mxu1  ;;  %v2996_v5 = vpop.f32.mrf.mxu2  ;;  %v15195_v15 = vsel %vm9702_vm3, 4294967295, %v15194_v15  ;;  %v2766_v10 = vsel %vm9702_vm3, %v2586_v42, 0.0  ;;  %v1841_v62 = vpack.c.bf16 %v1585_v48, %v1779_v12  ;;  %vm15200_vm2 = vcmask 523264   ;;  %v8059_v12 = vld [vmem:[%s14456_s0 + $0xe8] sm:$0xff] }
 0x17c   :  { %15189 = vst [vmem:[#allocation89_spill] sm:$0xff] %v9693_v13  ;;  %v2832_v46 = vpack.c.bf16 %v2766_v10, %v2587_v18  ;;  %v4173_v51 = vpack.c.bf16 %v8057_v53, %v8056_v25  ;;  %vm15201_vm6 = vmmov %vm15200_vm2  ;;  %vm15202_vm7 = vcmask 261120   ;;  %v2496_v58 = vrot.slane %v9567_v6, 1 }
 0x17d   :  { %15196 = vst [vmem:[#allocation91_spill] sm:$0xff] %v15195_v15  ;;  %vm15203_vm13 = vmmov %vm15200_vm2  ;;  %v2495_v42 = vrot.slane %v9512_v29, 1 }
 0x17f   :  { %v9745_v48 = vpop.f32.mrf.mxu0 }
 0x183   :  { %v2302_v49 = vpop.f32.mrf.mxu1  ;;  %v9720_v13 = vpop.f32.mrf.mxu2 }
 0x184   :  { %v2303_v1 = vadd.f32 %v2302_v49, %v9494_v40  ;;  %v1202_v40 = vpop.permute.xlu0 %1201  ;;  %v304_v49 = vand.u32 15, %v52_v54 }
 0x186   :  { %v9724_v32 = vadd.f32 %v2991_v37, %v2303_v1  ;;  %6945 = vmatmul.msk.bf16.gmra.mxu1 %vm15200_vm2, %v1452_v55  ;;  %v8058_v1 = vld [vmem:[%s14456_s0 + $0xe0] sm:$0xff]  ;;  %vm15204_vm2 = vmmov %vm15202_vm7 }
 0x187   :  { %6901 = vmatmul.msk.bf16.gmra.mxu0 %vm15201_vm6, %v1841_v62  ;;  %v9739_v37 = vsel %vm15202_vm7, %v8058_v1, %v7735_v59  ;;  %7149 = vmatmul.msk.bf16.gmra.mxu3 %vm15204_vm2, %v4173_v51  ;;  %v255_v62 = vand.u32 15, %v45_v52  ;;  %vm15205_vm6 = vmmov %vm15204_vm2  ;;  %vm9757_vm7 = vcmp.ne.s32.totalorder %v304_v49, 0  ;;  %v15210_v52 = vmov 0 }
 0x188   :  { %7005 = vmatmul.msk.bf16.gmra.mxu2 %vm15203_vm13, %v2832_v46  ;;  %v1508_v18 = vrot.slane %v9739_v37, 7  ;;  %v9752_v59 = vsel %vm15205_vm6, %v8059_v12, %v1202_v40  ;;  %v15206_v46 = vmov 0  ;;  %vm15209_vm13 = vcmp.lt.s32.totalorder %v8564_v11, 1 }
 0x189   :  { %v15207_v46 = vsel %vm9757_vm7, 4294967295, %v15206_v46  ;;  %v1509_v53 = vrot.slane %v9752_v59, 7  ;;  %vm9767_vm2 = vcmp.ne.s32.totalorder %v255_v62, 15  ;;  %vm15213_vm6 = vcmp.lt.s32.totalorder %v8564_v11, 7  ;;  %vm15214_vm9 = vmmov %vm15209_vm13 }
 0x18a   :  { %15208 = vst [vmem:[#allocation92_spill] sm:$0xff] %v15207_v46  ;;  %v1584_v25 = vsel %vm15209_vm13, %v1507_v45, %v1508_v18  ;;  %v15211_v52 = vsel %vm9767_vm2, 4294967295, %v15210_v52  ;;  %v2584_v40 = vsel %vm15213_vm6, %v2495_v42, %v2496_v58  ;;  %vm15215_vm13 = vmmov %vm15213_vm6  ;;  %v1453_v49 = vpack.c.bf16 %v9412_v9, %v9401_v20  ;;  %v8060_v20 = vld [vmem:[%s14456_s0 + $0x190] sm:$0xff]  ;;  %v8061_v9 = vld [vmem:[%s14456_s0 + $0x198] sm:$0xff] }
 0x18b   :  { %v2304_v10 = vpop.f32.mrf.mxu1  ;;  %v9754_v55 = vpop.f32.mrf.mxu2  ;;  %15212 = vst [vmem:[#allocation93_spill] sm:$0xff] %v15211_v52  ;;  %v1781_v1 = vsel %vm9757_vm7, %v1584_v25, 0.0  ;;  %v2585_v45 = vsel %vm15215_vm13, %v2494_v17, %v2495_v42  ;;  %v9791_v25 = vld [vmem:[%s14458_s4] ss:$0 sm:$0xff]  ;;  %v4174_v42 = vpack.c.bf16 %v8061_v9, %v8060_v20  ;;  %vm15218_vm13 = vcmask 261120  }
 0x18c   :  { %v2305_v54 = vadd.f32 %v2304_v10, %v9530_v14  ;;  %v1583_v14 = vsel %vm15214_vm9, %v1508_v18, %v1509_v53  ;;  %vm15216_vm9 = vcmask 523264   ;;  %v15222_v46 = vmov 0 }
 0x18d   :  { %v1842_v10 = vpack.c.bf16 %v1583_v14, %v1781_v1  ;;  %vm15217_vm6 = vmmov %vm15216_vm9 }
 0x18e   :  { %v9765_v51 = vadd.f32 %v9664_v8, %v2305_v54  ;;  %v2768_v8 = vsel %vm9767_vm2, %v2584_v40, 0.0  ;;  %v9785_v54 = vpop.f32.mrf.mxu0  ;;  %v54_v40 = vadd.s32 256, %v8564_v11 }
 0x18f   :  { %v2833_v15 = vpack.c.bf16 %v2768_v8, %v2585_v45  ;;  %v2497_v8 = vrot.slane %v9580_v30, 1 }
 0x190   :  { %v318_v9 = vand.u32 15, %v54_v40 }
 0x193   :  { %v2307_v62 = vpop.f32.mrf.mxu1  ;;  %v9783_v12 = vpop.f32.mrf.mxu2 }
 0x194   :  { %v2308_v18 = vadd.f32 %v2307_v62, %v9572_v23  ;;  %v47_v23 = vadd.s32 200, %v8564_v11 }
 0x196   :  { %v3163_v17 = vadd.f32 %v2996_v5, %v2308_v18  ;;  %6946 = vmatmul.msk.bf16.gmra.mxu1 %vm15216_vm9, %v1453_v49  ;;  %v8062_v5 = vld [vmem:[%s14456_s0 + $0xf0] sm:$0xff]  ;;  %vm15219_vm9 = vmmov %vm15217_vm6  ;;  %v269_v62 = vand.u32 15, %v47_v23  ;;  %v9827_v23 = vpop.f32.mrf.mxu0 }
 0x197   :  { %6902 = vmatmul.msk.bf16.gmra.mxu0 %vm15217_vm6, %v1842_v10  ;;  %v9808_v14 = vsel %vm15218_vm13, %v8062_v5, %v8649_v60  ;;  %vm15220_vm6 = vmmov %vm15218_vm13  ;;  %v8063_v10 = vld [vmem:[%s14456_s0 + $0xf8] sm:$0xff] }
 0x198   :  { %v3233_v1 = vadd.f32 %v9791_v25, %v3163_v17  ;;  %7006 = vmatmul.msk.bf16.gmra.mxu2 %vm15219_vm9, %v2833_v15  ;;  %7150 = vmatmul.msk.bf16.gmra.mxu3 %vm15220_vm6, %v4174_v42  ;;  %vm15221_vm7 = vmmov %vm15220_vm6  ;;  %v1510_v17 = vrot.slane %v9808_v14, 7  ;;  %vm9830_vm13 = vcmp.ne.s32.totalorder %v269_v62, 15  ;;  %vm15227_vm9 = vcmp.lt.s32.totalorder %v8564_v11, 1 }
 0x199   :  { %v9820_v18 = vsel %vm15221_vm7, %v8063_v10, %v8649_v60  ;;  %v15223_v46 = vsel %vm9830_vm13, 4294967295, %v15222_v46  ;;  %v15225_v60 = vrot.slane %v9622_v2, 1  ;;  %vm15226_vm7 = vcmp.lt.s32.totalorder %v8564_v11, 7 }
 0x19a   :  { %v3371_v49 = vmul.f32 1.442695, %v3233_v1  ;;  %v14666_v42 = vrot.slane %v9820_v18, 7  ;;  %15224 = vst [vmem:[#allocation94_spill] sm:$0xff] %v15223_v46  ;;  %v1582_v40 = vsel %vm15227_vm9, %v1509_v53, %v1510_v17  ;;  %vm9840_vm6 = vcmp.ne.s32.totalorder %v318_v9, 0  ;;  %vm15231_vm2 = vmmov %vm15226_vm7 }
 0x19b   :  { %v2309_v20 = vpop.f32.mrf.mxu1  ;;  %v9823_v15 = vpop.f32.mrf.mxu2  ;;  %v2582_v10 = vsel %vm15226_vm7, %v2497_v8, %v15225_v60  ;;  %v1454_v60 = vpack.c.bf16 %v9460_v39, %v9452_v22  ;;  %vm15232_vm7 = vmmov %vm15227_vm9  ;;  %v1783_v9 = vsel %vm9840_vm6, %v1582_v40, 0.0  ;;  %v8064_v22 = vld [vmem:[%s14456_s0 + $0x1a8] sm:$0xff]  ;;  %v8065_v39 = vld [vmem:[%s14456_s0 + $0x1a0] sm:$0xff]  ;;  %v49_v40 = vadd.s32 216, %v8564_v11 }
 0x19c   :  { %7908 = vpow2.f32 %v3371_v49  ;;  %v2310_v5 = vadd.f32 %v2309_v20, %v9609_v35  ;;  %v15228_v35 = vmov 0  ;;  %v2770_v62 = vsel %vm9830_vm13, %v2582_v10, 0.0 }
 0x19d   :  { %v15229_v35 = vsel %vm9840_vm6, 4294967295, %v15228_v35  ;;  %v1581_v53 = vsel %vm15232_vm7, %v1510_v17, %v14666_v42  ;;  %v4175_v17 = vpack.c.bf16 %v8064_v22, %v8065_v39  ;;  %v15237_v22 = vmov 0 }
 0x19e   :  { %v3164_v45 = vadd.f32 %v9720_v13, %v2310_v5  ;;  %15230 = vst [vmem:[#allocation95_spill] sm:$0xff] %v15229_v35  ;;  %v2583_v13 = vsel %vm15231_vm2, %v2496_v58, %v2497_v8  ;;  %v1843_v10 = vpack.c.bf16 %v1581_v53, %v1783_v9  ;;  %vm15233_vm2 = vcmask 523264  }
 0x19f   :  { %v2834_v8 = vpack.c.bf16 %v2770_v62, %v2583_v13  ;;  %vm15234_vm9 = vmmov %vm15233_vm2  ;;  %v283_v53 = vand.u32 15, %v49_v40 }
 0x1a0   :  { %v3234_v49 = vadd.f32 %v9791_v25, %v3164_v45  ;;  %vm15235_vm7 = vmmov %vm15233_vm2 }
 0x1a1   :  { %vm9884_vm6 = vcmp.ne.s32.totalorder %v283_v53, 15 }
 0x1a2   :  { %v7909_v20 = vpop.eup %7908  ;;  %v3373_v5 = vmul.f32 1.442695, %v3234_v49  ;;  %v15238_v22 = vsel %vm9884_vm6, 4294967295, %v15237_v22 }
 0x1a3   :  { %v2312_v45 = vpop.f32.mrf.mxu1  ;;  %v9857_v52 = vpop.f32.mrf.mxu2  ;;  %v7031_v46 = vadd.f32 -1.0, %v7909_v20  ;;  %v2500_v20 = vrot.slane %v9668_v61, 1  ;;  %15239 = vst [vmem:[#allocation96_spill] sm:$0xff] %v15238_v22 }
 0x1a4   :  { %7910 = vpow2.f32 %v3373_v5  ;;  %v2313_v58 = vadd.f32 %v2312_v45, %v9638_v26  ;;  %v9870_v26 = vpop.f32.mrf.mxu0  ;;  %v2499_v5 = vrot.slane %v9630_v50, 1 }
 0x1a6   :  { %v3165_v31 = vadd.f32 %v9754_v55, %v2313_v58  ;;  %6947 = vmatmul.msk.bf16.gmra.mxu1 %vm15233_vm2, %v1454_v60  ;;  %v3573_v55 = vmul.f32 1.6732632, %v7031_v46  ;;  %vm15236_vm2 = vcmask 261120  }
 0x1a7   :  { %6903 = vmatmul.msk.bf16.gmra.mxu0 %vm15234_vm9, %v1843_v10  ;;  %vm3301_vm9 = vcmp.gt.f32.partialorder %v3233_v1, 0.0 }
 0x1a8   :  { %v9873_v13 = vadd.f32 %v9791_v25, %v3165_v31  ;;  %7007 = vmatmul.msk.bf16.gmra.mxu2 %vm15235_vm7, %v2834_v8  ;;  %7151 = vmatmul.msk.bf16.gmra.mxu3 %vm15236_vm2, %v4175_v17  ;;  %v3641_v46 = vsel %vm3301_vm9, %v3233_v1, %v3573_v55  ;;  %vm3302_vm7 = vcmp.gt.f32.partialorder %v3234_v49, 0.0  ;;  %vm15240_vm2 = vcmp.lt.s32.totalorder %v8564_v11, 7 }
 0x1a9   :  { %v2580_v39 = vsel %vm15240_vm2, %v2499_v5, %v2500_v20  ;;  %v15241_v1 = vrot.slane %v9622_v2, 1  ;;  %vm15242_vm9 = vmmov %vm15240_vm2 }
 0x1aa   :  { %v7911_v62 = vpop.eup %7910  ;;  %v3375_v60 = vmul.f32 1.442695, %v9873_v13  ;;  %v2772_v55 = vsel %vm9884_vm6, %v2580_v39, 0.0  ;;  %vm15249_vm6 = vcmp.lt.s32.totalorder %v8564_v11, 7 }
 0x1ab   :  { %v2314_v9 = vpop.f32.mrf.mxu1  ;;  %v9880_v45 = vpop.f32.mrf.mxu2  ;;  %v7032_v58 = vadd.f32 -1.0, %v7911_v62  ;;  %v9893_v62 = vmul.f32 1.050701, %v3641_v46 }
 0x1ac   :  { %7912 = vpow2.f32 %v3375_v60  ;;  %v2315_v31 = vadd.f32 %v2314_v9, %v9670_v34  ;;  %v9903_v53 = vpop.f32.mrf.mxu0 }
 0x1ad   :  { %v3574_v8 = vmul.f32 1.6732632, %v7032_v58  ;;  %v1455_v58 = vpack.c.bf16 %v9512_v29, %v9501_v36  ;;  %v8066_v36 = vld [vmem:[%s14456_s0 + $0x1b0] sm:$0xff]  ;;  %v8067_v29 = vld [vmem:[%s14456_s0 + $0x1b8] sm:$0xff] }
 0x1ae   :  { %v3166_v10 = vadd.f32 %v9783_v12, %v2315_v31  ;;  %v2581_v12 = vsel %vm15242_vm9, %v15241_v1, %v2499_v5  ;;  %v51_v1 = vadd.s32 232, %v8564_v11  ;;  %vm15245_vm9 = vcmask 261120  }
 0x1af   :  { %v3642_v17 = vsel %vm3302_vm7, %v3234_v49, %v3574_v8  ;;  %v2835_v5 = vpack.c.bf16 %v2772_v55, %v2581_v12  ;;  %vm15243_vm7 = vcmask 523264  }
 0x1b0   :  { %v3236_v40 = vadd.f32 %v9791_v25, %v3166_v10  ;;  %v9895_v34 = vmul.f32 1.050701, %v3642_v17  ;;  %v7564_v10 = vld [vmem:[%s14460_s2 + $0x78] sm:$0xff]  ;;  %vm15244_vm2 = vmmov %vm15243_vm7 }
 0x1b1   :  { %4506 = vmatpush.bf16.msrb.mxu3 %v7564_v10 }
 0x1b2   :  { %v7913_v60 = vpop.eup %7912  ;;  %v3377_v9 = vmul.f32 1.442695, %v3236_v40  ;;  %v7736_v49 = vpack.i.bf16 %v9895_v34, %v9893_v62 }
 0x1b3   :  { %v2317_v31 = vpop.f32.mrf.mxu1  ;;  %v9909_v8 = vpop.f32.mrf.mxu2  ;;  %v7033_v39 = vadd.f32 -1.0, %v7913_v60 }
 0x1b4   :  { %7914 = vpow2.f32 %v3377_v9  ;;  %v2318_v46 = vadd.f32 %v2317_v31, %v9708_v38  ;;  %7737 = vrot.lane.b32.xlu2 %v7736_v49, %s8195_s19  ;;  %v4176_v38 = vpack.c.bf16 %v8067_v29, %v8066_v36  ;;  %v2501_v9 = vrot.slane %v9687_v24, 1 }
 0x1b5   :  { %v3575_v55 = vmul.f32 1.6732632, %v7033_v39 }
 0x1b6   :  { %v3167_v17 = vadd.f32 %v9823_v15, %v2318_v46  ;;  %6948 = vmatmul.msk.bf16.gmra.mxu1 %vm15243_vm7, %v1455_v58  ;;  %v9932_v15 = vld [vmem:[%s14456_s0 + $0x100] sm:$0xff]  ;;  %v297_v58 = vand.u32 15, %v51_v1  ;;  %vm3303_vm7 = vcmp.gt.f32.partialorder %v9873_v13, 0.0  ;;  %v15246_v1 = vmov 0 }
 0x1b7   :  { %v3643_v29 = vsel %vm3303_vm7, %v9873_v13, %v3575_v55  ;;  %vm15250_vm7 = vmmov %vm15249_vm6 }
 0x1b8   :  { %v9926_v12 = vadd.f32 %v9791_v25, %v3167_v17  ;;  %7008 = vmatmul.msk.bf16.gmra.mxu2 %vm15244_vm2, %v2835_v5  ;;  %7152 = vmatmul.msk.bf16.gmra.mxu3 %vm15245_vm9, %v4176_v38  ;;  %v14667_v5 = vrot.slane %v9739_v37, 1  ;;  %v9940_v17 = vpop.f32.mrf.mxu0  ;;  %vm3304_vm2 = vcmp.gt.f32.partialorder %v3236_v40, 0.0  ;;  %vm9948_vm9 = vcmp.ne.s32.totalorder %v297_v58, 15 }
 0x1b9   :  { %v15247_v1 = vsel %vm9948_vm9, 4294967295, %v15246_v1 }
 0x1ba   :  { %v7915_v60 = vpop.eup %7914  ;;  %v3379_v49 = vmul.f32 1.442695, %v9926_v12  ;;  %15248 = vst [vmem:[#allocation97_spill] sm:$0xff] %v15247_v1 }
 0x1bb   :  { %v2319_v31 = vpop.f32.mrf.mxu1  ;;  %v9937_v46 = vpop.f32.mrf.mxu2  ;;  %v7034_v10 = vadd.f32 -1.0, %v7915_v60 }
 0x1bc   :  { %7916 = vpow2.f32 %v3379_v49  ;;  %v2320_v36 = vadd.f32 %v2319_v31, %v9745_v48  ;;  %1305 = vrot.lane.b32.xlu2 %v9932_v15, %s8193_s26  ;;  %v2578_v48 = vsel %vm15249_vm6, %v2501_v9, %v14667_v5  ;;  %v9957_v31 = vmul.f32 1.050701, %v3643_v29 }
 0x1bd   :  { %v3576_v39 = vmul.f32 1.6732632, %v7034_v10  ;;  %v2774_v13 = vsel %vm9948_vm9, %v2578_v48, 0.0  ;;  %v9983_v48 = vld [vmem:[%s14456_s0 + $0x110] sm:$0xff]  ;;  %vm15251_vm6 = vcmask 523264  }
 0x1be   :  { %v3168_v38 = vadd.f32 %v9857_v52, %v2320_v36  ;;  %v2579_v52 = vsel %vm15250_vm7, %v2500_v20, %v2501_v9  ;;  %v9978_v9 = vld [vmem:[%s14456_s0 + $0x108] sm:$0xff]  ;;  %vm15253_vm7 = vcmask 261120  }
 0x1bf   :  { %v3644_v60 = vsel %vm3304_vm2, %v3236_v40, %v3576_v39  ;;  %v1456_v40 = vpack.c.bf16 %v9580_v30, %v9567_v6  ;;  %v2836_v20 = vpack.c.bf16 %v2774_v13, %v2579_v52  ;;  %v8069_v52 = vld [vmem:[%s14456_s0 + $0x1c8] sm:$0xff]  ;;  %vm15252_vm2 = vmmov %vm15251_vm6 }
 0x1c0   :  { %v3238_v49 = vadd.f32 %v9791_v25, %v3168_v38  ;;  %v9959_v10 = vmul.f32 1.050701, %v3644_v60  ;;  %v9985_v30 = vpop.f32.mrf.mxu0 }
 0x1c2   :  { %v7917_v55 = vpop.eup %7916  ;;  %v3381_v58 = vmul.f32 1.442695, %v3238_v49  ;;  %v7741_v36 = vpack.i.bf16 %v9959_v10, %v9957_v31 }
 0x1c3   :  { %v2322_v39 = vpop.f32.mrf.mxu1  ;;  %v9971_v29 = vpop.f32.mrf.mxu2  ;;  %v7035_v6 = vadd.f32 -1.0, %v7917_v55  ;;  %v7751_v55 = vpack.i.bf16 %v9983_v48, %v9978_v9 }
 0x1c4   :  { %7918 = vpow2.f32 %v3381_v58  ;;  %v2323_v38 = vadd.f32 %v2322_v39, %v9785_v54  ;;  %7742 = vrot.lane.b32.xlu1 %v7741_v36, %s8195_s19  ;;  %v8068_v54 = vld [vmem:[%s14456_s0 + $0x1c0] sm:$0xff] }
 0x1c5   :  { %v4177_v13 = vpack.c.bf16 %v8069_v52, %v8068_v54  ;;  %v3577_v36 = vmul.f32 1.6732632, %v7035_v6  ;;  %v2503_v54 = vrot.slane %v9752_v59, 1 }
 0x1c6   :  { %v3169_v60 = vadd.f32 %v9880_v45, %v2323_v38  ;;  %6949 = vmatmul.msk.bf16.gmra.mxu1 %vm15251_vm6, %v1456_v40  ;;  %v53_v45 = vadd.s32 248, %v8564_v11  ;;  %vm3305_vm6 = vcmp.gt.f32.partialorder %v9926_v12, 0.0 }
 0x1c7   :  { %v3645_v38 = vsel %vm3305_vm6, %v9926_v12, %v3577_v36 }
 0x1c8   :  { %v9996_v58 = vadd.f32 %v9791_v25, %v3169_v60  ;;  %7009 = vmatmul.msk.bf16.gmra.mxu2 %vm15252_vm2, %v2836_v20  ;;  %7153 = vmatmul.msk.bf16.gmra.mxu3 %vm15253_vm7, %v4177_v13  ;;  %v311_v6 = vand.u32 15, %v53_v45  ;;  %v7563_v13 = vld [vmem:[%s14460_s2 + $0x70] sm:$0xff]  ;;  %vm3306_vm2 = vcmp.gt.f32.partialorder %v3238_v49, 0.0  ;;  %vm15255_vm7 = vcmp.lt.s32.totalorder %v8564_v11, 7 }
 0x1c9   :  { %4507 = vmatpush.bf16.msrb.mxu3 %v7563_v13  ;;  %vm15260_vm6 = vmmov %vm15255_vm7 }
 0x1ca   :  { %v7919_v40 = vpop.eup %7918  ;;  %v3383_v39 = vmul.f32 1.442695, %v9996_v58  ;;  %vm10027_vm9 = vcmp.ne.s32.totalorder %v311_v6, 15 }
 0x1cb   :  { %v2324_v52 = vpop.f32.mrf.mxu1  ;;  %v10006_v60 = vpop.f32.mrf.mxu2  ;;  %v7036_v42 = vadd.f32 -1.0, %v7919_v40  ;;  %v15254_v40 = vrot.slane %v9808_v14, 1 }
 0x1cc   :  { %7920 = vpow2.f32 %v3383_v39  ;;  %v2325_v20 = vadd.f32 %v2324_v52, %v9827_v23  ;;  %7752 = vrot.lane.b32.xlu1 %v7751_v55, %s8193_s26  ;;  %v10020_v39 = vpop.f32.mrf.mxu0  ;;  %v10023_v52 = vmul.f32 1.050701, %v3645_v38 }
 0x1cd   :  { %v3578_v5 = vmul.f32 1.6732632, %v7036_v42  ;;  %v2576_v23 = vsel %vm15255_vm7, %v2503_v54, %v15254_v40  ;;  %v15256_v42 = vmov 0 }
 0x1ce   :  { %v3170_v35 = vadd.f32 %v9909_v8, %v2325_v20  ;;  %v15257_v42 = vsel %vm10027_vm9, 4294967295, %v15256_v42  ;;  %v2776_v6 = vsel %vm10027_vm9, %v2576_v23, 0.0 }
 0x1cf   :  { %v3646_v55 = vsel %vm3306_vm2, %v3238_v49, %v3578_v5  ;;  %15258 = vst [vmem:[#allocation98_spill] sm:$0xff] %v15257_v42  ;;  %v1457_v5 = vpack.c.bf16 %v9630_v50, %v9622_v2  ;;  %vm15261_vm2 = vcmask 523264   ;;  %v8070_v50 = vld [vmem:[%s14456_s0 + $0x1d0] sm:$0xff] }
 0x1d0   :  { %v3240_v45 = vadd.f32 %v9791_v25, %v3170_v35  ;;  %v10025_v1 = vmul.f32 1.050701, %v3646_v55  ;;  %v15259_v35 = vrot.slane %v9739_v37, 1  ;;  %vm15262_vm7 = vmmov %vm15261_vm2 }
 0x1d2   :  { %v7921_v8 = vpop.eup %7920  ;;  %v3385_v12 = vmul.f32 1.442695, %v3240_v45  ;;  %v7746_v36 = vpack.i.bf16 %v10025_v1, %v10023_v52  ;;  %v2577_v38 = vsel %vm15260_vm6, %v15259_v35, %v2503_v54  ;;  %v8071_v54 = vld [vmem:[%s14456_s0 + $0x1d8] sm:$0xff]  ;;  %vm15263_vm6 = vcmask 261120  }
 0x1d3   :  { %v2327_v49 = vpop.f32.mrf.mxu1  ;;  %v10035_v20 = vpop.f32.mrf.mxu2  ;;  %v7037_v40 = vadd.f32 -1.0, %v7921_v8  ;;  %v2837_v2 = vpack.c.bf16 %v2776_v6, %v2577_v38  ;;  %v4178_v23 = vpack.c.bf16 %v8071_v54, %v8070_v50 }
 0x1d4   :  { %7922 = vpow2.f32 %v3385_v12  ;;  %v2328_v13 = vadd.f32 %v2327_v49, %v9870_v26  ;;  %7747 = vrot.lane.b32.xlu0 %v7746_v36, %s8195_s19  ;;  %v8072_v26 = vld [vmem:[%s14456_s0 + $0x118] sm:$0xff]  ;;  %v10061_v49 = vpop.f32.mrf.mxu0 }
 0x1d5   :  { %v3579_v36 = vmul.f32 1.6732632, %v7037_v40  ;;  %v7562_v40 = vld [vmem:[%s14460_s2 + $0x68] sm:$0xff] }
 0x1d6   :  { %v3171_v55 = vadd.f32 %v9937_v46, %v2328_v13  ;;  %6950 = vmatmul.msk.bf16.gmra.mxu1 %vm15261_vm2, %v1457_v5  ;;  %v8073_v46 = vld [vmem:[%s14456_s0 + $0x120] sm:$0xff]  ;;  %vm3307_vm2 = vcmp.gt.f32.partialorder %v9996_v58, 0.0  ;;  %4508 = vmatpush.bf16.msrb.mxu3 %v7562_v40 }
 0x1d7   :  { %v7761_v8 = vpack.i.bf16 %v8073_v46, %v8072_v26  ;;  %v3647_v50 = vsel %vm3307_vm2, %v9996_v58, %v3579_v36 }
 0x1d8   :  { %v3241_v12 = vadd.f32 %v9791_v25, %v3171_v55  ;;  %7010 = vmatmul.msk.bf16.gmra.mxu2 %vm15262_vm7, %v2837_v2  ;;  %7154 = vmatmul.msk.bf16.gmra.mxu3 %vm15263_vm6, %v4178_v23  ;;  %vm3308_vm7 = vcmp.gt.f32.partialorder %v3240_v45, 0.0  ;;  %v10075_v46 = vmul.f32 1.050701, %v3647_v50  ;;  %vm15264_vm6 = vcmask 523264  }
 0x1da   :  { %v7923_v5 = vpop.eup %7922  ;;  %v3387_v35 = vmul.f32 1.442695, %v3241_v12  ;;  %vm3309_vm2 = vcmp.gt.f32.partialorder %v3241_v12, 0.0 }
 0x1db   :  { %v2329_v38 = vpop.f32.mrf.mxu1  ;;  %v10064_v6 = vpop.f32.mrf.mxu2  ;;  %v7038_v13 = vadd.f32 -1.0, %v7923_v5 }
 0x1dc   :  { %7924 = vpow2.f32 %v3387_v35  ;;  %v2330_v55 = vadd.f32 %v2329_v38, %v9903_v53  ;;  %7762 = vrot.lane.b32.xlu0 %v7761_v8, %s8193_s26  ;;  %v1458_v38 = vpack.c.bf16 %v9687_v24, %v9668_v61  ;;  %v8074_v61 = vld [vmem:[%s14456_s0 + $0x1e0] sm:$0xff]  ;;  %v8075_v24 = vld [vmem:[%s14456_s0 + $0x1e8] sm:$0xff] }
 0x1dd   :  { %v3580_v2 = vmul.f32 1.6732632, %v7038_v13  ;;  %v7561_v13 = vld [vmem:[%s14460_s2 + $0x60] sm:$0xff] }
 0x1de   :  { %v3172_v54 = vadd.f32 %v9971_v29, %v2330_v55  ;;  %v10090_v55 = vpop.f32.mrf.mxu0  ;;  %4509 = vmatpush.bf16.msrb.mxu3 %v7561_v13 }
 0x1df   :  { %v3648_v23 = vsel %vm3308_vm7, %v3240_v45, %v3580_v2  ;;  %vm15265_vm7 = vcmask 261120  }
 0x1e0   :  { %v3242_v26 = vadd.f32 %v9791_v25, %v3172_v54  ;;  %v10077_v53 = vmul.f32 1.050701, %v3648_v23 }
 0x1e2   :  { %v7925_v8 = vpop.eup %7924  ;;  %v3389_v5 = vmul.f32 1.442695, %v3242_v26  ;;  %v7756_v35 = vpack.i.bf16 %v10077_v53, %v10075_v46 }
 0x1e3   :  { %v2332_v58 = vpop.f32.mrf.mxu1  ;;  %v10083_v36 = vpop.f32.mrf.mxu2  ;;  %v7039_v29 = vadd.f32 -1.0, %v7925_v8 }
 0x1e4   :  { %7926 = vpow2.f32 %v3389_v5  ;;  %v2333_v45 = vadd.f32 %v2332_v58, %v9940_v17  ;;  %7757 = vrot.lane.b32.xlu2 %v7756_v35, %s8195_s19  ;;  %v4179_v17 = vpack.c.bf16 %v8075_v24, %v8074_v61  ;;  %v7560_v58 = vld [vmem:[%s14460_s2 + $0x58] sm:$0xff] }
 0x1e5   :  { %v3581_v2 = vmul.f32 1.6732632, %v7039_v29  ;;  %4510 = vmatpush.bf16.msrb.mxu3 %v7560_v58 }
 0x1e6   :  { %v3173_v40 = vadd.f32 %v10006_v60, %v2333_v45  ;;  %6951 = vmatmul.msk.bf16.gmra.mxu1 %vm15264_vm6, %v1458_v38  ;;  %vm3310_vm6 = vcmp.gt.f32.partialorder %v3242_v26, 0.0  ;;  %v10114_v61 = vpop.f32.mrf.mxu0 }
 0x1e7   :  { %v3649_v35 = vsel %vm3309_vm2, %v3241_v12, %v3581_v2  ;;  %v10121_v2 = vadd.f32 %v9791_v25, %v9724_v32  ;;  %vm15267_vm2 = vcmask 523264  }
 0x1e8   :  { %v3243_v50 = vadd.f32 %v9791_v25, %v3173_v40  ;;  %7155 = vmatmul.msk.bf16.gmra.mxu3 %vm15265_vm7, %v4179_v17  ;;  %v10109_v13 = vmul.f32 1.050701, %v3649_v35  ;;  %v7559_v40 = vld [vmem:[%s14460_s2 + $0x50] sm:$0xff] }
 0x1e9   :  { %4511 = vmatpush.bf16.msrb.mxu3 %v7559_v40 }
 0x1ea   :  { %v7927_v54 = vpop.eup %7926  ;;  %v3391_v23 = vmul.f32 1.442695, %v3243_v50  ;;  %vm3311_vm7 = vcmp.gt.f32.partialorder %v3243_v50, 0.0 }
 0x1eb   :  { %v2334_v60 = vpop.f32.mrf.mxu1  ;;  %v10102_v8 = vpop.f32.mrf.mxu2  ;;  %v7040_v5 = vadd.f32 -1.0, %v7927_v54 }
 0x1ec   :  { %7928 = vpow2.f32 %v3391_v23  ;;  %v2335_v38 = vadd.f32 %v2334_v60, %v9985_v30  ;;  %v1459_v23 = vpack.c.bf16 %v9752_v59, %v9739_v37  ;;  %v10127_v60 = vpop.f32.mrf.mxu3  ;;  %v7558_v37 = vld [vmem:[%s14460_s2 + $0x48] sm:$0xff]  ;;  %v3367_v59 = vmul.f32 1.442695, %v10121_v2 }
 0x1ed   :  { %v3582_v29 = vmul.f32 1.6732632, %v7040_v5  ;;  %15266 = vst [vmem:[#allocation99_spill] sm:$0xff] %v10127_v60  ;;  %4512 = vmatpush.bf16.msrb.mxu3 %v7558_v37 }
 0x1ee   :  { %v3174_v45 = vadd.f32 %v10035_v20, %v2335_v38 }
 0x1ef   :  { %v3650_v12 = vsel %vm3310_vm6, %v3242_v26, %v3582_v29  ;;  %v10131_v26 = vadd.f32 %v9791_v25, %v9765_v51  ;;  %v8076_v51 = vld [vmem:[%s14456_s0 + $0x1f0] sm:$0xff]  ;;  %vm15268_vm6 = vcmask 261120  }
 0x1f0   :  { %v3244_v30 = vadd.f32 %v9791_v25, %v3174_v45  ;;  %v10117_v24 = vmul.f32 1.050701, %v3650_v12  ;;  %v7557_v12 = vld [vmem:[%s14460_s2 + $0x40] sm:$0xff] }
 0x1f1   :  { %v3369_v45 = vmul.f32 1.442695, %v10131_v26  ;;  %4513 = vmatpush.bf16.msrb.mxu3 %v7557_v12  ;;  %vm3300_vm9 = vcmp.gt.f32.partialorder %v10131_v26, 0.0 }
 0x1f2   :  { %v7929_v17 = vpop.eup %7928  ;;  %v3393_v20 = vmul.f32 1.442695, %v3244_v30  ;;  %v7766_v54 = vpack.i.bf16 %v10117_v24, %v10109_v13 }
 0x1f3   :  { %v2337_v5 = vpop.f32.mrf.mxu1  ;;  %v10133_v35 = vpop.f32.mrf.mxu2  ;;  %v7041_v38 = vadd.f32 -1.0, %v7929_v17 }
 0x1f4   :  { %7930 = vpow2.f32 %v3393_v20  ;;  %v2338_v32 = vadd.f32 %v2337_v5, %v10020_v39  ;;  %7767 = vrot.lane.b32.xlu1 %v7766_v54, %s8195_s19  ;;  %v8077_v39 = vld [vmem:[%s14456_s0 + $0x1f8] sm:$0xff]  ;;  %v10154_v17 = vpop.f32.mrf.mxu0 }
 0x1f5   :  { %v4180_v29 = vpack.c.bf16 %v8077_v39, %v8076_v51  ;;  %v3583_v40 = vmul.f32 1.6732632, %v7041_v38  ;;  %7932 = vpow2.f32 %v3367_v59 }
 0x1f6   :  { %v3175_v58 = vadd.f32 %v10064_v6, %v2338_v32  ;;  %6952 = vmatmul.msk.bf16.gmra.mxu1 %vm15267_vm2, %v1459_v23  ;;  %7934 = vpow2.f32 %v3369_v45  ;;  %vm3312_vm2 = vcmp.gt.f32.partialorder %v3244_v30, 0.0 }
 0x1f7   :  { %v3651_v38 = vsel %vm3311_vm7, %v3243_v50, %v3583_v40  ;;  %vm15270_vm7 = vcmask 523264  }
 0x1f8   :  { %v3245_v6 = vadd.f32 %v9791_v25, %v3175_v58  ;;  %7156 = vmatmul.msk.bf16.gmra.mxu3 %vm15268_vm6, %v4180_v29  ;;  %v10160_v58 = vpop.f32.mrf.mxu3  ;;  %v10163_v59 = vmul.f32 1.050701, %v3651_v38 }
 0x1f9   :  { %15269 = vst [vmem:[#allocation100_spill] sm:$0xff] %v10160_v58 }
 0x1fa   :  { %v7931_v20 = vpop.eup %7930  ;;  %v3395_v54 = vmul.f32 1.442695, %v3245_v6  ;;  %vm3313_vm6 = vcmp.gt.f32.partialorder %v3245_v6, 0.0 }
 0x1fb   :  { %v2339_v23 = vpop.f32.mrf.mxu1  ;;  %v10157_v5 = vpop.f32.mrf.mxu2  ;;  %v7042_v32 = vadd.f32 -1.0, %v7931_v20 }
 0x1fc   :  { %7936 = vpow2.f32 %v3395_v54  ;;  %v2340_v37 = vadd.f32 %v2339_v23, %v10061_v49  ;;  %v7933_v29 = vpop.eup %7932  ;;  %v10170_v54 = vpop.f32.mrf.mxu0 }
 0x1fd   :  { %v3584_v51 = vmul.f32 1.6732632, %v7042_v32  ;;  %v7935_v20 = vpop.eup %7934  ;;  %v7029_v12 = vadd.f32 -1.0, %v7933_v29 }
 0x1fe   :  { %v3176_v39 = vadd.f32 %v10083_v36, %v2340_v37  ;;  %v7030_v36 = vadd.f32 -1.0, %v7935_v20 }
 0x1ff   :  { %v3652_v60 = vsel %vm3312_vm2, %v3244_v30, %v3584_v51  ;;  %v3571_v51 = vmul.f32 1.6732632, %v7029_v12  ;;  %vm3299_vm2 = vcmp.gt.f32.partialorder %v10121_v2, 0.0 }
 0x200   :  { %v3246_v45 = vadd.f32 %v9791_v25, %v3176_v39  ;;  %v10166_v42 = vmul.f32 1.050701, %v3652_v60  ;;  %v1460_v60 = vpack.c.bf16 %v9820_v18, %v9808_v14  ;;  %v10180_v39 = vpop.f32.mrf.mxu3 }
 0x201   :  { %15271 = vst [vmem:[#allocation101_spill] sm:$0xff] %v10180_v39 }
 0x202   :  { %v7937_v50 = vpop.eup %7936  ;;  %v3397_v40 = vmul.f32 1.442695, %v3246_v45  ;;  %v7771_v49 = vpack.i.bf16 %v10166_v42, %v10163_v59 }
 0x203   :  { %v2342_v23 = vpop.f32.mrf.mxu1  ;;  %v7043_v32 = vadd.f32 -1.0, %v7937_v50  ;;  %v10176_v38 = vpop.f32.mrf.mxu2  ;;  %v3572_v50 = vmul.f32 1.6732632, %v7030_v36 }
 0x204   :  { %7938 = vpow2.f32 %v3397_v40  ;;  %v2343_v30 = vadd.f32 %v2342_v23, %v10090_v55  ;;  %7772 = vrot.lane.b32.xlu2 %v7771_v49, %s8195_s19  ;;  %v3639_v49 = vsel %vm3299_vm2, %v10121_v2, %v3571_v51  ;;  %v10191_v36 = vpop.f32.mrf.mxu0  ;;  %vm15276_vm2 = vcmp.lt.s32.totalorder %v8564_v11, 1 }
 0x205   :  { %v3585_v29 = vmul.f32 1.6732632, %v7043_v32 }
 0x206   :  { %v3177_v37 = vadd.f32 %v10102_v8, %v2343_v30  ;;  %6953 = vmatmul.msk.bf16.gmra.mxu1 %vm15270_vm7, %v1460_v60  ;;  %v3640_v30 = vsel %vm3300_vm9, %v10131_v26, %v3572_v50  ;;  %vm3314_vm7 = vcmp.gt.f32.partialorder %v3246_v45, 0.0  ;;  %vm15273_vm9 = vcmask 523264  }
 0x207   :  { %v3653_v12 = vsel %vm3313_vm6, %v3245_v6, %v3585_v29  ;;  %v3708_v2 = vmul.f32 1.050701, %v3640_v30  ;;  %vm15275_vm6 = vmmov %vm15273_vm9 }
 0x208   :  { %v10183_v20 = vadd.f32 %v9791_v25, %v3177_v37  ;;  %v3707_v37 = vmul.f32 1.050701, %v3639_v49  ;;  %v10194_v22 = vmul.f32 1.050701, %v3653_v12 }
 0x20a   :  { %v7939_v55 = vpop.eup %7938  ;;  %v3399_v40 = vmul.f32 1.442695, %v10183_v20 }
 0x20b   :  { %v2344_v8 = vpop.f32.mrf.mxu1  ;;  %v7044_v23 = vadd.f32 -1.0, %v7939_v55  ;;  %v10196_v51 = vpop.f32.mrf.mxu2 }
 0x20c   :  { %7940 = vpow2.f32 %v3399_v40  ;;  %v2345_v32 = vadd.f32 %v2344_v8, %v10114_v61  ;;  %v55_v61 = vadd.s32 264, %v8564_v11  ;;  %v10202_v40 = vpop.f32.mrf.mxu3 }
 0x20d   :  { %v3586_v60 = vmul.f32 1.6732632, %v7044_v23  ;;  %15272 = vst [vmem:[#allocation102_spill] sm:$0xff] %v10202_v40 }
 0x20e   :  { %v3178_v39 = vadd.f32 %v10133_v35, %v2345_v32  ;;  %v7738_v58 = vpop.permute.xlu2 %7737 }
 0x20f   :  { %v7740_v55 = vunpack.i.h.bf16 %v7738_v58  ;;  %v7739_v6 = vunpack.i.l.bf16 %v7738_v58  ;;  %v3654_v29 = vsel %vm3314_vm7, %v3246_v45, %v3586_v60  ;;  %v325_v60 = vand.u32 15, %v55_v61 }
 0x210   :  { %v3248_v26 = vadd.f32 %v9791_v25, %v3178_v39  ;;  %v10199_v50 = vmul.f32 1.050701, %v3654_v29  ;;  %v2505_v29 = vrot.slane %v9820_v18, 1  ;;  %vm15278_vm7 = vcmask 261120  }
 0x211   :  { %v10205_v49 = vsel %vm15273_vm9, %v3707_v37, %v7739_v6  ;;  %v10208_v35 = vsel %vm15275_vm6, %v3708_v2, %v7740_v55  ;;  %vm10232_vm9 = vcmp.ne.s32.totalorder %v325_v60, 15  ;;  %vm3315_vm6 = vcmp.gt.f32.partialorder %v10183_v20, 0.0 }
 0x212   :  { %15274 = vst [vmem:[#allocation103_spill] sm:$0xff] %v10205_v49  ;;  %v7941_v8 = vpop.eup %7940  ;;  %v3401_v23 = vmul.f32 1.442695, %v3248_v26  ;;  %v7776_v58 = vpack.i.bf16 %v10199_v50, %v10194_v22  ;;  %v4112_v45 = vpack.c.bf16 %v10208_v35, %v10205_v49  ;;  %v14680_v39 = vrot.slane %v10205_v49, 7 }
 0x213   :  { %v2347_v12 = vpop.f32.mrf.mxu1  ;;  %v14681_v30 = vrot.slane %v10208_v35, 7  ;;  %v7045_v37 = vadd.f32 -1.0, %v7941_v8  ;;  %v15279_v8 = vmov 0  ;;  %vm3316_vm13 = vcmp.gt.f32.partialorder %v3248_v26, 0.0 }
 0x214   :  { %7942 = vpow2.f32 %v3401_v23  ;;  %v2348_v32 = vadd.f32 %v2347_v12, %v10154_v17  ;;  %7777 = vrot.lane.b32.xlu0 %v7776_v58, %s8195_s19  ;;  %4514 = vmatmul.bf16.vlgmr.msrb.gmra.mxu3 %v4112_v45  ;;  %v2049_v23 = vpop.f32.mrf.mxu0  ;;  %v15280_v8 = vsel %vm10232_vm9, 4294967295, %v15279_v8  ;;  %v3043_v12 = vpop.f32.mrf.mxu2 }
 0x215   :  { %v10224_v2 = vsel %vm15276_vm2, %v14680_v39, %v14681_v30  ;;  %v3587_v58 = vmul.f32 1.6732632, %v7045_v37  ;;  %15281 = vst [vmem:[#allocation105_spill] sm:$0xff] %v15280_v8  ;;  %vm15282_vm2 = vcmp.lt.s32.totalorder %v8564_v11, 7  ;;  %v15284_v39 = vrot.slane %v9808_v14, 1 }
 0x216   :  { %15277 = vst [vmem:[#allocation104_spill] sm:$0xff] %v10224_v2  ;;  %v3179_v55 = vadd.f32 %v10157_v5, %v2348_v32  ;;  %v1306_v6 = vpop.permute.xlu2 %1305 }
 0x217   :  { %v10229_v17 = vsel %vm15278_vm7, 0.0, %v1306_v6  ;;  %vm15285_vm7 = vmmov %vm15282_vm2  ;;  %v3655_v2 = vsel %vm3315_vm6, %v10183_v20, %v3587_v58 }
 0x218   :  { %v3249_v61 = vadd.f32 %v9791_v25, %v3179_v55  ;;  %v14687_v45 = vrot.slane %v10229_v17, 1  ;;  %v10244_v55 = vpop.f32.mrf.mxu3  ;;  %v2575_v30 = vsel %vm15285_vm7, %v15284_v39, %v2505_v29 }
 0x219   :  { %15283 = vst [vmem:[#allocation106_spill] sm:$0xff] %v10244_v55 }
 0x21a   :  { %v7943_v5 = vpop.eup %7942  ;;  %v3403_v32 = vmul.f32 1.442695, %v3249_v61  ;;  %v2574_v6 = vsel %vm15282_vm2, %v2505_v29, %v14687_v45  ;;  %vm15286_vm2 = vcmask 523264  }
 0x21b   :  { %v2778_v37 = vsel %vm10232_vm9, %v2574_v6, 0.0  ;;  %v2349_v60 = vpop.f32.mrf.mxu1  ;;  %v7046_v40 = vadd.f32 -1.0, %v7943_v5  ;;  %v10254_v6 = vmul.f32 1.050701, %v3655_v2  ;;  %vm15291_vm7 = vmmov %vm15286_vm2  ;;  %vm15305_vm9 = vcmp.lt.s32.totalorder %v8564_v11, 1 }
 0x21c   :  { %7944 = vpow2.f32 %v3403_v32  ;;  %v2350_v33 = vadd.f32 %v2349_v60, %v10170_v54  ;;  %v2838_v57 = vpack.c.bf16 %v2778_v37, %v2575_v30  ;;  %v2052_v39 = vpop.f32.mrf.mxu0  ;;  %v3046_v30 = vpop.f32.mrf.mxu2 }
 0x21d   :  { %v3588_v45 = vmul.f32 1.6732632, %v7046_v40 }
 0x21e   :  { %v3180_v8 = vadd.f32 %v10176_v38, %v2350_v33  ;;  %7011 = vmatmul.msk.bf16.gmra.mxu2 %vm15286_vm2, %v2838_v57 }
 0x21f   :  { %v3656_v55 = vsel %vm3316_vm13, %v3248_v26, %v3588_v45  ;;  %vm3317_vm13 = vcmp.gt.f32.partialorder %v3249_v61, 0.0 }
 0x220   :  { %v3250_v14 = vadd.f32 %v9791_v25, %v3180_v8  ;;  %v10257_v4 = vmul.f32 1.050701, %v3656_v55  ;;  %v10263_v57 = vpop.f32.mrf.mxu3 }
 0x221   :  { %15287 = vst [vmem:[#allocation107_spill] sm:$0xff] %v10263_v57 }
 0x222   :  { %v7945_v29 = vpop.eup %7944  ;;  %v3405_v20 = vmul.f32 1.442695, %v3250_v14  ;;  %v7781_v54 = vpack.i.bf16 %v10257_v4, %v10254_v6  ;;  %vm3318_vm6 = vcmp.gt.f32.partialorder %v3250_v14, 0.0 }
 0x223   :  { %v2352_v58 = vpop.f32.mrf.mxu1  ;;  %v7047_v40 = vadd.f32 -1.0, %v7945_v29 }
 0x224   :  { %7946 = vpow2.f32 %v3405_v20  ;;  %v2353_v33 = vadd.f32 %v2352_v58, %v10191_v36  ;;  %7782 = vrot.lane.b32.xlu1 %v7781_v54, %s8195_s19  ;;  %v2054_v5 = vpop.f32.mrf.mxu0  ;;  %v3048_v36 = vpop.f32.mrf.mxu2 }
 0x225   :  { %v3589_v26 = vmul.f32 1.6732632, %v7047_v40 }
 0x226   :  { %v3181_v38 = vadd.f32 %v10196_v51, %v2353_v33 }
 0x227   :  { %v3657_v55 = vsel %vm3317_vm13, %v3249_v61, %v3589_v26 }
 0x228   :  { %v3251_v2 = vadd.f32 %v9791_v25, %v3181_v38  ;;  %v10267_v54 = vmul.f32 1.050701, %v3657_v55  ;;  %v10269_v58 = vpop.f32.mrf.mxu3 }
 0x229   :  { %15288 = vst [vmem:[#allocation108_spill] sm:$0xff] %v10269_v58  ;;  %v15294_v58 = vrot.slane %v10205_v49, 1 }
 0x22a   :  { %v7947_v8 = vpop.eup %7946  ;;  %v3407_v45 = vmul.f32 1.442695, %v3251_v2  ;;  %vm3319_vm13 = vcmp.gt.f32.partialorder %v3251_v2, 0.0 }
 0x22b   :  { %v2354_v32 = vpop.f32.mrf.mxu1  ;;  %v7048_v37 = vadd.f32 -1.0, %v7947_v8  ;;  %v7586_v8 = vld [vmem:[%s14459_s3 + $0x28] sm:$0xff] }
 0x22c   :  { %7948 = vpow2.f32 %v3407_v45  ;;  %v2355_v60 = vadd.f32 %v2354_v32, %v2049_v23  ;;  %6285 = vmatpush.bf16.msra.mxu2 %v7586_v8 }
 0x22d   :  { %v3590_v29 = vmul.f32 1.6732632, %v7048_v37  ;;  %v10280_v37 = vpop.f32.mrf.mxu2 }
 0x22e   :  { %v3182_v20 = vadd.f32 %v3043_v12, %v2355_v60 }
 0x22f   :  { %v3658_v51 = vsel %vm3318_vm6, %v3250_v14, %v3590_v29  ;;  %v2057_v14 = vpop.f32.mrf.mxu0  ;;  %v57_v29 = vadd.s32 280, %v8564_v11  ;;  %vm15292_vm6 = vcmp.lt.s32.totalorder %v8564_v11, 7 }
 0x230   :  { %v3252_v40 = vadd.f32 %v9791_v25, %v3182_v20  ;;  %v10272_v33 = vmul.f32 1.050701, %v3658_v51  ;;  %v5702_v51 = vrot.slane %v10208_v35, 1 }
 0x231   :  { %v339_v49 = vand.u32 15, %v57_v29  ;;  %v15304_v29 = vrot.slane %v9820_v18, 7 }
 0x232   :  { %15289 = vst [vmem:[#allocation109_spill] sm:$0xff] %v10272_v33  ;;  %v7949_v38 = vpop.eup %7948  ;;  %v3409_v57 = vmul.f32 1.442695, %v3252_v40  ;;  %v7786_v61 = vpack.i.bf16 %v10272_v33, %v10267_v54 }
 0x233   :  { %v2357_v26 = vpop.f32.mrf.mxu1  ;;  %v7049_v12 = vadd.f32 -1.0, %v7949_v38  ;;  %v10288_v38 = vpop.f32.mrf.mxu3 }
 0x234   :  { %7950 = vpow2.f32 %v3409_v57  ;;  %v2358_v23 = vadd.f32 %v2357_v26, %v2052_v39  ;;  %7787 = vrot.lane.b32.xlu2 %v7786_v61, %s8195_s19  ;;  %v56_v57 = vadd.s32 272, %v8564_v11  ;;  %15290 = vst [vmem:[#allocation110_spill] sm:$0xff] %v10288_v38 }
 0x235   :  { %v3591_v20 = vmul.f32 1.6732632, %v7049_v12 }
 0x236   :  { %v3183_v45 = vadd.f32 %v3046_v30, %v2358_v23  ;;  %v7743_v32 = vpop.permute.xlu1 %7742  ;;  %v332_v38 = vand.u32 15, %v56_v57 }
 0x237   :  { %v7745_v55 = vunpack.i.h.bf16 %v7743_v32  ;;  %v7744_v60 = vunpack.i.l.bf16 %v7743_v32 }
 0x238   :  { %v10285_v39 = vadd.f32 %v9791_v25, %v3183_v45 }
 0x239   :  { %v10292_v30 = vsel %vm15291_vm7, %v9893_v62, %v7744_v60  ;;  %v10296_v61 = vsel %vm15286_vm2, %v9895_v34, %v7745_v55  ;;  %v3659_v60 = vsel %vm3319_vm13, %v3251_v2, %v3591_v20  ;;  %v7574_v34 = vld [vmem:[%s14460_s2 + $0x38] sm:$0xff]  ;;  %vm15295_vm7 = vmmov %vm15292_vm6  ;;  %vm3320_vm2 = vcmp.gt.f32.partialorder %v3252_v40, 0.0 }
 0x23a   :  { %v7951_v26 = vpop.eup %7950  ;;  %v3411_v23 = vmul.f32 1.442695, %v10285_v39  ;;  %v4113_v8 = vpack.c.bf16 %v10296_v61, %v10292_v30  ;;  %v14692_v45 = vrot.slane %v10292_v30, 1  ;;  %v1512_v2 = vrot.slane %v10229_v17, 7  ;;  %5468 = vmatpush.bf16.msra.mxu1 %v7574_v34 }
 0x23b   :  { %v2359_v12 = vpop.f32.mrf.mxu1  ;;  %v7050_v32 = vadd.f32 -1.0, %v7951_v26  ;;  %v10316_v26 = vsel %vm15295_vm7, %v15294_v58, %v5702_v51  ;;  %v10321_v44 = vmul.f32 1.050701, %v3659_v60  ;;  %vm10326_vm13 = vcmp.ne.s32.totalorder %v332_v38, 0 }
 0x23c   :  { %7952 = vpow2.f32 %v3411_v23  ;;  %v2360_v62 = vadd.f32 %v2359_v12, %v2054_v5  ;;  %4519 = vmatmul.bf16.gmra.mxu3 %v4113_v8  ;;  %v10310_v55 = vsel %vm15292_vm6, %v5702_v51, %v14692_v45  ;;  %15296 = vst [vmem:[#allocation112_spill] sm:$0xff] %v10316_v26  ;;  %v2059_v8 = vpop.f32.mrf.mxu0  ;;  %v15298_v51 = vmov 0 }
 0x23d   :  { %15293 = vst [vmem:[#allocation111_spill] sm:$0xff] %v10310_v55  ;;  %v3592_v5 = vmul.f32 1.6732632, %v7050_v32  ;;  %v15299_v51 = vsel %vm10326_vm13, 4294967295, %v15298_v51  ;;  %vm15301_vm6 = vcmask 261120  }
 0x23e   :  { %v3184_v57 = vadd.f32 %v3048_v36, %v2360_v62  ;;  %v7753_v23 = vpop.permute.xlu1 %7752  ;;  %15297 = vst [vmem:[#allocation113_spill] sm:$0xff] %v10321_v44  ;;  %v3053_v36 = vpop.f32.mrf.mxu2  ;;  %vm15302_vm7 = vmmov %vm15301_vm6 }
 0x23f   :  { %v7755_v12 = vunpack.i.h.bf16 %v7753_v23  ;;  %v7754_v45 = vunpack.i.l.bf16 %v7753_v23  ;;  %v3660_v58 = vsel %vm3320_vm2, %v3252_v40, %v3592_v5  ;;  %15300 = vst [vmem:[#allocation114_spill] sm:$0xff] %v15299_v51  ;;  %vm10353_vm2 = vcmp.ne.s32.totalorder %v339_v49, 15 }
 0x240   :  { %v10324_v7 = vadd.f32 %v9791_v25, %v3184_v57  ;;  %v10337_v34 = vmul.f32 1.050701, %v3660_v58  ;;  %v1580_v25 = vsel %vm15305_vm9, %v15304_v29, %v1512_v2  ;;  %vm15310_vm9 = vcmask 523264  }
 0x241   :  { %v10332_v32 = vsel %vm15301_vm6, %v9932_v15, %v7755_v12  ;;  %v10335_v62 = vsel %vm15302_vm7, 0.0, %v7754_v45  ;;  %v10347_v15 = vpop.f32.mrf.mxu3  ;;  %v15307_v12 = vmov 0  ;;  %v1785_v20 = vsel %vm10326_vm13, %v1580_v25, 0.0 }
 0x242   :  { %15303 = vst [vmem:[#allocation115_spill] sm:$0xff] %v10337_v34  ;;  %v7953_v60 = vpop.eup %7952  ;;  %v3413_v40 = vmul.f32 1.442695, %v10324_v7  ;;  %v14705_v38 = vrot.slane %v10332_v32, 1  ;;  %v1461_v5 = vpack.c.bf16 %v10335_v62, %v10229_v17  ;;  %v1513_v45 = vrot.slane %v10335_v62, 7 }
 0x243   :  { %15306 = vst [vmem:[#allocation116_spill] sm:$0xff] %v10347_v15  ;;  %v2507_v57 = vrot.slane %v10335_v62, 1  ;;  %v2362_v23 = vpop.f32.mrf.mxu1  ;;  %v7791_v18 = vpack.i.bf16 %v10337_v34, %v10321_v44  ;;  %v15308_v12 = vsel %vm10353_vm2, 4294967295, %v15307_v12  ;;  %v7051_v29 = vadd.f32 -1.0, %v7953_v60 }
 0x244   :  { %15309 = vst [vmem:[#allocation117_spill] sm:$0xff] %v15308_v12  ;;  %7954 = vpow2.f32 %v3413_v40  ;;  %v2363_v58 = vadd.f32 %v2362_v23, %v2057_v14  ;;  %6954 = vmatmul.msk.bf16.gmra.mxu1 %vm15310_vm9, %v1461_v5  ;;  %vm15311_vm6 = vcmp.lt.s32.totalorder %v8564_v11, 1  ;;  %vm15312_vm7 = vcmp.lt.s32.totalorder %v8564_v11, 7 }
 0x245   :  { %7792 = vrot.lane.b32.xlu0 %v7791_v18, %s8195_s19  ;;  %v1579_v62 = vsel %vm15311_vm6, %v1512_v2, %v1513_v45  ;;  %v2572_v49 = vsel %vm15312_vm7, %v2507_v57, %v14705_v38  ;;  %v15313_v15 = vrot.slane %v10229_v17, 1  ;;  %vm15314_vm3 = vmmov %vm15312_vm7  ;;  %v58_v51 = vadd.s32 288, %v8564_v11  ;;  %v10378_v38 = vld [vmem:[%s14458_s4] ss:$0 sm:$0xff] }
 0x246   :  { %v3185_v60 = vadd.f32 %v10280_v37, %v2363_v58  ;;  %v7748_v40 = vpop.permute.xlu0 %7747  ;;  %v1844_v5 = vpack.c.bf16 %v1579_v62, %v1785_v20  ;;  %v2780_v25 = vsel %vm10353_vm2, %v2572_v49, 0.0  ;;  %v3593_v37 = vmul.f32 1.6732632, %v7051_v29  ;;  %v2062_v20 = vpop.f32.mrf.mxu0 }
 0x247   :  { %v2573_v14 = vsel %vm15314_vm3, %v15313_v15, %v2507_v57  ;;  %v7750_v23 = vunpack.i.h.bf16 %v7748_v40  ;;  %v7749_v18 = vunpack.i.l.bf16 %v7748_v40  ;;  %vm15315_vm3 = vmmov %vm15310_vm9  ;;  %vm3321_vm2 = vcmp.gt.f32.partialorder %v10285_v39, 0.0 }
 0x248   :  { %v2839_v2 = vpack.c.bf16 %v2780_v25, %v2573_v14  ;;  %v10381_v17 = vadd.f32 %v10378_v38, %v3185_v60  ;;  %6904 = vmatmul.msk.bf16.gmra.mxu0 %vm15315_vm3, %v1844_v5  ;;  %vm15316_vm9 = vmmov %vm15315_vm3  ;;  %v59_v29 = vadd.s32 296, %v8564_v11  ;;  %v3056_v14 = vpop.f32.mrf.mxu2  ;;  %v1514_v60 = vrot.slane %v10332_v32, 7 }
 0x249   :  { %vm15317_vm6 = vmmov %vm15315_vm3  ;;  %v346_v5 = vand.u32 15, %v58_v51 }
 0x24a   :  { %7012 = vmatmul.msk.bf16.gmra.mxu2 %vm15316_vm9, %v2839_v2  ;;  %v10387_v15 = vsel %vm15317_vm6, %v9957_v31, %v7749_v18  ;;  %vm15318_vm7 = vmmov %vm15315_vm3  ;;  %v7955_v58 = vpop.eup %7954  ;;  %v3415_v62 = vmul.f32 1.442695, %v10381_v17  ;;  %vm3322_vm3 = vcmp.gt.f32.partialorder %v10324_v7, 0.0  ;;  %v7758_v2 = vpop.permute.xlu2 %7757  ;;  %v353_v55 = vand.u32 15, %v59_v29 }
 0x24b   :  { %v10391_v57 = vsel %vm15318_vm7, %v9959_v10, %v7750_v23  ;;  %v2364_v40 = vpop.f32.mrf.mxu1  ;;  %v7052_v31 = vadd.f32 -1.0, %v7955_v58  ;;  %v3661_v10 = vsel %vm3321_vm2, %v10285_v39, %v3593_v37  ;;  %v10401_v23 = vpop.f32.mrf.mxu3  ;;  %vm10411_vm9 = vcmp.ne.s32.totalorder %v346_v5, 0 }
 0x24c   :  { %v4114_v49 = vpack.c.bf16 %v10391_v57, %v10387_v15  ;;  %7956 = vpow2.f32 %v3415_v62  ;;  %v2365_v25 = vadd.f32 %v2364_v40, %v2059_v8  ;;  %15319 = vst [vmem:[#allocation118_spill] sm:$0xff] %v10401_v23  ;;  %v10404_v58 = vmul.f32 1.050701, %v3661_v10  ;;  %v7584_v10 = vld [vmem:[%s14460_s2 + $0xb8] sm:$0xff] }
 0x24d   :  { %v3594_v18 = vmul.f32 1.6732632, %v7052_v31  ;;  %v15320_v39 = vmov 0  ;;  %vm15323_vm2 = vcmp.lt.s32.totalorder %v8564_v11, 1  ;;  %v7760_v37 = vunpack.i.h.bf16 %v7758_v2  ;;  %6496 = vmatpush.bf16.msra.mxu3 %v7584_v10 }
 0x24e   :  { %4524 = vmatmul.bf16.gmra.mxu3 %v4114_v49  ;;  %v3186_v12 = vadd.f32 %v3053_v36, %v2365_v25  ;;  %v7763_v26 = vpop.permute.xlu0 %7762  ;;  %v15321_v39 = vsel %vm10411_vm9, 4294967295, %v15320_v39  ;;  %v1578_v36 = vsel %vm15323_vm2, %v1513_v45, %v1514_v60  ;;  %v7759_v62 = vunpack.i.l.bf16 %v7758_v2  ;;  %v2064_v45 = vpop.f32.mrf.mxu0 }
 0x24f   :  { %v7765_v34 = vunpack.i.h.bf16 %v7763_v26  ;;  %v7764_v44 = vunpack.i.l.bf16 %v7763_v26  ;;  %v3662_v33 = vsel %vm3322_vm3, %v10324_v7, %v3594_v18  ;;  %15322 = vst [vmem:[#allocation119_spill] sm:$0xff] %v15321_v39  ;;  %vm15324_vm6 = vcmask 261120  }
 0x250   :  { %v10407_v8 = vadd.f32 %v10378_v38, %v3186_v12  ;;  %v10409_v51 = vmul.f32 1.050701, %v3662_v33  ;;  %vm15325_vm7 = vmmov %vm15324_vm6  ;;  %vm10425_vm3 = vcmp.ne.s32.totalorder %v353_v55, 15  ;;  %v15326_v40 = vmov 0  ;;  %v3058_v18 = vpop.f32.mrf.mxu2 }
 0x251   :  { %v10419_v26 = vsel %vm15324_vm6, %v9983_v48, %v7765_v34  ;;  %v1404_v7 = vsel %vm15325_vm7, %v9978_v9, %v7764_v44  ;;  %v15327_v40 = vsel %vm10425_vm3, 4294967295, %v15326_v40  ;;  %v1787_v44 = vsel %vm10411_vm9, %v1578_v36, 0.0 }
 0x252   :  { %v7957_v12 = vpop.eup %7956  ;;  %v3417_v33 = vmul.f32 1.442695, %v10407_v8  ;;  %v14717_v49 = vrot.slane %v10419_v26, 1  ;;  %v1515_v29 = vrot.slane %v1404_v7, 7  ;;  %15328 = vst [vmem:[#allocation120_spill] sm:$0xff] %v15327_v40  ;;  %v2509_v31 = vrot.slane %v1404_v7, 1 }
 0x253   :  { %v2367_v5 = vpop.f32.mrf.mxu1  ;;  %v7796_v48 = vpack.i.bf16 %v10409_v51, %v10404_v58  ;;  %v1462_v34 = vpack.c.bf16 %v1404_v7, %v10332_v32  ;;  %v7053_v55 = vadd.f32 -1.0, %v7957_v12  ;;  %vm15329_vm6 = vcmask 523264  }
 0x254   :  { %7958 = vpow2.f32 %v3417_v33  ;;  %v2368_v9 = vadd.f32 %v2367_v5, %v2062_v20  ;;  %v1577_v25 = vsel %vm15323_vm2, %v1514_v60, %v1515_v29  ;;  %vm15330_vm7 = vcmp.lt.s32.totalorder %v8564_v11, 7  ;;  %vm15333_vm9 = vmmov %vm15329_vm6 }
 0x255   :  { %7797 = vrot.lane.b32.xlu1 %v7796_v48, %s8195_s19  ;;  %6955 = vmatmul.msk.bf16.gmra.mxu1 %vm15329_vm6, %v1462_v34  ;;  %v1845_v2 = vpack.c.bf16 %v1577_v25, %v1787_v44  ;;  %v2570_v36 = vsel %vm15330_vm7, %v2509_v31, %v14717_v49  ;;  %v15331_v20 = vrot.slane %v10332_v32, 1  ;;  %vm15332_vm2 = vmmov %vm15330_vm7  ;;  %v10453_v33 = vsel %vm15333_vm9, %v10023_v52, %v7759_v62  ;;  %v10460_v44 = vpop.f32.mrf.mxu3 }
 0x256   :  { %v3187_v7 = vadd.f32 %v3056_v14, %v2368_v9  ;;  %v2782_v12 = vsel %vm10425_vm3, %v2570_v36, 0.0  ;;  %v10457_v48 = vsel %vm15329_vm6, %v10025_v1, %v7760_v37  ;;  %v3595_v34 = vmul.f32 1.6732632, %v7053_v55  ;;  %15334 = vst [vmem:[#allocation121_spill] sm:$0xff] %v10460_v44  ;;  %vm15335_vm7 = vmmov %vm15329_vm6  ;;  %v2067_v36 = vpop.f32.mrf.mxu0 }
 0x257   :  { %v2571_v60 = vsel %vm15332_vm2, %v15331_v20, %v2509_v31  ;;  %v60_v32 = vadd.s32 304, %v8564_v11  ;;  %vm3323_vm2 = vcmp.gt.f32.partialorder %v10381_v17, 0.0  ;;  %vm15336_vm9 = vmmov %vm15329_vm6  ;;  %v4115_v1 = vpack.c.bf16 %v10457_v48, %v10453_v33 }
 0x258   :  { %v2840_v5 = vpack.c.bf16 %v2782_v12, %v2571_v60  ;;  %v10463_v14 = vadd.f32 %v10378_v38, %v3187_v7  ;;  %6905 = vmatmul.msk.bf16.gmra.mxu0 %vm15335_vm7, %v1845_v2  ;;  %v61_v37 = vadd.s32 312, %v8564_v11  ;;  %v3663_v25 = vsel %vm3323_vm2, %v10381_v17, %v3595_v34  ;;  %v15337_v60 = vld [vmem:[#allocation5_spill] sm:$0xff]  ;;  %v3061_v44 = vpop.f32.mrf.mxu2 }
 0x259   :  { %v360_v55 = vand.u32 15, %v60_v32  ;;  %v1516_v10 = vrot.slane %v10419_v26, 7  ;;  %vm3324_vm6 = vcmp.gt.f32.partialorder %v10407_v8, 0.0  ;;  %v2511_v7 = vrot.slane %v15337_v60, 1 }
 0x25a   :  { %7013 = vmatmul.msk.bf16.gmra.mxu2 %vm15336_vm9, %v2840_v5  ;;  %v7959_v52 = vpop.eup %7958  ;;  %v3419_v62 = vmul.f32 1.442695, %v10463_v14  ;;  %v10476_v5 = vmul.f32 1.050701, %v3663_v25  ;;  %v367_v49 = vand.u32 15, %v61_v37  ;;  %vm15341_vm2 = vcmp.lt.s32.totalorder %v8564_v11, 1 }
 0x25b   :  { %v2369_v31 = vpop.f32.mrf.mxu1  ;;  %v7054_v9 = vadd.f32 -1.0, %v7959_v52  ;;  %vm10482_vm7 = vcmp.ne.s32.totalorder %v360_v55, 0  ;;  %v1576_v32 = vsel %vm15341_vm2, %v1515_v29, %v1516_v10  ;;  %v1463_v29 = vpack.c.bf16 %v15337_v60, %v10419_v26 }
 0x25c   :  { %7960 = vpow2.f32 %v3419_v62  ;;  %v2370_v2 = vadd.f32 %v2369_v31, %v2064_v45  ;;  %v15338_v45 = vmov 0  ;;  %vm10492_vm9 = vcmp.ne.s32.totalorder %v367_v49, 15 }
 0x25d   :  { %v3596_v20 = vmul.f32 1.6732632, %v7054_v9  ;;  %v15339_v45 = vsel %vm10482_vm7, 4294967295, %v15338_v45  ;;  %v15346_v31 = vrot.slane %v8580_v41, 1  ;;  %v15348_v55 = vrot.slane %v15337_v60, 7 }
 0x25e   :  { %4529 = vmatmul.bf16.gmra.mxu3 %v4115_v1  ;;  %v3188_v12 = vadd.f32 %v3058_v18, %v2370_v2  ;;  %15340 = vst [vmem:[#allocation5_spill] sm:$0xff] %v15339_v45  ;;  %v10488_v1 = vpop.f32.mrf.mxu3  ;;  %v1789_v49 = vsel %vm10482_vm7, %v1576_v32, 0.0  ;;  %vm15350_vm3 = vcmask 523264  }
 0x25f   :  { %v3664_v52 = vsel %vm3324_vm6, %v10407_v8, %v3596_v20  ;;  %15342 = vst [vmem:[#allocation122_spill] sm:$0xff] %v10488_v1  ;;  %v15343_v8 = vmov 0  ;;  %vm15347_vm6 = vcmp.lt.s32.totalorder %v8564_v11, 7  ;;  %v1575_v2 = vsel %vm15341_vm2, %v1516_v10, %v15348_v55  ;;  %v2069_v55 = vpop.f32.mrf.mxu0  ;;  %vm15351_vm2 = vmmov %vm15350_vm3 }
 0x260   :  { %v3258_v17 = vadd.f32 %v10378_v38, %v3188_v12  ;;  %v10480_v34 = vmul.f32 1.050701, %v3664_v52  ;;  %v15344_v8 = vsel %vm10492_vm9, 4294967295, %v15343_v8  ;;  %v2568_v9 = vsel %vm15347_vm6, %v2511_v7, %v15346_v31  ;;  %vm15353_vm7 = vmmov %vm15351_vm2 }
 0x261   :  { %15345 = vst [vmem:[#allocation123_spill] sm:$0xff] %v15344_v8  ;;  %v15349_v52 = vrot.slane %v10419_v26, 1  ;;  %v1846_v23 = vpack.c.bf16 %v1575_v2, %v1789_v49  ;;  %v2784_v10 = vsel %vm10492_vm9, %v2568_v9, 0.0  ;;  %v3063_v26 = vpop.f32.mrf.mxu2  ;;  %vm15354_vm9 = vmmov %vm15351_vm2  ;;  %v14725_v2 = vrot.slane %v10296_v61, 1 }
 0x262   :  { %v7961_v62 = vpop.eup %7960  ;;  %v3421_v18 = vmul.f32 1.442695, %v3258_v17  ;;  %v7801_v37 = vpack.i.bf16 %v10480_v34, %v10476_v5 }
 0x263   :  { %v2372_v25 = vpop.f32.mrf.mxu1  ;;  %v7055_v20 = vadd.f32 -1.0, %v7961_v62  ;;  %v2569_v31 = vsel %vm15347_vm6, %v15349_v52, %v2511_v7  ;;  %vm3325_vm6 = vcmp.gt.f32.partialorder %v10463_v14, 0.0 }
 0x264   :  { %7962 = vpow2.f32 %v3421_v18  ;;  %v2373_v12 = vadd.f32 %v2372_v25, %v2067_v36  ;;  %7802 = vrot.lane.b32.xlu2 %v7801_v37, %s8195_s19  ;;  %v2841_v18 = vpack.c.bf16 %v2784_v10, %v2569_v31  ;;  %v4677_v25 = vrot.slane %v10292_v30, 7  ;;  %v7773_v10 = vpop.permute.xlu2 %7772 }
 0x265   :  { %6956 = vmatmul.msk.bf16.gmra.mxu1 %vm15350_vm3, %v1463_v29  ;;  %v3597_v36 = vmul.f32 1.6732632, %v7055_v20  ;;  %vm15352_vm3 = vmmov %vm15351_vm2  ;;  %v14724_v29 = vrot.slane %v10296_v61, 7 }
 0x266   :  { %v3189_v1 = vadd.f32 %v3061_v44, %v2373_v12  ;;  %v7768_v60 = vpop.permute.xlu1 %7767  ;;  %v10537_v12 = vpop.f32.mrf.mxu3 }
 0x267   :  { %v7770_v32 = vunpack.i.h.bf16 %v7768_v60  ;;  %v7769_v62 = vunpack.i.l.bf16 %v7768_v60  ;;  %15355 = vst [vmem:[#allocation124_spill] sm:$0xff] %v10537_v12 }
 0x268   :  { %v10517_v37 = vadd.f32 %v10378_v38, %v3189_v1  ;;  %6906 = vmatmul.msk.bf16.gmra.mxu0 %vm15351_vm2, %v1846_v23 }
 0x269   :  { %v10524_v44 = vsel %vm15353_vm7, %v10075_v46, %v7769_v62  ;;  %v10528_v7 = vsel %vm15354_vm9, %v10077_v53, %v7770_v32  ;;  %v3665_v46 = vsel %vm3325_vm6, %v10463_v14, %v3597_v36  ;;  %vm3326_vm7 = vcmp.gt.f32.partialorder %v3258_v17, 0.0 }
 0x26a   :  { %7014 = vmatmul.msk.bf16.gmra.mxu2 %vm15352_vm3, %v2841_v18  ;;  %v7963_v9 = vpop.eup %7962  ;;  %v3423_v1 = vmul.f32 1.442695, %v10517_v37  ;;  %v4116_v23 = vpack.c.bf16 %v10528_v7, %v10524_v44  ;;  %v10539_v60 = vmul.f32 1.050701, %v3665_v46  ;;  %vm15356_vm9 = vcmp.lt.s32.totalorder %v8564_v11, 1  ;;  %v3066_v46 = vpop.f32.mrf.mxu2 }
 0x26b   :  { %v2374_v49 = vpop.f32.mrf.mxu1  ;;  %v7056_v20 = vadd.f32 -1.0, %v7963_v9  ;;  %v10545_v62 = vsel %vm15356_vm9, %v4677_v25, %v14724_v29  ;;  %v15357_v14 = vrot.slane %v10208_v35, 7  ;;  %vm15358_vm2 = vmmov %vm15356_vm9  ;;  %vm15361_vm6 = vcmp.lt.s32.totalorder %v8564_v11, 7  ;;  %v2072_v35 = vpop.f32.mrf.mxu0  ;;  %v8079_v9 = vld [vmem:[%s14456_s0 + $0x8] sm:$0xff]  ;;  %v8080_v29 = vld [vmem:[%s14456_s0] sm:$0xff] }
 0x26c   :  { %7964 = vpow2.f32 %v3423_v1  ;;  %v2375_v53 = vadd.f32 %v2374_v49, %v2069_v55  ;;  %v15360_v55 = vrot.slane %v10292_v30, 1  ;;  %v7774_v49 = vunpack.i.l.bf16 %v7773_v10  ;;  %vm15365_vm9 = vmmov %vm15352_vm3 }
 0x26d   :  { %v3598_v52 = vmul.f32 1.6732632, %v7056_v20  ;;  %v10551_v18 = vsel %vm15358_vm2, %v15357_v14, %v4677_v25  ;;  %v15362_v1 = vpack.c.bf16 %v8594_v28, %v8580_v41 }
 0x26e   :  { %4534 = vmatmul.bf16.gmra.mxu3 %v4116_v23  ;;  %v3190_v31 = vadd.f32 %v3063_v26, %v2375_v53  ;;  %15359 = vst [vmem:[#allocation125_spill] sm:$0xff] %v10551_v18  ;;  %v10559_v36 = vsel %vm15361_vm6, %v15360_v55, %v14725_v2  ;;  %v14726_v23 = vrot.slane %v10457_v48, 7  ;;  %v5707_v53 = vrot.slane %v10453_v33, 1 }
 0x26f   :  { %v3666_v32 = vsel %vm3326_vm7, %v3258_v17, %v3598_v52  ;;  %v14727_v52 = vrot.slane %v10457_v48, 1  ;;  %v4149_v2 = vpack.c.bf16 %v8079_v9, %v8080_v29  ;;  %vm15364_vm7 = vmmov %vm15352_vm3  ;;  %v15366_v29 = vrot.slane %v10453_v33, 7  ;;  %v7573_v9 = vld [vmem:[%s14460_s2 + $0x30] sm:$0xff] }
 0x270   :  { %v3260_v17 = vadd.f32 %v10378_v38, %v3190_v31  ;;  %v10562_v26 = vmul.f32 1.050701, %v3666_v32  ;;  %v7775_v31 = vunpack.i.h.bf16 %v7773_v10  ;;  %v10583_v10 = vpop.f32.mrf.mxu3  ;;  %5469 = vmatpush.bf16.msra.mxu1 %v7573_v9  ;;  %v15371_v18 = vrot.slane %v8556_v63, 1 }
 0x271   :  { %15363 = vst [vmem:[#allocation126_spill] sm:$0xff] %v10583_v10  ;;  %v10599_v41 = vsel %vm15358_vm2, %v15366_v29, %v14726_v23  ;;  %v10605_v28 = vsel %vm15361_vm6, %v5707_v53, %v14727_v52  ;;  %v5706_v10 = vrot.slane %v10391_v57, 1  ;;  %v15378_v9 = vmov 0 }
 0x272   :  { %v7965_v25 = vpop.eup %7964  ;;  %v3425_v20 = vmul.f32 1.442695, %v3260_v17  ;;  %v7806_v30 = vpack.i.bf16 %v10562_v26, %v10539_v60  ;;  %15367 = vst [vmem:[#allocation127_spill] sm:$0xff] %v10599_v41  ;;  %vm3328_vm2 = vcmp.gt.f32.partialorder %v3260_v17, 0.0  ;;  %v3068_v12 = vpop.f32.mrf.mxu2 }
 0x273   :  { %v2377_v32 = vpop.f32.mrf.mxu1  ;;  %v7057_v14 = vadd.f32 -1.0, %v7965_v25  ;;  %15368 = vst [vmem:[#allocation128_spill] sm:$0xff] %v10605_v28 }
 0x274   :  { %7966 = vpow2.f32 %v3425_v20  ;;  %v2378_v55 = vadd.f32 %v2377_v32, %v2072_v35  ;;  %7807 = vrot.lane.b32.xlu0 %v7806_v30, %s8195_s19  ;;  %v10587_v35 = vsel %vm15364_vm7, %v10109_v13, %v7774_v49  ;;  %v10591_v20 = vsel %vm15365_vm9, %v10117_v24, %v7775_v31  ;;  %v15370_v49 = vld [vmem:[#allocation11_spill] sm:$0xff] }
 0x275   :  { %6957 = vmatmul.msk.bf16.gmra.mxu1 %vm15352_vm3, %v15362_v1  ;;  %v3599_v30 = vmul.f32 1.6732632, %v7057_v14  ;;  %vm15369_vm3 = vcmask 261120   ;;  %vm3327_vm7 = vcmp.gt.f32.partialorder %v10517_v37, 0.0  ;;  %v65_v24 = vadd.s32 344, %v8564_v11  ;;  %v2074_v14 = vpop.f32.mrf.mxu0 }
 0x276   :  { %v3191_v25 = vadd.f32 %v3066_v46, %v2378_v55  ;;  %v2515_v46 = vrot.slane %v15370_v49, 1  ;;  %v4679_v31 = vrot.slane %v10387_v15, 7  ;;  %v4680_v55 = vrot.slane %v10391_v57, 7 }
 0x277   :  { %v3667_v23 = vsel %vm3327_vm7, %v10517_v37, %v3599_v30  ;;  %v395_v45 = vand.u32 15, %v65_v24  ;;  %v15372_v37 = vrot.slane %v10296_v61, 1  ;;  %vm15374_vm7 = vcmp.lt.s32.totalorder %v8564_v11, 1 }
 0x278   :  { %v10608_v13 = vadd.f32 %v10378_v38, %v3191_v25  ;;  %7125 = vmatmul.msk.bf16.vlgmr.msrb.gmra.mxu0 %vm15369_vm3, %v4149_v2  ;;  %v4117_v2 = vpack.c.bf16 %v10591_v20, %v10587_v35  ;;  %v10627_v39 = vmul.f32 1.050701, %v3667_v23  ;;  %vm15373_vm3 = vmmov %vm15361_vm6  ;;  %v10641_v57 = vsel %vm15374_vm7, %v4679_v31, %v4680_v55 }
 0x27a   :  { %7015 = vmatmul.msk.bf16.gmra.mxu2 %vm15365_vm9, %v9121_v43  ;;  %v7967_v1 = vpop.eup %7966  ;;  %v3427_v32 = vmul.f32 1.442695, %v10608_v13  ;;  %v5705_v43 = vrot.slane %v10387_v15, 1  ;;  %v2564_v15 = vsel %vm15361_vm6, %v2515_v46, %v15371_v18  ;;  %vm15376_vm9 = vmmov %vm15374_vm7 }
 0x27b   :  { %v2379_v25 = vpop.f32.mrf.mxu1  ;;  %v7058_v29 = vadd.f32 -1.0, %v7967_v1  ;;  %vm15381_vm6 = vmmov %vm15373_vm3 }
 0x27c   :  { %7968 = vpow2.f32 %v3427_v32  ;;  %v2380_v52 = vadd.f32 %v2379_v25, %v2074_v14  ;;  %v10637_v30 = vsel %vm15373_vm3, %v15372_v37, %v5705_v43 }
 0x27d   :  { %v3600_v8 = vmul.f32 1.6732632, %v7058_v29  ;;  %v15385_v29 = vrot.slane %v8646_v56, 1 }
 0x27e   :  { %4539 = vmatmul.bf16.gmra.mxu3 %v4117_v2  ;;  %v3192_v40 = vadd.f32 %v3068_v12, %v2380_v52  ;;  %v15375_v12 = vrot.slane %v10296_v61, 7  ;;  %v10649_v52 = vpop.f32.mrf.mxu3  ;;  %v10664_v61 = vsel %vm15381_vm6, %v5706_v10, %v5707_v53  ;;  %v1465_v53 = vpack.c.bf16 %v15370_v49, %v8646_v56 }
 0x27f   :  { %v3668_v1 = vsel %vm3328_vm2, %v3260_v17, %v3600_v8  ;;  %15377 = vst [vmem:[#allocation11_spill] sm:$0xff] %v10649_v52  ;;  %vm10658_vm2 = vcmp.ne.s32.totalorder %v395_v45, 15  ;;  %vm15387_vm6 = vcmask 523264  }
 0x280   :  { %v10647_v23 = vsel %vm15376_vm9, %v15375_v12, %v4679_v31  ;;  %v3262_v8 = vadd.f32 %v10378_v38, %v3192_v40  ;;  %v10652_v18 = vmul.f32 1.050701, %v3668_v1  ;;  %v15379_v9 = vsel %vm10658_vm2, 4294967295, %v15378_v9  ;;  %vm15386_vm9 = vmmov %vm15373_vm3 }
 0x281   :  { %15380 = vst [vmem:[#allocation129_spill] sm:$0xff] %v15379_v9  ;;  %v10668_v31 = vsel %vm15373_vm3, %v5705_v43, %v5706_v10  ;;  %v15383_v40 = vrot.slane %v10453_v33, 7  ;;  %v8081_v33 = vld [vmem:[%s14456_s0 + $0x10] sm:$0xff]  ;;  %v2565_v49 = vsel %vm15386_vm9, %v15385_v29, %v2515_v46  ;;  %v2788_v1 = vsel %vm10658_vm2, %v2564_v15, 0.0  ;;  %vm15390_vm13 = vmmov %vm15387_vm6 }
 0x282   :  { %15382 = vst [vmem:[#allocation130_spill] sm:$0xff] %v10668_v31  ;;  %v7969_v2 = vpop.eup %7968  ;;  %v3429_v14 = vmul.f32 1.442695, %v3262_v8  ;;  %v7811_v45 = vpack.i.bf16 %v10652_v18, %v10627_v39  ;;  %vm15388_vm3 = vcmask 261120   ;;  %vm15391_vm9 = vmmov %vm15387_vm6 }
 0x283   :  { %v10674_v32 = vsel %vm15374_vm7, %v4680_v55, %v15383_v40  ;;  %v8082_v55 = vld [vmem:[%s14456_s0 + $0x18] sm:$0xff]  ;;  %v7059_v37 = vadd.f32 -1.0, %v7969_v2  ;;  %vm15389_vm7 = vmmov %vm15387_vm6 }
 0x284   :  { %15384 = vst [vmem:[#allocation131_spill] sm:$0xff] %v10674_v32  ;;  %7970 = vpow2.f32 %v3429_v14  ;;  %7812 = vrot.lane.b32.xlu1 %v7811_v45, %s8195_s19  ;;  %v4150_v43 = vpack.c.bf16 %v8082_v55, %v8081_v33  ;;  %v2843_v45 = vpack.c.bf16 %v2788_v1, %v2565_v49 }
 0x285   :  { %6958 = vmatmul.msk.bf16.gmra.mxu1 %vm15387_vm6, %v1465_v53  ;;  %v3601_v15 = vmul.f32 1.6732632, %v7059_v37  ;;  %vm3329_vm6 = vcmp.gt.f32.partialorder %v10608_v13, 0.0 }
 0x286   :  { %v7778_v12 = vpop.permute.xlu0 %7777  ;;  %v10708_v53 = vpop.f32.mrf.mxu3 }
 0x287   :  { %v7780_v40 = vunpack.i.h.bf16 %v7778_v12  ;;  %v7779_v14 = vunpack.i.l.bf16 %v7778_v12  ;;  %15392 = vst [vmem:[#allocation132_spill] sm:$0xff] %v10708_v53  ;;  %v3669_v29 = vsel %vm3329_vm6, %v10608_v13, %v3601_v15  ;;  %v8083_v12 = vld [vmem:[%s14456_s0 + $0x28] sm:$0xff]  ;;  %v8084_v13 = vld [vmem:[%s14456_s0 + $0x20] sm:$0xff]  ;;  %v15443_v53 = vrot.slane %v10591_v20, 1 }
 0x288   :  { %7126 = vmatmul.msk.bf16.gmra.mxu0 %vm15388_vm3, %v4150_v43  ;;  %v10714_v49 = vmul.f32 1.050701, %v3669_v29  ;;  %vm15395_vm3 = vmmov %vm15389_vm7  ;;  %v7583_v29 = vld [vmem:[%s14460_s2 + $0xb0] sm:$0xff] }
 0x289   :  { %v10702_v56 = vsel %vm15390_vm13, %v10163_v59, %v7779_v14  ;;  %v10706_v46 = vsel %vm15391_vm9, %v10166_v42, %v7780_v40  ;;  %vm3330_vm13 = vcmp.gt.f32.partialorder %v3262_v8, 0.0  ;;  %v15394_v40 = vpack.c.bf16 %v8560_v3, %v8556_v63  ;;  %vm15397_vm9 = vmmov %vm15395_vm3  ;;  %6497 = vmatpush.bf16.msra.mxu3 %v7583_v29 }
 0x28a   :  { %7016 = vmatmul.msk.bf16.gmra.mxu2 %vm15389_vm7, %v2843_v45  ;;  %v7971_v33 = vpop.eup %7970  ;;  %v4118_v2 = vpack.c.bf16 %v10706_v46, %v10702_v56  ;;  %v4685_v14 = vrot.slane %v10587_v35, 7  ;;  %v14739_v45 = vrot.slane %v10591_v20, 7  ;;  %vm15396_vm7 = vcmask 261120   ;;  %vm15398_vm6 = vmmov %vm15395_vm3 }
 0x28b   :  { %v7060_v55 = vadd.f32 -1.0, %v7971_v33  ;;  %v5711_v33 = vrot.slane %v10587_v35, 1  ;;  %v69_v35 = vadd.s32 376, %v8564_v11  ;;  %v15405_v29 = vrot.slane %v10457_v48, 1 }
 0x28d   :  { %v3602_v43 = vmul.f32 1.6732632, %v7060_v55 }
 0x28e   :  { %4544 = vmatmul.bf16.gmra.mxu3 %v4118_v2  ;;  %v10720_v37 = vpop.f32.mrf.mxu3  ;;  %v14740_v2 = vrot.slane %v10591_v20, 1 }
 0x28f   :  { %v3670_v59 = vsel %vm3330_vm13, %v3262_v8, %v3602_v43  ;;  %15393 = vst [vmem:[#allocation133_spill] sm:$0xff] %v10720_v37  ;;  %v4151_v8 = vpack.c.bf16 %v8083_v12, %v8084_v13  ;;  %vm15399_vm13 = vmmov %vm15395_vm3  ;;  %v5710_v13 = vrot.slane %v10528_v7, 1 }
 0x290   :  { %v10716_v42 = vmul.f32 1.050701, %v3670_v59  ;;  %v4683_v59 = vrot.slane %v10524_v44, 7 }
 0x292   :  { %v7816_v1 = vpack.i.bf16 %v10716_v42, %v10714_v49 }
 0x294   :  { %7817 = vrot.lane.b32.xlu2 %v7816_v1, %s8195_s19  ;;  %v4684_v1 = vrot.slane %v10528_v7, 7  ;;  %v423_v7 = vand.u32 15, %v69_v35 }
 0x295   :  { %6959 = vmatmul.msk.bf16.gmra.mxu1 %vm15395_vm3, %v15394_v40  ;;  %vm15400_vm3 = vcmp.lt.s32.totalorder %v8564_v11, 1  ;;  %v2519_v40 = vrot.slane %v8821_v47, 1 }
 0x296   :  { %v7783_v15 = vpop.permute.xlu1 %7782 }
 0x297   :  { %v7785_v55 = vunpack.i.h.bf16 %v7783_v15  ;;  %v7784_v43 = vunpack.i.l.bf16 %v7783_v15  ;;  %v2077_v15 = vpop.f32.mrf.mxu0 }
 0x298   :  { %7127 = vmatmul.msk.bf16.gmra.mxu0 %vm15396_vm7, %v4151_v8  ;;  %vm15402_vm7 = vcmp.lt.s32.totalorder %v8564_v11, 7 }
 0x299   :  { %v10745_v63 = vsel %vm15398_vm6, %v10194_v22, %v7784_v43  ;;  %v10749_v3 = vsel %vm15399_vm13, %v10199_v50, %v7785_v55  ;;  %v2382_v22 = vpop.f32.mrf.mxu1  ;;  %v10762_v50 = vsel %vm15400_vm3, %v4685_v14, %v14739_v45  ;;  %v10768_v8 = vsel %vm15402_vm7, %v5711_v33, %v14740_v2  ;;  %v10772_v55 = vpop.f32.mrf.mxu3  ;;  %vm15408_vm6 = vmmov %vm15400_vm3  ;;  %v8086_v2 = vld [vmem:[%s14456_s0 + $0x38] sm:$0xff] }
 0x29a   :  { %7017 = vmatmul.msk.bf16.gmra.mxu2 %vm15397_vm9, %v9169_v19  ;;  %v4119_v12 = vpack.c.bf16 %v10749_v3, %v10745_v63  ;;  %v5709_v19 = vrot.slane %v10524_v44, 1  ;;  %15401 = vst [vmem:[#allocation134_spill] sm:$0xff] %v10762_v50  ;;  %v2520_v44 = vrot.slane %v8896_v21, 1  ;;  %v2383_v43 = vadd.f32 %v2382_v22, %v2077_v15  ;;  %vm15406_vm9 = vmmov %vm15402_vm7  ;;  %v7788_v22 = vpop.permute.xlu2 %7787 }
 0x29b   :  { %15403 = vst [vmem:[#allocation135_spill] sm:$0xff] %v10768_v8  ;;  %v10782_v25 = vsel %vm15408_vm6, %v4683_v59, %v4684_v1  ;;  %vm15411_vm13 = vmmov %vm15400_vm3  ;;  %v7789_v45 = vunpack.i.l.bf16 %v7788_v22  ;;  %v15474_v8 = vrot.slane %v10706_v46, 7 }
 0x29c   :  { %15404 = vst [vmem:[#allocation136_spill] sm:$0xff] %v10772_v55  ;;  %v10778_v10 = vsel %vm15406_vm9, %v15405_v29, %v5709_v19  ;;  %vm15413_vm3 = vmmov %vm15402_vm7  ;;  %v15423_v55 = vrot.slane %v8825_v27, 1 }
 0x29d   :  { %15407 = vst [vmem:[#allocation137_spill] sm:$0xff] %v10778_v10  ;;  %v10792_v35 = vsel %vm15413_vm3, %v5710_v13, %v5711_v33  ;;  %vm15415_vm7 = vmmov %vm15413_vm3  ;;  %v8123_v10 = vld [vmem:[%s14456_s0 + $0x138] sm:$0xff] }
 0x29e   :  { %4549 = vmatmul.bf16.gmra.mxu3 %v4119_v12  ;;  %15409 = vst [vmem:[#allocation138_spill] sm:$0xff] %v10782_v25  ;;  %v15410_v12 = vrot.slane %v10457_v48, 7  ;;  %v10800_v17 = vsel %vm15415_vm7, %v5709_v19, %v5710_v13  ;;  %vm15417_vm9 = vmmov %vm15408_vm6  ;;  %vm10806_vm6 = vcmp.ne.s32.totalorder %v423_v7, 15  ;;  %v7790_v13 = vunpack.i.h.bf16 %v7788_v22  ;;  %v8085_v7 = vld [vmem:[%s14456_s0 + $0x30] sm:$0xff] }
 0x29f   :  { %15414 = vst [vmem:[#allocation140_spill] sm:$0xff] %v10792_v35  ;;  %v10804_v48 = vsel %vm15417_vm9, %v4684_v1, %v4685_v14  ;;  %v1467_v14 = vpack.c.bf16 %v8821_v47, %v8825_v27  ;;  %v4152_v15 = vpack.c.bf16 %v8086_v2, %v8085_v7  ;;  %vm15424_vm7 = vcmask 523264   ;;  %v15535_v35 = vld [vmem:[#allocation52_spill] sm:$0xff] }
 0x2a0   :  { %v10788_v24 = vsel %vm15411_vm13, %v15410_v12, %v4683_v59  ;;  %15416 = vst [vmem:[#allocation141_spill] sm:$0xff] %v10800_v17  ;;  %v15419_v12 = vmov 0  ;;  %vm15422_vm13 = vmmov %vm15413_vm3 }
 0x2a1   :  { %15412 = vst [vmem:[#allocation139_spill] sm:$0xff] %v10788_v24  ;;  %v3071_v59 = vpop.f32.mrf.mxu2  ;;  %v15420_v12 = vsel %vm10806_vm6, 4294967295, %v15419_v12  ;;  %v2560_v33 = vsel %vm15422_vm13, %v2519_v40, %v2520_v44  ;;  %v2384_v47 = vpop.f32.mrf.mxu1  ;;  %vm15425_vm9 = vmmov %vm15424_vm7 }
 0x2a2   :  { %15418 = vst [vmem:[#allocation142_spill] sm:$0xff] %v10804_v48  ;;  %v3193_v19 = vadd.f32 %v3071_v59, %v2383_v43  ;;  %v2561_v43 = vsel %vm15413_vm3, %v15423_v55, %v2519_v40  ;;  %v2792_v22 = vsel %vm10806_vm6, %v2560_v33, 0.0  ;;  %v10834_v37 = vsel %vm15425_vm9, %v10254_v6, %v7789_v45  ;;  %vm15426_vm13 = vmmov %vm15424_vm7  ;;  %v10840_v27 = vpop.f32.mrf.mxu3  ;;  %v15504_v48 = vld [vmem:[#allocation8_spill] sm:$0xff] }
 0x2a3   :  { %15421 = vst [vmem:[#allocation143_spill] sm:$0xff] %v15420_v12  ;;  %v2845_v29 = vpack.c.bf16 %v2792_v22, %v2561_v43  ;;  %v10838_v2 = vsel %vm15426_vm13, %v10257_v4, %v7790_v13  ;;  %vm15428_vm3 = vcmask 261120   ;;  %vm15429_vm6 = vmmov %vm15424_vm7  ;;  %v71_v33 = vadd.s32 392, %v8564_v11 }
 0x2a4   :  { %v3263_v1 = vadd.f32 %v10378_v38, %v3193_v19  ;;  %v2079_v19 = vpop.f32.mrf.mxu0  ;;  %15427 = vst [vmem:[#allocation144_spill] sm:$0xff] %v10840_v27  ;;  %v4120_v6 = vpack.c.bf16 %v10838_v2, %v10834_v37  ;;  %v2521_v4 = vrot.slane %v8915_v0, 1  ;;  %v14743_v13 = vrot.slane %v8986_v16, 1  ;;  %vm15436_vm2 = vmmov %vm15426_vm13 }
 0x2a5   :  { %6960 = vmatmul.msk.bf16.gmra.mxu1 %vm15424_vm7, %v1467_v14  ;;  %v2385_v40 = vadd.f32 %v2384_v47, %v2079_v19  ;;  %v437_v7 = vand.u32 15, %v71_v33  ;;  %v1468_v19 = vpack.c.bf16 %v8915_v0, %v8896_v21  ;;  %v15459_v12 = vrot.slane %v10838_v2, 7 }
 0x2a6   :  { %v3431_v59 = vmul.f32 1.442695, %v3263_v1 }
 0x2a7   :  { %vm10850_vm7 = vcmp.ne.s32.totalorder %v437_v7, 15 }
 0x2a8   :  { %7128 = vmatmul.msk.bf16.gmra.mxu0 %vm15428_vm3, %v4152_v15  ;;  %7972 = vpow2.f32 %v3431_v59 }
 0x2a9   :  { %v3073_v55 = vpop.f32.mrf.mxu2 }
 0x2aa   :  { %7018 = vmatmul.msk.bf16.gmra.mxu2 %vm15429_vm6, %v2845_v29  ;;  %v3194_v14 = vadd.f32 %v3073_v55, %v2385_v40  ;;  %v15430_v29 = vmov 0  ;;  %vm15433_vm6 = vcmp.lt.s32.totalorder %v8564_v11, 7  ;;  %v10858_v47 = vpop.f32.mrf.mxu3  ;;  %v8087_v40 = vld [vmem:[%s14456_s0 + $0x48] sm:$0xff]  ;;  %v8088_v55 = vld [vmem:[%s14456_s0 + $0x40] sm:$0xff] }
 0x2ab   :  { %v15431_v29 = vsel %vm10850_vm7, 4294967295, %v15430_v29  ;;  %v2558_v22 = vsel %vm15433_vm6, %v2521_v4, %v14743_v13  ;;  %15434 = vst [vmem:[#allocation146_spill] sm:$0xff] %v10858_v47  ;;  %v4153_v33 = vpack.c.bf16 %v8087_v40, %v8088_v55  ;;  %vm15435_vm9 = vmmov %vm15433_vm6  ;;  %vm3331_vm6 = vcmp.gt.f32.partialorder %v3263_v1, 0.0  ;;  %v15440_v55 = vld [vmem:[#allocation37_spill] sm:$0xff] }
 0x2ac   :  { %v3264_v45 = vadd.f32 %v10378_v38, %v3194_v14  ;;  %15432 = vst [vmem:[#allocation145_spill] sm:$0xff] %v15431_v29  ;;  %v2559_v14 = vsel %vm15435_vm9, %v2520_v44, %v2521_v4  ;;  %v73_v44 = vadd.s32 408, %v8564_v11  ;;  %vm15437_vm9 = vmmov %vm15436_vm2 }
 0x2ae   :  { %4554 = vmatmul.bf16.gmra.mxu3 %v4120_v6  ;;  %v3433_v43 = vmul.f32 1.442695, %v3264_v45  ;;  %v7973_v15 = vpop.eup %7972  ;;  %v2794_v6 = vsel %vm10850_vm7, %v2558_v22, 0.0  ;;  %v15438_v22 = vld [vmem:[#allocation109_spill] sm:$0xff] }
 0x2af   :  { %v7061_v59 = vadd.f32 -1.0, %v7973_v15  ;;  %v2846_v15 = vpack.c.bf16 %v2794_v6, %v2559_v14  ;;  %v2523_v14 = vrot.slane %v15440_v55, 1  ;;  %v5713_v6 = vrot.slane %v10702_v56, 1 }
 0x2b0   :  { %7974 = vpow2.f32 %v3433_v43 }
 0x2b1   :  { %v3603_v43 = vmul.f32 1.6732632, %v7061_v59 }
 0x2b5   :  { %6961 = vmatmul.msk.bf16.gmra.mxu1 %vm15426_vm13, %v1468_v19  ;;  %vm15439_vm13 = vmmov %vm15436_vm2  ;;  %v3671_v19 = vsel %vm3331_vm6, %v3263_v1, %v3603_v43  ;;  %vm15446_vm6 = vcmp.lt.s32.totalorder %v8564_v11, 1 }
 0x2b6   :  { %v7975_v7 = vpop.eup %7974  ;;  %v3739_v1 = vmul.f32 1.050701, %v3671_v19 }
 0x2b7   :  { %v7062_v21 = vadd.f32 -1.0, %v7975_v7  ;;  %v7793_v0 = vpop.permute.xlu0 %7792  ;;  %v4687_v7 = vrot.slane %v10702_v56, 7  ;;  %v15456_v56 = vrot.slane %v8986_v16, 1 }
 0x2b8   :  { %v7795_v13 = vunpack.i.h.bf16 %v7793_v0  ;;  %v7794_v47 = vunpack.i.l.bf16 %v7793_v0  ;;  %7129 = vmatmul.msk.bf16.gmra.mxu0 %vm15428_vm3, %v4153_v33  ;;  %vm3332_vm3 = vcmp.gt.f32.partialorder %v3264_v45, 0.0 }
 0x2b9   :  { %v3604_v40 = vmul.f32 1.6732632, %v7062_v21  ;;  %v14747_v21 = vrot.slane %v10706_v46, 7 }
 0x2ba   :  { %7019 = vmatmul.msk.bf16.gmra.mxu2 %vm15436_vm2, %v2846_v15  ;;  %v10878_v4 = vsel %vm15437_vm9, %v10267_v54, %v7794_v47  ;;  %v10882_v59 = vsel %vm15439_vm13, %v15438_v22, %v7795_v13  ;;  %v5714_v54 = vrot.slane %v10706_v46, 1  ;;  %v10891_v47 = vpop.f32.mrf.mxu3  ;;  %v15442_v13 = vld [vmem:[#allocation43_spill] sm:$0xff]  ;;  %v451_v22 = vand.u32 15, %v73_v44  ;;  %vm15449_vm9 = vmmov %vm15446_vm6 }
 0x2bb   :  { %v4121_v33 = vpack.c.bf16 %v10882_v59, %v10878_v4  ;;  %15441 = vst [vmem:[#allocation109_spill] sm:$0xff] %v10891_v47  ;;  %v3672_v0 = vsel %vm3332_vm3, %v3264_v45, %v3604_v40  ;;  %v14746_v15 = vrot.slane %v15442_v13, 1  ;;  %vm15444_vm2 = vcmp.lt.s32.totalorder %v8564_v11, 7 }
 0x2bc   :  { %v3740_v43 = vmul.f32 1.050701, %v3672_v0  ;;  %v10898_v52 = vsel %vm15444_vm2, %v15443_v53, %v5713_v6  ;;  %v10906_v45 = vsel %vm15446_vm6, %v4687_v7, %v14747_v21  ;;  %v15448_v40 = vrot.slane %v10591_v20, 7  ;;  %vm15451_vm13 = vmmov %vm15444_vm2 }
 0x2bd   :  { %15445 = vst [vmem:[#allocation37_spill] sm:$0xff] %v10898_v52  ;;  %v10916_v19 = vsel %vm15451_vm13, %v5713_v6, %v5714_v54  ;;  %vm10919_vm3 = vcmp.ne.s32.totalorder %v451_v22, 15  ;;  %v2556_v20 = vsel %vm15444_vm2, %v2523_v14, %v14746_v15  ;;  %v1469_v0 = vpack.c.bf16 %v15440_v55, %v8986_v16  ;;  %v8089_v22 = vld [vmem:[%s14456_s0 + $0x58] sm:$0xff]  ;;  %vm15457_vm6 = vmmov %vm15444_vm2 }
 0x2be   :  { %4559 = vmatmul.bf16.gmra.mxu3 %v4121_v33  ;;  %v7821_v27 = vpack.i.bf16 %v3740_v43, %v3739_v1  ;;  %15447 = vst [vmem:[#allocation43_spill] sm:$0xff] %v10906_v45  ;;  %v10912_v44 = vsel %vm15449_vm9, %v15448_v40, %v4687_v7  ;;  %v15453_v33 = vmov 0  ;;  %v4691_v6 = vrot.slane %v10834_v37, 7  ;;  %v8090_v40 = vld [vmem:[%s14456_s0 + $0x50] sm:$0xff] }
 0x2bf   :  { %15450 = vst [vmem:[#allocation147_spill] sm:$0xff] %v10912_v44  ;;  %v15454_v33 = vsel %vm10919_vm3, 4294967295, %v15453_v33  ;;  %v5717_v1 = vrot.slane %v10834_v37, 1  ;;  %v4154_v7 = vpack.c.bf16 %v8089_v22, %v8090_v40  ;;  %v2557_v55 = vsel %vm15457_vm6, %v15456_v56, %v2523_v14 }
 0x2c0   :  { %15452 = vst [vmem:[#allocation148_spill] sm:$0xff] %v10916_v19  ;;  %7822 = vrot.lane.b32.xlu0 %v7821_v27, %s8195_s19  ;;  %v2796_v15 = vsel %vm10919_vm3, %v2556_v20, 0.0  ;;  %vm15458_vm9 = vcmask 523264   ;;  %vm15460_vm13 = vcmp.lt.s32.totalorder %v8564_v11, 1  ;;  %v15462_v16 = vrot.slane %v10838_v2, 1 }
 0x2c1   :  { %v2387_v53 = vpop.f32.mrf.mxu1  ;;  %15455 = vst [vmem:[#allocation149_spill] sm:$0xff] %v15454_v33  ;;  %v2847_v29 = vpack.c.bf16 %v2796_v15, %v2557_v55  ;;  %v10954_v22 = vsel %vm15460_vm13, %v4691_v6, %v15459_v12  ;;  %vm15464_vm6 = vcmask 261120   ;;  %v75_v15 = vadd.s32 424, %v8564_v11  ;;  %vm15466_vm3 = vmmov %vm15458_vm9  ;;  %v15467_v12 = vld [vmem:[#allocation115_spill] sm:$0xff] }
 0x2c2   :  { %v10948_v21 = vpop.f32.mrf.mxu3  ;;  %15461 = vst [vmem:[#allocation150_spill] sm:$0xff] %v10954_v22  ;;  %v10960_v14 = vsel %vm15444_vm2, %v5717_v1, %v15462_v16  ;;  %vm15468_vm13 = vmmov %vm15466_vm3  ;;  %v4690_v16 = vrot.slane %v10749_v3, 7  ;;  %v4693_v19 = vrot.slane %v10878_v4, 7 }
 0x2c3   :  { %15463 = vst [vmem:[#allocation151_spill] sm:$0xff] %v10960_v14  ;;  %v465_v47 = vand.u32 15, %v75_v15 }
 0x2c5   :  { %v2082_v37 = vpop.f32.mrf.mxu0  ;;  %6962 = vmatmul.msk.bf16.gmra.mxu1 %vm15458_vm9, %v1469_v0  ;;  %v15465_v0 = vld [vmem:[#allocation113_spill] sm:$0xff] }
 0x2c6   :  { %v2388_v43 = vadd.f32 %v2387_v53, %v2082_v37  ;;  %v4689_v37 = vrot.slane %v10745_v63, 7 }
 0x2c7   :  { %v7798_v27 = vpop.permute.xlu1 %7797 }
 0x2c8   :  { %v7800_v56 = vunpack.i.h.bf16 %v7798_v27  ;;  %v7799_v20 = vunpack.i.l.bf16 %v7798_v27  ;;  %7130 = vmatmul.msk.bf16.gmra.mxu0 %vm15464_vm6, %v4154_v7  ;;  %v5715_v27 = vrot.slane %v10745_v63, 1  ;;  %v5716_v7 = vrot.slane %v10749_v3, 1 }
 0x2c9   :  { %v2389_v53 = vpop.f32.mrf.mxu1 }
 0x2ca   :  { %7020 = vmatmul.msk.bf16.gmra.mxu2 %vm15458_vm9, %v2847_v29  ;;  %v10967_v40 = vsel %vm15466_vm3, %v15465_v0, %v7799_v20  ;;  %v10971_v55 = vsel %vm15468_vm13, %v15467_v12, %v7800_v56  ;;  %v7572_v20 = vld [vmem:[%s14460_s2 + $0x28] sm:$0xff]  ;;  %v10985_v44 = vpop.f32.mrf.mxu3  ;;  %vm15470_vm3 = vmmov %vm15444_vm2  ;;  %vm15472_vm2 = vcmp.lt.s32.totalorder %v8564_v11, 1 }
 0x2cb   :  { %v4122_v29 = vpack.c.bf16 %v10971_v55, %v10967_v40  ;;  %v15469_v0 = vld [vmem:[#allocation35_spill] sm:$0xff]  ;;  %5470 = vmatpush.bf16.msra.mxu1 %v7572_v20  ;;  %v10989_v45 = vsel %vm15470_vm3, %v5714_v54, %v5715_v27  ;;  %v10993_v3 = vsel %vm15472_vm2, %v4689_v37, %v4690_v16  ;;  %vm15475_vm6 = vmmov %vm15472_vm2  ;;  %vm11017_vm2 = vcmp.ne.s32.totalorder %v465_v47, 15 }
 0x2cc   :  { %v2525_v9 = vrot.slane %v15469_v0, 1  ;;  %15471 = vst [vmem:[#allocation113_spill] sm:$0xff] %v10989_v45  ;;  %vm15477_vm9 = vmmov %vm15470_vm3  ;;  %v15483_v20 = vmov 0  ;;  %v4696_v14 = vrot.slane %v10971_v55, 7 }
 0x2cd   :  { %v3076_v33 = vpop.f32.mrf.mxu2  ;;  %v2084_v12 = vpop.f32.mrf.mxu0  ;;  %15473 = vst [vmem:[#allocation115_spill] sm:$0xff] %v10993_v3  ;;  %v11007_v54 = vsel %vm15477_vm9, %v5716_v7, %v5717_v1  ;;  %vm15479_vm13 = vmmov %vm15470_vm3  ;;  %v15484_v20 = vsel %vm11017_vm2, 4294967295, %v15483_v20  ;;  %v11025_v1 = vsel %vm15475_vm6, %v4690_v16, %v4691_v6  ;;  %v8091_v6 = vld [vmem:[%s14456_s0 + $0x60] sm:$0xff]  ;;  %v8092_v16 = vld [vmem:[%s14456_s0 + $0x68] sm:$0xff] }
 0x2ce   :  { %v10983_v56 = vadd.f32 %v3076_v33, %v2388_v43  ;;  %4564 = vmatmul.bf16.gmra.mxu3 %v4122_v29  ;;  %v2390_v63 = vadd.f32 %v2389_v53, %v2084_v12  ;;  %v10999_v33 = vsel %vm15475_vm6, %v15474_v8, %v4689_v37  ;;  %15478 = vst [vmem:[#allocation152_spill] sm:$0xff] %v11007_v54  ;;  %v15481_v29 = vld [vmem:[#allocation25_spill] sm:$0xff]  ;;  %v7803_v37 = vpop.permute.xlu2 %7802  ;;  %vm15488_vm9 = vmmov %vm15470_vm3 }
 0x2cf   :  { %15476 = vst [vmem:[#allocation35_spill] sm:$0xff] %v10999_v33  ;;  %v11011_v15 = vsel %vm15479_vm13, %v5715_v27, %v5716_v7  ;;  %v15482_v46 = vrot.slane %v15481_v29, 1  ;;  %v1470_v7 = vpack.c.bf16 %v15469_v0, %v15442_v13  ;;  %v7805_v43 = vunpack.i.h.bf16 %v7803_v37 }
 0x2d0   :  { %15480 = vst [vmem:[#allocation153_spill] sm:$0xff] %v11011_v15  ;;  %v7804_v33 = vunpack.i.l.bf16 %v7803_v37  ;;  %v4155_v27 = vpack.c.bf16 %v8092_v16, %v8091_v6  ;;  %vm15489_vm13 = vcmask 523264  }
 0x2d1   :  { %v2554_v8 = vsel %vm15470_vm3, %v2525_v9, %v15482_v46  ;;  %15485 = vst [vmem:[#allocation25_spill] sm:$0xff] %v15484_v20  ;;  %v15487_v46 = vrot.slane %v15442_v13, 1  ;;  %vm15490_vm3 = vcmask 261120   ;;  %vm15491_vm6 = vmmov %vm15489_vm13 }
 0x2d2   :  { %15486 = vst [vmem:[#allocation154_spill] sm:$0xff] %v11025_v1  ;;  %v2392_v53 = vpop.f32.mrf.mxu1  ;;  %v2798_v0 = vsel %vm11017_vm2, %v2554_v8, 0.0  ;;  %v11046_v37 = vpop.f32.mrf.mxu3  ;;  %vm15493_vm7 = vmmov %vm15491_vm6  ;;  %v79_v1 = vadd.s32 456, %v8564_v11 }
 0x2d3   :  { %v2555_v47 = vsel %vm15488_vm9, %v15487_v46, %v2525_v9  ;;  %v11051_v46 = vsel %vm15491_vm6, %v10404_v58, %v7804_v33  ;;  %vm15492_vm9 = vmmov %vm15491_vm6 }
 0x2d4   :  { %v2848_v9 = vpack.c.bf16 %v2798_v0, %v2555_v47  ;;  %v11055_v6 = vsel %vm15492_vm9, %v10409_v51, %v7805_v43 }
 0x2d5   :  { %v3078_v3 = vpop.f32.mrf.mxu2  ;;  %v2087_v13 = vpop.f32.mrf.mxu0  ;;  %6963 = vmatmul.msk.bf16.gmra.mxu1 %vm15489_vm13, %v1470_v7  ;;  %v4123_v8 = vpack.c.bf16 %v11055_v6, %v11051_v46  ;;  %vm15497_vm13 = vmmov %vm15490_vm3 }
 0x2d6   :  { %v11043_v12 = vadd.f32 %v3078_v3, %v2390_v63  ;;  %v2393_v3 = vadd.f32 %v2392_v53, %v2087_v13  ;;  %v8093_v13 = vld [vmem:[%s14456_s0 + $0x78] sm:$0xff] }
 0x2d8   :  { %7131 = vmatmul.msk.bf16.gmra.mxu0 %vm15490_vm3, %v4155_v27  ;;  %v7582_v27 = vld [vmem:[%s14460_s2 + $0xa8] sm:$0xff]  ;;  %vm15499_vm3 = vmmov %vm15491_vm6 }
 0x2d9   :  { %6498 = vmatpush.bf16.msra.mxu3 %v7582_v27  ;;  %v15494_v27 = vld [vmem:[#allocation9_spill] sm:$0xff]  ;;  %vm15501_vm9 = vmmov %vm15499_vm3 }
 0x2da   :  { %7021 = vmatmul.msk.bf16.gmra.mxu2 %vm15493_vm7, %v2848_v9  ;;  %v2394_v63 = vpop.f32.mrf.mxu1  ;;  %v11067_v33 = vpop.f32.mrf.mxu3  ;;  %v8094_v9 = vld [vmem:[%s14456_s0 + $0x70] sm:$0xff]  ;;  %vm15496_vm7 = vmmov %vm15491_vm6 }
 0x2db   :  { %vm15500_vm6 = vmmov %vm15499_vm3 }
 0x2dd   :  { %v3081_v7 = vpop.f32.mrf.mxu2  ;;  %v2089_v16 = vpop.f32.mrf.mxu0 }
 0x2de   :  { %v3197_v47 = vadd.f32 %v3081_v7, %v2393_v3  ;;  %4569 = vmatmul.bf16.gmra.mxu3 %v4123_v8  ;;  %v2395_v53 = vadd.f32 %v2394_v63, %v2089_v16  ;;  %v4156_v3 = vpack.c.bf16 %v8093_v13, %v8094_v9  ;;  %v15502_v9 = vld [vmem:[#allocation6_spill] sm:$0xff] }
 0x2e0   :  { %v11064_v58 = vadd.f32 %v10378_v38, %v3197_v47  ;;  %v15495_v47 = vpack.c.bf16 %v15494_v27, %v15481_v29 }
 0x2e2   :  { %v3439_v51 = vmul.f32 1.442695, %v11064_v58  ;;  %v2397_v43 = vpop.f32.mrf.mxu1 }
 0x2e4   :  { %7976 = vpow2.f32 %v3439_v51 }
 0x2e5   :  { %v3083_v0 = vpop.f32.mrf.mxu2  ;;  %v2092_v7 = vpop.f32.mrf.mxu0  ;;  %6964 = vmatmul.msk.bf16.gmra.mxu1 %vm15496_vm7, %v15495_v47 }
 0x2e6   :  { %v3198_v8 = vadd.f32 %v3083_v0, %v2395_v53  ;;  %v7808_v20 = vpop.permute.xlu0 %7807  ;;  %v15498_v53 = vld [vmem:[#allocation46_spill] sm:$0xff]  ;;  %v2398_v54 = vadd.f32 %v2397_v43, %v2092_v7  ;;  %v15505_v43 = vmov 0 }
 0x2e7   :  { %v7810_v16 = vunpack.i.h.bf16 %v7808_v20  ;;  %v7809_v51 = vunpack.i.l.bf16 %v7808_v20  ;;  %v2529_v20 = vrot.slane %v15502_v9, 1 }
 0x2e8   :  { %v11080_v63 = vadd.f32 %v10378_v38, %v3198_v8  ;;  %7132 = vmatmul.msk.bf16.gmra.mxu0 %vm15497_vm13, %v4156_v3  ;;  %v15503_v8 = vld [vmem:[#allocation15_spill] sm:$0xff]  ;;  %vm15509_vm13 = vcmp.lt.s32.totalorder %v8564_v11, 7 }
 0x2e9   :  { %v11089_v29 = vsel %vm15500_vm6, %v10476_v5, %v7809_v51  ;;  %v11093_v0 = vsel %vm15501_vm9, %v10480_v34, %v7810_v16  ;;  %v14775_v5 = vrot.slane %v10882_v59, 7  ;;  %v5719_v51 = vrot.slane %v10878_v4, 1  ;;  %v11103_v16 = vpop.f32.mrf.mxu3 }
 0x2ea   :  { %v7977_v22 = vpop.eup %7976  ;;  %v3441_v13 = vmul.f32 1.442695, %v11080_v63  ;;  %7022 = vmatmul.msk.bf16.gmra.mxu2 %vm15499_vm3, %v15498_v53  ;;  %v2399_v47 = vpop.f32.mrf.mxu1  ;;  %v4124_v3 = vpack.c.bf16 %v11093_v0, %v11089_v29  ;;  %v493_v53 = vand.u32 15, %v79_v1  ;;  %v14776_v34 = vrot.slane %v10882_v59, 1  ;;  %vm15511_vm3 = vmmov %vm15509_vm13 }
 0x2eb   :  { %v7065_v15 = vadd.f32 -1.0, %v7977_v22  ;;  %v1472_v22 = vpack.c.bf16 %v15502_v9, %v15504_v48  ;;  %v15508_v4 = vrot.slane %v15503_v8, 1  ;;  %vm15513_vm6 = vcmp.lt.s32.totalorder %v8564_v11, 1 }
 0x2ec   :  { %7978 = vpow2.f32 %v3441_v13  ;;  %vm11110_vm7 = vcmp.ne.s32.totalorder %v493_v53, 15  ;;  %vm15516_vm9 = vmmov %vm15513_vm6 }
 0x2ed   :  { %v3086_v45 = vpop.f32.mrf.mxu2  ;;  %v2094_v52 = vpop.f32.mrf.mxu0  ;;  %v3607_v13 = vmul.f32 1.6732632, %v7065_v15  ;;  %v15506_v43 = vsel %vm11110_vm7, 4294967295, %v15505_v43  ;;  %v2550_v7 = vsel %vm15509_vm13, %v2529_v20, %v15508_v4  ;;  %v15515_v15 = vrot.slane %v10838_v2, 7  ;;  %vm15518_vm13 = vmmov %vm15511_vm3 }
 0x2ee   :  { %v3199_v27 = vadd.f32 %v3086_v45, %v2398_v54  ;;  %4574 = vmatmul.bf16.gmra.mxu3 %v4124_v3  ;;  %15507 = vst [vmem:[#allocation9_spill] sm:$0xff] %v15506_v43  ;;  %v15510_v45 = vrot.slane %v10838_v2, 1  ;;  %v15520_v4 = vrot.slane %v15504_v48, 1  ;;  %v2400_v50 = vadd.f32 %v2399_v47, %v2094_v52 }
 0x2ef   :  { %v11134_v9 = vsel %vm15516_vm9, %v15515_v15, %v4693_v19  ;;  %v8095_v15 = vld [vmem:[%s14456_s0 + $0x88] sm:$0xff]  ;;  %vm3336_vm9 = vcmp.gt.f32.partialorder %v11080_v63, 0.0  ;;  %v81_v47 = vadd.s32 472, %v8564_v11 }
 0x2f0   :  { %v11108_v1 = vadd.f32 %v10378_v38, %v3199_v27  ;;  %v11122_v54 = vsel %vm15511_vm3, %v15510_v45, %v5719_v51  ;;  %v11128_v38 = vsel %vm15513_vm6, %v4693_v19, %v14775_v5  ;;  %15517 = vst [vmem:[#allocation15_spill] sm:$0xff] %v11134_v9  ;;  %v11140_v27 = vsel %vm15518_vm13, %v5719_v51, %v14776_v34 }
 0x2f1   :  { %15512 = vst [vmem:[#allocation46_spill] sm:$0xff] %v11122_v54  ;;  %v2551_v45 = vsel %vm15511_vm3, %v15520_v4, %v2529_v20  ;;  %vm3335_vm6 = vcmp.gt.f32.partialorder %v11064_v58, 0.0  ;;  %v2802_v34 = vsel %vm11110_vm7, %v2550_v7, 0.0  ;;  %v5723_v4 = vrot.slane %v11051_v46, 1 }
 0x2f2   :  { %15514 = vst [vmem:[#allocation6_spill] sm:$0xff] %v11128_v38  ;;  %v7979_v3 = vpop.eup %7978  ;;  %v3443_v53 = vmul.f32 1.442695, %v11108_v1  ;;  %v2402_v5 = vpop.f32.mrf.mxu1  ;;  %v3675_v20 = vsel %vm3335_vm6, %v11064_v58, %v3607_v13  ;;  %vm15521_vm13 = vcmask 523264   ;;  %v2850_v2 = vpack.c.bf16 %v2802_v34, %v2551_v45 }
 0x2f3   :  { %15519 = vst [vmem:[#allocation8_spill] sm:$0xff] %v11140_v27  ;;  %v7066_v51 = vadd.f32 -1.0, %v7979_v3  ;;  %v8096_v3 = vld [vmem:[%s14456_s0 + $0x80] sm:$0xff]  ;;  %v11170_v13 = vpop.f32.mrf.mxu3  ;;  %v11173_v9 = vmul.f32 1.050701, %v3675_v20  ;;  %vm15525_vm3 = vcmask 261120   ;;  %v2403_v24 = vadd.f32 %v2402_v5, %v15535_v35 }
 0x2f4   :  { %7980 = vpow2.f32 %v3443_v53  ;;  %v4157_v7 = vpack.c.bf16 %v8095_v15, %v8096_v3  ;;  %v11178_v15 = vld [vmem:[%s14458_s4] ss:$0 sm:$0xff]  ;;  %vm15528_vm6 = vcmp.lt.s32.totalorder %v8564_v11, 1  ;;  %v15530_v20 = vrot.slane %v11055_v6, 1 }
 0x2f5   :  { %v3088_v19 = vpop.f32.mrf.mxu2  ;;  %v3608_v43 = vmul.f32 1.6732632, %v7066_v51  ;;  %6965 = vmatmul.msk.bf16.gmra.mxu1 %vm15521_vm13, %v1472_v22  ;;  %v11167_v58 = vpop.f32.mrf.mxu0  ;;  %v15523_v3 = vld [vmem:[#allocation14_spill] sm:$0xff]  ;;  %v15537_v35 = vmov 0 }
 0x2f6   :  { %v3200_v52 = vadd.f32 %v3088_v19, %v2400_v50  ;;  %15522 = vst [vmem:[#allocation155_spill] sm:$0xff] %v11167_v58  ;;  %v7813_v53 = vpop.permute.xlu1 %7812  ;;  %v2531_v38 = vrot.slane %v15523_v3, 1  ;;  %v15524_v58 = vld [vmem:[#allocation20_spill] sm:$0xff] }
 0x2f7   :  { %v3676_v48 = vsel %vm3336_vm9, %v11080_v63, %v3608_v43  ;;  %v7815_v22 = vunpack.i.h.bf16 %v7813_v53  ;;  %v7814_v19 = vunpack.i.l.bf16 %v7813_v53  ;;  %v15526_v63 = vrot.slane %v11055_v6, 7 }
 0x2f8   :  { %v11181_v50 = vadd.f32 %v11178_v15, %v3200_v52  ;;  %v11183_v51 = vmul.f32 1.050701, %v3676_v48  ;;  %7133 = vmatmul.msk.bf16.gmra.mxu0 %vm15525_vm3, %v4157_v7  ;;  %v15527_v43 = vrot.slane %v11051_v46, 7  ;;  %vm15531_vm9 = vcmp.lt.s32.totalorder %v8564_v11, 7  ;;  %vm15533_vm3 = vmmov %vm15521_vm13 }
 0x2f9   :  { %v11200_v48 = vsel %vm15531_vm9, %v5723_v4, %v15530_v20  ;;  %v11208_v34 = vsel %vm15533_vm3, %v10539_v60, %v7814_v19  ;;  %v5721_v20 = vrot.slane %v10967_v40, 1  ;;  %v15540_v5 = vrot.slane %v15524_v58, 1 }
 0x2fa   :  { %v11194_v45 = vsel %vm15528_vm6, %v15527_v43, %v15526_v63  ;;  %15532 = vst [vmem:[#allocation20_spill] sm:$0xff] %v11200_v48  ;;  %v7981_v52 = vpop.eup %7980  ;;  %v3445_v53 = vmul.f32 1.442695, %v11181_v50  ;;  %7023 = vmatmul.msk.bf16.gmra.mxu2 %vm15521_vm13, %v2850_v2  ;;  %v7826_v7 = vpack.i.bf16 %v11183_v51, %v11173_v9  ;;  %v507_v63 = vand.u32 15, %v81_v47  ;;  %v2404_v54 = vpop.f32.mrf.mxu1  ;;  %vm15534_vm6 = vmmov %vm15533_vm3 }
 0x2fb   :  { %15529 = vst [vmem:[#allocation14_spill] sm:$0xff] %v11194_v45  ;;  %v4695_v43 = vrot.slane %v10967_v40, 7  ;;  %v11215_v17 = vsel %vm15534_vm6, %v10562_v26, %v7815_v22  ;;  %v7067_v2 = vadd.f32 -1.0, %v7981_v52  ;;  %v5722_v47 = vrot.slane %v10971_v55, 1  ;;  %v7818_v52 = vpop.permute.xlu2 %7817 }
 0x2fc   :  { %7982 = vpow2.f32 %v3445_v53  ;;  %7827 = vrot.lane.b32.xlu1 %v7826_v7, %s8195_s19  ;;  %v4125_v60 = vpack.c.bf16 %v11215_v17, %v11208_v34  ;;  %v1473_v26 = vpack.c.bf16 %v15523_v3, %v15503_v8  ;;  %vm11227_vm9 = vcmp.ne.s32.totalorder %v507_v63, 15  ;;  %v11248_v53 = vpop.f32.mrf.mxu3 }
 0x2fd   :  { %v3091_v19 = vpop.f32.mrf.mxu2  ;;  %v4300_v28 = vpop.f32.mrf.mxu0  ;;  %v15538_v35 = vsel %vm11227_vm9, 4294967295, %v15537_v35  ;;  %vm15541_vm13 = vcmp.lt.s32.totalorder %v8564_v11, 7  ;;  %v3609_v55 = vmul.f32 1.6732632, %v7067_v2  ;;  %vm15545_vm6 = vcmp.lt.s32.totalorder %v8564_v11, 1  ;;  %15547 = vst [vmem:[#allocation159_spill] sm:$0xff] %v11248_v53 }
 0x2fe   :  { %v3201_v25 = vadd.f32 %v3091_v19, %v2403_v24  ;;  %4579 = vmatmul.bf16.gmra.mxu3 %v4125_v60  ;;  %v11223_v40 = vadd.f32 %v10948_v21, %v4300_v28  ;;  %15539 = vst [vmem:[#allocation156_spill] sm:$0xff] %v15538_v35  ;;  %v2548_v22 = vsel %vm15541_vm13, %v2531_v38, %v15540_v5  ;;  %v15542_v28 = vrot.slane %v10882_v59, 1  ;;  %vm15543_vm3 = vmmov %vm15541_vm13  ;;  %v8098_v35 = vld [vmem:[%s14456_s0 + $0x90] sm:$0xff] }
 0x2ff   :  { %v11246_v3 = vsel %vm15545_vm6, %v4695_v43, %v4696_v14  ;;  %v15548_v63 = vrot.slane %v10882_v59, 7  ;;  %vm15549_vm13 = vmmov %vm15545_vm6  ;;  %v11264_v60 = vsel %vm15543_vm3, %v5721_v20, %v5722_v47 }
 0x300   :  { %15536 = vst [vmem:[#allocation52_spill] sm:$0xff] %v11223_v40  ;;  %v11236_v24 = vadd.f32 %v11178_v15, %v3201_v25  ;;  %v11242_v21 = vsel %vm15543_vm3, %v15542_v28, %v5721_v20  ;;  %vm15551_vm7 = vmmov %vm15543_vm3  ;;  %v15554_v28 = vrot.slane %v15503_v8, 1  ;;  %v2804_v20 = vsel %vm11227_vm9, %v2548_v22, 0.0 }
 0x301   :  { %15544 = vst [vmem:[#allocation157_spill] sm:$0xff] %v11242_v21  ;;  %v11256_v25 = vsel %vm15549_vm13, %v15548_v63, %v4695_v43  ;;  %v11260_v2 = vsel %vm15551_vm7, %v5722_v47, %v5723_v4  ;;  %vm15555_vm6 = vmmov %vm15543_vm3  ;;  %v7820_v4 = vunpack.i.h.bf16 %v7818_v52  ;;  %v7576_v47 = vld [vmem:[%s14459_s3 + $0x8] sm:$0xff]  ;;  %v15556_v8 = vrot.slane %v11051_v46, 7  ;;  %v8099_v46 = vld [vmem:[%s14456_s0 + $0x98] sm:$0xff] }
 0x302   :  { %15546 = vst [vmem:[#allocation158_spill] sm:$0xff] %v11246_v3  ;;  %v7983_v19 = vpop.eup %7982  ;;  %v3447_v5 = vmul.f32 1.442695, %v11236_v24  ;;  %v2549_v59 = vsel %vm15555_vm6, %v15554_v28, %v2531_v38  ;;  %v2407_v53 = vpop.f32.mrf.mxu1  ;;  %vm15557_vm7 = vmmov %vm15549_vm13  ;;  %vm3337_vm13 = vcmp.gt.f32.partialorder %v11108_v1, 0.0  ;;  %v15559_v28 = vld [vmem:[#allocation3_spill] sm:$0xff]  ;;  %v7819_v43 = vunpack.i.l.bf16 %v7818_v52  ;;  %5257 = vmatpush.bf16.msra.mxu0 %v7576_v47  ;;  %v15566_v47 = vld [vmem:[#allocation21_spill] sm:$0xff] }
 0x303   :  { %15550 = vst [vmem:[#allocation160_spill] sm:$0xff] %v11256_v25  ;;  %v7068_v7 = vadd.f32 -1.0, %v7983_v19  ;;  %v11284_v38 = vsel %vm15557_vm7, %v4696_v14, %v15556_v8  ;;  %v2405_v63 = vadd.f32 %v2404_v54, %v15559_v28  ;;  %v4158_v14 = vpack.c.bf16 %v8099_v46, %v8098_v35 }
 0x304   :  { %15552 = vst [vmem:[#allocation161_spill] sm:$0xff] %v11260_v2  ;;  %7984 = vpow2.f32 %v3447_v5  ;;  %vm3338_vm3 = vcmp.gt.f32.partialorder %v11181_v50, 0.0  ;;  %vm15560_vm6 = vcmask 523264   ;;  %vm15562_vm7 = vcmask 261120  }
 0x305   :  { %15553 = vst [vmem:[#allocation162_spill] sm:$0xff] %v11264_v60  ;;  %v3093_v22 = vpop.f32.mrf.mxu2  ;;  %v3610_v8 = vmul.f32 1.6732632, %v7068_v7  ;;  %v3677_v60 = vsel %vm3337_vm13, %v11108_v1, %v3609_v55  ;;  %6966 = vmatmul.msk.bf16.gmra.mxu1 %vm15560_vm6, %v1473_v26  ;;  %v4303_v52 = vpop.f32.mrf.mxu0  ;;  %vm15563_vm13 = vmmov %vm15560_vm6  ;;  %v11315_v26 = vsel %vm15560_vm6, %v10652_v18, %v7820_v4  ;;  %v83_v7 = vadd.s32 488, %v8564_v11  ;;  %v7571_v4 = vld [vmem:[%s14460_s2 + $0x20] sm:$0xff] }
 0x306   :  { %15558 = vst [vmem:[#allocation163_spill] sm:$0xff] %v11284_v38  ;;  %v3202_v54 = vadd.f32 %v3093_v22, %v2405_v63  ;;  %v11300_v5 = vadd.f32 %v10985_v44, %v4303_v52  ;;  %v2851_v38 = vpack.c.bf16 %v2804_v20, %v2549_v59  ;;  %v11304_v45 = vmul.f32 1.050701, %v3677_v60  ;;  %v11321_v60 = vpop.f32.mrf.mxu3  ;;  %v15565_v63 = vld [vmem:[#allocation55_spill] sm:$0xff]  ;;  %v15567_v22 = vld [vmem:[#allocation26_spill] sm:$0xff]  ;;  %5471 = vmatpush.bf16.msra.mxu1 %v7571_v4 }
 0x307   :  { %v3678_v28 = vsel %vm3338_vm3, %v11181_v50, %v3610_v8  ;;  %v11311_v1 = vsel %vm15563_vm13, %v10627_v39, %v7819_v43  ;;  %vm15564_vm3 = vmmov %vm15560_vm6  ;;  %v2408_v20 = vadd.f32 %v2407_v53, %v15565_v63  ;;  %v14796_v46 = vrot.slane %v15567_v22, 1 }
 0x308   :  { %15561 = vst [vmem:[#allocation3_spill] sm:$0xff] %v11300_v5  ;;  %v3272_v19 = vadd.f32 %v11178_v15, %v3202_v54  ;;  %v11306_v35 = vmul.f32 1.050701, %v3678_v28  ;;  %7134 = vmatmul.msk.bf16.gmra.mxu0 %vm15562_vm7, %v4158_v14  ;;  %v4126_v39 = vpack.c.bf16 %v11315_v26, %v11311_v1  ;;  %v521_v53 = vand.u32 15, %v83_v7 }
 0x309   :  { %vm15572_vm13 = vcmp.lt.s32.totalorder %v8564_v11, 7  ;;  %vm3339_vm6 = vcmp.gt.f32.partialorder %v11236_v24, 0.0  ;;  %v5729_v48 = vrot.slane %v11311_v1, 1 }
 0x30a   :  { %v7985_v44 = vpop.eup %7984  ;;  %v3449_v55 = vmul.f32 1.442695, %v3272_v19  ;;  %7024 = vmatmul.msk.bf16.gmra.mxu2 %vm15564_vm3, %v2851_v38  ;;  %v7831_v50 = vpack.i.bf16 %v11306_v35, %v11304_v45  ;;  %v2409_v59 = vpop.f32.mrf.mxu1  ;;  %v2533_v38 = vrot.slane %v15566_v47, 1  ;;  %vm11339_vm7 = vcmp.ne.s32.totalorder %v521_v53, 15  ;;  %vm15575_vm3 = vmmov %vm15572_vm13  ;;  %v8100_v53 = vld [vmem:[%s14456_s0 + $0xa8] sm:$0xff] }
 0x30b   :  { %v7069_v18 = vadd.f32 -1.0, %v7985_v44 }
 0x30c   :  { %7986 = vpow2.f32 %v3449_v55  ;;  %7832 = vrot.lane.b32.xlu2 %v7831_v50, %s8195_s19  ;;  %v15569_v50 = vmov 0  ;;  %v2546_v7 = vsel %vm15572_vm13, %v2533_v38, %v14796_v46  ;;  %vm3340_vm13 = vcmp.gt.f32.partialorder %v3272_v19, 0.0 }
 0x30d   :  { %v3096_v43 = vpop.f32.mrf.mxu2  ;;  %v4305_v8 = vpop.f32.mrf.mxu0  ;;  %v3611_v28 = vmul.f32 1.6732632, %v7069_v18  ;;  %v15570_v50 = vsel %vm11339_vm7, 4294967295, %v15569_v50 }
 0x30e   :  { %v3203_v14 = vadd.f32 %v3096_v43, %v2408_v20  ;;  %4584 = vmatmul.bf16.gmra.mxu3 %v4126_v39  ;;  %v11333_v54 = vadd.f32 %v11046_v37, %v4305_v8  ;;  %15571 = vst [vmem:[#allocation21_spill] sm:$0xff] %v15570_v50  ;;  %v1474_v20 = vpack.c.bf16 %v15566_v47, %v15524_v58  ;;  %v15573_v39 = vld [vmem:[#allocation13_spill] sm:$0xff]  ;;  %v15574_v43 = vrot.slane %v15524_v58, 1  ;;  %v8101_v47 = vld [vmem:[%s14456_s0 + $0xa0] sm:$0xff] }
 0x30f   :  { %v2410_v18 = vadd.f32 %v2409_v59, %v15573_v39  ;;  %v2806_v59 = vsel %vm11339_vm7, %v2546_v7, 0.0  ;;  %v3679_v58 = vsel %vm3339_vm6, %v11236_v24, %v3611_v28  ;;  %vm15579_vm6 = vcmask 261120   ;;  %v15580_v28 = vld [vmem:[#allocation27_spill] sm:$0xff] }
 0x310   :  { %15568 = vst [vmem:[#allocation55_spill] sm:$0xff] %v11333_v54  ;;  %v11336_v52 = vadd.f32 %v11178_v15, %v3203_v14  ;;  %v2547_v4 = vsel %vm15575_vm3, %v15574_v43, %v2533_v38  ;;  %v11355_v14 = vpop.f32.mrf.mxu3  ;;  %vm15577_vm3 = vcmask 523264   ;;  %vm15593_vm7 = vcmp.lt.s32.totalorder %v8564_v11, 1 }
 0x311   :  { %15576 = vst [vmem:[#allocation26_spill] sm:$0xff] %v11355_v14  ;;  %v85_v14 = vadd.s32 504, %v8564_v11 }
 0x312   :  { %v7987_v44 = vpop.eup %7986  ;;  %v3451_v55 = vmul.f32 1.442695, %v11336_v52  ;;  %v2412_v37 = vpop.f32.mrf.mxu1 }
 0x313   :  { %v7070_v63 = vadd.f32 -1.0, %v7987_v44  ;;  %v4159_v44 = vpack.c.bf16 %v8100_v53, %v8101_v47  ;;  %v2852_v53 = vpack.c.bf16 %v2806_v59, %v2547_v4  ;;  %v11374_v47 = vmul.f32 1.050701, %v3679_v58  ;;  %v15582_v58 = vld [vmem:[#allocation59_spill] sm:$0xff] }
 0x314   :  { %7988 = vpow2.f32 %v3451_v55  ;;  %v4699_v4 = vrot.slane %v11089_v29, 7  ;;  %v535_v59 = vand.u32 15, %v85_v14 }
 0x315   :  { %v3098_v8 = vpop.f32.mrf.mxu2  ;;  %v3612_v55 = vmul.f32 1.6732632, %v7070_v63  ;;  %6967 = vmatmul.msk.bf16.gmra.mxu1 %vm15577_vm3, %v1474_v20  ;;  %v4308_v39 = vpop.f32.mrf.mxu0  ;;  %v2535_v63 = vrot.slane %v15580_v28, 1 }
 0x316   :  { %v3204_v38 = vadd.f32 %v3098_v8, %v2410_v18  ;;  %v11368_v43 = vadd.f32 %v11067_v33, %v4308_v39  ;;  %v14802_v39 = vrot.slane %v11093_v0, 1  ;;  %v7581_v18 = vld [vmem:[%s14460_s2 + $0xa0] sm:$0xff] }
 0x317   :  { %v3680_v46 = vsel %vm3340_vm13, %v3272_v19, %v3612_v55  ;;  %v15581_v19 = vld [vmem:[#allocation31_spill] sm:$0xff]  ;;  %vm11399_vm13 = vcmp.ne.s32.totalorder %v535_v59, 15  ;;  %6499 = vmatpush.bf16.msra.mxu3 %v7581_v18 }
 0x318   :  { %15578 = vst [vmem:[#allocation13_spill] sm:$0xff] %v11368_v43  ;;  %v11372_v2 = vadd.f32 %v11178_v15, %v3204_v38  ;;  %v11376_v7 = vmul.f32 1.050701, %v3680_v46  ;;  %7135 = vmatmul.msk.bf16.gmra.mxu0 %vm15579_vm6, %v4159_v44  ;;  %v5725_v44 = vrot.slane %v11089_v29, 1  ;;  %v2413_v38 = vadd.f32 %v2412_v37, %v15582_v58  ;;  %v11394_v8 = vpop.f32.mrf.mxu3 }
 0x319   :  { %v15584_v29 = vmov 0  ;;  %v15587_v37 = vrot.slane %v15581_v19, 1  ;;  %vm15588_vm6 = vcmp.lt.s32.totalorder %v8564_v11, 7  ;;  %v15589_v58 = vrot.slane %v11055_v6, 1 }
 0x31a   :  { %v7989_v24 = vpop.eup %7988  ;;  %v3453_v20 = vmul.f32 1.442695, %v11372_v2  ;;  %7025 = vmatmul.msk.bf16.gmra.mxu2 %vm15577_vm3, %v2852_v53  ;;  %v7836_v33 = vpack.i.bf16 %v11376_v7, %v11374_v47  ;;  %v2414_v46 = vpop.f32.mrf.mxu1  ;;  %v15585_v29 = vsel %vm11399_vm13, 4294967295, %v15584_v29  ;;  %vm15590_vm3 = vmmov %vm15588_vm6 }
 0x31b   :  { %v7071_v55 = vadd.f32 -1.0, %v7989_v24  ;;  %15586 = vst [vmem:[#allocation31_spill] sm:$0xff] %v15585_v29  ;;  %v2544_v24 = vsel %vm15588_vm6, %v2535_v63, %v15587_v37  ;;  %vm15596_vm6 = vmmov %vm15593_vm7 }
 0x31c   :  { %7990 = vpow2.f32 %v3453_v20  ;;  %7837 = vrot.lane.b32.xlu0 %v7836_v33, %s8195_s19 }
 0x31d   :  { %v3101_v53 = vpop.f32.mrf.mxu2  ;;  %v4310_v43 = vpop.f32.mrf.mxu0  ;;  %v3613_v20 = vmul.f32 1.6732632, %v7071_v55 }
 0x31e   :  { %v3205_v50 = vadd.f32 %v3101_v53, %v2413_v38  ;;  %v11397_v14 = vadd.f32 %v11103_v16, %v4310_v43  ;;  %v11414_v16 = vsel %vm15590_vm3, %v15589_v58, %v5725_v44  ;;  %v15592_v43 = vrot.slane %v11093_v0, 7 }
 0x31f   :  { %15591 = vst [vmem:[#allocation59_spill] sm:$0xff] %v11414_v16  ;;  %v1475_v38 = vpack.c.bf16 %v15580_v28, %v15567_v22  ;;  %v11436_v53 = vsel %vm15590_vm3, %v5725_v44, %v14802_v39  ;;  %v15599_v28 = vrot.slane %v15567_v22, 1  ;;  %v15601_v16 = vld [vmem:[#allocation61_spill] sm:$0xff]  ;;  %v87_v22 = vadd.s32 520, %v8564_v11 }
 0x320   :  { %15583 = vst [vmem:[#allocation27_spill] sm:$0xff] %v11397_v14  ;;  %v11408_v33 = vadd.f32 %v11178_v15, %v3205_v50  ;;  %v11420_v59 = vsel %vm15593_vm7, %v4699_v4, %v15592_v43  ;;  %v15595_v50 = vrot.slane %v11055_v6, 7  ;;  %vm15600_vm7 = vmmov %vm15590_vm3  ;;  %v2808_v6 = vsel %vm11399_vm13, %v2544_v24, 0.0 }
 0x321   :  { %15594 = vst [vmem:[#allocation164_spill] sm:$0xff] %v11420_v59  ;;  %v2545_v43 = vsel %vm15600_vm7, %v15599_v28, %v2535_v63  ;;  %v2415_v63 = vadd.f32 %v2414_v46, %v15601_v16  ;;  %vm3342_vm3 = vcmp.gt.f32.partialorder %v11372_v2, 0.0  ;;  %vm15602_vm7 = vcmask 523264  }
 0x322   :  { %v11430_v55 = vsel %vm15596_vm6, %v15595_v50, %v4699_v4  ;;  %15598 = vst [vmem:[#allocation166_spill] sm:$0xff] %v11436_v53  ;;  %v7991_v37 = vpop.eup %7990  ;;  %v3455_v58 = vmul.f32 1.442695, %v11408_v33  ;;  %vm3341_vm6 = vcmp.gt.f32.partialorder %v11336_v52, 0.0  ;;  %v2417_v39 = vpop.f32.mrf.mxu1  ;;  %v8102_v4 = vld [vmem:[%s14456_s0 + $0xb8] sm:$0xff]  ;;  %v8103_v50 = vld [vmem:[%s14456_s0 + $0xb0] sm:$0xff]  ;;  %v2853_v16 = vpack.c.bf16 %v2808_v6, %v2545_v43 }
 0x323   :  { %15597 = vst [vmem:[#allocation165_spill] sm:$0xff] %v11430_v55  ;;  %v7072_v18 = vadd.f32 -1.0, %v7991_v37  ;;  %v3681_v28 = vsel %vm3341_vm6, %v11336_v52, %v3613_v20  ;;  %v4160_v37 = vpack.c.bf16 %v8102_v4, %v8103_v50  ;;  %v15604_v4 = vrot.slane %v11315_v26, 7  ;;  %v11488_v6 = vpop.f32.mrf.mxu3 }
 0x324   :  { %7992 = vpow2.f32 %v3455_v58  ;;  %v11466_v58 = vmul.f32 1.050701, %v3681_v28  ;;  %vm15606_vm6 = vcmp.lt.s32.totalorder %v8564_v11, 1  ;;  %15611 = vst [vmem:[#allocation169_spill] sm:$0xff] %v11488_v6  ;;  %vm15613_vm13 = vcmask 523264   ;;  %v15616_v6 = vld [vmem:[#allocation65_spill] sm:$0xff] }
 0x325   :  { %v3103_v24 = vpop.f32.mrf.mxu2  ;;  %v3614_v44 = vmul.f32 1.6732632, %v7072_v18  ;;  %6968 = vmatmul.msk.bf16.gmra.mxu1 %vm15602_vm7, %v1475_v38  ;;  %v4313_v46 = vpop.f32.mrf.mxu0  ;;  %v15605_v38 = vrot.slane %v11311_v1, 7  ;;  %vm15612_vm7 = vcmask 261120  }
 0x326   :  { %v3206_v29 = vadd.f32 %v3103_v24, %v2415_v63  ;;  %v11463_v52 = vadd.f32 %v11170_v13, %v4313_v46  ;;  %v15608_v13 = vrot.slane %v11315_v26, 1  ;;  %v15614_v63 = vld [vmem:[#allocation32_spill] sm:$0xff] }
 0x327   :  { %v3682_v20 = vsel %vm3342_vm3, %v11372_v2, %v3614_v44  ;;  %v11480_v43 = vsel %vm15606_vm6, %v15605_v38, %v15604_v4  ;;  %vm15609_vm3 = vcmp.lt.s32.totalorder %v8564_v11, 7  ;;  %v2537_v28 = vrot.slane %v15614_v63, 1  ;;  %v15615_v24 = vld [vmem:[#allocation36_spill] sm:$0xff] }
 0x328   :  { %15603 = vst [vmem:[#allocation61_spill] sm:$0xff] %v11463_v52  ;;  %v11470_v55 = vadd.f32 %v11178_v15, %v3206_v29  ;;  %v11472_v18 = vmul.f32 1.050701, %v3682_v20  ;;  %v11486_v2 = vsel %vm15609_vm3, %v5729_v48, %v15608_v13  ;;  %7136 = vmatmul.msk.bf16.gmra.mxu0 %vm15612_vm7, %v4160_v37  ;;  %v4701_v20 = vrot.slane %v11208_v34, 7  ;;  %vm15621_vm6 = vmmov %vm15609_vm3 }
 0x329   :  { %15607 = vst [vmem:[#allocation167_spill] sm:$0xff] %v11480_v43  ;;  %v549_v38 = vand.u32 15, %v87_v22  ;;  %v4702_v13 = vrot.slane %v11215_v17, 7  ;;  %v5727_v37 = vrot.slane %v11208_v34, 1  ;;  %v2418_v52 = vadd.f32 %v2417_v39, %v15616_v6 }
 0x32a   :  { %15610 = vst [vmem:[#allocation168_spill] sm:$0xff] %v11486_v2  ;;  %v3457_v29 = vmul.f32 1.442695, %v11470_v55  ;;  %7026 = vmatmul.msk.bf16.gmra.mxu2 %vm15613_vm13, %v2853_v16  ;;  %v7841_v50 = vpack.i.bf16 %v11472_v18, %v11466_v58  ;;  %v7993_v44 = vpop.eup %7992  ;;  %v2419_v4 = vpop.f32.mrf.mxu1  ;;  %v5728_v16 = vrot.slane %v11215_v17, 1  ;;  %v1476_v46 = vpack.c.bf16 %v15614_v63, %v15581_v19 }
 0x32b   :  { %v7073_v14 = vadd.f32 -1.0, %v7993_v44  ;;  %vm11507_vm13 = vcmp.ne.s32.totalorder %v549_v38, 15  ;;  %v15620_v39 = vrot.slane %v15615_v24, 1  ;;  %v15622_v6 = vrot.slane %v11093_v0, 1 }
 0x32c   :  { %7994 = vpow2.f32 %v3457_v29  ;;  %7842 = vrot.lane.b32.xlu1 %v7841_v50, %s8195_s19  ;;  %vm15624_vm7 = vcmp.lt.s32.totalorder %v8564_v11, 1  ;;  %v11542_v63 = vsel %vm15609_vm3, %v5727_v37, %v5728_v16 }
 0x32d   :  { %v3106_v59 = vpop.f32.mrf.mxu2  ;;  %v11503_v5 = vpop.f32.mrf.mxu0  ;;  %v2542_v17 = vsel %vm15621_vm6, %v2537_v28, %v15620_v39  ;;  %vm15627_vm9 = vmmov %vm15624_vm7  ;;  %15631 = vst [vmem:[#allocation172_spill] sm:$0xff] %v11542_v63  ;;  %v3615_v39 = vmul.f32 1.6732632, %v7073_v14 }
 0x32e   :  { %v3207_v54 = vadd.f32 %v3106_v59, %v2418_v52  ;;  %15617 = vst [vmem:[#allocation32_spill] sm:$0xff] %v11503_v5  ;;  %v11522_v59 = vsel %vm15609_vm3, %v15622_v6, %v5727_v37  ;;  %v11526_v52 = vsel %vm15624_vm7, %v4701_v20, %v4702_v13  ;;  %vm15629_vm6 = vmmov %vm15609_vm3  ;;  %v2810_v14 = vsel %vm11507_vm13, %v2542_v17, 0.0 }
 0x32f   :  { %15623 = vst [vmem:[#allocation36_spill] sm:$0xff] %v11522_v59  ;;  %v11538_v44 = vsel %vm15629_vm6, %v5728_v16, %v5729_v48  ;;  %v15632_v48 = vrot.slane %v15581_v19, 1  ;;  %v15634_v16 = vrot.slane %v11311_v1, 7  ;;  %vm3343_vm6 = vcmp.gt.f32.partialorder %v11408_v33, 0.0  ;;  %v8104_v1 = vld [vmem:[%s14456_s0 + $0xc0] sm:$0xff] }
 0x330   :  { %v11512_v34 = vadd.f32 %v11178_v15, %v3207_v54  ;;  %15625 = vst [vmem:[#allocation65_spill] sm:$0xff] %v11526_v52  ;;  %v15626_v54 = vrot.slane %v11093_v0, 7  ;;  %v15636_v0 = vld [vmem:[#allocation67_spill] sm:$0xff]  ;;  %vm3344_vm13 = vcmp.gt.f32.partialorder %v11470_v55, 0.0 }
 0x331   :  { %15630 = vst [vmem:[#allocation171_spill] sm:$0xff] %v11538_v44  ;;  %v11561_v29 = vsel %vm15624_vm7, %v4702_v13, %v15634_v16  ;;  %v2420_v63 = vadd.f32 %v2419_v4, %v15636_v0  ;;  %v8105_v13 = vld [vmem:[%s14456_s0 + $0xc8] sm:$0xff]  ;;  %v3683_v0 = vsel %vm3343_vm6, %v11408_v33, %v3615_v39  ;;  %vm15641_vm6 = vcmask 261120  }
 0x332   :  { %v11534_v50 = vsel %vm15627_vm9, %v15626_v54, %v4701_v20  ;;  %v7995_v38 = vpop.eup %7994  ;;  %v3459_v6 = vmul.f32 1.442695, %v11512_v34  ;;  %v11549_v20 = vpop.f32.mrf.mxu3  ;;  %vm15633_vm9 = vmmov %vm15609_vm3  ;;  %15635 = vst [vmem:[#allocation173_spill] sm:$0xff] %v11561_v29  ;;  %v4161_v22 = vpack.c.bf16 %v8105_v13, %v8104_v1  ;;  %vm15637_vm3 = vcmask 523264   ;;  %v15643_v13 = vld [vmem:[#allocation71_spill] sm:$0xff] }
 0x333   :  { %15628 = vst [vmem:[#allocation170_spill] sm:$0xff] %v11534_v50  ;;  %v7074_v54 = vadd.f32 -1.0, %v7995_v38  ;;  %v2422_v53 = vpop.f32.mrf.mxu1  ;;  %v2543_v37 = vsel %vm15633_vm9, %v15632_v48, %v2537_v28  ;;  %v7823_v38 = vpop.permute.xlu0 %7822  ;;  %vm15639_vm9 = vmmov %vm15637_vm3 }
 0x334   :  { %7996 = vpow2.f32 %v3459_v6  ;;  %v7825_v44 = vunpack.i.h.bf16 %v7823_v38  ;;  %v7824_v28 = vunpack.i.l.bf16 %v7823_v38  ;;  %vm15640_vm7 = vmmov %vm15637_vm3  ;;  %v2854_v1 = vpack.c.bf16 %v2810_v14, %v2543_v37 }
 0x335   :  { %v3108_v48 = vpop.f32.mrf.mxu2  ;;  %v3616_v17 = vmul.f32 1.6732632, %v7074_v54  ;;  %6969 = vmatmul.msk.bf16.gmra.mxu1 %vm15637_vm3, %v1476_v46  ;;  %v4318_v6 = vpop.f32.mrf.mxu0  ;;  %v89_v46 = vadd.s32 536, %v8564_v11 }
 0x336   :  { %v3208_v4 = vadd.f32 %v3108_v48, %v2420_v63  ;;  %v11579_v16 = vadd.f32 %v11321_v60, %v4318_v6  ;;  %v11583_v38 = vsel %vm15639_vm9, %v10714_v49, %v7824_v28  ;;  %v11587_v54 = vsel %vm15640_vm7, %v10716_v42, %v7825_v44  ;;  %v15642_v44 = vld [vmem:[#allocation18_spill] sm:$0xff] }
 0x337   :  { %v3684_v63 = vsel %vm3344_vm13, %v11470_v55, %v3616_v17  ;;  %v4127_v33 = vpack.c.bf16 %v11587_v54, %v11583_v38  ;;  %v11595_v60 = vmul.f32 1.050701, %v3683_v0  ;;  %v2539_v37 = vrot.slane %v15642_v44, 1 }
 0x338   :  { %15638 = vst [vmem:[#allocation67_spill] sm:$0xff] %v11579_v16  ;;  %v3278_v48 = vadd.f32 %v11178_v15, %v3208_v4  ;;  %7137 = vmatmul.msk.bf16.gmra.mxu0 %vm15641_vm6, %v4161_v22  ;;  %v11597_v49 = vmul.f32 1.050701, %v3684_v63  ;;  %v563_v14 = vand.u32 15, %v89_v46  ;;  %v2423_v17 = vadd.f32 %v2422_v53, %v15643_v13 }
 0x339   :  { %4589 = vmatmul.bf16.gmra.mxu3 %v4127_v33  ;;  %v15648_v33 = vld [vmem:[#allocation19_spill] sm:$0xff]  ;;  %vm15650_vm9 = vcmp.lt.s32.totalorder %v8564_v11, 7  ;;  %vm3345_vm7 = vcmp.gt.f32.partialorder %v11512_v34, 0.0 }
 0x33a   :  { %v7997_v39 = vpop.eup %7996  ;;  %v3461_v28 = vmul.f32 1.442695, %v3278_v48  ;;  %7027 = vmatmul.msk.bf16.gmra.mxu2 %vm15637_vm3, %v2854_v1  ;;  %v7846_v55 = vpack.i.bf16 %v11597_v49, %v11595_v60  ;;  %v11604_v22 = vpop.f32.mrf.mxu3  ;;  %vm11609_vm13 = vcmp.ne.s32.totalorder %v563_v14, 15  ;;  %v15649_v19 = vrot.slane %v15648_v33, 1  ;;  %vm15653_vm6 = vmmov %vm15650_vm9 }
 0x33b   :  { %v2424_v42 = vpop.f32.mrf.mxu1  ;;  %15644 = vst [vmem:[#allocation18_spill] sm:$0xff] %v11604_v22  ;;  %v7075_v4 = vadd.f32 -1.0, %v7997_v39  ;;  %vm3346_vm3 = vcmp.gt.f32.partialorder %v3278_v48, 0.0 }
 0x33c   :  { %7998 = vpow2.f32 %v3461_v28  ;;  %7847 = vrot.lane.b32.xlu2 %v7846_v55, %s8195_s19  ;;  %v2608_v46 = vsel %vm15650_vm9, %v2539_v37, %v15649_v19  ;;  %v1477_v19 = vpack.c.bf16 %v15642_v44, %v15615_v24  ;;  %vm15656_vm9 = vcmask 261120  }
 0x33d   :  { %v3111_v6 = vpop.f32.mrf.mxu2  ;;  %v11607_v63 = vpop.f32.mrf.mxu0  ;;  %v3617_v28 = vmul.f32 1.6732632, %v7075_v4  ;;  %v2812_v13 = vsel %vm11609_vm13, %v2608_v46, 0.0  ;;  %v8106_v4 = vld [vmem:[%s14456_s0 + $0xd8] sm:$0xff]  ;;  %v15652_v46 = vrot.slane %v15615_v24, 1  ;;  %vm15654_vm13 = vcmask 523264  }
 0x33e   :  { %v3209_v0 = vadd.f32 %v3111_v6, %v2423_v17  ;;  %15645 = vst [vmem:[#allocation71_spill] sm:$0xff] %v11607_v63  ;;  %v15651_v6 = vld [vmem:[#allocation73_spill] sm:$0xff] }
 0x33f   :  { %v2425_v22 = vadd.f32 %v2424_v42, %v15651_v6 }
 0x340   :  { %v11618_v53 = vadd.f32 %v11178_v15, %v3209_v0  ;;  %v8107_v0 = vld [vmem:[%s14456_s0 + $0xd0] sm:$0xff] }
 0x341   :  { %v4162_v1 = vpack.c.bf16 %v8106_v4, %v8107_v0 }
 0x342   :  { %v7999_v39 = vpop.eup %7998  ;;  %v3463_v55 = vmul.f32 1.442695, %v11618_v53  ;;  %v11639_v29 = vpop.f32.mrf.mxu3 }
 0x343   :  { %v7076_v17 = vadd.f32 -1.0, %v7999_v39  ;;  %v2427_v14 = vpop.f32.mrf.mxu1  ;;  %v2541_v39 = vsel %vm15653_vm6, %v15652_v46, %v2539_v37 }
 0x344   :  { %8000 = vpow2.f32 %v3463_v55  ;;  %v3685_v55 = vsel %vm3345_vm7, %v11512_v34, %v3617_v28  ;;  %v2855_v24 = vpack.c.bf16 %v2812_v13, %v2541_v39  ;;  %vm15657_vm7 = vmmov %vm15654_vm13  ;;  %v7585_v39 = vld [vmem:[%s14459_s3 + $0x20] sm:$0xff] }
 0x345   :  { %v3113_v33 = vpop.f32.mrf.mxu2  ;;  %v3618_v42 = vmul.f32 1.6732632, %v7076_v17  ;;  %6970 = vmatmul.msk.bf16.gmra.mxu1 %vm15654_vm13, %v1477_v19  ;;  %v4323_v6 = vpop.f32.mrf.mxu0  ;;  %v11645_v0 = vmul.f32 1.050701, %v3685_v55  ;;  %v15658_v19 = vld [vmem:[#allocation77_spill] sm:$0xff]  ;;  %6286 = vmatpush.bf16.msra.mxu2 %v7585_v39  ;;  %vm3347_vm13 = vcmp.gt.f32.partialorder %v11618_v53, 0.0 }
 0x346   :  { %v3210_v44 = vadd.f32 %v3113_v33, %v2425_v22  ;;  %v11642_v43 = vadd.f32 %v11394_v8, %v4323_v6  ;;  %v11656_v8 = vld [vmem:[%s14456_s0 + $0x10] sm:$0xff]  ;;  %v2428_v33 = vadd.f32 %v2427_v14, %v15658_v19 }
 0x347   :  { %v3686_v63 = vsel %vm3346_vm3, %v3278_v48, %v3618_v42  ;;  %v14818_v48 = vrot.slane %v11656_v8, 1  ;;  %vm15662_vm3 = vmmov %vm15653_vm6 }
 0x348   :  { %15655 = vst [vmem:[#allocation19_spill] sm:$0xff] %v11642_v43  ;;  %v3280_v4 = vadd.f32 %v11178_v15, %v3210_v44  ;;  %v11647_v37 = vmul.f32 1.050701, %v3686_v63  ;;  %7138 = vmatmul.msk.bf16.gmra.mxu0 %vm15656_vm9, %v4162_v1  ;;  %v11662_v63 = vld [vmem:[%s14456_s0 + $0x8] sm:$0xff]  ;;  %v11675_v44 = vld [vmem:[%s14456_s0] sm:$0xff] }
 0x349   :  { %v5943_v13 = vrot.slane %v11662_v63, 1  ;;  %15660 = vst [vmem:[#allocation77_spill] sm:$0xff] %v11675_v44  ;;  %v14820_v6 = vrot.slane %v11675_v44, 1 }
 0x34a   :  { %v8001_v34 = vpop.eup %8000  ;;  %v3465_v22 = vmul.f32 1.442695, %v3280_v4  ;;  %7028 = vmatmul.msk.bf16.gmra.mxu2 %vm15657_vm7, %v2855_v24  ;;  %v7851_v28 = vpack.i.bf16 %v11647_v37, %v11645_v0  ;;  %v11684_v24 = vadd.f32 %v11178_v15, %v10983_v56  ;;  %vm3348_vm9 = vcmp.gt.f32.partialorder %v3280_v4, 0.0  ;;  %v8134_v56 = vld [vmem:[%s14456_s0 + $0x38] sm:$0xff] }
 0x34b   :  { %v2429_v17 = vpop.f32.mrf.mxu1  ;;  %v7077_v1 = vadd.f32 -1.0, %v8001_v34  ;;  %v6067_v14 = vsel %vm15653_vm6, %v5943_v13, %v14818_v48  ;;  %v6068_v39 = vsel %vm15662_vm3, %v14820_v6, %v5943_v13  ;;  %v8111_v13 = vld [vmem:[%s14456_s0 + $0xe0] sm:$0xff]  ;;  %vm15666_vm7 = vcmask 261120  }
 0x34c   :  { %8002 = vpow2.f32 %v3465_v22  ;;  %7852 = vrot.lane.b32.xlu0 %v7851_v28, %s8195_s19  ;;  %v11691_v22 = vadd.f32 %v11178_v15, %v11043_v12  ;;  %v11693_v28 = vpop.f32.mrf.mxu3  ;;  %v6071_v48 = vsel %vm9050_vm0, %v6067_v14, 0.0  ;;  %v7570_v12 = vld [vmem:[%s14460_s2 + $0x18] sm:$0xff]  ;;  %v8112_v14 = vld [vmem:[%s14456_s0 + $0xe8] sm:$0xff]  ;;  %vm15667_vm6 = vmmov %vm15666_vm7 }
 0x34d   :  { %v3116_v46 = vpop.f32.mrf.mxu2  ;;  %v11670_v55 = vpop.f32.mrf.mxu0  ;;  %15661 = vst [vmem:[#allocation174_spill] sm:$0xff] %v11693_v28  ;;  %v3619_v19 = vmul.f32 1.6732632, %v7077_v1  ;;  %v3435_v28 = vmul.f32 1.442695, %v11684_v24  ;;  %v15664_v1 = vld [vmem:[#allocation79_spill] sm:$0xff]  ;;  %5472 = vmatpush.bf16.msra.mxu1 %v7570_v12  ;;  %v6139_v59 = vpack.c.bf16 %v6071_v48, %v6068_v39 }
 0x34e   :  { %v3211_v42 = vadd.f32 %v3116_v46, %v2428_v33  ;;  %15659 = vst [vmem:[#allocation73_spill] sm:$0xff] %v11670_v55  ;;  %v2430_v43 = vadd.f32 %v2429_v17, %v15664_v1  ;;  %v3437_v16 = vmul.f32 1.442695, %v11691_v22 }
 0x34f   :  { %v3687_v52 = vsel %vm3347_vm13, %v11618_v53, %v3619_v19 }
 0x350   :  { %v11687_v34 = vadd.f32 %v11178_v15, %v3211_v42  ;;  %v11720_v3 = vmul.f32 1.050701, %v3687_v52 }
 0x352   :  { %v8003_v33 = vpop.eup %8002  ;;  %v3467_v46 = vmul.f32 1.442695, %v11687_v34  ;;  %vm3349_vm3 = vcmp.gt.f32.partialorder %v11687_v34, 0.0 }
 0x353   :  { %v7078_v42 = vadd.f32 -1.0, %v8003_v33  ;;  %v2432_v55 = vpop.f32.mrf.mxu1  ;;  %v4163_v33 = vpack.c.bf16 %v8112_v14, %v8111_v13 }
 0x354   :  { %8004 = vpow2.f32 %v3467_v46 }
 0x355   :  { %v3118_v50 = vpop.f32.mrf.mxu2  ;;  %v3620_v6 = vmul.f32 1.6732632, %v7078_v42  ;;  %v4328_v46 = vpop.f32.mrf.mxu0  ;;  %8006 = vpow2.f32 %v3435_v28 }
 0x356   :  { %v3212_v17 = vadd.f32 %v3118_v50, %v2430_v43  ;;  %v11717_v1 = vadd.f32 %v11549_v20, %v4328_v46  ;;  %8008 = vpow2.f32 %v3437_v16  ;;  %v11728_v50 = vpop.f32.mrf.mxu3  ;;  %v7580_v16 = vld [vmem:[%s14460_s2 + $0x98] sm:$0xff] }
 0x357   :  { %v3688_v5 = vsel %vm3348_vm9, %v3280_v4, %v3620_v6  ;;  %v15668_v4 = vld [vmem:[#allocation83_spill] sm:$0xff]  ;;  %6500 = vmatpush.bf16.msra.mxu3 %v7580_v16  ;;  %vm15673_vm9 = vmmov %vm15667_vm6 }
 0x358   :  { %15665 = vst [vmem:[#allocation39_spill] sm:$0xff] %v11717_v1  ;;  %v3282_v25 = vadd.f32 %v11178_v15, %v3212_v17  ;;  %v11722_v27 = vmul.f32 1.050701, %v3688_v5  ;;  %7139 = vmatmul.msk.bf16.gmra.mxu0 %vm15666_vm7, %v4163_v33  ;;  %v2433_v48 = vadd.f32 %v2432_v55, %v15668_v4  ;;  %v5731_v1 = vrot.slane %v11583_v38, 1 }
 0x359   :  { %vm3333_vm7 = vcmp.gt.f32.partialorder %v11684_v24, 0.0 }
 0x35a   :  { %v8005_v53 = vpop.eup %8004  ;;  %v3469_v19 = vmul.f32 1.442695, %v3282_v25  ;;  %v7856_v43 = vpack.i.bf16 %v11722_v27, %v11720_v3  ;;  %7385 = vmatmul.msk.bf16.vlgmr.msra.gmra.mxu2 %vm15667_vm6, %v6139_v59  ;;  %vm3350_vm13 = vcmp.gt.f32.partialorder %v3282_v25, 0.0  ;;  %vm3334_vm6 = vcmp.gt.f32.partialorder %v11691_v22, 0.0 }
 0x35b   :  { %v2434_v20 = vpop.f32.mrf.mxu1  ;;  %v7079_v5 = vadd.f32 -1.0, %v8005_v53  ;;  %v8007_v6 = vpop.eup %8006  ;;  %v15670_v53 = vld [vmem:[#allocation85_spill] sm:$0xff] }
 0x35c   :  { %8010 = vpow2.f32 %v3469_v19  ;;  %7857 = vrot.lane.b32.xlu1 %v7856_v43, %s8195_s19  ;;  %v8009_v42 = vpop.eup %8008  ;;  %v7063_v13 = vadd.f32 -1.0, %v8007_v6  ;;  %v2435_v19 = vadd.f32 %v2434_v20, %v15670_v53  ;;  %v14826_v53 = vrot.slane %v11587_v54, 7 }
 0x35d   :  { %v3121_v52 = vpop.f32.mrf.mxu2  ;;  %v11735_v39 = vpop.f32.mrf.mxu0  ;;  %v3621_v12 = vmul.f32 1.6732632, %v7079_v5  ;;  %v7064_v14 = vadd.f32 -1.0, %v8009_v42  ;;  %v8114_v5 = vld [vmem:[%s14456_s0 + $0xf8] sm:$0xff] }
 0x35e   :  { %v3213_v28 = vadd.f32 %v3121_v52, %v2433_v48  ;;  %15669 = vst [vmem:[#allocation79_spill] sm:$0xff] %v11735_v39  ;;  %v11743_v43 = vpop.f32.mrf.mxu3  ;;  %v8113_v48 = vld [vmem:[%s14456_s0 + $0xf0] sm:$0xff] }
 0x35f   :  { %15671 = vst [vmem:[#allocation83_spill] sm:$0xff] %v11743_v43  ;;  %v4164_v52 = vpack.c.bf16 %v8114_v5, %v8113_v48  ;;  %v3689_v6 = vsel %vm3349_vm3, %v11687_v34, %v3621_v12  ;;  %v3606_v42 = vmul.f32 1.6732632, %v7064_v14  ;;  %v15674_v14 = vld [vmem:[#allocation88_spill] sm:$0xff]  ;;  %v15675_v5 = vrot.slane %v11315_v26, 1 }
 0x360   :  { %v11738_v59 = vadd.f32 %v11178_v15, %v3213_v28  ;;  %v3605_v28 = vmul.f32 1.6732632, %v7063_v13  ;;  %vm15676_vm3 = vcmp.lt.s32.totalorder %v8564_v11, 7 }
 0x362   :  { %v8011_v55 = vpop.eup %8010  ;;  %v3471_v33 = vmul.f32 1.442695, %v11738_v59 }
 0x363   :  { %v7080_v17 = vadd.f32 -1.0, %v8011_v55  ;;  %v2437_v46 = vpop.f32.mrf.mxu1 }
 0x364   :  { %8012 = vpow2.f32 %v3471_v33  ;;  %v4705_v33 = vrot.slane %v11583_v38, 7  ;;  %v3674_v38 = vsel %vm3334_vm6, %v11691_v22, %v3606_v42 }
 0x365   :  { %v3123_v4 = vpop.f32.mrf.mxu2  ;;  %v3622_v16 = vmul.f32 1.6732632, %v7080_v17  ;;  %v4333_v55 = vpop.f32.mrf.mxu0  ;;  %v11759_v17 = vmul.f32 1.050701, %v3689_v6 }
 0x366   :  { %v3214_v20 = vadd.f32 %v3123_v4, %v2435_v19  ;;  %v11755_v43 = vadd.f32 %v11639_v29, %v4333_v55  ;;  %v2438_v19 = vadd.f32 %v2437_v46, %v15674_v14  ;;  %v3742_v55 = vmul.f32 1.050701, %v3674_v38 }
 0x367   :  { %v3690_v39 = vsel %vm3350_vm13, %v3282_v25, %v3622_v16  ;;  %v3673_v25 = vsel %vm3333_vm7, %v11684_v24, %v3605_v28  ;;  %vm15678_vm13 = vcmp.lt.s32.totalorder %v8564_v11, 1  ;;  %v15686_v38 = vrot.slane %v11587_v54, 1 }
 0x368   :  { %15672 = vst [vmem:[#allocation85_spill] sm:$0xff] %v11755_v43  ;;  %v3284_v48 = vadd.f32 %v11178_v15, %v3214_v20  ;;  %v11761_v34 = vmul.f32 1.050701, %v3690_v39  ;;  %7140 = vmatmul.msk.bf16.gmra.mxu0 %vm15673_vm9, %v4164_v52  ;;  %v11776_v52 = vsel %vm15676_vm3, %v15675_v5, %v5731_v1  ;;  %v11782_v24 = vsel %vm15678_vm13, %v4705_v33, %v14826_v53  ;;  %vm15684_vm6 = vmmov %vm15678_vm13 }
 0x369   :  { %15677 = vst [vmem:[#allocation88_spill] sm:$0xff] %v11776_v52  ;;  %v3741_v20 = vmul.f32 1.050701, %v3673_v25  ;;  %vm15681_vm9 = vcmask 523264   ;;  %vm3351_vm13 = vcmp.gt.f32.partialorder %v11738_v59, 0.0 }
 0x36a   :  { %v8013_v12 = vpop.eup %8012  ;;  %v3473_v13 = vmul.f32 1.442695, %v3284_v48  ;;  %v7861_v29 = vpack.i.bf16 %v11761_v34, %v11759_v17  ;;  %15679 = vst [vmem:[#allocation175_spill] sm:$0xff] %v11782_v24  ;;  %vm15682_vm7 = vmmov %vm15681_vm9 }
 0x36b   :  { %v2439_v4 = vpop.f32.mrf.mxu1  ;;  %v7081_v39 = vadd.f32 -1.0, %v8013_v12  ;;  %v11789_v12 = vpop.f32.mrf.mxu3 }
 0x36c   :  { %8014 = vpow2.f32 %v3473_v13  ;;  %7862 = vrot.lane.b32.xlu2 %v7861_v29, %s8195_s19 }
 0x36d   :  { %v3126_v46 = vpop.f32.mrf.mxu2  ;;  %v11787_v28 = vpop.f32.mrf.mxu0  ;;  %v3623_v14 = vmul.f32 1.6732632, %v7081_v39  ;;  %v11810_v39 = vsel %vm15676_vm3, %v5731_v1, %v15686_v38  ;;  %v8115_v1 = vld [vmem:[%s14456_s0 + $0x100] sm:$0xff] }
 0x36e   :  { %v3215_v6 = vadd.f32 %v3126_v46, %v2438_v19  ;;  %15680 = vst [vmem:[#allocation176_spill] sm:$0xff] %v11787_v28  ;;  %v7828_v42 = vpop.permute.xlu1 %7827  ;;  %v15683_v19 = vrot.slane %v11315_v26, 7  ;;  %v15688_v26 = vld [vmem:[#allocation89_spill] sm:$0xff] }
 0x36f   :  { %v7830_v13 = vunpack.i.h.bf16 %v7828_v42  ;;  %v7829_v29 = vunpack.i.l.bf16 %v7828_v42  ;;  %15687 = vst [vmem:[#allocation178_spill] sm:$0xff] %v11810_v39  ;;  %v3691_v16 = vsel %vm3351_vm13, %v11738_v59, %v3623_v14 }
 0x370   :  { %v11792_v5 = vadd.f32 %v11178_v15, %v3215_v6  ;;  %v11804_v25 = vsel %vm15684_vm6, %v15683_v19, %v4705_v33  ;;  %v8116_v19 = vld [vmem:[%s14456_s0 + $0x108] sm:$0xff]  ;;  %v7833_v33 = vpop.permute.xlu2 %7832  ;;  %v11830_v43 = vmul.f32 1.050701, %v3691_v16  ;;  %vm15694_vm6 = vcmask 523264  }
 0x371   :  { %v11795_v53 = vsel %vm15681_vm9, %v3741_v20, %v7829_v29  ;;  %v11798_v22 = vsel %vm15682_vm7, %v3742_v55, %v7830_v13  ;;  %15685 = vst [vmem:[#allocation177_spill] sm:$0xff] %v11804_v25  ;;  %v2440_v13 = vadd.f32 %v2439_v4, %v15688_v26  ;;  %v4165_v38 = vpack.c.bf16 %v8116_v19, %v8115_v1  ;;  %vm15695_vm3 = vmmov %vm15694_vm6 }
 0x372   :  { %v8015_v46 = vpop.eup %8014  ;;  %v3475_v6 = vmul.f32 1.442695, %v11792_v5  ;;  %v4128_v42 = vpack.c.bf16 %v11798_v22, %v11795_v53  ;;  %vm3352_vm9 = vcmp.gt.f32.partialorder %v3284_v48, 0.0  ;;  %vm15691_vm7 = vcmask 261120  }
 0x373   :  { %v7082_v20 = vadd.f32 -1.0, %v8015_v46  ;;  %v2442_v55 = vpop.f32.mrf.mxu1  ;;  %v11834_v24 = vpop.f32.mrf.mxu3  ;;  %vm3353_vm13 = vcmp.gt.f32.partialorder %v11792_v5, 0.0 }
 0x374   :  { %8016 = vpow2.f32 %v3475_v6  ;;  %4594 = vmatmul.bf16.gmra.mxu3 %v4128_v42  ;;  %15690 = vst [vmem:[#allocation179_spill] sm:$0xff] %v11834_v24 }
 0x375   :  { %v3128_v29 = vpop.f32.mrf.mxu2  ;;  %v3624_v46 = vmul.f32 1.6732632, %v7082_v20  ;;  %v4338_v6 = vpop.f32.mrf.mxu0 }
 0x376   :  { %v3216_v4 = vadd.f32 %v3128_v29, %v2440_v13  ;;  %v11827_v42 = vadd.f32 %v11728_v50, %v4338_v6  ;;  %v7835_v13 = vunpack.i.h.bf16 %v7833_v33  ;;  %v7834_v50 = vunpack.i.l.bf16 %v7833_v33 }
 0x377   :  { %v3692_v26 = vsel %vm3352_vm9, %v3284_v48, %v3624_v46  ;;  %v15692_v48 = vld [vmem:[#allocation12_spill] sm:$0xff] }
 0x378   :  { %15689 = vst [vmem:[#allocation89_spill] sm:$0xff] %v11827_v42  ;;  %v3286_v28 = vadd.f32 %v11178_v15, %v3216_v4  ;;  %v11832_v25 = vmul.f32 1.050701, %v3692_v26  ;;  %7141 = vmatmul.msk.bf16.gmra.mxu0 %vm15691_vm7, %v4165_v38  ;;  %v2443_v1 = vadd.f32 %v2442_v55, %v15692_v48  ;;  %v11845_v38 = vsel %vm15694_vm6, %v11173_v9, %v7834_v50  ;;  %v15696_v9 = vld [vmem:[#allocation56_spill] sm:$0xff]  ;;  %vm15701_vm6 = vmmov %vm15695_vm3 }
 0x379   :  { %v11849_v6 = vsel %vm15695_vm3, %v11183_v51, %v7835_v13  ;;  %v8117_v13 = vld [vmem:[%s14456_s0 + $0x118] sm:$0xff] }
 0x37a   :  { %v8017_v20 = vpop.eup %8016  ;;  %v3477_v59 = vmul.f32 1.442695, %v3286_v28  ;;  %v7866_v14 = vpack.i.bf16 %v11832_v25, %v11830_v43  ;;  %vm3354_vm9 = vcmp.gt.f32.partialorder %v3286_v28, 0.0 }
 0x37b   :  { %v2444_v29 = vpop.f32.mrf.mxu1  ;;  %v7083_v16 = vadd.f32 -1.0, %v8017_v20  ;;  %v4129_v20 = vpack.c.bf16 %v11849_v6, %v11845_v38 }
 0x37c   :  { %8018 = vpow2.f32 %v3477_v59  ;;  %7867 = vrot.lane.b32.xlu0 %v7866_v14, %s8195_s19  ;;  %v11857_v14 = vpop.f32.mrf.mxu3  ;;  %v2445_v50 = vadd.f32 %v2444_v29, %v15696_v9 }
 0x37d   :  { %v3131_v19 = vpop.f32.mrf.mxu2  ;;  %v11841_v4 = vpop.f32.mrf.mxu0  ;;  %v3625_v55 = vmul.f32 1.6732632, %v7083_v16  ;;  %v8118_v16 = vld [vmem:[%s14456_s0 + $0x110] sm:$0xff] }
 0x37e   :  { %v3217_v46 = vadd.f32 %v3131_v19, %v2443_v1  ;;  %15693 = vst [vmem:[#allocation12_spill] sm:$0xff] %v11841_v4  ;;  %v4166_v19 = vpack.c.bf16 %v8117_v13, %v8118_v16 }
 0x380   :  { %v11852_v33 = vadd.f32 %v11178_v15, %v3217_v46 }
 0x382   :  { %v8019_v26 = vpop.eup %8018  ;;  %v3479_v59 = vmul.f32 1.442695, %v11852_v33 }
 0x383   :  { %v7084_v48 = vadd.f32 -1.0, %v8019_v26  ;;  %v2447_v1 = vpop.f32.mrf.mxu1  ;;  %v3693_v26 = vsel %vm3353_vm13, %v11792_v5, %v3625_v55  ;;  %vm3355_vm13 = vcmp.gt.f32.partialorder %v11852_v33, 0.0 }
 0x384   :  { %8020 = vpow2.f32 %v3479_v59  ;;  %4599 = vmatmul.bf16.gmra.mxu3 %v4129_v20  ;;  %v11872_v9 = vmul.f32 1.050701, %v3693_v26 }
 0x385   :  { %v3133_v51 = vpop.f32.mrf.mxu2  ;;  %v3626_v46 = vmul.f32 1.6732632, %v7084_v48  ;;  %v4343_v4 = vpop.f32.mrf.mxu0  ;;  %v15698_v48 = vld [vmem:[#allocation4_spill] sm:$0xff] }
 0x386   :  { %v3218_v24 = vadd.f32 %v3133_v51, %v2445_v50  ;;  %v11869_v29 = vadd.f32 %v11789_v12, %v4343_v4  ;;  %v2448_v50 = vadd.f32 %v2447_v1, %v15698_v48 }
 0x387   :  { %v3694_v59 = vsel %vm3354_vm9, %v3286_v28, %v3626_v46  ;;  %v11881_v28 = vpop.f32.mrf.mxu3  ;;  %v11888_v46 = vld [vmem:[%s14458_s4] ss:$0 sm:$0xff] }
 0x388   :  { %15697 = vst [vmem:[#allocation56_spill] sm:$0xff] %v11869_v29  ;;  %v3288_v20 = vadd.f32 %v11178_v15, %v3218_v24  ;;  %v11874_v42 = vmul.f32 1.050701, %v3694_v59  ;;  %7142 = vmatmul.msk.bf16.gmra.mxu0 %vm15691_vm7, %v4166_v19 }
 0x389   :  { %15699 = vst [vmem:[#allocation4_spill] sm:$0xff] %v11881_v28 }
 0x38a   :  { %v8021_v2 = vpop.eup %8020  ;;  %v3481_v13 = vmul.f32 1.442695, %v3288_v20  ;;  %v7871_v5 = vpack.i.bf16 %v11874_v42, %v11872_v9  ;;  %vm3356_vm9 = vcmp.gt.f32.partialorder %v3288_v20, 0.0 }
 0x38b   :  { %v2449_v55 = vpop.f32.mrf.mxu1  ;;  %v7085_v15 = vadd.f32 -1.0, %v8021_v2 }
 0x38c   :  { %8022 = vpow2.f32 %v3481_v13  ;;  %7872 = vrot.lane.b32.xlu1 %v7871_v5, %s8195_s19 }
 0x38d   :  { %v3136_v24 = vpop.f32.mrf.mxu2  ;;  %v11883_v4 = vpop.f32.mrf.mxu0  ;;  %v3627_v26 = vmul.f32 1.6732632, %v7085_v15  ;;  %v7569_v15 = vld [vmem:[%s14460_s2 + $0x10] sm:$0xff] }
 0x38e   :  { %v3219_v12 = vadd.f32 %v3136_v24, %v2448_v50  ;;  %15700 = vst [vmem:[#allocation180_spill] sm:$0xff] %v11883_v4  ;;  %v7838_v51 = vpop.permute.xlu0 %7837  ;;  %5473 = vmatpush.bf16.msra.mxu1 %v7569_v15 }
 0x38f   :  { %v7840_v16 = vunpack.i.h.bf16 %v7838_v51  ;;  %v7839_v19 = vunpack.i.l.bf16 %v7838_v51  ;;  %v8120_v51 = vld [vmem:[%s14456_s0 + $0x128] sm:$0xff]  ;;  %v3695_v28 = vsel %vm3355_vm13, %v11852_v33, %v3627_v26  ;;  %vm15707_vm13 = vmmov %vm15695_vm3 }
 0x390   :  { %v11891_v1 = vadd.f32 %v11888_v46, %v3219_v12  ;;  %v11920_v52 = vmul.f32 1.050701, %v3695_v28 }
 0x391   :  { %v11895_v59 = vsel %vm15701_vm6, %v11304_v45, %v7839_v19  ;;  %v11899_v2 = vsel %vm15695_vm3, %v11306_v35, %v7840_v16  ;;  %v15702_v45 = vld [vmem:[#allocation60_spill] sm:$0xff]  ;;  %v8121_v16 = vld [vmem:[%s14456_s0 + $0x120] sm:$0xff] }
 0x392   :  { %v8023_v13 = vpop.eup %8022  ;;  %v3483_v5 = vmul.f32 1.442695, %v11891_v1  ;;  %v4130_v48 = vpack.c.bf16 %v11899_v2, %v11895_v59  ;;  %v2450_v12 = vadd.f32 %v2449_v55, %v15702_v45  ;;  %v4167_v19 = vpack.c.bf16 %v8120_v51, %v8121_v16  ;;  %v4570_v55 = vpop.f32.mrf.mxu3  ;;  %v7579_v16 = vld [vmem:[%s14460_s2 + $0x90] sm:$0xff] }
 0x393   :  { %v7086_v50 = vadd.f32 -1.0, %v8023_v13  ;;  %v2452_v24 = vpop.f32.mrf.mxu1  ;;  %6501 = vmatpush.bf16.msra.mxu3 %v7579_v16  ;;  %vm3357_vm6 = vcmp.gt.f32.partialorder %v11891_v1, 0.0  ;;  %v15710_v16 = vrot.slane %v11849_v6, 1 }
 0x394   :  { %8024 = vpow2.f32 %v3483_v5  ;;  %4604 = vmatmul.bf16.gmra.mxu3 %v4130_v48 }
 0x395   :  { %v3138_v35 = vpop.f32.mrf.mxu2  ;;  %v3628_v13 = vmul.f32 1.6732632, %v7086_v50  ;;  %v4348_v29 = vpop.f32.mrf.mxu0 }
 0x396   :  { %v3220_v4 = vadd.f32 %v3138_v35, %v2450_v12  ;;  %v11917_v5 = vadd.f32 %v11857_v14, %v4348_v29  ;;  %v15704_v12 = vld [vmem:[#allocation62_spill] sm:$0xff]  ;;  %v4709_v14 = vrot.slane %v11845_v38, 7  ;;  %v14832_v29 = vrot.slane %v11849_v6, 7 }
 0x397   :  { %v3696_v48 = vsel %vm3356_vm9, %v3288_v20, %v3628_v13  ;;  %v2453_v35 = vadd.f32 %v2452_v24, %v15704_v12  ;;  %v5735_v20 = vrot.slane %v11845_v38, 1  ;;  %v4708_v12 = vrot.slane %v11798_v22, 7 }
 0x398   :  { %15703 = vst [vmem:[#allocation60_spill] sm:$0xff] %v11917_v5  ;;  %v3290_v45 = vadd.f32 %v11888_v46, %v3220_v4  ;;  %v11922_v21 = vmul.f32 1.050701, %v3696_v48  ;;  %7143 = vmatmul.msk.bf16.gmra.mxu0 %vm15691_vm7, %v4167_v19  ;;  %vm15708_vm9 = vcmp.lt.s32.totalorder %v8564_v11, 1  ;;  %vm15711_vm7 = vcmp.lt.s32.totalorder %v8564_v11, 7  ;;  %v15713_v5 = vld [vmem:[#allocation66_spill] sm:$0xff] }
 0x39a   :  { %v8025_v50 = vpop.eup %8024  ;;  %v3485_v51 = vmul.f32 1.442695, %v3290_v45  ;;  %v7876_v33 = vpack.i.bf16 %v11922_v21, %v11920_v52  ;;  %v11944_v28 = vpop.f32.mrf.mxu3 }
 0x39b   :  { %v7087_v26 = vadd.f32 -1.0, %v8025_v50  ;;  %v2454_v15 = vpop.f32.mrf.mxu1  ;;  %15706 = vst [vmem:[#allocation181_spill] sm:$0xff] %v11944_v28 }
 0x39c   :  { %8026 = vpow2.f32 %v3485_v51  ;;  %7877 = vrot.lane.b32.xlu2 %v7876_v33, %s8195_s19  ;;  %v4707_v33 = vrot.slane %v11795_v53, 7  ;;  %v2455_v40 = vadd.f32 %v2454_v15, %v15713_v5  ;;  %v15714_v5 = vrot.slane %v11587_v54, 1 }
 0x39d   :  { %v3141_v4 = vpop.f32.mrf.mxu2  ;;  %v3629_v19 = vmul.f32 1.6732632, %v7087_v26  ;;  %v11936_v48 = vpop.f32.mrf.mxu0 }
 0x39e   :  { %v3221_v13 = vadd.f32 %v3141_v4, %v2453_v35  ;;  %15705 = vst [vmem:[#allocation62_spill] sm:$0xff] %v11936_v48  ;;  %v7843_v24 = vpop.permute.xlu1 %7842  ;;  %v11958_v4 = vsel %vm15708_vm9, %v4709_v14, %v14832_v29  ;;  %v5734_v29 = vrot.slane %v11798_v22, 1 }
 0x39f   :  { %v7845_v50 = vunpack.i.h.bf16 %v7843_v24  ;;  %v7844_v51 = vunpack.i.l.bf16 %v7843_v24  ;;  %15709 = vst [vmem:[#allocation182_spill] sm:$0xff] %v11958_v4 }
 0x3a0   :  { %v11942_v38 = vadd.f32 %v11888_v46, %v3221_v13  ;;  %v11964_v13 = vsel %vm15711_vm7, %v5735_v20, %v15710_v16 }
 0x3a1   :  { %v11948_v26 = vsel %vm15695_vm3, %v11374_v47, %v7844_v51  ;;  %v11952_v35 = vsel %vm15707_vm13, %v11376_v7, %v7845_v50  ;;  %15712 = vst [vmem:[#allocation183_spill] sm:$0xff] %v11964_v13  ;;  %v5733_v47 = vrot.slane %v11795_v53, 1  ;;  %v3697_v50 = vsel %vm3357_vm6, %v11891_v1, %v3629_v19  ;;  %v8122_v53 = vld [vmem:[%s14456_s0 + $0x130] sm:$0xff]  ;;  %vm15715_vm6 = vmmov %vm15711_vm7 }
 0x3a2   :  { %v8027_v24 = vpop.eup %8026  ;;  %v3487_v51 = vmul.f32 1.442695, %v11942_v38  ;;  %v4131_v7 = vpack.c.bf16 %v11952_v35, %v11948_v26  ;;  %vm3358_vm3 = vcmp.gt.f32.partialorder %v3290_v45, 0.0  ;;  %v4168_v32 = vpack.c.bf16 %v8123_v10, %v8122_v53  ;;  %vm15717_vm13 = vmmov %vm15708_vm9  ;;  %v7848_v53 = vpop.permute.xlu2 %7847 }
 0x3a3   :  { %v7088_v28 = vadd.f32 -1.0, %v8027_v24  ;;  %v2457_v48 = vpop.f32.mrf.mxu1  ;;  %v11979_v19 = vmul.f32 1.050701, %v3697_v50  ;;  %v11985_v15 = vsel %vm15715_vm6, %v15714_v5, %v5733_v47  ;;  %vm15722_vm7 = vmmov %vm15715_vm6 }
 0x3a4   :  { %8028 = vpow2.f32 %v3487_v51  ;;  %4609 = vmatmul.bf16.gmra.mxu3 %v4131_v7  ;;  %15716 = vst [vmem:[#allocation66_spill] sm:$0xff] %v11985_v15  ;;  %v11989_v51 = vsel %vm15717_vm13, %v4707_v33, %v4708_v12  ;;  %v15719_v7 = vrot.slane %v11587_v54, 7  ;;  %v12008_v54 = vsel %vm15722_vm7, %v5734_v29, %v5735_v20  ;;  %vm15726_vm13 = vmmov %vm15708_vm9 }
 0x3a5   :  { %v3143_v16 = vpop.f32.mrf.mxu2  ;;  %v3630_v1 = vmul.f32 1.6732632, %v7088_v28  ;;  %v4353_v22 = vpop.f32.mrf.mxu0  ;;  %15718 = vst [vmem:[#allocation184_spill] sm:$0xff] %v11989_v51 }
 0x3a6   :  { %v3222_v24 = vadd.f32 %v3143_v16, %v2455_v40  ;;  %v11995_v10 = vsel %vm15708_vm9, %v15719_v7, %v4707_v33  ;;  %v11997_v28 = vadd.f32 %v4570_v55, %v4353_v22  ;;  %15723 = vst [vmem:[#allocation187_spill] sm:$0xff] %v12008_v54  ;;  %v12012_v55 = vsel %vm15715_vm6, %v5733_v47, %v5734_v29  ;;  %v4575_v7 = vpop.f32.mrf.mxu3 }
 0x3a7   :  { %15720 = vst [vmem:[#allocation185_spill] sm:$0xff] %v11995_v10  ;;  %v3698_v40 = vsel %vm3358_vm3, %v3290_v45, %v3630_v1  ;;  %vm15725_vm3 = vcmask 261120   ;;  %v12019_v33 = vsel %vm15726_vm13, %v4708_v12, %v4709_v14  ;;  %v7850_v29 = vunpack.i.h.bf16 %v7848_v53 }
 0x3a8   :  { %15721 = vst [vmem:[#allocation186_spill] sm:$0xff] %v11997_v28  ;;  %v3292_v5 = vadd.f32 %v11888_v46, %v3222_v24  ;;  %v12004_v41 = vmul.f32 1.050701, %v3698_v40  ;;  %7144 = vmatmul.msk.bf16.gmra.mxu0 %vm15725_vm3, %v4168_v32  ;;  %v7849_v47 = vunpack.i.l.bf16 %v7848_v53  ;;  %v15728_v32 = vld [vmem:[#allocation68_spill] sm:$0xff]  ;;  %vm15730_vm9 = vcmask 523264  }
 0x3a9   :  { %15724 = vst [vmem:[#allocation188_spill] sm:$0xff] %v12012_v55  ;;  %v2458_v16 = vadd.f32 %v2457_v48, %v15728_v32  ;;  %vm15731_vm7 = vmmov %vm15730_vm9  ;;  %v7575_v32 = vld [vmem:[%s14459_s3] sm:$0xff]  ;;  %vm3359_vm6 = vcmp.gt.f32.partialorder %v11942_v38, 0.0  ;;  %vm15735_vm13 = vcmask 261120  }
 0x3aa   :  { %15727 = vst [vmem:[#allocation189_spill] sm:$0xff] %v12019_v33  ;;  %v8029_v1 = vpop.eup %8028  ;;  %v3489_v24 = vmul.f32 1.442695, %v3292_v5  ;;  %v7881_v22 = vpack.i.bf16 %v12004_v41, %v11979_v19  ;;  %v12031_v28 = vsel %vm15730_vm9, %v11466_v58, %v7849_v47  ;;  %v12035_v20 = vsel %vm15731_vm7, %v11472_v18, %v7850_v29  ;;  %v15732_v58 = vld [vmem:[#allocation72_spill] sm:$0xff]  ;;  %v8124_v29 = vld [vmem:[%s14456_s0 + $0x140] sm:$0xff]  ;;  %5258 = vmatpush.bf16.msra.mxu0 %v7575_v32  ;;  %vm15738_vm9 = vmmov %vm15731_vm7 }
 0x3ab   :  { %v2459_v40 = vpop.f32.mrf.mxu1  ;;  %v7089_v45 = vadd.f32 -1.0, %v8029_v1  ;;  %v4132_v1 = vpack.c.bf16 %v12035_v20, %v12031_v28  ;;  %vm3360_vm3 = vcmp.gt.f32.partialorder %v3292_v5, 0.0 }
 0x3ac   :  { %8030 = vpow2.f32 %v3489_v24  ;;  %7882 = vrot.lane.b32.xlu0 %v7881_v22, %s8195_s19  ;;  %v2460_v47 = vadd.f32 %v2459_v40, %v15732_v58 }
 0x3ad   :  { %v3146_v14 = vpop.f32.mrf.mxu2  ;;  %v12027_v50 = vpop.f32.mrf.mxu0  ;;  %v3631_v33 = vmul.f32 1.6732632, %v7089_v45 }
 0x3ae   :  { %v3223_v12 = vadd.f32 %v3146_v14, %v2458_v16  ;;  %15729 = vst [vmem:[#allocation68_spill] sm:$0xff] %v12027_v50  ;;  %v12045_v18 = vpop.f32.mrf.mxu3  ;;  %v8125_v14 = vld [vmem:[%s14456_s0 + $0x148] sm:$0xff] }
 0x3af   :  { %15733 = vst [vmem:[#allocation72_spill] sm:$0xff] %v12045_v18  ;;  %v3699_v50 = vsel %vm3359_vm6, %v11942_v38, %v3631_v33 }
 0x3b0   :  { %v3293_v53 = vadd.f32 %v11888_v46, %v3223_v12  ;;  %v4169_v12 = vpack.c.bf16 %v8125_v14, %v8124_v29  ;;  %v12057_v4 = vmul.f32 1.050701, %v3699_v50 }
 0x3b2   :  { %v8031_v48 = vpop.eup %8030  ;;  %v3491_v24 = vmul.f32 1.442695, %v3293_v53  ;;  %vm3361_vm6 = vcmp.gt.f32.partialorder %v3293_v53, 0.0 }
 0x3b3   :  { %v7090_v22 = vadd.f32 -1.0, %v8031_v48  ;;  %v2462_v16 = vpop.f32.mrf.mxu1 }
 0x3b4   :  { %8032 = vpow2.f32 %v3491_v24  ;;  %4614 = vmatmul.bf16.gmra.mxu3 %v4132_v1 }
 0x3b5   :  { %v3148_v45 = vpop.f32.mrf.mxu2  ;;  %v3632_v48 = vmul.f32 1.6732632, %v7090_v22  ;;  %v4358_v24 = vpop.f32.mrf.mxu0  ;;  %v15736_v22 = vld [vmem:[#allocation74_spill] sm:$0xff] }
 0x3b6   :  { %v3224_v40 = vadd.f32 %v3148_v45, %v2460_v47  ;;  %v12054_v1 = vadd.f32 %v4575_v7, %v4358_v24  ;;  %v2463_v32 = vadd.f32 %v2462_v16, %v15736_v22  ;;  %v4580_v14 = vpop.f32.mrf.mxu3  ;;  %v5737_v22 = vrot.slane %v11895_v59, 1 }
 0x3b7   :  { %v3700_v58 = vsel %vm3360_vm3, %v3292_v5, %v3632_v48 }
 0x3b8   :  { %15734 = vst [vmem:[#allocation190_spill] sm:$0xff] %v12054_v1  ;;  %v3294_v18 = vadd.f32 %v11888_v46, %v3224_v40  ;;  %v12059_v55 = vmul.f32 1.050701, %v3700_v58  ;;  %7145 = vmatmul.msk.bf16.gmra.mxu0 %vm15735_vm13, %v4169_v12  ;;  %vm15741_vm13 = vcmp.lt.s32.totalorder %v8564_v11, 7 }
 0x3ba   :  { %v8033_v54 = vpop.eup %8032  ;;  %v3493_v29 = vmul.f32 1.442695, %v3294_v18  ;;  %v7886_v38 = vpack.i.bf16 %v12059_v55, %v12057_v4  ;;  %vm3362_vm3 = vcmp.gt.f32.partialorder %v3294_v18, 0.0 }
 0x3bb   :  { %v7091_v33 = vadd.f32 -1.0, %v8033_v54  ;;  %v2464_v5 = vpop.f32.mrf.mxu1  ;;  %v4711_v54 = vrot.slane %v11895_v59, 7  ;;  %v8126_v59 = vld [vmem:[%s14456_s0 + $0x150] sm:$0xff] }
 0x3bc   :  { %8034 = vpow2.f32 %v3493_v29  ;;  %7887 = vrot.lane.b32.xlu1 %v7886_v38, %s8195_s19 }
 0x3bd   :  { %v3151_v7 = vpop.f32.mrf.mxu2  ;;  %v12066_v50 = vpop.f32.mrf.mxu0  ;;  %v3633_v40 = vmul.f32 1.6732632, %v7091_v33 }
 0x3be   :  { %v3225_v47 = vadd.f32 %v3151_v7, %v2463_v32  ;;  %15737 = vst [vmem:[#allocation74_spill] sm:$0xff] %v12066_v50  ;;  %v7853_v45 = vpop.permute.xlu0 %7852 }
 0x3bf   :  { %v7855_v48 = vunpack.i.h.bf16 %v7853_v45  ;;  %v7854_v12 = vunpack.i.l.bf16 %v7853_v45 }
 0x3c0   :  { %v12069_v24 = vadd.f32 %v11888_v46, %v3225_v47  ;;  %v15739_v47 = vld [vmem:[#allocation78_spill] sm:$0xff] }
 0x3c1   :  { %v12074_v16 = vsel %vm15738_vm9, %v11595_v60, %v7854_v12  ;;  %v12078_v58 = vsel %vm15731_vm7, %v11597_v49, %v7855_v48  ;;  %v2465_v45 = vadd.f32 %v2464_v5, %v15739_v47  ;;  %v3701_v60 = vsel %vm3361_vm6, %v3293_v53, %v3633_v40  ;;  %v8127_v12 = vld [vmem:[%s14456_s0 + $0x158] sm:$0xff] }
 0x3c2   :  { %v8035_v29 = vpop.eup %8034  ;;  %v3495_v33 = vmul.f32 1.442695, %v12069_v24  ;;  %v4133_v32 = vpack.c.bf16 %v12078_v58, %v12074_v16  ;;  %v4170_v38 = vpack.c.bf16 %v8127_v12, %v8126_v59  ;;  %v15740_v5 = vrot.slane %v11849_v6, 1 }
 0x3c3   :  { %v7092_v7 = vadd.f32 -1.0, %v8035_v29  ;;  %v15743_v40 = vrot.slane %v11899_v2, 7  ;;  %vm15744_vm9 = vcmp.lt.s32.totalorder %v8564_v11, 1  ;;  %v12114_v12 = vmul.f32 1.050701, %v3701_v60 }
 0x3c4   :  { %8036 = vpow2.f32 %v3495_v33  ;;  %4619 = vmatmul.bf16.gmra.mxu3 %v4133_v32  ;;  %v12097_v53 = vsel %vm15741_vm13, %v15740_v5, %v5737_v22  ;;  %v15746_v32 = vrot.slane %v11849_v6, 7  ;;  %vm15747_vm7 = vmmov %vm15744_vm9  ;;  %vm15752_vm6 = vcmask 261120  }
 0x3c5   :  { %v3153_v48 = vpop.f32.mrf.mxu2  ;;  %v3634_v50 = vmul.f32 1.6732632, %v7092_v7  ;;  %v4363_v1 = vpop.f32.mrf.mxu0  ;;  %15742 = vst [vmem:[#allocation78_spill] sm:$0xff] %v12097_v53  ;;  %v12103_v33 = vsel %vm15744_vm9, %v4711_v54, %v15743_v40  ;;  %v4915_v7 = vrot.slane %v11675_v44, 7  ;;  %v12128_v40 = vld [vmem:[%s14456_s0 + $0x1f8] sm:$0xff]  ;;  %v15753_v60 = vrot.slane %v11899_v2, 1  ;;  %vm15761_vm9 = vmmov %vm15747_vm7 }
 0x3c6   :  { %v3226_v29 = vadd.f32 %v3153_v48, %v2465_v45  ;;  %15745 = vst [vmem:[#allocation191_spill] sm:$0xff] %v12103_v33  ;;  %v12109_v47 = vsel %vm15747_vm7, %v15746_v32, %v4711_v54  ;;  %v2467_v45 = vpop.f32.mrf.mxu1  ;;  %v12112_v48 = vadd.f32 %v4580_v14, %v4363_v1  ;;  %v12131_v1 = vpop.f32.mrf.mxu3  ;;  %v15760_v14 = vrot.slane %v12031_v28, 7 }
 0x3c7   :  { %15748 = vst [vmem:[#allocation192_spill] sm:$0xff] %v12109_v47  ;;  %v3702_v59 = vsel %vm3362_vm3, %v3294_v18, %v3634_v50  ;;  %vm15754_vm3 = vmmov %vm15741_vm13 }
 0x3c8   :  { %15749 = vst [vmem:[#allocation193_spill] sm:$0xff] %v12112_v48  ;;  %v12117_v5 = vadd.f32 %v11888_v46, %v3226_v29  ;;  %v12119_v49 = vmul.f32 1.050701, %v3702_v59  ;;  %7146 = vmatmul.msk.bf16.gmra.mxu0 %vm15752_vm6, %v4170_v38  ;;  %v12140_v29 = vsel %vm15754_vm3, %v5737_v22, %v15753_v60  ;;  %v5741_v59 = vrot.slane %v12031_v28, 1  ;;  %v15755_v38 = vld [vmem:[#allocation80_spill] sm:$0xff]  ;;  %vm15757_vm13 = vmmov %vm15747_vm7 }
 0x3c9   :  { %15750 = vst [vmem:[#allocation194_spill] sm:$0xff] %v12128_v40  ;;  %v2468_v44 = vadd.f32 %v2467_v45, %v15755_v38  ;;  %v15756_v22 = vrot.slane %v12128_v40, 7  ;;  %vm15763_vm7 = vmmov %vm15754_vm3  ;;  %vm3363_vm3 = vcmp.gt.f32.partialorder %v12069_v24, 0.0 }
 0x3ca   :  { %15751 = vst [vmem:[#allocation195_spill] sm:$0xff] %v12131_v1  ;;  %v8037_v32 = vpop.eup %8036  ;;  %v3497_v6 = vmul.f32 1.442695, %v12117_v5  ;;  %v7891_v50 = vpack.i.bf16 %v12119_v49, %v12114_v12  ;;  %vm15765_vm6 = vmmov %vm15761_vm9 }
 0x3cb   :  { %v7093_v18 = vadd.f32 -1.0, %v8037_v32  ;;  %v5042_v60 = vsel %vm15757_vm13, %v15756_v22, %v4915_v7  ;;  %v15759_v32 = vrot.slane %v12035_v20, 7  ;;  %vm15767_vm13 = vcmask 523264  }
 0x3cc   :  { %8038 = vpow2.f32 %v3497_v6  ;;  %7892 = vrot.lane.b32.xlu2 %v7891_v50, %s8195_s19  ;;  %v15762_v6 = vrot.slane %v12035_v20, 1 }
 0x3cd   :  { %v3156_v1 = vpop.f32.mrf.mxu2  ;;  %v3635_v54 = vmul.f32 1.6732632, %v7093_v18  ;;  %v12154_v47 = vpop.f32.mrf.mxu0  ;;  %v12162_v45 = vsel %vm15761_vm9, %v15760_v14, %v15759_v32  ;;  %v5043_v14 = vsel %vm8746_vm8, %v5042_v60, 0.0  ;;  %v4713_v32 = vrot.slane %v11948_v26, 7  ;;  %vm15768_vm9 = vmmov %vm15767_vm13 }
 0x3ce   :  { %v3227_v48 = vadd.f32 %v3156_v1, %v2468_v44  ;;  %15758 = vst [vmem:[#allocation80_spill] sm:$0xff] %v12154_v47  ;;  %v7858_v33 = vpop.permute.xlu1 %7857  ;;  %v12168_v50 = vsel %vm15763_vm7, %v5741_v59, %v15762_v6  ;;  %v7568_v44 = vld [vmem:[%s14460_s2 + $0x8] sm:$0xff]  ;;  %v15764_v1 = vrot.slane %v11662_v63, 7  ;;  %v4714_v6 = vrot.slane %v11952_v35, 7  ;;  %v4585_v51 = vpop.f32.mrf.mxu3 }
 0x3cf   :  { %v7860_v38 = vunpack.i.h.bf16 %v7858_v33  ;;  %v7859_v18 = vunpack.i.l.bf16 %v7858_v33  ;;  %v2469_v33 = vpop.f32.mrf.mxu1  ;;  %5474 = vmatpush.bf16.msra.mxu1 %v7568_v44  ;;  %v3703_v10 = vsel %vm3363_vm3, %v12069_v24, %v3635_v54  ;;  %vm3364_vm7 = vcmp.gt.f32.partialorder %v12117_v5, 0.0 }
 0x3d0   :  { %v5041_v22 = vsel %vm15765_vm6, %v4915_v7, %v15764_v1  ;;  %v12181_v47 = vadd.f32 %v11888_v46, %v3227_v48  ;;  %v5739_v1 = vrot.slane %v11948_v26, 1  ;;  %v12204_v31 = vmul.f32 1.050701, %v3703_v10 }
 0x3d1   :  { %v12187_v13 = vsel %vm15767_vm13, %v11645_v0, %v7859_v18  ;;  %v12191_v7 = vsel %vm15768_vm9, %v11647_v37, %v7860_v38  ;;  %v5740_v0 = vrot.slane %v11952_v35, 1  ;;  %v15769_v18 = vld [vmem:[#allocation84_spill] sm:$0xff]  ;;  %v7578_v37 = vld [vmem:[%s14460_s2 + $0x88] sm:$0xff]  ;;  %v5111_v26 = vpack.c.bf16 %v5041_v22, %v5043_v14 }
 0x3d2   :  { %v8039_v60 = vpop.eup %8038  ;;  %v3499_v48 = vmul.f32 1.442695, %v12181_v47  ;;  %v4134_v53 = vpack.c.bf16 %v12191_v7, %v12187_v13  ;;  %v2470_v15 = vadd.f32 %v2469_v33, %v15769_v18  ;;  %6502 = vmatpush.bf16.msra.mxu3 %v7578_v37  ;;  %v15770_v35 = vrot.slane %v11899_v2, 1 }
 0x3d3   :  { %v7094_v39 = vadd.f32 -1.0, %v8039_v60  ;;  %vm15771_vm6 = vcmp.lt.s32.totalorder %v8564_v11, 7  ;;  %vm15772_vm3 = vcmp.lt.s32.totalorder %v8564_v11, 1  ;;  %v15773_v22 = vrot.slane %v11899_v2, 7 }
 0x3d4   :  { %8040 = vpow2.f32 %v3499_v48  ;;  %4624 = vmatmul.bf16.gmra.mxu3 %v4134_v53  ;;  %v12210_v33 = vsel %vm15771_vm6, %v15770_v35, %v5739_v1  ;;  %v12214_v53 = vsel %vm15772_vm3, %v4713_v32, %v4714_v6  ;;  %vm15774_vm13 = vmmov %vm15772_vm3  ;;  %v7863_v48 = vpop.permute.xlu2 %7862 }
 0x3d5   :  { %v3158_v38 = vpop.f32.mrf.mxu2  ;;  %v3636_v44 = vmul.f32 1.6732632, %v7094_v39  ;;  %v4368_v54 = vpop.f32.mrf.mxu0  ;;  %v12220_v39 = vsel %vm15774_vm13, %v15773_v22, %v4713_v32  ;;  %vm15776_vm9 = vmmov %vm15771_vm6  ;;  %v15778_v32 = vrot.slane %v12031_v28, 7  ;;  %vm15781_vm13 = vcmask 523264  }
 0x3d6   :  { %v3228_v24 = vadd.f32 %v3158_v38, %v2470_v15  ;;  %v12222_v10 = vadd.f32 %v4585_v51, %v4368_v54  ;;  %v12234_v2 = vsel %vm15776_vm9, %v5740_v0, %v5741_v59  ;;  %v12238_v51 = vsel %vm15771_vm6, %v5739_v1, %v5740_v0  ;;  %vm15782_vm9 = vmmov %vm15781_vm13 }
 0x3d7   :  { %v3704_v15 = vsel %vm3364_vm7, %v12117_v5, %v3636_v44  ;;  %vm15777_vm7 = vcmask 261120   ;;  %v7865_v0 = vunpack.i.h.bf16 %v7863_v48  ;;  %vm3365_vm6 = vcmp.gt.f32.partialorder %v12181_v47, 0.0 }
 0x3d8   :  { %15775 = vst [vmem:[#allocation23_spill] sm:$0xff] %v12222_v10  ;;  %v3298_v18 = vadd.f32 %v11888_v46, %v3228_v24  ;;  %v12230_v37 = vmul.f32 1.050701, %v3704_v15  ;;  %7197 = vmatmul.msk.bf16.vlgmr.msra.gmra.mxu0 %vm15777_vm7, %v5111_v26  ;;  %v12247_v46 = vsel %vm15772_vm3, %v4714_v6, %v15778_v32  ;;  %v7864_v24 = vunpack.i.l.bf16 %v7863_v48  ;;  %v12254_v26 = vpop.f32.mrf.mxu3  ;;  %vm15786_vm3 = vmmov %vm15782_vm9 }
 0x3d9   :  { %15779 = vst [vmem:[#allocation84_spill] sm:$0xff] %v12254_v26  ;;  %v12264_v35 = vsel %vm15782_vm9, %v11722_v27, %v7865_v0  ;;  %vm15789_vm9 = vcmp.lt.s32.totalorder %v8564_v11, 7 }
 0x3da   :  { %v8041_v38 = vpop.eup %8040  ;;  %v3501_v44 = vmul.f32 1.442695, %v3298_v18  ;;  %v7896_v59 = vpack.i.bf16 %v12230_v37, %v12204_v31  ;;  %v12260_v6 = vsel %vm15781_vm13, %v11720_v3, %v7864_v24  ;;  %vm3366_vm7 = vcmp.gt.f32.partialorder %v3298_v18, 0.0  ;;  %vm15787_vm13 = vmmov %vm15786_vm3 }
 0x3db   :  { %v7095_v28 = vadd.f32 -1.0, %v8041_v38  ;;  %v4135_v48 = vpack.c.bf16 %v12264_v35, %v12260_v6 }
 0x3dc   :  { %8042 = vpow2.f32 %v3501_v44  ;;  %7897 = vrot.lane.b32.xlu0 %v7896_v59, %s8195_s19 }
 0x3dd   :  { %v12256_v54 = vpop.f32.mrf.mxu0  ;;  %v3637_v22 = vmul.f32 1.6732632, %v7095_v28 }
 0x3de   :  { %15780 = vst [vmem:[#allocation196_spill] sm:$0xff] %v12256_v54 }
 0x3df   :  { %v3705_v59 = vsel %vm3365_vm6, %v12181_v47, %v3637_v22  ;;  %v5743_v22 = vrot.slane %v12074_v16, 1  ;;  %vm15790_vm6 = vcmp.lt.s32.totalorder %v8564_v11, 1 }
 0x3e0   :  { %v4590_v38 = vpop.f32.mrf.mxu3  ;;  %v3773_v27 = vmul.f32 1.050701, %v3705_v59 }
 0x3e2   :  { %v8043_v15 = vpop.eup %8042 }
 0x3e3   :  { %v7096_v32 = vadd.f32 -1.0, %v8043_v15 }
 0x3e4   :  { %4629 = vmatmul.bf16.gmra.mxu3 %v4135_v48 }
 0x3e5   :  { %v3638_v44 = vmul.f32 1.6732632, %v7096_v32  ;;  %v4373_v3 = vpop.f32.mrf.mxu0  ;;  %v4717_v32 = vrot.slane %v12074_v16, 7 }
 0x3e6   :  { %v12270_v24 = vadd.f32 %v4590_v38, %v4373_v3  ;;  %v5744_v38 = vrot.slane %v12078_v58, 1  ;;  %v15788_v3 = vrot.slane %v12035_v20, 1 }
 0x3e7   :  { %v3706_v1 = vsel %vm3366_vm7, %v3298_v18, %v3638_v44  ;;  %vm15792_vm7 = vmmov %vm15790_vm6 }
 0x3e8   :  { %15783 = vst [vmem:[#allocation197_spill] sm:$0xff] %v12270_v24  ;;  %v3774_v0 = vmul.f32 1.050701, %v3706_v1  ;;  %v12275_v60 = vpop.f32.mrf.mxu3  ;;  %v4718_v1 = vrot.slane %v12078_v58, 7 }
 0x3e9   :  { %15785 = vst [vmem:[#allocation199_spill] sm:$0xff] %v12275_v60  ;;  %v5745_v60 = vrot.slane %v12187_v13, 1 }
 0x3ea   :  { %v7901_v28 = vpack.i.bf16 %v3774_v0, %v3773_v27 }
 0x3ec   :  { %7902 = vrot.lane.b32.xlu1 %v7901_v28, %s8195_s19 }
 0x3ed   :  { %v12273_v5 = vpop.f32.mrf.mxu0 }
 0x3ee   :  { %15784 = vst [vmem:[#allocation198_spill] sm:$0xff] %v12273_v5  ;;  %v7868_v15 = vpop.permute.xlu0 %7867  ;;  %v5746_v5 = vrot.slane %v12191_v7, 1 }
 0x3ef   :  { %v7870_v48 = vunpack.i.h.bf16 %v7868_v15  ;;  %v7869_v14 = vunpack.i.l.bf16 %v7868_v15 }
 0x3f1   :  { %v12280_v47 = vsel %vm15786_vm3, %v11759_v17, %v7869_v14  ;;  %v12284_v18 = vsel %vm15787_vm13, %v11761_v34, %v7870_v48  ;;  %v12295_v17 = vsel %vm15789_vm9, %v15788_v3, %v5743_v22  ;;  %v12299_v34 = vsel %vm15790_vm6, %v4717_v32, %v4718_v1  ;;  %vm15793_vm3 = vmmov %vm15789_vm9 }
 0x3f2   :  { %v4136_v44 = vpack.c.bf16 %v12284_v18, %v12280_v47  ;;  %v15791_v14 = vrot.slane %v12035_v20, 7  ;;  %v12309_v58 = vsel %vm15793_vm3, %v5743_v22, %v5744_v38  ;;  %v4721_v48 = vrot.slane %v12260_v6, 7  ;;  %vm15796_vm13 = vmmov %vm15790_vm6 }
 0x3f3   :  { %v14851_v20 = vrot.slane %v12264_v35, 7  ;;  %vm15797_vm9 = vmmov %vm15793_vm3  ;;  %vm15800_vm6 = vcmask 523264   ;;  %v12351_v24 = vsel %vm15793_vm3, %v5744_v38, %v5745_v60 }
 0x3f4   :  { %4634 = vmatmul.bf16.gmra.mxu3 %v4136_v44  ;;  %v12305_v16 = vsel %vm15792_vm7, %v15791_v14, %v4717_v32  ;;  %v5747_v32 = vrot.slane %v12260_v6, 1  ;;  %v5748_v44 = vrot.slane %v12264_v35, 1  ;;  %v4719_v6 = vrot.slane %v12187_v13, 7  ;;  %vm15801_vm7 = vmmov %vm15800_vm6 }
 0x3f5   :  { %v4378_v59 = vpop.f32.mrf.mxu0  ;;  %v12327_v14 = vsel %vm15796_vm13, %v4721_v48, %v14851_v20  ;;  %v4720_v20 = vrot.slane %v12191_v7, 7 }
 0x3f7   :  { %v4595_v27 = vpop.f32.mrf.mxu3 }
 0x3f8   :  { %v12315_v15 = vadd.f32 %v4595_v27, %v4378_v59  ;;  %v12331_v59 = vsel %vm15797_vm9, %v5747_v32, %v5748_v44  ;;  %vm15802_vm9 = vmmov %vm15796_vm13 }
 0x3f9   :  { %15798 = vst [vmem:[#allocation202_spill] sm:$0xff] %v12331_v59 }
 0x3fa   :  { %15794 = vst [vmem:[#allocation200_spill] sm:$0xff] %v12315_v15 }
 0x3fd   :  { %v12321_v22 = vpop.f32.mrf.mxu0 }
 0x3fe   :  { %v7873_v3 = vpop.permute.xlu1 %7872  ;;  %15795 = vst [vmem:[#allocation201_spill] sm:$0xff] %v12321_v22 }
 0x3ff   :  { %v7875_v27 = vunpack.i.h.bf16 %v7873_v3  ;;  %v7874_v28 = vunpack.i.l.bf16 %v7873_v3  ;;  %v12333_v0 = vpop.f32.mrf.mxu3 }
 0x400   :  { %15799 = vst [vmem:[#allocation203_spill] sm:$0xff] %v12333_v0 }
 0x401   :  { %v12338_v15 = vsel %vm15800_vm6, %v11830_v43, %v7874_v28  ;;  %v12342_v22 = vsel %vm15801_vm7, %v11832_v25, %v7875_v27  ;;  %v12355_v43 = vsel %vm15796_vm13, %v4719_v6, %v4720_v20  ;;  %v12359_v25 = vsel %vm15802_vm9, %v4718_v1, %v4719_v6  ;;  %vm15803_vm6 = vmmov %vm15793_vm3  ;;  %v7878_v1 = vpop.permute.xlu2 %7877 }
 0x402   :  { %v4137_v3 = vpack.c.bf16 %v12342_v22, %v12338_v15  ;;  %v12363_v13 = vsel %vm15803_vm6, %v5746_v5, %v5747_v32  ;;  %vm15804_vm7 = vmmov %vm15793_vm3  ;;  %v7880_v26 = vunpack.i.h.bf16 %v7878_v1  ;;  %v7879_v54 = vunpack.i.l.bf16 %v7878_v1 }
 0x403   :  { %v12371_v27 = vsel %vm15804_vm7, %v5745_v60, %v5746_v5  ;;  %vm15805_vm3 = vmmov %vm15802_vm9  ;;  %vm15809_vm13 = vcmask 523264   ;;  %v4723_v32 = vrot.slane %v12280_v47, 7 }
 0x404   :  { %4639 = vmatmul.bf16.gmra.mxu3 %v4137_v3  ;;  %v12375_v3 = vsel %vm15805_vm3, %v4720_v20, %v4721_v48  ;;  %v12389_v60 = vsel %vm15809_vm13, %v11872_v9, %v7879_v54  ;;  %vm15810_vm9 = vmmov %vm15809_vm13  ;;  %v7567_v48 = vld [vmem:[%s14460_s2] sm:$0xff]  ;;  %vm15816_vm3 = vcmp.lt.s32.totalorder %v8564_v11, 7  ;;  %vm15817_vm13 = vcmp.lt.s32.totalorder %v8564_v11, 1 }
 0x405   :  { %v4383_v0 = vpop.f32.mrf.mxu0  ;;  %v12393_v5 = vsel %vm15810_vm9, %v11874_v42, %v7880_v26  ;;  %v7577_v20 = vld [vmem:[%s14460_s2 + $0x80] sm:$0xff]  ;;  %5475 = vmatpush.bf16.msra.mxu1 %v7567_v48  ;;  %vm15814_vm6 = vmmov %vm15810_vm9 }
 0x406   :  { %6503 = vmatpush.bf16.msra.mxu3 %v7577_v20  ;;  %vm15815_vm7 = vmmov %vm15814_vm6  ;;  %v4724_v20 = vrot.slane %v12284_v18, 7 }
 0x407   :  { %v4600_v7 = vpop.f32.mrf.mxu3  ;;  %vm15820_vm9 = vmmov %vm15817_vm13 }
 0x408   :  { %v12377_v6 = vadd.f32 %v4600_v7, %v4383_v0  ;;  %v4138_v0 = vpack.c.bf16 %v12393_v5, %v12389_v60 }
 0x40a   :  { %15806 = vst [vmem:[#allocation204_spill] sm:$0xff] %v12377_v6 }
 0x40d   :  { %v12383_v38 = vpop.f32.mrf.mxu0 }
 0x40e   :  { %15807 = vst [vmem:[#allocation205_spill] sm:$0xff] %v12383_v38 }
 0x40f   :  { %v12385_v10 = vpop.f32.mrf.mxu3 }
 0x410   :  { %15808 = vst [vmem:[#allocation206_spill] sm:$0xff] %v12385_v10 }
 0x414   :  { %4644 = vmatmul.bf16.gmra.mxu3 %v4138_v0 }
 0x415   :  { %v4388_v7 = vpop.f32.mrf.mxu0 }
 0x417   :  { %v4605_v9 = vpop.f32.mrf.mxu3 }
 0x418   :  { %v12403_v54 = vadd.f32 %v4605_v9, %v4388_v7  ;;  %v5749_v7 = vrot.slane %v12280_v47, 1  ;;  %v5750_v9 = vrot.slane %v12284_v18, 1 }
 0x41a   :  { %15811 = vst [vmem:[#allocation207_spill] sm:$0xff] %v12403_v54  ;;  %v4727_v54 = vrot.slane %v12389_v60, 7 }
 0x41d   :  { %v12405_v26 = vpop.f32.mrf.mxu0 }
 0x41e   :  { %v7883_v42 = vpop.permute.xlu0 %7882  ;;  %15812 = vst [vmem:[#allocation208_spill] sm:$0xff] %v12405_v26  ;;  %v12425_v26 = vsel %vm15816_vm3, %v5748_v44, %v5749_v7 }
 0x41f   :  { %v7885_v1 = vunpack.i.h.bf16 %v7883_v42  ;;  %v7884_v28 = vunpack.i.l.bf16 %v7883_v42  ;;  %v12407_v0 = vpop.f32.mrf.mxu3 }
 0x420   :  { %15813 = vst [vmem:[#allocation209_spill] sm:$0xff] %v12407_v0 }
 0x421   :  { %v12412_v10 = vsel %vm15814_vm6, %v11920_v52, %v7884_v28  ;;  %v12416_v48 = vsel %vm15815_vm7, %v11922_v21, %v7885_v1  ;;  %v12429_v52 = vsel %vm15817_vm13, %v4723_v32, %v4724_v20  ;;  %v15819_v21 = vrot.slane %v12264_v35, 7  ;;  %vm15822_vm6 = vmmov %vm15816_vm3 }
 0x422   :  { %v4139_v42 = vpack.c.bf16 %v12416_v48, %v12412_v10  ;;  %15818 = vst [vmem:[#allocation210_spill] sm:$0xff] %v12429_v52  ;;  %v12439_v18 = vsel %vm15822_vm6, %v5749_v7, %v5750_v9  ;;  %v4728_v35 = vrot.slane %v12393_v5, 7  ;;  %vm15826_vm7 = vmmov %vm15820_vm9  ;;  %vm15830_vm13 = vcmask 523264  }
 0x423   :  { %v12435_v47 = vsel %vm15820_vm9, %v15819_v21, %v4723_v32  ;;  %15823 = vst [vmem:[#allocation212_spill] sm:$0xff] %v12439_v18  ;;  %v5753_v32 = vrot.slane %v12389_v60, 1  ;;  %v5754_v21 = vrot.slane %v12393_v5, 1  ;;  %vm15831_vm9 = vmmov %vm15830_vm13  ;;  %v5752_v52 = vrot.slane %v12342_v22, 1 }
 0x424   :  { %4649 = vmatmul.bf16.gmra.mxu3 %v4139_v42  ;;  %15821 = vst [vmem:[#allocation211_spill] sm:$0xff] %v12435_v47  ;;  %v12455_v6 = vsel %vm15826_vm7, %v4727_v54, %v4728_v35  ;;  %v5751_v47 = vrot.slane %v12338_v15, 1  ;;  %vm15832_vm6 = vmmov %vm15816_vm3 }
 0x425   :  { %v4393_v0 = vpop.f32.mrf.mxu0  ;;  %15827 = vst [vmem:[#allocation215_spill] sm:$0xff] %v12455_v6  ;;  %v12459_v44 = vsel %vm15816_vm3, %v5753_v32, %v5754_v21  ;;  %vm15834_vm3 = vmmov %vm15826_vm7 }
 0x426   :  { %15828 = vst [vmem:[#allocation216_spill] sm:$0xff] %v12459_v44  ;;  %v12479_v59 = vsel %vm15832_vm6, %v5750_v9, %v5751_v47 }
 0x427   :  { %v4610_v28 = vpop.f32.mrf.mxu3  ;;  %15833 = vst [vmem:[#allocation218_spill] sm:$0xff] %v12479_v59 }
 0x428   :  { %v12445_v42 = vadd.f32 %v4610_v28, %v4393_v0 }
 0x42a   :  { %15824 = vst [vmem:[#allocation213_spill] sm:$0xff] %v12445_v42  ;;  %v4725_v42 = vrot.slane %v12338_v15, 7 }
 0x42d   :  { %v12451_v7 = vpop.f32.mrf.mxu0 }
 0x42e   :  { %v7888_v38 = vpop.permute.xlu1 %7887  ;;  %15825 = vst [vmem:[#allocation214_spill] sm:$0xff] %v12451_v7  ;;  %v4726_v7 = vrot.slane %v12342_v22, 7 }
 0x42f   :  { %v7890_v0 = vunpack.i.h.bf16 %v7888_v38  ;;  %v7889_v28 = vunpack.i.l.bf16 %v7888_v38  ;;  %v12461_v1 = vpop.f32.mrf.mxu3 }
 0x430   :  { %15829 = vst [vmem:[#allocation217_spill] sm:$0xff] %v12461_v1 }
 0x431   :  { %v12466_v60 = vsel %vm15830_vm13, %v11979_v19, %v7889_v28  ;;  %v12470_v5 = vsel %vm15831_vm9, %v12004_v41, %v7890_v0  ;;  %v12483_v19 = vsel %vm15826_vm7, %v4725_v42, %v4726_v7  ;;  %v12487_v41 = vsel %vm15834_vm3, %v4724_v20, %v4725_v42  ;;  %vm15835_vm13 = vmmov %vm15832_vm6  ;;  %v7893_v20 = vpop.permute.xlu2 %7892 }
 0x432   :  { %v4140_v38 = vpack.c.bf16 %v12470_v5, %v12466_v60  ;;  %v12491_v15 = vsel %vm15835_vm13, %v5752_v52, %v5753_v32  ;;  %vm15836_vm9 = vmmov %vm15832_vm6  ;;  %v7895_v18 = vunpack.i.h.bf16 %v7893_v20  ;;  %v7894_v59 = vunpack.i.l.bf16 %v7893_v20 }
 0x433   :  { %v12499_v28 = vsel %vm15836_vm9, %v5751_v47, %v5752_v52  ;;  %vm15838_vm6 = vmmov %vm15834_vm3  ;;  %vm15842_vm7 = vcmask 523264  }
 0x434   :  { %4654 = vmatmul.bf16.gmra.mxu3 %v4140_v38  ;;  %15837 = vst [vmem:[#allocation219_spill] sm:$0xff] %v12499_v28  ;;  %v12503_v38 = vsel %vm15838_vm6, %v4726_v7, %v4727_v54  ;;  %v12515_v52 = vsel %vm15842_vm7, %v12059_v55, %v7895_v18  ;;  %vm15843_vm3 = vmmov %vm15842_vm7  ;;  %v4730_v18 = vrot.slane %v12416_v48, 7  ;;  %vm15849_vm6 = vcmp.lt.s32.totalorder %v8564_v11, 7 }
 0x435   :  { %v4398_v1 = vpop.f32.mrf.mxu0  ;;  %15839 = vst [vmem:[#allocation220_spill] sm:$0xff] %v12503_v38  ;;  %v12519_v54 = vsel %vm15843_vm3, %v12057_v4, %v7894_v59  ;;  %vm15847_vm13 = vmmov %vm15843_vm3  ;;  %v4729_v59 = vrot.slane %v12412_v10, 7  ;;  %vm15851_vm7 = vcmp.lt.s32.totalorder %v8564_v11, 1  ;;  %v15918_v38 = vrot.slane %v12515_v52, 7 }
 0x436   :  { %vm15848_vm9 = vmmov %vm15843_vm3 }
 0x437   :  { %v4615_v22 = vpop.f32.mrf.mxu3  ;;  %vm15853_vm3 = vmmov %vm15851_vm7 }
 0x438   :  { %v12505_v42 = vadd.f32 %v4615_v22, %v4398_v1  ;;  %v4141_v1 = vpack.c.bf16 %v12515_v52, %v12519_v54 }
 0x43a   :  { %15840 = vst [vmem:[#allocation221_spill] sm:$0xff] %v12505_v42 }
 0x43d   :  { %v12511_v9 = vpop.f32.mrf.mxu0 }
 0x43e   :  { %15841 = vst [vmem:[#allocation222_spill] sm:$0xff] %v12511_v9 }
 0x43f   :  { %v12521_v47 = vpop.f32.mrf.mxu3 }
 0x440   :  { %15844 = vst [vmem:[#allocation223_spill] sm:$0xff] %v12521_v47  ;;  %v5759_v47 = vrot.slane %v12519_v54, 1 }
 0x444   :  { %4659 = vmatmul.bf16.gmra.mxu3 %v4141_v1  ;;  %v5755_v1 = vrot.slane %v12412_v10, 1 }
 0x445   :  { %v4403_v7 = vpop.f32.mrf.mxu0 }
 0x447   :  { %v4620_v22 = vpop.f32.mrf.mxu3 }
 0x448   :  { %v12525_v0 = vadd.f32 %v4620_v22, %v4403_v7  ;;  %v5756_v7 = vrot.slane %v12416_v48, 1 }
 0x44a   :  { %15845 = vst [vmem:[#allocation224_spill] sm:$0xff] %v12525_v0 }
 0x44e   :  { %v7898_v20 = vpop.permute.xlu0 %7897 }
 0x44f   :  { %v7900_v32 = vunpack.i.h.bf16 %v7898_v20  ;;  %v7899_v9 = vunpack.i.l.bf16 %v7898_v20  ;;  %v12527_v42 = vpop.f32.mrf.mxu3  ;;  %v8129_v20 = vld [vmem:[%s14456_s0 + $0x10] sm:$0xff] }
 0x450   :  { %15846 = vst [vmem:[#allocation225_spill] sm:$0xff] %v12527_v42  ;;  %v15861_v42 = vrot.slane %v11656_v8, 1 }
 0x451   :  { %v12531_v55 = vsel %vm15847_vm13, %v12119_v49, %v7900_v32  ;;  %v12535_v4 = vsel %vm15848_vm9, %v12114_v12, %v7899_v9  ;;  %v12545_v49 = vsel %vm15849_vm6, %v5754_v21, %v5755_v1  ;;  %v12549_v12 = vsel %vm15851_vm7, %v4729_v59, %v4730_v18  ;;  %vm15855_vm13 = vmmov %vm15849_vm6  ;;  %v8131_v21 = vld [vmem:[%s14456_s0 + $0x20] sm:$0xff] }
 0x452   :  { %v4142_v22 = vpack.c.bf16 %v12531_v55, %v12535_v4  ;;  %15850 = vst [vmem:[#allocation226_spill] sm:$0xff] %v12545_v49  ;;  %v12553_v9 = vsel %vm15853_vm3, %v4728_v35, %v4729_v59  ;;  %v12557_v10 = vsel %vm15855_vm13, %v5755_v1, %v5756_v7  ;;  %v8130_v35 = vld [vmem:[%s14456_s0 + $0x18] sm:$0xff]  ;;  %v4733_v32 = vrot.slane %v12519_v54, 7  ;;  %vm15858_vm9 = vmmov %vm15853_vm3 }
 0x453   :  { %15852 = vst [vmem:[#allocation227_spill] sm:$0xff] %v12549_v12  ;;  %v4918_v59 = vrot.slane %v8130_v35, 7  ;;  %v5945_v1 = vrot.slane %v8130_v35, 1  ;;  %v5946_v0 = vrot.slane %v8131_v21, 1  ;;  %vm15860_vm6 = vmmov %vm15853_vm3  ;;  %v8135_v12 = vld [vmem:[%s14456_s0 + $0x40] sm:$0xff] }
 0x454   :  { %4664 = vmatmul.bf16.gmra.mxu3 %v4142_v22  ;;  %15854 = vst [vmem:[#allocation228_spill] sm:$0xff] %v12553_v9  ;;  %v4917_v22 = vrot.slane %v8129_v20, 7  ;;  %v15859_v9 = vrot.slane %v11662_v63, 7  ;;  %vm15862_vm7 = vmmov %vm15855_vm13  ;;  %vm15866_vm13 = vcmask 261120  }
 0x455   :  { %15856 = vst [vmem:[#allocation229_spill] sm:$0xff] %v12557_v10  ;;  %vm15864_vm3 = vmmov %vm15862_vm7 }
 0x456   :  { %v5039_v20 = vsel %vm15858_vm9, %v4917_v22, %v4918_v59  ;;  %v5040_v35 = vsel %vm15860_vm6, %v15859_v9, %v4917_v22  ;;  %v6065_v49 = vsel %vm15864_vm3, %v5945_v1, %v5946_v0  ;;  %v15867_v9 = vrot.slane %v12515_v52, 7  ;;  %vm15868_vm9 = vmmov %vm15860_vm6 }
 0x457   :  { %v12559_v48 = vpop.f32.mrf.mxu3  ;;  %v5045_v44 = vsel %vm8845_vm11, %v5040_v35, 0.0  ;;  %v6073_v6 = vsel %vm9243_vm10, %v6065_v49, 0.0  ;;  %vm15871_vm6 = vmmov %vm15864_vm3  ;;  %vm15875_vm3 = vcmask 523264   ;;  %v4732_v35 = vrot.slane %v12470_v5, 7 }
 0x458   :  { %15857 = vst [vmem:[#allocation230_spill] sm:$0xff] %v12559_v48  ;;  %v6066_v48 = vsel %vm15862_vm7, %v15861_v42, %v5945_v1  ;;  %v5112_v54 = vpack.c.bf16 %v5039_v20, %v5045_v44  ;;  %v12599_v8 = vsel %vm15868_vm9, %v4733_v32, %v15867_v9  ;;  %v15870_v42 = vrot.slane %v12515_v52, 1  ;;  %vm15874_vm7 = vmmov %vm15866_vm13 }
 0x459   :  { %v6140_v28 = vpack.c.bf16 %v6073_v6, %v6066_v48  ;;  %15869 = vst [vmem:[#allocation28_spill] sm:$0xff] %v12599_v8  ;;  %v4731_v6 = vrot.slane %v12466_v60, 7  ;;  %vm15883_vm2 = vmmov %vm15868_vm9 }
 0x45a   :  { %7198 = vmatmul.msk.bf16.gmra.mxu0 %vm15866_vm13, %v5112_v54  ;;  %v12605_v22 = vsel %vm15871_vm6, %v5759_v47, %v15870_v42  ;;  %vm15876_vm13 = vmmov %vm15875_vm3  ;;  %v5757_v54 = vrot.slane %v12466_v60, 1  ;;  %v15877_v42 = vld [vmem:[#allocation103_spill] sm:$0xff]  ;;  %vm8196_vm6 = vmmov 1  }
 0x45b   :  { %15872 = vst [vmem:[#allocation50_spill] sm:$0xff] %v12605_v22  ;;  %7386 = vmatmul.msk.bf16.gmra.mxu2 %vm15874_vm7, %v6140_v28  ;;  %vm7261_vm7 = vmpackc.low %vm8196_vm6, %vm8746_vm8  ;;  %v16058_v22 = vld [vmem:[#allocation15_spill] sm:$0xff] }
 0x45e   :  { %v7903_v63 = vpop.permute.xlu1 %7902 }
 0x45f   :  { %v7905_v44 = vunpack.i.h.bf16 %v7903_v63  ;;  %v7904_v1 = vunpack.i.l.bf16 %v7903_v63  ;;  %v12607_v20 = vpop.f32.mrf.mxu3  ;;  %v5758_v63 = vrot.slane %v12470_v5, 1 }
 0x460   :  { %15873 = vst [vmem:[#allocation231_spill] sm:$0xff] %v12607_v20  ;;  %v15878_v20 = vrot.slane %v15877_v42, 7 }
 0x461   :  { %v12613_v49 = vsel %vm15875_vm3, %v12230_v37, %v7905_v44  ;;  %v12617_v48 = vsel %vm15876_vm13, %v12204_v31, %v7904_v1  ;;  %v15879_v31 = vld [vmem:[#allocation104_spill] sm:$0xff]  ;;  %vm15880_vm3 = vcmp.lt.s32.totalorder %v8564_v11, 7  ;;  %vm15881_vm13 = vmmov %vm15868_vm9  ;;  %v12645_v1 = vsel %vm15883_vm2, %v4730_v18, %v4731_v6 }
 0x462   :  { %v14866_v9 = vrot.slane %v12613_v49, 7  ;;  %v4143_v28 = vpack.c.bf16 %v12613_v49, %v12617_v48  ;;  %v12637_v5 = vsel %vm15880_vm3, %v5756_v7, %v5757_v54  ;;  %v12641_v44 = vsel %vm15881_vm13, %v4731_v6, %v4732_v35  ;;  %15884 = vst [vmem:[#allocation104_spill] sm:$0xff] %v12645_v1  ;;  %vm15888_vm8 = vmmov %vm15880_vm3 }
 0x463   :  { %15882 = vst [vmem:[#allocation103_spill] sm:$0xff] %v12641_v44  ;;  %v12663_v18 = vsel %vm15883_vm2, %v4732_v35, %v4733_v32  ;;  %v4919_v6 = vrot.slane %v8131_v21, 7  ;;  %vm15893_vm13 = vmmov %vm15888_vm8  ;;  %v16165_v44 = vld [vmem:[#allocation73_spill] sm:$0xff] }
 0x464   :  { %v4802_v37 = vsel %vm15868_vm9, %v14866_v9, %v15878_v20  ;;  %4669 = vmatmul.bf16.gmra.mxu3 %v4143_v28  ;;  %vm15885_vm9 = vmmov %vm15880_vm3  ;;  %15890 = vst [vmem:[#allocation235_spill] sm:$0xff] %v12663_v18  ;;  %v8133_v28 = vld [vmem:[%s14456_s0 + $0x30] sm:$0xff] }
 0x465   :  { %v7262_v60 = vpack.c.bf16 %v15879_v31, %v4802_v37  ;;  %v12649_v40 = vsel %vm15885_vm9, %v5758_v63, %v5759_v47  ;;  %v12659_v37 = vsel %vm15888_vm8, %v5757_v54, %v5758_v63  ;;  %v8132_v47 = vld [vmem:[%s14456_s0 + $0x28] sm:$0xff]  ;;  %v5948_v7 = vrot.slane %v8133_v28, 1  ;;  %vm15892_vm3 = vmmov %vm15883_vm2 }
 0x466   :  { %15886 = vst [vmem:[#allocation232_spill] sm:$0xff] %v12649_v40  ;;  %v4920_v31 = vrot.slane %v8132_v47, 7  ;;  %v5038_v21 = vsel %vm15892_vm3, %v4918_v59, %v4919_v6  ;;  %vm15895_vm9 = vmmov %vm15888_vm8  ;;  %vm15897_vm8 = vcmask 261120   ;;  %v15901_v59 = vld [vmem:[#allocation112_spill] sm:$0xff] }
 0x467   :  { %v12651_v20 = vpop.f32.mrf.mxu3  ;;  %7263 = vmatmul.msk.bf16.vlgmr.msra.gmra.mxu1 %vm7261_vm7, %v7262_v60  ;;  %15889 = vst [vmem:[#allocation234_spill] sm:$0xff] %v12659_v37  ;;  %v5947_v60 = vrot.slane %v8132_v47, 1  ;;  %vm15891_vm7 = vmmov %vm15883_vm2  ;;  %v5047_v9 = vsel %vm8934_vm14, %v5038_v21, 0.0 }
 0x468   :  { %15887 = vst [vmem:[#allocation233_spill] sm:$0xff] %v12651_v20  ;;  %v5037_v32 = vsel %vm15891_vm7, %v4919_v6, %v4920_v31  ;;  %vm15899_vm2 = vmmov %vm15897_vm8  ;;  %v4921_v6 = vrot.slane %v8133_v28, 7 }
 0x469   :  { %v6064_v35 = vsel %vm15893_vm13, %v5946_v0, %v5947_v60  ;;  %v6063_v20 = vsel %vm15895_vm9, %v5947_v60, %v5948_v7  ;;  %v5113_v1 = vpack.c.bf16 %v5037_v32, %v5047_v9  ;;  %vm7449_vm7 = vmpackc.low %vm9050_vm0, %vm8196_vm6  ;;  %v15900_v0 = vld [vmem:[#allocation111_spill] sm:$0xff]  ;;  %v4922_v60 = vrot.slane %v8134_v56, 7 }
 0x46a   :  { %v6075_v37 = vsel %vm9283_vm1, %v6063_v20, 0.0  ;;  %vm7264_vm3 = vmpackc.low %vm8196_vm6, %vm8845_vm11  ;;  %v15902_v9 = vpack.c.bf16 %v15900_v0, %v15901_v59  ;;  %v5950_v32 = vrot.slane %v8135_v12, 1  ;;  %vm15906_vm0 = vcmp.lt.s32.totalorder %v8564_v11, 1 }
 0x46b   :  { %v6141_v63 = vpack.c.bf16 %v6075_v37, %v6064_v35  ;;  %7199 = vmatmul.msk.bf16.gmra.mxu0 %vm15897_vm8, %v5113_v1  ;;  %v15904_v1 = vld [vmem:[#allocation125_spill] sm:$0xff]  ;;  %v5035_v21 = vsel %vm15906_vm0, %v4921_v6, %v4922_v60  ;;  %vm15907_vm11 = vmmov %vm15906_vm0 }
 0x46c   :  { %v15905_v37 = vpack.c.bf16 %v10545_v62, %v15904_v1  ;;  %v5036_v35 = vsel %vm15907_vm11, %v4920_v31, %v4921_v6  ;;  %vm15908_vm13 = vmmov %vm15895_vm9  ;;  %v4736_v31 = vrot.slane %v12531_v55, 7  ;;  %v4735_v6 = vrot.slane %v12535_v4, 7  ;;  %v8140_v1 = vld [vmem:[%s14456_s0 + $0x68] sm:$0xff] }
 0x46d   :  { %7387 = vmatmul.msk.bf16.gmra.mxu2 %vm15899_vm2, %v6141_v63  ;;  %v5949_v63 = vrot.slane %v8134_v56, 1  ;;  %v5049_v0 = vsel %vm9056_vm4, %v5036_v35, 0.0  ;;  %vm15911_vm8 = vmmov %vm15899_vm2  ;;  %v5761_v35 = vrot.slane %v12535_v4, 1 }
 0x46e   :  { %vm15915_vm0 = vmmov %vm15895_vm9  ;;  %v12748_v4 = vsel %vm15907_vm11, %v4735_v6, %v4736_v31 }
 0x46f   :  { %v12688_v18 = vpop.f32.mrf.mxu3  ;;  %v6062_v62 = vsel %vm15908_vm13, %v5948_v7, %v5949_v63  ;;  %v6061_v59 = vsel %vm15895_vm9, %v5949_v63, %v5950_v32  ;;  %v5762_v7 = vrot.slane %v12531_v55, 1  ;;  %v15913_v63 = vpack.c.bf16 %v10637_v30, %v10559_v36  ;;  %15917 = vst [vmem:[#allocation125_spill] sm:$0xff] %v12748_v4  ;;  %v16057_v4 = vld [vmem:[#allocation6_spill] sm:$0xff] }
 0x470   :  { %15898 = vst [vmem:[#allocation33_spill] sm:$0xff] %v12688_v18 }
 0x474   :  { %7451 = vmatmul.msk.bf16.vlgmr.msra.gmra.mxu3 %vm7449_vm7, %v15902_v9  ;;  %v5114_v9 = vpack.c.bf16 %v5035_v21, %v5049_v0  ;;  %vm7452_vm7 = vmpackc.low %vm9243_vm10, %vm8196_vm6  ;;  %v15914_v21 = vrot.slane %v12515_v52, 1 }
 0x475   :  { %vm15919_vm10 = vmmov %vm15907_vm11 }
 0x476   :  { %v12744_v55 = vsel %vm15915_vm0, %v15914_v21, %v5761_v35  ;;  %v12754_v47 = vsel %vm15919_vm10, %v15918_v38, %v4735_v6  ;;  %v8137_v6 = vld [vmem:[%s14456_s0 + $0x50] sm:$0xff]  ;;  %vm15925_vm13 = vmmov %vm15919_vm10 }
 0x477   :  { %v12700_v20 = vpop.f32.mrf.mxu3  ;;  %7266 = vmatmul.msk.bf16.gmra.mxu1 %vm7264_vm3, %v15905_v37  ;;  %v6077_v37 = vsel %vm9329_vm5, %v6061_v59, 0.0  ;;  %vm7267_vm3 = vmpackc.low %vm8196_vm6, %vm8934_vm14  ;;  %15916 = vst [vmem:[#allocation112_spill] sm:$0xff] %v12744_v55  ;;  %v4923_v59 = vrot.slane %v8135_v12, 7  ;;  %v16059_v55 = vpack.c.bf16 %v16057_v4, %v16058_v22 }
 0x478   :  { %15903 = vst [vmem:[#allocation51_spill] sm:$0xff] %v12700_v20  ;;  %v6142_v56 = vpack.c.bf16 %v6077_v37, %v6062_v62  ;;  %vm15921_vm14 = vmmov %vm15915_vm0  ;;  %v15924_v62 = vpack.c.bf16 %v10641_v57, %v10647_v23 }
 0x479   :  { %15920 = vst [vmem:[#allocation40_spill] sm:$0xff] %v12754_v47  ;;  %v12758_v36 = vsel %vm15921_vm14, %v5761_v35, %v5762_v7  ;;  %v5952_v35 = vrot.slane %v8137_v6, 1  ;;  %vm15926_vm9 = vmmov %vm15919_vm10 }
 0x47a   :  { %15922 = vst [vmem:[#allocation54_spill] sm:$0xff] %v12758_v36  ;;  %v5034_v23 = vsel %vm15926_vm9, %v4922_v60, %v4923_v59  ;;  %v5764_v60 = vrot.slane %v12613_v49, 1  ;;  %vm7270_vm11 = vmpackc.low %vm8196_vm6, %vm9056_vm4 }
 0x47b   :  { %7200 = vmatmul.msk.bf16.gmra.mxu0 %vm15911_vm8, %v5114_v9  ;;  %v8136_v9 = vld [vmem:[%s14456_s0 + $0x48] sm:$0xff]  ;;  %vm15927_vm8 = vmmov %vm15915_vm0  ;;  %v5051_v21 = vsel %vm9180_vm15, %v5034_v23, 0.0 }
 0x47c   :  { %v4924_v37 = vrot.slane %v8136_v9, 7  ;;  %vm15939_vm14 = vmmov %vm15926_vm9  ;;  %v15946_v23 = vld [vmem:[#allocation127_spill] sm:$0xff] }
 0x47d   :  { %7388 = vmatmul.msk.bf16.gmra.mxu2 %vm15899_vm2, %v6142_v56  ;;  %v5951_v56 = vrot.slane %v8136_v9, 1  ;;  %vm15929_vm2 = vmmov %vm15915_vm0  ;;  %v8142_v9 = vld [vmem:[%s14456_s0 + $0x78] sm:$0xff] }
 0x47e   :  { %v5033_v57 = vsel %vm15925_vm13, %v4923_v59, %v4924_v37  ;;  %v5763_v59 = vrot.slane %v12617_v48, 1  ;;  %vm7455_vm0 = vmpackc.low %vm9283_vm1, %vm8196_vm6  ;;  %v16462_v11 = vld [vmem:[#allocation112_spill] sm:$0xff] }
 0x47f   :  { %v12724_v20 = vpop.f32.mrf.mxu3  ;;  %v6060_v12 = vsel %vm15927_vm8, %v5950_v32, %v5951_v56  ;;  %v6059_v38 = vsel %vm15929_vm2, %v5951_v56, %v5952_v35  ;;  %v4737_v32 = vrot.slane %v12617_v48, 7  ;;  %vm15936_vm10 = vmmov %vm15929_vm2 }
 0x480   :  { %15912 = vst [vmem:[#allocation111_spill] sm:$0xff] %v12724_v20  ;;  %v6079_v52 = vsel %vm9376_vm12, %v6059_v38, 0.0  ;;  %vm15941_vm1 = vmmov %vm15926_vm9  ;;  %v15949_v38 = vrot.slane %v15877_v42, 1 }
 0x481   :  { %v6143_v0 = vpack.c.bf16 %v6079_v52, %v6060_v12  ;;  %v15934_v52 = vld [vmem:[#allocation130_spill] sm:$0xff]  ;;  %v12815_v54 = vsel %vm15941_vm1, %v4736_v31, %v4737_v32  ;;  %vm15943_vm4 = vmmov %vm15929_vm2  ;;  %v15947_v12 = vld [vmem:[#allocation131_spill] sm:$0xff] }
 0x482   :  { %v15935_v56 = vpack.c.bf16 %v10664_v61, %v15934_v52  ;;  %15942 = vst [vmem:[#allocation237_spill] sm:$0xff] %v12815_v54  ;;  %v12819_v28 = vsel %vm15943_vm4, %v5763_v59, %v5764_v60  ;;  %vm15950_vm13 = vmmov %vm15929_vm2 }
 0x483   :  { %15944 = vst [vmem:[#allocation238_spill] sm:$0xff] %v12819_v28  ;;  %v12834_v31 = vsel %vm15950_vm13, %v5764_v60, %v15949_v38  ;;  %vm15952_vm9 = vmmov %vm15941_vm1  ;;  %v16034_v28 = vld [vmem:[#allocation153_spill] sm:$0xff] }
 0x484   :  { %7454 = vmatmul.msk.bf16.gmra.mxu3 %vm7452_vm7, %v15913_v63  ;;  %vm15931_vm7 = vcmask 261120   ;;  %15951 = vst [vmem:[#allocation127_spill] sm:$0xff] %v12834_v31  ;;  %vm15953_vm8 = vmmov %vm15941_vm1  ;;  %v8141_v63 = vld [vmem:[%s14456_s0 + $0x70] sm:$0xff] }
 0x485   :  { %vm7273_vm1 = vmpackc.low %vm8196_vm6, %vm9180_vm15 }
 0x486   :  { %vm15969_vm15 = vmmov %vm15953_vm8 }
 0x487   :  { %v12760_v30 = vpop.f32.mrf.mxu3  ;;  %7269 = vmatmul.msk.bf16.gmra.mxu1 %vm7267_vm3, %v15924_v62  ;;  %v5115_v62 = vpack.c.bf16 %v5033_v57, %v5051_v21  ;;  %vm15933_vm3 = vmmov %vm15931_vm7  ;;  %v15938_v57 = vrot.slane %v12613_v49, 7  ;;  %v15957_v21 = vld [vmem:[#allocation64_spill] sm:$0xff] }
 0x488   :  { %15923 = vst [vmem:[#allocation236_spill] sm:$0xff] %v12760_v30  ;;  %vm15971_vm4 = vmmov %vm15929_vm2 }
 0x489   :  { %v12811_v48 = vsel %vm15939_vm14, %v4737_v32, %v15938_v57  ;;  %v8138_v32 = vld [vmem:[%s14456_s0 + $0x58] sm:$0xff]  ;;  %vm7458_vm14 = vmpackc.low %vm9329_vm5, %vm8196_vm6 }
 0x48a   :  { %15940 = vst [vmem:[#allocation130_spill] sm:$0xff] %v12811_v48  ;;  %v5953_v52 = vrot.slane %v8138_v32, 1  ;;  %vm15970_vm5 = vmmov %vm15953_vm8 }
 0x48b   :  { %7201 = vmatmul.msk.bf16.gmra.mxu0 %vm15931_vm7, %v5115_v62  ;;  %v4925_v62 = vrot.slane %v8137_v6, 7 }
 0x48c   :  { %v6058_v60 = vsel %vm15929_vm2, %v5952_v35, %v5953_v52  ;;  %v15963_v35 = vld [vmem:[#allocation128_spill] sm:$0xff] }
 0x48d   :  { %7389 = vmatmul.msk.bf16.gmra.mxu2 %vm15933_vm3, %v6143_v0  ;;  %v12805_v0 = vsel %vm15936_vm10, %v5762_v7, %v5763_v59  ;;  %v15948_v7 = vpack.c.bf16 %v15946_v23, %v15947_v12  ;;  %v4926_v59 = vrot.slane %v8138_v32, 7  ;;  %v5032_v6 = vsel %vm15953_vm8, %v4924_v37, %v4925_v62  ;;  %v15954_v12 = vld [vmem:[#allocation49_spill] sm:$0xff]  ;;  %vm15956_vm3 = vmmov %vm15929_vm2 }
 0x48e   :  { %15937 = vst [vmem:[#allocation58_spill] sm:$0xff] %v12805_v0  ;;  %vm15955_vm7 = vnez %v15954_v12  ;;  %v15962_v37 = vld [vmem:[#allocation137_spill] sm:$0xff]  ;;  %v8143_v12 = vld [vmem:[%s14456_s0 + $0x80] sm:$0xff] }
 0x48f   :  { %v12788_v30 = vpop.f32.mrf.mxu3  ;;  %v5031_v42 = vsel %vm15952_vm9, %v4925_v62, %v4926_v59  ;;  %v15964_v62 = vpack.c.bf16 %v15962_v37, %v15963_v35  ;;  %v15972_v35 = vld [vmem:[#allocation2_spill] sm:$0xff]  ;;  %vm15974_vm9 = vmmov %vm15929_vm2 }
 0x490   :  { %15932 = vst [vmem:[#allocation47_spill] sm:$0xff] %v12788_v30  ;;  %vm15973_vm13 = vnez %v15972_v35 }
 0x494   :  { %7457 = vmatmul.msk.bf16.gmra.mxu3 %vm7455_vm0, %v15935_v56  ;;  %v8139_v56 = vld [vmem:[%s14456_s0 + $0x60] sm:$0xff]  ;;  %vm15958_vm0 = vnez %v15957_v21  ;;  %v8144_v21 = vld [vmem:[%s14456_s0 + $0x88] sm:$0xff] }
 0x495   :  { %v5954_v57 = vrot.slane %v8139_v56, 1  ;;  %v4932_v35 = vrot.slane %v8144_v21, 7 }
 0x497   :  { %v12821_v61 = vpop.f32.mrf.mxu3  ;;  %7272 = vmatmul.msk.bf16.gmra.mxu1 %vm7270_vm11, %v15948_v7  ;;  %v5053_v7 = vsel %vm15955_vm7, %v5032_v6, 0.0  ;;  %v6057_v38 = vsel %vm15956_vm3, %v5953_v52, %v5954_v57  ;;  %vm15959_vm11 = vcmask 261120  }
 0x498   :  { %15945 = vst [vmem:[#allocation239_spill] sm:$0xff] %v12821_v61  ;;  %v5116_v32 = vpack.c.bf16 %v5031_v42, %v5053_v7  ;;  %v6081_v49 = vsel %vm15958_vm0, %v6057_v38, 0.0  ;;  %vm15961_vm10 = vmmov %vm15959_vm11  ;;  %v15967_v42 = vld [vmem:[#allocation139_spill] sm:$0xff]  ;;  %v5955_v7 = vrot.slane %v8140_v1, 1  ;;  %v5956_v38 = vrot.slane %v8141_v63, 1 }
 0x499   :  { %v6144_v23 = vpack.c.bf16 %v6081_v49, %v6058_v60  ;;  %v15966_v49 = vld [vmem:[#allocation138_spill] sm:$0xff]  ;;  %v4927_v60 = vrot.slane %v8139_v56, 7  ;;  %vm15977_vm2 = vmmov %vm15961_vm10 }
 0x49a   :  { %v15968_v6 = vpack.c.bf16 %v15966_v49, %v15967_v42  ;;  %v6056_v56 = vsel %vm15971_vm4, %v5954_v57, %v5955_v7  ;;  %v6055_v49 = vsel %vm15974_vm9, %v5955_v7, %v5956_v38  ;;  %vm15979_vm3 = vmmov %vm15977_vm2  ;;  %v15981_v57 = vld [vmem:[#allocation141_spill] sm:$0xff] }
 0x49b   :  { %7202 = vmatmul.msk.bf16.gmra.mxu0 %vm15959_vm11, %v5116_v32  ;;  %v5030_v37 = vsel %vm15970_vm5, %v4926_v59, %v4927_v60  ;;  %vm7461_vm11 = vmpackc.low %vm9376_vm12, %vm8196_vm6  ;;  %v15980_v59 = vld [vmem:[#allocation140_spill] sm:$0xff] }
 0x49c   :  { %vm15987_vm12 = vmmov %vm15970_vm5 }
 0x49d   :  { %7390 = vmatmul.msk.bf16.gmra.mxu2 %vm15961_vm10, %v6144_v23  ;;  %v4928_v23 = vrot.slane %v8140_v1, 7  ;;  %vm7276_vm10 = vmpackc.low %vm8196_vm6, %vm15955_vm7 }
 0x49e   :  { %vm15988_vm7 = vmmov %vm15970_vm5 }
 0x49f   :  { %v12857_v61 = vpop.f32.mrf.mxu3  ;;  %v5029_v32 = vsel %vm15969_vm15, %v4927_v60, %v4928_v23  ;;  %v15982_v60 = vpack.c.bf16 %v15980_v59, %v15981_v57  ;;  %vm15998_vm9 = vmmov %vm15977_vm2 }
 0x4a0   :  { %15960 = vst [vmem:[#allocation131_spill] sm:$0xff] %v12857_v61 }
 0x4a4   :  { %7460 = vmatmul.msk.bf16.gmra.mxu3 %vm7458_vm14, %v15964_v62  ;;  %v5055_v62 = vsel %vm15973_vm13, %v5030_v37, 0.0  ;;  %v15985_v37 = vld [vmem:[#allocation142_spill] sm:$0xff]  ;;  %vm15989_vm14 = vmmov %vm15971_vm4 }
 0x4a5   :  { %v5117_v42 = vpack.c.bf16 %v5029_v32, %v5055_v62  ;;  %v15984_v32 = vld [vmem:[#allocation134_spill] sm:$0xff]  ;;  %v4929_v62 = vrot.slane %v8141_v63, 7 }
 0x4a7   :  { %v12869_v52 = vpop.f32.mrf.mxu3  ;;  %7275 = vmatmul.msk.bf16.gmra.mxu1 %vm7273_vm1, %v15968_v6  ;;  %v15975_v6 = vld [vmem:[#allocation70_spill] sm:$0xff]  ;;  %v5028_v59 = vsel %vm15988_vm7, %v4928_v23, %v4929_v62  ;;  %vm15990_vm1 = vmmov %vm15971_vm4  ;;  %v15999_v23 = vld [vmem:[#allocation37_spill] sm:$0xff] }
 0x4a8   :  { %15965 = vst [vmem:[#allocation49_spill] sm:$0xff] %v12869_v52  ;;  %vm15976_vm8 = vnez %v15975_v6  ;;  %vm15997_vm4 = vmmov %vm15977_vm2 }
 0x4a9   :  { %v6083_v1 = vsel %vm15976_vm8, %v6055_v49, 0.0  ;;  %v5957_v49 = vrot.slane %v8142_v9, 1 }
 0x4aa   :  { %v6145_v52 = vpack.c.bf16 %v6083_v1, %v6056_v56  ;;  %v15986_v56 = vpack.c.bf16 %v15984_v32, %v15985_v37  ;;  %v15993_v37 = vld [vmem:[#allocation76_spill] sm:$0xff] }
 0x4ab   :  { %7203 = vmatmul.msk.bf16.gmra.mxu0 %vm15977_vm2, %v5117_v42  ;;  %v5958_v42 = vrot.slane %v8143_v12, 1  ;;  %v6054_v57 = vsel %vm15990_vm1, %v5956_v38, %v5957_v49  ;;  %vm15994_vm5 = vnez %v15993_v37  ;;  %vm7464_vm2 = vmpackc.low %vm15958_vm0, %vm8196_vm6  ;;  %v16000_v38 = vld [vmem:[#allocation135_spill] sm:$0xff]  ;;  %v16037_v37 = vld [vmem:[#allocation150_spill] sm:$0xff] }
 0x4ac   :  { %vm16006_vm0 = vmmov %vm15988_vm7 }
 0x4ad   :  { %7391 = vmatmul.msk.bf16.gmra.mxu2 %vm15979_vm3, %v6145_v52  ;;  %v4930_v52 = vrot.slane %v8142_v9, 7  ;;  %v6053_v63 = vsel %vm15989_vm14, %v5957_v49, %v5958_v42  ;;  %vm7279_vm3 = vmpackc.low %vm8196_vm6, %vm15973_vm13 }
 0x4ae   :  { %vm16007_vm13 = vmmov %vm16006_vm0 }
 0x4af   :  { %v12893_v61 = vpop.f32.mrf.mxu3  ;;  %v5027_v1 = vsel %vm15987_vm12, %v4929_v62, %v4930_v52  ;;  %v16001_v62 = vpack.c.bf16 %v15999_v23, %v16000_v38  ;;  %vm16012_vm12 = vmmov %vm15990_vm1 }
 0x4b0   :  { %15978 = vst [vmem:[#allocation64_spill] sm:$0xff] %v12893_v61  ;;  %v12928_v61 = vpop.f32.mrf.mxu0  ;;  %vm16013_vm7 = vmmov %vm15990_vm1 }
 0x4b1   :  { %15995 = vst [vmem:[#allocation128_spill] sm:$0xff] %v12928_v61  ;;  %vm7467_vm14 = vmpackc.low %vm15976_vm8, %vm8196_vm6 }
 0x4b2   :  { %vm16023_vm8 = vmmov %vm16006_vm0 }
 0x4b4   :  { %7463 = vmatmul.msk.bf16.gmra.mxu3 %vm7461_vm11, %v15982_v60  ;;  %v15991_v60 = vld [vmem:[#allocation53_spill] sm:$0xff] }
 0x4b5   :  { %vm15992_vm15 = vnez %v15991_v60 }
 0x4b6   :  { %v5057_v32 = vsel %vm15992_vm15, %v5028_v59, 0.0  ;;  %v16004_v59 = vld [vmem:[#allocation147_spill] sm:$0xff] }
 0x4b7   :  { %v12905_v7 = vpop.f32.mrf.mxu3  ;;  %7278 = vmatmul.msk.bf16.gmra.mxu1 %vm7276_vm10, %v15986_v56  ;;  %v6085_v56 = vsel %vm15994_vm5, %v6053_v63, 0.0  ;;  %v5118_v9 = vpack.c.bf16 %v5027_v1, %v5057_v32  ;;  %v16003_v1 = vld [vmem:[#allocation43_spill] sm:$0xff]  ;;  %vm16011_vm10 = vmmov %vm15997_vm4 }
 0x4b8   :  { %15983 = vst [vmem:[#allocation137_spill] sm:$0xff] %v12905_v7  ;;  %v6146_v7 = vpack.c.bf16 %v6085_v56, %v6054_v57  ;;  %v16005_v63 = vpack.c.bf16 %v16003_v1, %v16004_v59  ;;  %v12948_v57 = vpop.f32.mrf.mxu0  ;;  %v8145_v1 = vld [vmem:[%s14456_s0 + $0x90] sm:$0xff] }
 0x4b9   :  { %v5960_v59 = vrot.slane %v8145_v1, 1  ;;  %v4933_v6 = vrot.slane %v8145_v1, 7 }
 0x4bb   :  { %7204 = vmatmul.msk.bf16.gmra.mxu0 %vm15997_vm4, %v5118_v9  ;;  %v16008_v9 = vld [vmem:[#allocation57_spill] sm:$0xff]  ;;  %vm7282_vm4 = vmpackc.low %vm8196_vm6, %vm15992_vm15 }
 0x4bc   :  { %vm16009_vm11 = vnez %v16008_v9  ;;  %vm16024_vm15 = vmmov %vm16006_vm0 }
 0x4bd   :  { %7392 = vmatmul.msk.bf16.gmra.mxu2 %vm15998_vm9, %v6146_v7  ;;  %v4931_v7 = vrot.slane %v8143_v12, 7  ;;  %v5959_v12 = vrot.slane %v8144_v21, 1  ;;  %v16014_v21 = vld [vmem:[#allocation82_spill] sm:$0xff] }
 0x4be   :  { %vm16015_vm1 = vnez %v16014_v21  ;;  %v16055_v21 = vld [vmem:[#allocation155_spill] sm:$0xff] }
 0x4bf   :  { %v12930_v30 = vpop.f32.mrf.mxu3  ;;  %v5025_v32 = vsel %vm16006_vm0, %v4931_v7, %v4932_v35  ;;  %v5026_v56 = vsel %vm16007_vm13, %v4930_v52, %v4931_v7  ;;  %v6052_v52 = vsel %vm16013_vm7, %v5958_v42, %v5959_v12  ;;  %v12971_v7 = vpop.f32.mrf.mxu2  ;;  %v16019_v42 = vld [vmem:[#allocation115_spill] sm:$0xff]  ;;  %vm16029_vm0 = vmmov %vm16013_vm7 }
 0x4c0   :  { %15996 = vst [vmem:[#allocation138_spill] sm:$0xff] %v12930_v30  ;;  %v5059_v23 = vsel %vm16009_vm11, %v5026_v56, 0.0  ;;  %vm16030_vm13 = vmmov %vm16029_vm0 }
 0x4c1   :  { %v5119_v38 = vpack.c.bf16 %v5025_v32, %v5059_v23  ;;  %v16016_v23 = vld [vmem:[#allocation113_spill] sm:$0xff]  ;;  %vm7285_vm7 = vmpackc.low %vm8196_vm6, %vm16009_vm11 }
 0x4c4   :  { %7466 = vmatmul.msk.bf16.gmra.mxu3 %vm7464_vm2, %v16001_v62 }
 0x4c7   :  { %v12943_v49 = vpop.f32.mrf.mxu3  ;;  %7281 = vmatmul.msk.bf16.gmra.mxu1 %vm7279_vm3, %v16005_v63  ;;  %v12965_v63 = vpop.f32.mrf.mxu0  ;;  %vm16027_vm3 = vmmov %vm15998_vm9 }
 0x4c8   :  { %16002 = vst [vmem:[#allocation139_spill] sm:$0xff] %v12943_v49  ;;  %v6051_v49 = vsel %vm16012_vm12, %v5959_v12, %v5960_v59  ;;  %v16020_v12 = vld [vmem:[#allocation35_spill] sm:$0xff] }
 0x4c9   :  { %v6087_v32 = vsel %vm16015_vm1, %v6051_v49, 0.0  ;;  %v16021_v30 = vpack.c.bf16 %v16019_v42, %v16020_v12  ;;  %v8146_v49 = vld [vmem:[%s14456_s0 + $0x98] sm:$0xff]  ;;  %v8147_v12 = vld [vmem:[%s14456_s0 + $0xa0] sm:$0xff] }
 0x4ca   :  { %v6147_v56 = vpack.c.bf16 %v6087_v32, %v6052_v52  ;;  %v4934_v52 = vrot.slane %v8146_v49, 7  ;;  %v5961_v42 = vrot.slane %v8146_v49, 1 }
 0x4cb   :  { %7205 = vmatmul.msk.bf16.gmra.mxu0 %vm16011_vm10, %v5119_v38  ;;  %v16017_v38 = vld [vmem:[#allocation148_spill] sm:$0xff]  ;;  %vm7470_vm10 = vmpackc.low %vm15994_vm5, %vm8196_vm6 }
 0x4cc   :  { %v5023_v60 = vsel %vm16023_vm8, %v4933_v6, %v4934_v52  ;;  %vm16041_vm5 = vmmov %vm16023_vm8 }
 0x4cd   :  { %7393 = vmatmul.msk.bf16.gmra.mxu2 %vm15998_vm9, %v6147_v56  ;;  %v16025_v56 = vld [vmem:[#allocation63_spill] sm:$0xff]  ;;  %vm16042_vm11 = vmmov %vm16041_vm5 }
 0x4ce   :  { %vm16026_vm2 = vnez %v16025_v56  ;;  %vm16045_vm9 = vmmov %vm16027_vm3  ;;  %v8150_v56 = vld [vmem:[%s14456_s0 + $0xb8] sm:$0xff] }
 0x4cf   :  { %v12959_v62 = vpop.f32.mrf.mxu3  ;;  %vm16047_vm8 = vmmov %vm16029_vm0 }
 0x4d0   :  { %16010 = vst [vmem:[#allocation2_spill] sm:$0xff] %v12959_v62  ;;  %v16018_v62 = vpack.c.bf16 %v16016_v23, %v16017_v38  ;;  %v12997_v23 = vpop.f32.mrf.mxu2 }
 0x4d4   :  { %7469 = vmatmul.msk.bf16.gmra.mxu3 %vm7467_vm14, %v16018_v62  ;;  %v5024_v62 = vsel %vm16024_vm15, %v4932_v35, %v4933_v6  ;;  %v6050_v6 = vsel %vm16030_vm13, %v5960_v59, %v5961_v42  ;;  %vm16036_vm14 = vmmov %vm16027_vm3 }
 0x4d5   :  { %v5061_v38 = vsel %vm16026_vm2, %v5024_v62, 0.0  ;;  %vm16048_vm15 = vmmov %vm16029_vm0 }
 0x4d6   :  { %v5120_v1 = vpack.c.bf16 %v5023_v60, %v5061_v38  ;;  %v16031_v60 = vld [vmem:[#allocation87_spill] sm:$0xff]  ;;  %vm7288_vm13 = vmpackc.low %vm8196_vm6, %vm16026_vm2 }
 0x4d7   :  { %7284 = vmatmul.msk.bf16.gmra.mxu1 %vm7282_vm4, %v16021_v30  ;;  %v12991_v32 = vpop.f32.mrf.mxu3  ;;  %v13001_v30 = vpop.f32.mrf.mxu0  ;;  %vm16032_vm12 = vnez %v16031_v60  ;;  %vm16060_vm2 = vmmov %vm16041_vm5  ;;  %v16071_v60 = vld [vmem:[#allocation157_spill] sm:$0xff] }
 0x4d8   :  { %16022 = vst [vmem:[#allocation70_spill] sm:$0xff] %v12991_v32  ;;  %v5962_v32 = vrot.slane %v8147_v12, 1 }
 0x4da   :  { %v6049_v35 = vsel %vm16029_vm0, %v5961_v42, %v5962_v32  ;;  %v16038_v42 = vld [vmem:[#allocation154_spill] sm:$0xff] }
 0x4db   :  { %7206 = vmatmul.msk.bf16.gmra.mxu0 %vm16027_vm3, %v5120_v1  ;;  %v6089_v49 = vsel %vm16032_vm12, %v6049_v35, 0.0  ;;  %v16039_v31 = vpack.c.bf16 %v16037_v37, %v16038_v42  ;;  %v4935_v35 = vrot.slane %v8147_v12, 7  ;;  %vm7473_vm3 = vmpackc.low %vm16015_vm1, %vm8196_vm6 }
 0x4dc   :  { %v6148_v1 = vpack.c.bf16 %v6089_v49, %v6050_v6  ;;  %v8148_v6 = vld [vmem:[%s14456_s0 + $0xa8] sm:$0xff]  ;;  %vm16054_vm1 = vmmov %vm16045_vm9 }
 0x4dd   :  { %v4936_v49 = vrot.slane %v8148_v6, 7  ;;  %v5963_v42 = vrot.slane %v8148_v6, 1 }
 0x4de   :  { %v13018_v62 = vpop.f32.mrf.mxu2  ;;  %7394 = vmatmul.msk.bf16.gmra.mxu2 %vm16036_vm14, %v6148_v1  ;;  %vm16064_vm14 = vcmask 523264  }
 0x4df   :  { %v13007_v20 = vpop.f32.mrf.mxu3  ;;  %v13020_v38 = vpop.f32.mrf.mxu0  ;;  %v5021_v9 = vsel %vm16041_vm5, %v4935_v35, %v4936_v49  ;;  %vm16065_vm5 = vmmov %vm16054_vm1 }
 0x4e0   :  { %16028 = vst [vmem:[#allocation140_spill] sm:$0xff] %v13007_v20  ;;  %v16033_v20 = vld [vmem:[#allocation152_spill] sm:$0xff] }
 0x4e1   :  { %v16035_v59 = vpack.c.bf16 %v16033_v20, %v16034_v28  ;;  %v5022_v20 = vsel %vm16042_vm11, %v4934_v52, %v4935_v35  ;;  %v16043_v28 = vld [vmem:[#allocation69_spill] sm:$0xff]  ;;  %v6048_v35 = vsel %vm16048_vm15, %v5962_v32, %v5963_v42  ;;  %v16051_v32 = vld [vmem:[#allocation46_spill] sm:$0xff]  ;;  %vm16067_vm11 = vmmov %vm16047_vm8 }
 0x4e2   :  { %vm16044_vm4 = vnez %v16043_v28 }
 0x4e3   :  { %v5063_v1 = vsel %vm16044_vm4, %v5022_v20, 0.0 }
 0x4e4   :  { %v5477_v18 = vpop.f32.mrf.mxu1  ;;  %7472 = vmatmul.msk.bf16.gmra.mxu3 %vm7470_vm10, %v16035_v59  ;;  %v5121_v12 = vpack.c.bf16 %v5021_v9, %v5063_v1  ;;  %v16049_v9 = vld [vmem:[#allocation91_spill] sm:$0xff]  ;;  %vm16061_vm10 = vmmov %vm16060_vm2 }
 0x4e5   :  { %vm16050_vm0 = vnez %v16049_v9  ;;  %v16091_v9 = vld [vmem:[#allocation161_spill] sm:$0xff] }
 0x4e6   :  { %v13043_v59 = vpop.f32.mrf.mxu2 }
 0x4e7   :  { %7287 = vmatmul.msk.bf16.gmra.mxu1 %vm7285_vm7, %v16039_v31  ;;  %v13035_v54 = vpop.f32.mrf.mxu3 }
 0x4e8   :  { %16040 = vst [vmem:[#allocation141_spill] sm:$0xff] %v13035_v54  ;;  %v13045_v31 = vpop.f32.mrf.mxu0  ;;  %v8149_v54 = vld [vmem:[%s14456_s0 + $0xb0] sm:$0xff] }
 0x4e9   :  { %v5964_v48 = vrot.slane %v8149_v54, 1 }
 0x4eb   :  { %7207 = vmatmul.msk.bf16.gmra.mxu0 %vm16045_vm9, %v5121_v12  ;;  %v6047_v52 = vsel %vm16047_vm8, %v5963_v42, %v5964_v48  ;;  %v16052_v42 = vld [vmem:[#allocation151_spill] sm:$0xff]  ;;  %vm16068_vm9 = vmmov %vm16047_vm8 }
 0x4ec   :  { %v5479_v37 = vpop.f32.mrf.mxu1  ;;  %v6091_v6 = vsel %vm16050_vm0, %v6047_v52, 0.0  ;;  %v16053_v61 = vpack.c.bf16 %v16051_v32, %v16052_v42  ;;  %v16056_v52 = vld [vmem:[#allocation109_spill] sm:$0xff]  ;;  %vm7476_vm8 = vmpackc.low %vm16032_vm12, %vm8196_vm6 }
 0x4ed   :  { %v6149_v12 = vpack.c.bf16 %v6091_v6, %v6048_v35  ;;  %v4516_v47 = vadd.f32 %v16056_v52, %v16055_v21  ;;  %v4937_v35 = vrot.slane %v8149_v54, 7  ;;  %v4938_v6 = vrot.slane %v8150_v56, 7  ;;  %vm16074_vm12 = vmmov %vm16054_vm1 }
 0x4ee   :  { %v5480_v21 = vadd.f32 %v5479_v37, %v12965_v63 }
 0x4ef   :  { %v13051_v36 = vpop.f32.mrf.mxu3  ;;  %7395 = vmatmul.msk.bf16.gmra.mxu2 %vm16054_vm1, %v6149_v12  ;;  %v5019_v12 = vsel %vm16060_vm2, %v4937_v35, %v4938_v6  ;;  %v5020_v22 = vsel %vm16061_vm10, %v4936_v49, %v4937_v35  ;;  %v5965_v49 = vrot.slane %v8150_v56, 1  ;;  %v8151_v35 = vld [vmem:[%s14456_s0 + $0xc0] sm:$0xff]  ;;  %v16069_v56 = vld [vmem:[#allocation93_spill] sm:$0xff]  ;;  %vm16081_vm1 = vmmov %vm16060_vm2 }
 0x4f0   :  { %16046 = vst [vmem:[#allocation134_spill] sm:$0xff] %v13051_v36  ;;  %v13062_v20 = vpop.f32.mrf.mxu2  ;;  %v13064_v1 = vpop.f32.mrf.mxu0  ;;  %v5478_v36 = vadd.f32 %v5477_v18, %v12948_v57  ;;  %vm16070_vm15 = vnez %v16069_v56  ;;  %v16110_v56 = vld [vmem:[#allocation59_spill] sm:$0xff] }
 0x4f2   :  { %v5637_v57 = vadd.f32 %v5478_v36, %v4516_v47 }
 0x4f4   :  { %v5482_v0 = vpop.f32.mrf.mxu1  ;;  %7475 = vmatmul.msk.bf16.gmra.mxu3 %vm7473_vm3, %v16053_v61  ;;  %v13086_v61 = vld [vmem:[%s14458_s4 + $0x1] ss:$0 sm:$0xff]  ;;  %vm7291_vm3 = vmpackc.low %vm8196_vm6, %vm16044_vm4 }
 0x4f5   :  { %vm16080_vm4 = vmmov %vm16060_vm2 }
 0x4f7   :  { %7290 = vmatmul.msk.bf16.gmra.mxu1 %vm7288_vm13, %v16059_v55  ;;  %v6505_v18 = vpop.f32.mrf.mxu3  ;;  %v16062_v55 = vld [vmem:[#allocation75_spill] sm:$0xff]  ;;  %vm16075_vm13 = vmmov %vm16064_vm14 }
 0x4f8   :  { %v6506_v32 = vadd.f32 %v6505_v18, %v12971_v7  ;;  %vm16063_vm7 = vnez %v16062_v55  ;;  %v13094_v54 = vpop.f32.mrf.mxu2  ;;  %v13096_v47 = vpop.f32.mrf.mxu0  ;;  %v5966_v18 = vrot.slane %v8151_v35, 1  ;;  %vm16084_vm10 = vmmov %vm16075_vm13 }
 0x4f9   :  { %v5065_v4 = vsel %vm16063_vm7, %v5020_v22, 0.0  ;;  %v6046_v22 = vsel %vm16068_vm9, %v5964_v48, %v5965_v49  ;;  %v5483_v48 = vadd.f32 %v5482_v0, %v13001_v30  ;;  %v8152_v0 = vld [vmem:[%s14456_s0 + $0xc8] sm:$0xff] }
 0x4fa   :  { %v6665_v42 = vadd.f32 %v6506_v32, %v5637_v57  ;;  %v5122_v36 = vpack.c.bf16 %v5019_v12, %v5065_v4  ;;  %v16066_v32 = vld [vmem:[#allocation52_spill] sm:$0xff]  ;;  %v6045_v37 = vsel %vm16067_vm11, %v5965_v49, %v5966_v18  ;;  %v4940_v30 = vrot.slane %v8152_v0, 7 }
 0x4fb   :  { %v5638_v12 = vadd.f32 %v5480_v21, %v16066_v32  ;;  %v6093_v4 = vsel %vm16070_vm15, %v6045_v37, 0.0  ;;  %v4939_v37 = vrot.slane %v8151_v35, 7 }
 0x4fc   :  { %v5484_v7 = vpop.f32.mrf.mxu1  ;;  %v6731_v52 = vadd.f32 %v13086_v61, %v6665_v42  ;;  %7208 = vmatmul.msk.bf16.gmra.mxu0 %vm16065_vm5, %v5122_v36  ;;  %v6150_v21 = vpack.c.bf16 %v6093_v4, %v6046_v22  ;;  %v16079_v4 = vld [vmem:[#allocation3_spill] sm:$0xff] }
 0x4fe   :  { %6795 = vst.msk [vmem:[%s14461_s5] sm:$0xff] %vm16064_vm14, %v6731_v52  ;;  %vm16085_vm14 = vmmov %vm16065_vm5 }
 0x4ff   :  { %v6507_v57 = vpop.f32.mrf.mxu3  ;;  %7396 = vmatmul.msk.bf16.gmra.mxu2 %vm16074_vm12, %v6150_v21  ;;  %vm16087_vm5 = vmmov %vm16068_vm9 }
 0x500   :  { %v6508_v63 = vadd.f32 %v6507_v57, %v12997_v23  ;;  %v13119_v42 = vpop.f32.mrf.mxu2  ;;  %v13121_v52 = vpop.f32.mrf.mxu0  ;;  %v16072_v57 = vld [vmem:[#allocation8_spill] sm:$0xff]  ;;  %vm16088_vm11 = vmmov %vm16087_vm5 }
 0x501   :  { %v16073_v32 = vpack.c.bf16 %v16071_v60, %v16072_v57  ;;  %v5017_v60 = vsel %vm16080_vm4, %v4939_v37, %v4940_v30  ;;  %v16082_v57 = vld [vmem:[#allocation81_spill] sm:$0xff]  ;;  %vm7479_vm9 = vmpackc.low %vm16050_vm0, %vm8196_vm6 }
 0x502   :  { %v6666_v36 = vadd.f32 %v6508_v63, %v5638_v12  ;;  %v16076_v12 = vld [vmem:[#allocation158_spill] sm:$0xff]  ;;  %v16077_v63 = vld [vmem:[#allocation160_spill] sm:$0xff]  ;;  %vm16083_vm2 = vnez %v16082_v57  ;;  %vm16094_vm0 = vmmov %vm16074_vm12 }
 0x503   :  { %v16078_v28 = vpack.c.bf16 %v16076_v12, %v16077_v63  ;;  %vm16095_vm12 = vmmov %vm16084_vm10 }
 0x504   :  { %v5487_v23 = vpop.f32.mrf.mxu1  ;;  %v6732_v49 = vadd.f32 %v13086_v61, %v6666_v36  ;;  %7478 = vmatmul.msk.bf16.gmra.mxu3 %vm7476_vm8, %v16073_v32  ;;  %v5639_v36 = vadd.f32 %v5483_v48, %v16079_v4  ;;  %v5485_v48 = vadd.f32 %v5484_v7, %v13020_v38 }
 0x506   :  { %6796 = vst.msk [vmem:[%s14461_s5 + $0x8] sm:$0xff] %vm16075_vm13, %v6732_v49  ;;  %v5018_v49 = vsel %vm16081_vm1, %v4938_v6, %v4939_v37  ;;  %v5967_v6 = vrot.slane %v8152_v0, 1  ;;  %v8153_v37 = vld [vmem:[%s14456_s0 + $0xd0] sm:$0xff]  ;;  %v16089_v0 = vld [vmem:[#allocation94_spill] sm:$0xff]  ;;  %vm16101_vm13 = vmmov %vm16081_vm1 }
 0x507   :  { %7293 = vmatmul.msk.bf16.gmra.mxu1 %vm7291_vm3, %v16078_v28  ;;  %v6510_v22 = vpop.f32.mrf.mxu3  ;;  %v5067_v32 = vsel %vm16083_vm2, %v5018_v49, 0.0  ;;  %vm16090_vm8 = vnez %v16089_v0  ;;  %vm7294_vm3 = vmpackc.low %vm8196_vm6, %vm16063_vm7 }
 0x508   :  { %v6511_v21 = vadd.f32 %v6510_v22, %v13018_v62  ;;  %v13150_v35 = vpop.f32.mrf.mxu2  ;;  %v13152_v63 = vpop.f32.mrf.mxu0  ;;  %v5123_v28 = vpack.c.bf16 %v5017_v60, %v5067_v32  ;;  %v5968_v22 = vrot.slane %v8153_v37, 1  ;;  %v6044_v60 = vsel %vm16088_vm11, %v5966_v18, %v5967_v6  ;;  %vm16100_vm7 = vmmov %vm16081_vm1 }
 0x509   :  { %v5488_v18 = vadd.f32 %v5487_v23, %v13045_v31  ;;  %v8154_v31 = vld [vmem:[%s14456_s0 + $0xd8] sm:$0xff]  ;;  %vm16104_vm1 = vmmov %vm16084_vm10 }
 0x50a   :  { %v6667_v12 = vadd.f32 %v6511_v21, %v5639_v36  ;;  %v16086_v36 = vld [vmem:[#allocation55_spill] sm:$0xff]  ;;  %v6043_v7 = vsel %vm16087_vm5, %v5967_v6, %v5968_v22  ;;  %v16092_v6 = vld [vmem:[#allocation162_spill] sm:$0xff]  ;;  %v4942_v23 = vrot.slane %v8154_v31, 7  ;;  %vm7482_vm11 = vmpackc.low %vm16070_vm15, %vm8196_vm6 }
 0x50b   :  { %v5640_v21 = vadd.f32 %v5485_v48, %v16086_v36  ;;  %v6095_v49 = vsel %vm16090_vm8, %v6043_v7, 0.0  ;;  %v16096_v36 = vld [vmem:[#allocation14_spill] sm:$0xff]  ;;  %vm16113_vm15 = vmmov %vm16094_vm0 }
 0x50c   :  { %v5489_v8 = vpop.f32.mrf.mxu1  ;;  %v6733_v62 = vadd.f32 %v13086_v61, %v6667_v12  ;;  %7209 = vmatmul.msk.bf16.gmra.mxu0 %vm16085_vm14, %v5123_v28  ;;  %v6151_v48 = vpack.c.bf16 %v6095_v49, %v6044_v60  ;;  %v16099_v60 = vld [vmem:[#allocation13_spill] sm:$0xff]  ;;  %vm16107_vm14 = vmmov %vm16087_vm5 }
 0x50d   :  { %v5641_v49 = vadd.f32 %v5488_v18, %v16099_v60  ;;  %v5490_v18 = vadd.f32 %v5489_v8, %v13064_v1 }
 0x50e   :  { %6797 = vst.msk [vmem:[%s14461_s5 + $0x10] sm:$0xff] %vm16084_vm10, %v6733_v62  ;;  %vm16105_vm10 = vmmov %vm16094_vm0 }
 0x50f   :  { %v6512_v4 = vpop.f32.mrf.mxu3  ;;  %7397 = vmatmul.msk.bf16.gmra.mxu2 %vm16094_vm0, %v6151_v48  ;;  %vm16114_vm0 = vmmov %vm16104_vm1 }
 0x510   :  { %v6513_v38 = vadd.f32 %v6512_v4, %v13043_v59  ;;  %v13175_v32 = vpop.f32.mrf.mxu2  ;;  %v13177_v28 = vpop.f32.mrf.mxu0  ;;  %v16093_v4 = vpack.c.bf16 %v16091_v9, %v16092_v6  ;;  %v16102_v9 = vld [vmem:[#allocation86_spill] sm:$0xff] }
 0x511   :  { %vm16103_vm4 = vnez %v16102_v9  ;;  %v16136_v9 = vld [vmem:[#allocation65_spill] sm:$0xff] }
 0x512   :  { %v6668_v12 = vadd.f32 %v6513_v38, %v5640_v21  ;;  %v16097_v21 = vld [vmem:[#allocation163_spill] sm:$0xff]  ;;  %v4941_v38 = vrot.slane %v8153_v37, 7 }
 0x513   :  { %v16098_v55 = vpack.c.bf16 %v16096_v36, %v16097_v21 }
 0x514   :  { %v5492_v59 = vpop.f32.mrf.mxu1  ;;  %v6734_v62 = vadd.f32 %v13086_v61, %v6668_v12  ;;  %7481 = vmatmul.msk.bf16.gmra.mxu3 %vm7479_vm9, %v16093_v4  ;;  %v5015_v48 = vsel %vm16100_vm7, %v4941_v38, %v4942_v23 }
 0x516   :  { %6798 = vst.msk [vmem:[%s14461_s5 + $0x18] sm:$0xff] %vm16095_vm12, %v6734_v62  ;;  %v5016_v62 = vsel %vm16101_vm13, %v4940_v30, %v4941_v38  ;;  %v5969_v30 = vrot.slane %v8154_v31, 1  ;;  %v8155_v38 = vld [vmem:[%s14456_s0 + $0xe0] sm:$0xff]  ;;  %v16108_v31 = vld [vmem:[#allocation96_spill] sm:$0xff]  ;;  %vm16125_vm13 = vmmov %vm16114_vm0 }
 0x517   :  { %7296 = vmatmul.msk.bf16.gmra.mxu1 %vm7294_vm3, %v16098_v55  ;;  %v6515_v7 = vpop.f32.mrf.mxu3  ;;  %v5069_v6 = vsel %vm16103_vm4, %v5016_v62, 0.0  ;;  %vm16109_vm9 = vnez %v16108_v31  ;;  %vm7297_vm3 = vmpackc.low %vm8196_vm6, %vm16083_vm2  ;;  %v16157_v31 = vld [vmem:[#allocation167_spill] sm:$0xff] }
 0x518   :  { %v6516_v12 = vadd.f32 %v6515_v7, %v13062_v20  ;;  %v13206_v37 = vpop.f32.mrf.mxu2  ;;  %v13208_v36 = vpop.f32.mrf.mxu0  ;;  %v5124_v21 = vpack.c.bf16 %v5015_v48, %v5069_v6  ;;  %v5970_v7 = vrot.slane %v8155_v38, 1  ;;  %v6042_v48 = vsel %vm16087_vm5, %v5968_v22, %v5969_v30  ;;  %vm16119_vm2 = vmmov %vm16100_vm7 }
 0x519   :  { %v5493_v22 = vadd.f32 %v5492_v59, %v13096_v47  ;;  %v8156_v47 = vld [vmem:[%s14456_s0 + $0xe8] sm:$0xff]  ;;  %vm16120_vm12 = vmmov %vm16119_vm2 }
 0x51a   :  { %v6669_v4 = vadd.f32 %v6516_v12, %v5641_v49  ;;  %v16106_v49 = vld [vmem:[#allocation27_spill] sm:$0xff]  ;;  %v6041_v1 = vsel %vm16107_vm14, %v5969_v30, %v5970_v7  ;;  %v16111_v30 = vld [vmem:[#allocation20_spill] sm:$0xff]  ;;  %v4944_v59 = vrot.slane %v8156_v47, 7  ;;  %vm16128_vm14 = vmmov %vm16087_vm5 }
 0x51b   :  { %v5642_v12 = vadd.f32 %v5490_v18, %v16106_v49  ;;  %v6097_v62 = vsel %vm16109_vm9, %v6041_v1, 0.0  ;;  %v16115_v49 = vld [vmem:[#allocation164_spill] sm:$0xff] }
 0x51c   :  { %v5494_v55 = vpop.f32.mrf.mxu1  ;;  %v6735_v20 = vadd.f32 %v13086_v61, %v6669_v4  ;;  %7210 = vmatmul.msk.bf16.gmra.mxu0 %vm16105_vm10, %v5124_v21  ;;  %v6152_v18 = vpack.c.bf16 %v6097_v62, %v6042_v48  ;;  %v16118_v48 = vld [vmem:[#allocation61_spill] sm:$0xff] }
 0x51d   :  { %v5643_v62 = vadd.f32 %v5493_v22, %v16118_v48  ;;  %v5495_v22 = vadd.f32 %v5494_v55, %v13121_v52  ;;  %v16124_v48 = vld [vmem:[#allocation159_spill] sm:$0xff] }
 0x51e   :  { %6799 = vst.msk [vmem:[%s14461_s5 + $0x20] sm:$0xff] %vm16104_vm1, %v6735_v20  ;;  %vm16126_vm1 = vmmov %vm16105_vm10 }
 0x51f   :  { %v6517_v60 = vpop.f32.mrf.mxu3  ;;  %7398 = vmatmul.msk.bf16.gmra.mxu2 %vm16113_vm15, %v6152_v18  ;;  %vm16127_vm10 = vmmov %vm16087_vm5 }
 0x520   :  { %v6518_v8 = vadd.f32 %v6517_v60, %v13094_v54  ;;  %v13231_v6 = vpop.f32.mrf.mxu2  ;;  %v13233_v21 = vpop.f32.mrf.mxu0  ;;  %v16112_v60 = vpack.c.bf16 %v16110_v56, %v16111_v30  ;;  %v16121_v56 = vld [vmem:[#allocation90_spill] sm:$0xff]  ;;  %vm7485_vm5 = vmpackc.low %vm16090_vm8, %vm8196_vm6 }
 0x521   :  { %vm16122_vm7 = vnez %v16121_v56  ;;  %vm16134_vm8 = vmmov %vm16126_vm1  ;;  %v16158_v56 = vld [vmem:[#allocation173_spill] sm:$0xff] }
 0x522   :  { %v6670_v4 = vadd.f32 %v6518_v8, %v5642_v12  ;;  %v16116_v12 = vld [vmem:[#allocation165_spill] sm:$0xff]  ;;  %v4943_v8 = vrot.slane %v8155_v38, 7  ;;  %vm16135_vm15 = vmmov %vm16114_vm0 }
 0x523   :  { %v16117_v57 = vpack.c.bf16 %v16115_v49, %v16116_v12 }
 0x524   :  { %v5497_v54 = vpop.f32.mrf.mxu1  ;;  %v6736_v20 = vadd.f32 %v13086_v61, %v6670_v4  ;;  %7484 = vmatmul.msk.bf16.gmra.mxu3 %vm7482_vm11, %v16112_v60  ;;  %v5013_v18 = vsel %vm16119_vm2, %v4943_v8, %v4944_v59 }
 0x526   :  { %6800 = vst.msk [vmem:[%s14461_s5 + $0x28] sm:$0xff] %vm16114_vm0, %v6736_v20  ;;  %v5014_v20 = vsel %vm16120_vm12, %v4942_v23, %v4943_v8  ;;  %v5971_v23 = vrot.slane %v8156_v47, 1  ;;  %v8157_v8 = vld [vmem:[%s14456_s0 + $0xf0] sm:$0xff]  ;;  %v16129_v47 = vld [vmem:[#allocation97_spill] sm:$0xff]  ;;  %vm16141_vm0 = vmmov %vm16119_vm2 }
 0x527   :  { %7299 = vmatmul.msk.bf16.gmra.mxu1 %vm7297_vm3, %v16117_v57  ;;  %v6520_v1 = vpop.f32.mrf.mxu3  ;;  %v5071_v30 = vsel %vm16122_vm7, %v5014_v20, 0.0  ;;  %vm16130_vm11 = vnez %v16129_v47  ;;  %vm7300_vm3 = vmpackc.low %vm8196_vm6, %vm16103_vm4 }
 0x528   :  { %v6521_v4 = vadd.f32 %v6520_v1, %v13119_v42  ;;  %v13262_v38 = vpop.f32.mrf.mxu2  ;;  %v13264_v49 = vpop.f32.mrf.mxu0  ;;  %v5125_v12 = vpack.c.bf16 %v5013_v18, %v5071_v30  ;;  %v16123_v1 = vld [vmem:[#allocation32_spill] sm:$0xff]  ;;  %v6040_v20 = vsel %vm16128_vm14, %v5970_v7, %v5971_v23  ;;  %v8158_v7 = vld [vmem:[%s14456_s0 + $0xf8] sm:$0xff]  ;;  %vm16140_vm4 = vmmov %vm16119_vm2 }
 0x529   :  { %v4533_v40 = vadd.f32 %v16124_v48, %v16123_v1  ;;  %v4946_v0 = vrot.slane %v8158_v7, 7  ;;  %v16131_v48 = vld [vmem:[#allocation36_spill] sm:$0xff]  ;;  %vm16146_vm12 = vmmov %vm16125_vm13 }
 0x52a   :  { %v6671_v60 = vadd.f32 %v6521_v4, %v5643_v62  ;;  %v5972_v62 = vrot.slane %v8157_v8, 1 }
 0x52b   :  { %v5644_v52 = vadd.f32 %v5495_v22, %v4533_v40  ;;  %v5498_v22 = vadd.f32 %v5497_v54, %v13152_v63  ;;  %v16139_v63 = vld [vmem:[#allocation67_spill] sm:$0xff] }
 0x52c   :  { %v5499_v57 = vpop.f32.mrf.mxu1  ;;  %v6737_v42 = vadd.f32 %v13086_v61, %v6671_v60  ;;  %7211 = vmatmul.msk.bf16.gmra.mxu0 %vm16126_vm1, %v5125_v12  ;;  %v6039_v18 = vsel %vm16127_vm10, %v5971_v23, %v5972_v62  ;;  %v16132_v23 = vld [vmem:[#allocation166_spill] sm:$0xff] }
 0x52d   :  { %v6099_v30 = vsel %vm16130_vm11, %v6039_v18, 0.0  ;;  %v4945_v18 = vrot.slane %v8157_v8, 7  ;;  %v5645_v54 = vadd.f32 %v5498_v22, %v16139_v63  ;;  %v8159_v8 = vld [vmem:[%s14456_s0 + $0x100] sm:$0xff] }
 0x52e   :  { %6801 = vst.msk [vmem:[%s14461_s5 + $0x30] sm:$0xff] %vm16125_vm13, %v6737_v42  ;;  %v6153_v40 = vpack.c.bf16 %v6099_v30, %v6040_v20  ;;  %v16145_v63 = vld [vmem:[#allocation26_spill] sm:$0xff]  ;;  %vm16147_vm13 = vmmov %vm16126_vm1 }
 0x52f   :  { %v6522_v4 = vpop.f32.mrf.mxu3  ;;  %vm16148_vm1 = vmmov %vm16127_vm10 }
 0x530   :  { %v6523_v55 = vadd.f32 %v6522_v4, %v13150_v35  ;;  %v13288_v60 = vpop.f32.mrf.mxu2  ;;  %v13290_v42 = vpop.f32.mrf.mxu0  ;;  %v16133_v4 = vpack.c.bf16 %v16131_v48, %v16132_v23  ;;  %7399 = vmatmul.msk.bf16.gmra.mxu2 %vm16134_vm8, %v6153_v40  ;;  %v5012_v40 = vsel %vm16141_vm0, %v4944_v59, %v4945_v18  ;;  %v16142_v48 = vld [vmem:[#allocation92_spill] sm:$0xff]  ;;  %vm16149_vm10 = vmmov %vm16148_vm1 }
 0x531   :  { %vm16143_vm2 = vnez %v16142_v48  ;;  %v16177_v48 = vld [vmem:[#allocation175_spill] sm:$0xff] }
 0x532   :  { %v6672_v12 = vadd.f32 %v6523_v55, %v5644_v52  ;;  %v16137_v52 = vld [vmem:[#allocation170_spill] sm:$0xff]  ;;  %v5073_v23 = vsel %vm16143_vm2, %v5012_v40, 0.0 }
 0x533   :  { %v16138_v55 = vpack.c.bf16 %v16136_v9, %v16137_v52  ;;  %v5974_v9 = vrot.slane %v8159_v8, 1 }
 0x534   :  { %v5502_v35 = vpop.f32.mrf.mxu1  ;;  %v6738_v1 = vadd.f32 %v13086_v61, %v6672_v12  ;;  %7487 = vmatmul.msk.bf16.gmra.mxu3 %vm7485_vm5, %v16133_v4  ;;  %v5011_v12 = vsel %vm16140_vm4, %v4945_v18, %v4946_v0  ;;  %v5973_v4 = vrot.slane %v8158_v7, 1  ;;  %v16144_v18 = vld [vmem:[#allocation71_spill] sm:$0xff]  ;;  %vm7488_vm5 = vmpackc.low %vm16109_vm9, %vm8196_vm6 }
 0x535   :  { %v5126_v52 = vpack.c.bf16 %v5011_v12, %v5073_v23  ;;  %v4538_v40 = vadd.f32 %v16145_v63, %v16144_v18  ;;  %vm16155_vm9 = vmmov %vm16134_vm8 }
 0x536   :  { %6802 = vst.msk [vmem:[%s14461_s5 + $0x38] sm:$0xff] %vm16135_vm15, %v6738_v1  ;;  %v6037_v7 = vsel %vm16148_vm1, %v5973_v4, %v5974_v9  ;;  %vm16156_vm8 = vmmov %vm16146_vm12 }
 0x537   :  { %7302 = vmatmul.msk.bf16.gmra.mxu1 %vm7300_vm3, %v16138_v55  ;;  %v6525_v20 = vpop.f32.mrf.mxu3  ;;  %vm7303_vm3 = vmpackc.low %vm8196_vm6, %vm16122_vm7 }
 0x538   :  { %v6526_v30 = vadd.f32 %v6525_v20, %v13175_v32  ;;  %v13319_v1 = vpop.f32.mrf.mxu2  ;;  %v13324_v55 = vpop.f32.mrf.mxu0  ;;  %v5500_v20 = vadd.f32 %v5499_v57, %v13177_v28  ;;  %v16150_v28 = vld [vmem:[#allocation98_spill] sm:$0xff]  ;;  %vm16160_vm7 = vmmov %vm16141_vm0 }
 0x539   :  { %vm16151_vm14 = vnez %v16150_v28  ;;  %vm16164_vm4 = vmmov %vm16141_vm0 }
 0x53a   :  { %v6673_v22 = vadd.f32 %v6526_v30, %v5645_v54  ;;  %v6038_v54 = vsel %vm16149_vm10, %v5972_v62, %v5973_v4  ;;  %v6101_v57 = vsel %vm16151_vm14, %v6037_v7, 0.0  ;;  %v5646_v12 = vadd.f32 %v5500_v20, %v4538_v40  ;;  %v16152_v20 = vld [vmem:[#allocation171_spill] sm:$0xff]  ;;  %v16153_v40 = vld [vmem:[#allocation172_spill] sm:$0xff]  ;;  %vm16167_vm0 = vmmov %vm16156_vm8 }
 0x53b   :  { %v5503_v4 = vadd.f32 %v5502_v35, %v13208_v36  ;;  %v16154_v7 = vpack.c.bf16 %v16152_v20, %v16153_v40  ;;  %v8160_v36 = vld [vmem:[%s14456_s0 + $0x108] sm:$0xff]  ;;  %vm7491_vm10 = vmpackc.low %vm16130_vm11, %vm8196_vm6 }
 0x53c   :  { %v5504_v32 = vpop.f32.mrf.mxu1  ;;  %v6739_v59 = vadd.f32 %v13086_v61, %v6673_v22  ;;  %7212 = vmatmul.msk.bf16.gmra.mxu0 %vm16147_vm13, %v5126_v52  ;;  %v6154_v22 = vpack.c.bf16 %v6101_v57, %v6038_v54  ;;  %v4948_v35 = vrot.slane %v8160_v36, 7  ;;  %v16161_v57 = vld [vmem:[#allocation95_spill] sm:$0xff]  ;;  %vm16169_vm13 = vmmov %vm16148_vm1 }
 0x53d   :  { %vm16162_vm15 = vnez %v16161_v57  ;;  %vm16175_vm11 = vmmov %vm16155_vm9  ;;  %v16198_v57 = vld [vmem:[#allocation184_spill] sm:$0xff] }
 0x53e   :  { %6803 = vst.msk [vmem:[%s14461_s5 + $0x40] sm:$0xff] %vm16146_vm12, %v6739_v59  ;;  %v4947_v59 = vrot.slane %v8159_v8, 7  ;;  %v16159_v8 = vpack.c.bf16 %v16157_v31, %v16158_v56  ;;  %v5505_v56 = vadd.f32 %v5504_v32, %v13233_v21  ;;  %vm16168_vm12 = vmmov %vm16155_vm9 }
 0x53f   :  { %v6527_v30 = vpop.f32.mrf.mxu3 }
 0x540   :  { %v6528_v23 = vadd.f32 %v6527_v30, %v13206_v37  ;;  %v13345_v18 = vpop.f32.mrf.mxu2  ;;  %v13350_v62 = vpop.f32.mrf.mxu0  ;;  %7400 = vmatmul.msk.bf16.gmra.mxu2 %vm16155_vm9, %v6154_v22  ;;  %v5010_v54 = vsel %vm16160_vm7, %v4946_v0, %v4947_v59  ;;  %vm16176_vm9 = vmmov %vm16167_vm0 }
 0x542   :  { %v6674_v52 = vadd.f32 %v6528_v23, %v5646_v12  ;;  %v5075_v12 = vsel %vm16162_vm15, %v5010_v54, 0.0  ;;  %v16163_v23 = vld [vmem:[#allocation19_spill] sm:$0xff]  ;;  %v16166_v54 = vld [vmem:[#allocation169_spill] sm:$0xff] }
 0x543   :  { %v5647_v22 = vadd.f32 %v5503_v4, %v16163_v23  ;;  %v4543_v10 = vadd.f32 %v16166_v54, %v16165_v44 }
 0x544   :  { %v5507_v63 = vpop.f32.mrf.mxu1  ;;  %v6740_v37 = vadd.f32 %v13086_v61, %v6674_v52  ;;  %7490 = vmatmul.msk.bf16.gmra.mxu3 %vm7488_vm5, %v16154_v7 }
 0x545   :  { %v5648_v4 = vadd.f32 %v5505_v56, %v4543_v10  ;;  %v16178_v56 = vld [vmem:[#allocation177_spill] sm:$0xff] }
 0x546   :  { %6804 = vst.msk [vmem:[%s14461_s5 + $0x48] sm:$0xff] %vm16156_vm8, %v6740_v37  ;;  %v5009_v37 = vsel %vm16164_vm4, %v4947_v59, %v4948_v35  ;;  %v8161_v59 = vld [vmem:[%s14456_s0 + $0x110] sm:$0xff] }
 0x547   :  { %7305 = vmatmul.msk.bf16.gmra.mxu1 %vm7303_vm3, %v16159_v8  ;;  %v6530_v30 = vpop.f32.mrf.mxu3  ;;  %v5127_v40 = vpack.c.bf16 %v5009_v37, %v5075_v12  ;;  %v5976_v21 = vrot.slane %v8161_v59, 1  ;;  %vm7306_vm3 = vmpackc.low %vm8196_vm6, %vm16143_vm2  ;;  %v4949_v54 = vrot.slane %v8161_v59, 7 }
 0x548   :  { %v6531_v52 = vadd.f32 %v6530_v30, %v13231_v6  ;;  %v13376_v31 = vpop.f32.mrf.mxu0  ;;  %v13380_v8 = vpop.f32.mrf.mxu2  ;;  %v5975_v6 = vrot.slane %v8160_v36, 1  ;;  %v16170_v36 = vld [vmem:[#allocation105_spill] sm:$0xff]  ;;  %vm16181_vm2 = vmmov %vm16164_vm4 }
 0x549   :  { %vm16171_vm5 = vnez %v16170_v36  ;;  %vm16182_vm8 = vmmov %vm16181_vm2 }
 0x54a   :  { %v6675_v20 = vadd.f32 %v6531_v52, %v5647_v22  ;;  %v6035_v44 = vsel %vm16169_vm13, %v5975_v6, %v5976_v21  ;;  %v6036_v12 = vsel %vm16148_vm1, %v5974_v9, %v5975_v6  ;;  %vm16187_vm4 = vmmov %vm16167_vm0 }
 0x54b   :  { %v6103_v23 = vsel %vm16171_vm5, %v6035_v44, 0.0  ;;  %vm16190_vm13 = vmmov %vm16148_vm1 }
 0x54c   :  { %v5509_v7 = vpop.f32.mrf.mxu1  ;;  %v6741_v0 = vadd.f32 %v13086_v61, %v6675_v20  ;;  %7213 = vmatmul.msk.bf16.gmra.mxu0 %vm16168_vm12, %v5127_v40  ;;  %v6155_v52 = vpack.c.bf16 %v6103_v23, %v6036_v12  ;;  %v16172_v20 = vld [vmem:[#allocation88_spill] sm:$0xff]  ;;  %v5008_v23 = vsel %vm16182_vm8, %v4948_v35, %v4949_v54  ;;  %vm16189_vm12 = vmmov %vm16148_vm1 }
 0x54d   :  { %v16173_v40 = vld [vmem:[#allocation168_spill] sm:$0xff]  ;;  %vm7494_vm1 = vmpackc.low %vm16151_vm14, %vm8196_vm6 }
 0x54e   :  { %6805 = vst.msk [vmem:[%s14461_s5 + $0x50] sm:$0xff] %vm16167_vm0, %v6741_v0  ;;  %v16174_v47 = vpack.c.bf16 %v16172_v20, %v16173_v40  ;;  %v16179_v0 = vpack.c.bf16 %v16177_v48, %v16178_v56  ;;  %v16185_v48 = vld [vmem:[#allocation79_spill] sm:$0xff]  ;;  %vm16188_vm0 = vmmov %vm16175_vm11 }
 0x54f   :  { %v6532_v32 = vpop.f32.mrf.mxu3  ;;  %vm16196_vm14 = vmmov %vm16188_vm0 }
 0x550   :  { %v6533_v30 = vadd.f32 %v6532_v32, %v13262_v38  ;;  %v13405_v10 = vpop.f32.mrf.mxu0  ;;  %v5508_v38 = vadd.f32 %v5507_v63, %v13264_v49  ;;  %7401 = vmatmul.msk.bf16.gmra.mxu2 %vm16175_vm11, %v6155_v52  ;;  %v8162_v49 = vld [vmem:[%s14456_s0 + $0x118] sm:$0xff]  ;;  %v13423_v32 = vpop.f32.mrf.mxu2  ;;  %vm16197_vm11 = vmmov %vm16187_vm4 }
 0x551   :  { %v4950_v63 = vrot.slane %v8162_v49, 7  ;;  %v5977_v35 = vrot.slane %v8162_v49, 1  ;;  %v16191_v49 = vld [vmem:[#allocation117_spill] sm:$0xff]  ;;  %vm16208_vm8 = vmmov %vm16187_vm4 }
 0x552   :  { %v6676_v22 = vadd.f32 %v6533_v30, %v5648_v4  ;;  %v16180_v4 = vld [vmem:[#allocation39_spill] sm:$0xff] }
 0x553   :  { %v5649_v30 = vadd.f32 %v5508_v38, %v16180_v4  ;;  %v5007_v12 = vsel %vm16181_vm2, %v4949_v54, %v4950_v63 }
 0x554   :  { %v5512_v37 = vpop.f32.mrf.mxu1  ;;  %v6742_v9 = vadd.f32 %v13086_v61, %v6676_v22  ;;  %7493 = vmatmul.msk.bf16.gmra.mxu3 %vm7491_vm10, %v16174_v47  ;;  %v16183_v22 = vld [vmem:[#allocation114_spill] sm:$0xff]  ;;  %v5510_v47 = vadd.f32 %v5509_v7, %v13290_v42  ;;  %vm16192_vm10 = vnez %v16191_v49 }
 0x555   :  { %vm16184_vm7 = vnez %v16183_v22  ;;  %v16219_v22 = vld [vmem:[#allocation182_spill] sm:$0xff] }
 0x556   :  { %6806 = vst.msk [vmem:[%s14461_s5 + $0x58] sm:$0xff] %vm16176_vm9, %v6742_v9  ;;  %v5077_v59 = vsel %vm16184_vm7, %v5008_v23, 0.0  ;;  %vm16203_vm9 = vmmov %vm16181_vm2 }
 0x557   :  { %7308 = vmatmul.msk.bf16.gmra.mxu1 %vm7306_vm3, %v16179_v0  ;;  %v6535_v6 = vpop.f32.mrf.mxu3  ;;  %v5128_v9 = vpack.c.bf16 %v5007_v12, %v5077_v59  ;;  %v8163_v0 = vld [vmem:[%s14456_s0 + $0x120] sm:$0xff]  ;;  %vm7309_vm3 = vmpackc.low %vm8196_vm6, %vm16162_vm15 }
 0x558   :  { %v6536_v44 = vadd.f32 %v6535_v6, %v13288_v60  ;;  %v13433_v40 = vpop.f32.mrf.mxu0  ;;  %v16186_v60 = vld [vmem:[#allocation18_spill] sm:$0xff]  ;;  %v5978_v54 = vrot.slane %v8163_v0, 1  ;;  %v13447_v42 = vpop.f32.mrf.mxu2  ;;  %vm16202_vm15 = vmmov %vm16181_vm2 }
 0x559   :  { %v4548_v56 = vadd.f32 %v16186_v60, %v16185_v48  ;;  %v16199_v48 = vld [vmem:[#allocation185_spill] sm:$0xff] }
 0x55a   :  { %v6677_v52 = vadd.f32 %v6536_v44, %v5649_v30  ;;  %v6033_v30 = vsel %vm16189_vm12, %v5977_v35, %v5978_v54  ;;  %v6034_v44 = vsel %vm16190_vm13, %v5976_v21, %v5977_v35  ;;  %v16200_v60 = vpack.c.bf16 %v16198_v57, %v16199_v48  ;;  %v16206_v57 = vld [vmem:[#allocation176_spill] sm:$0xff]  ;;  %vm7497_vm13 = vmpackc.low %vm16171_vm5, %vm8196_vm6 }
 0x55b   :  { %v5650_v7 = vadd.f32 %v5510_v47, %v4548_v56  ;;  %v6105_v12 = vsel %vm16192_vm10, %v6033_v30, 0.0  ;;  %v16193_v47 = vld [vmem:[#allocation66_spill] sm:$0xff]  ;;  %v4951_v56 = vrot.slane %v8163_v0, 7 }
 0x55c   :  { %v5514_v20 = vpop.f32.mrf.mxu1  ;;  %v6743_v38 = vadd.f32 %v13086_v61, %v6677_v52  ;;  %7214 = vmatmul.msk.bf16.gmra.mxu0 %vm16188_vm0, %v5128_v9  ;;  %v6156_v59 = vpack.c.bf16 %v6105_v12, %v6034_v44  ;;  %v5513_v9 = vadd.f32 %v5512_v37, %v13324_v55  ;;  %v8164_v55 = vld [vmem:[%s14456_s0 + $0x128] sm:$0xff] }
 0x55d   :  { %v4952_v37 = vrot.slane %v8164_v55, 7  ;;  %v5006_v12 = vsel %vm16203_vm9, %v4950_v63, %v4951_v56  ;;  %v5979_v63 = vrot.slane %v8164_v55, 1  ;;  %v16212_v55 = vld [vmem:[#allocation120_spill] sm:$0xff] }
 0x55e   :  { %6807 = vst.msk [vmem:[%s14461_s5 + $0x60] sm:$0xff] %vm16187_vm4, %v6743_v38  ;;  %v16194_v38 = vld [vmem:[#allocation178_spill] sm:$0xff]  ;;  %vm16209_vm4 = vmmov %vm16188_vm0 }
 0x55f   :  { %v6537_v6 = vpop.f32.mrf.mxu3  ;;  %v16195_v28 = vpack.c.bf16 %v16193_v47, %v16194_v38  ;;  %v5005_v44 = vsel %vm16202_vm15, %v4951_v56, %v4952_v37  ;;  %vm16210_vm0 = vmmov %vm16189_vm12 }
 0x560   :  { %v6538_v4 = vadd.f32 %v6537_v6, %v13319_v1  ;;  %v13462_v1 = vpop.f32.mrf.mxu0  ;;  %7402 = vmatmul.msk.bf16.gmra.mxu2 %vm16196_vm14, %v6156_v59  ;;  %vm16211_vm12 = vmmov %vm16210_vm0 }
 0x561   :  { %v13480_v6 = vpop.f32.mrf.mxu2  ;;  %vm16217_vm5 = vmmov %vm16209_vm4 }
 0x562   :  { %v6678_v23 = vadd.f32 %v6538_v4, %v5650_v7  ;;  %v16201_v7 = vld [vmem:[#allocation85_spill] sm:$0xff]  ;;  %vm16218_vm14 = vmmov %vm16208_vm8 }
 0x563   :  { %v5651_v4 = vadd.f32 %v5513_v9, %v16201_v7 }
 0x564   :  { %v5517_v52 = vpop.f32.mrf.mxu1  ;;  %v6744_v21 = vadd.f32 %v13086_v61, %v6678_v23  ;;  %7496 = vmatmul.msk.bf16.gmra.mxu3 %vm7494_vm1, %v16195_v28  ;;  %v16204_v23 = vld [vmem:[#allocation119_spill] sm:$0xff]  ;;  %v5515_v28 = vadd.f32 %v5514_v20, %v13350_v62  ;;  %vm16213_vm1 = vnez %v16212_v55 }
 0x565   :  { %vm16205_vm2 = vnez %v16204_v23  ;;  %v5518_v36 = vadd.f32 %v5517_v52, %v13376_v31  ;;  %v16222_v52 = vld [vmem:[#allocation89_spill] sm:$0xff]  ;;  %v16239_v23 = vld [vmem:[#allocation191_spill] sm:$0xff] }
 0x566   :  { %6808 = vst.msk [vmem:[%s14461_s5 + $0x68] sm:$0xff] %vm16197_vm11, %v6744_v21  ;;  %v5079_v0 = vsel %vm16205_vm2, %v5006_v12, 0.0 }
 0x567   :  { %7311 = vmatmul.msk.bf16.gmra.mxu1 %vm7309_vm3, %v16200_v60  ;;  %v6540_v35 = vpop.f32.mrf.mxu3  ;;  %v5129_v21 = vpack.c.bf16 %v5005_v44, %v5079_v0  ;;  %v8165_v60 = vld [vmem:[%s14456_s0 + $0x130] sm:$0xff]  ;;  %vm7312_vm3 = vmpackc.low %vm8196_vm6, %vm16184_vm7 }
 0x568   :  { %v6541_v30 = vadd.f32 %v6540_v35, %v13345_v18  ;;  %v13490_v38 = vpop.f32.mrf.mxu0  ;;  %v16207_v18 = vld [vmem:[#allocation174_spill] sm:$0xff]  ;;  %v5980_v56 = vrot.slane %v8165_v60, 1  ;;  %vm16223_vm7 = vmmov %vm16203_vm9 }
 0x569   :  { %v4553_v48 = vadd.f32 %v16207_v18, %v16206_v57  ;;  %v13504_v62 = vpop.f32.mrf.mxu2  ;;  %v16215_v57 = vld [vmem:[#allocation188_spill] sm:$0xff]  ;;  %vm16224_vm11 = vmmov %vm16223_vm7 }
 0x56a   :  { %v6679_v59 = vadd.f32 %v6541_v30, %v5651_v4  ;;  %v6031_v4 = vsel %vm16210_vm0, %v5979_v63, %v5980_v56  ;;  %v6032_v30 = vsel %vm16211_vm12, %v5978_v54, %v5979_v63  ;;  %v8166_v54 = vld [vmem:[%s14456_s0 + $0x138] sm:$0xff]  ;;  %vm16229_vm9 = vmmov %vm16208_vm8 }
 0x56b   :  { %v5652_v20 = vadd.f32 %v5515_v28, %v4553_v48  ;;  %v6107_v44 = vsel %vm16213_vm1, %v6031_v4, 0.0  ;;  %v16220_v48 = vld [vmem:[#allocation189_spill] sm:$0xff]  ;;  %vm7500_vm12 = vmpackc.low %vm16192_vm10, %vm8196_vm6 }
 0x56c   :  { %v5519_v47 = vpop.f32.mrf.mxu1  ;;  %v6745_v9 = vadd.f32 %v13086_v61, %v6679_v59  ;;  %7215 = vmatmul.msk.bf16.gmra.mxu0 %vm16209_vm4, %v5129_v21  ;;  %v6157_v0 = vpack.c.bf16 %v6107_v44, %v6032_v30  ;;  %v4954_v21 = vrot.slane %v8166_v54, 7  ;;  %v16221_v63 = vpack.c.bf16 %v16219_v22, %v16220_v48  ;;  %v16228_v48 = vld [vmem:[#allocation83_spill] sm:$0xff]  ;;  %vm16237_vm10 = vmmov %vm16217_vm5 }
 0x56d   :  { %v5520_v22 = vadd.f32 %v5519_v47, %v13405_v10 }
 0x56e   :  { %6809 = vst.msk [vmem:[%s14461_s5 + $0x70] sm:$0xff] %vm16208_vm8, %v6745_v9  ;;  %v16214_v9 = vld [vmem:[#allocation187_spill] sm:$0xff]  ;;  %vm16230_vm8 = vmmov %vm16209_vm4 }
 0x56f   :  { %v6542_v35 = vpop.f32.mrf.mxu3  ;;  %v16216_v18 = vpack.c.bf16 %v16214_v9, %v16215_v57  ;;  %v5981_v57 = vrot.slane %v8166_v54, 1  ;;  %vm16231_vm4 = vmmov %vm16210_vm0 }
 0x570   :  { %v6543_v7 = vadd.f32 %v6542_v35, %v13380_v8  ;;  %v13519_v8 = vpop.f32.mrf.mxu0  ;;  %7403 = vmatmul.msk.bf16.gmra.mxu2 %vm16217_vm5, %v6157_v0  ;;  %v4953_v35 = vrot.slane %v8165_v60, 7  ;;  %vm16238_vm5 = vmmov %vm16229_vm9 }
 0x571   :  { %v6030_v10 = vsel %vm16231_vm4, %v5980_v56, %v5981_v57  ;;  %vm16252_vm4 = vmmov %vm16210_vm0 }
 0x572   :  { %v6680_v12 = vadd.f32 %v6543_v7, %v5652_v20  ;;  %v13537_v31 = vpop.f32.mrf.mxu2  ;;  %v5653_v7 = vadd.f32 %v5518_v36, %v16222_v52  ;;  %v5003_v30 = vsel %vm16223_vm7, %v4953_v35, %v4954_v21  ;;  %v5004_v44 = vsel %vm16224_vm11, %v4952_v37, %v4953_v35  ;;  %v8167_v37 = vld [vmem:[%s14456_s0 + $0x140] sm:$0xff]  ;;  %vm16249_vm11 = vmmov %vm16238_vm5 }
 0x573   :  { %v5982_v54 = vrot.slane %v8167_v37, 1 }
 0x574   :  { %v5522_v59 = vpop.f32.mrf.mxu1  ;;  %v6746_v28 = vadd.f32 %v13086_v61, %v6680_v12  ;;  %7499 = vmatmul.msk.bf16.gmra.mxu3 %vm7497_vm13, %v16216_v18  ;;  %v16225_v12 = vld [vmem:[#allocation5_spill] sm:$0xff] }
 0x575   :  { %vm16226_vm15 = vnez %v16225_v12  ;;  %v16258_v12 = vpack.c.bf16 %v12214_v53, %v12220_v39 }
 0x576   :  { %6810 = vst.msk [vmem:[%s14461_s5 + $0x78] sm:$0xff] %vm16218_vm14, %v6746_v28  ;;  %v5081_v0 = vsel %vm16226_vm15, %v5004_v44, 0.0 }
 0x577   :  { %7314 = vmatmul.msk.bf16.gmra.mxu1 %vm7312_vm3, %v16221_v63  ;;  %v6545_v20 = vpop.f32.mrf.mxu3  ;;  %v5130_v9 = vpack.c.bf16 %v5003_v30, %v5081_v0  ;;  %vm7315_vm3 = vmpackc.low %vm8196_vm6, %vm16205_vm2 }
 0x578   :  { %v6546_v4 = vadd.f32 %v6545_v20, %v13423_v32  ;;  %v16227_v32 = vld [vmem:[#allocation12_spill] sm:$0xff]  ;;  %vm16243_vm2 = vmmov %vm16223_vm7 }
 0x579   :  { %v13547_v18 = vpop.f32.mrf.mxu0  ;;  %v4558_v63 = vadd.f32 %v16228_v48, %v16227_v32  ;;  %v4955_v48 = vrot.slane %v8167_v37, 7  ;;  %vm16244_vm14 = vmmov %vm16243_vm2 }
 0x57a   :  { %v6681_v28 = vadd.f32 %v6546_v4, %v5653_v7  ;;  %v13561_v20 = vpop.f32.mrf.mxu2  ;;  %v6029_v7 = vsel %vm16210_vm0, %v5981_v57, %v5982_v54  ;;  %v16232_v4 = vld [vmem:[#allocation123_spill] sm:$0xff]  ;;  %v16234_v57 = vld [vmem:[#allocation78_spill] sm:$0xff] }
 0x57b   :  { %v5654_v47 = vadd.f32 %v5520_v22, %v4558_v63  ;;  %vm16233_vm13 = vnez %v16232_v4  ;;  %v16235_v22 = vld [vmem:[#allocation183_spill] sm:$0xff]  ;;  %v16272_v4 = vpack.c.bf16 %v12234_v2, %v12238_v51  ;;  %v16276_v51 = vld [vmem:[#allocation186_spill] sm:$0xff] }
 0x57c   :  { %v5524_v60 = vpop.f32.mrf.mxu1  ;;  %v6747_v36 = vadd.f32 %v13086_v61, %v6681_v28  ;;  %7216 = vmatmul.msk.bf16.gmra.mxu0 %vm16230_vm8, %v5130_v9  ;;  %v6109_v30 = vsel %vm16233_vm13, %v6029_v7, 0.0  ;;  %v16236_v49 = vpack.c.bf16 %v16234_v57, %v16235_v22 }
 0x57d   :  { %v6158_v0 = vpack.c.bf16 %v6109_v30, %v6030_v10  ;;  %v16242_v10 = vld [vmem:[#allocation56_spill] sm:$0xff]  ;;  %v5002_v30 = vsel %vm16244_vm14, %v4954_v21, %v4955_v48 }
 0x57e   :  { %6811 = vst.msk [vmem:[%s14461_s5 + $0x80] sm:$0xff] %vm16229_vm9, %v6747_v36  ;;  %v16240_v36 = vld [vmem:[#allocation192_spill] sm:$0xff]  ;;  %vm16250_vm9 = vmmov %vm16230_vm8 }
 0x57f   :  { %v6547_v35 = vpop.f32.mrf.mxu3  ;;  %v16241_v32 = vpack.c.bf16 %v16239_v23, %v16240_v36  ;;  %v16247_v23 = vld [vmem:[#allocation180_spill] sm:$0xff]  ;;  %vm16251_vm8 = vmmov %vm16210_vm0 }
 0x580   :  { %v6548_v52 = vadd.f32 %v6547_v35, %v13447_v42  ;;  %v5523_v42 = vadd.f32 %v5522_v59, %v13433_v40  ;;  %7404 = vmatmul.msk.bf16.gmra.mxu2 %vm16237_vm10, %v6158_v0  ;;  %v8168_v40 = vld [vmem:[%s14456_s0 + $0x148] sm:$0xff]  ;;  %vm7503_vm0 = vmpackc.low %vm16213_vm1, %vm8196_vm6 }
 0x581   :  { %v13576_v56 = vpop.f32.mrf.mxu0  ;;  %v4956_v59 = vrot.slane %v8168_v40, 7  ;;  %v5983_v21 = vrot.slane %v8168_v40, 1  ;;  %v16253_v40 = vld [vmem:[#allocation42_spill] sm:$0xff]  ;;  %vm16256_vm1 = vmmov %vm16250_vm9 }
 0x582   :  { %v6682_v44 = vadd.f32 %v6548_v52, %v5654_v47  ;;  %v13594_v35 = vpop.f32.mrf.mxu2  ;;  %v5655_v47 = vadd.f32 %v5523_v42, %v16242_v10  ;;  %vm16257_vm10 = vmmov %vm16238_vm5 }
 0x583   :  { %v5001_v7 = vsel %vm16243_vm2, %v4955_v48, %v4956_v59  ;;  %vm16266_vm14 = vmmov %vm16257_vm10 }
 0x584   :  { %v5527_v28 = vpop.f32.mrf.mxu1  ;;  %v6748_v9 = vadd.f32 %v13086_v61, %v6682_v44  ;;  %7502 = vmatmul.msk.bf16.gmra.mxu3 %vm7500_vm12, %v16236_v49  ;;  %v16245_v44 = vld [vmem:[#allocation7_spill] sm:$0xff]  ;;  %v5525_v49 = vadd.f32 %v5524_v60, %v13462_v1  ;;  %vm16254_vm12 = vnez %v16253_v40  ;;  %v16289_v40 = vpack.c.bf16 %v12295_v17, %v12168_v50  ;;  %v16293_v17 = vld [vmem:[#allocation190_spill] sm:$0xff] }
 0x585   :  { %vm16246_vm7 = vnez %v16245_v44  ;;  %v5528_v55 = vadd.f32 %v5527_v28, %v13490_v38  ;;  %v16259_v28 = vld [vmem:[#allocation60_spill] sm:$0xff]  ;;  %v16275_v44 = vpack.c.bf16 %v12162_v45, %v12247_v46  ;;  %v16279_v46 = vld [vmem:[#allocation22_spill] sm:$0xff] }
 0x586   :  { %6812 = vst.msk [vmem:[%s14461_s5 + $0x88] sm:$0xff] %vm16238_vm5, %v6748_v9  ;;  %v5083_v37 = vsel %vm16246_vm7, %v5002_v30, 0.0  ;;  %vm16261_vm5 = vmmov %vm16243_vm2 }
 0x587   :  { %7317 = vmatmul.msk.bf16.gmra.mxu1 %vm7315_vm3, %v16241_v32  ;;  %v6550_v63 = vpop.f32.mrf.mxu3  ;;  %v5131_v9 = vpack.c.bf16 %v5001_v7, %v5083_v37  ;;  %v8169_v32 = vld [vmem:[%s14456_s0 + $0x150] sm:$0xff]  ;;  %vm7318_vm3 = vmpackc.low %vm8196_vm6, %vm16226_vm15 }
 0x588   :  { %v6551_v52 = vadd.f32 %v6550_v63, %v13480_v6  ;;  %v16248_v6 = vld [vmem:[#allocation179_spill] sm:$0xff]  ;;  %v5984_v48 = vrot.slane %v8169_v32, 1  ;;  %vm16260_vm15 = vmmov %vm16243_vm2 }
 0x589   :  { %v13604_v22 = vpop.f32.mrf.mxu0  ;;  %v4563_v36 = vadd.f32 %v16248_v6, %v16247_v23  ;;  %v4957_v23 = vrot.slane %v8169_v32, 7 }
 0x58a   :  { %v6683_v0 = vadd.f32 %v6551_v52, %v5655_v47  ;;  %v13618_v1 = vpop.f32.mrf.mxu2  ;;  %v6027_v47 = vsel %vm16251_vm8, %v5983_v21, %v5984_v48  ;;  %v6028_v52 = vsel %vm16252_vm4, %v5982_v54, %v5983_v21  ;;  %v8170_v54 = vld [vmem:[%s14456_s0 + $0x158] sm:$0xff]  ;;  %vm16269_vm8 = vmmov %vm16252_vm4 }
 0x58b   :  { %v5656_v60 = vadd.f32 %v5525_v49, %v4563_v36  ;;  %v6111_v7 = vsel %vm16254_vm12, %v6027_v47, 0.0  ;;  %v5657_v36 = vadd.f32 %v5528_v55, %v16259_v28  ;;  %v5000_v21 = vsel %vm16261_vm5, %v4956_v59, %v4957_v23  ;;  %v8171_v59 = vld [vmem:[%s14456_s0 + $0x160] sm:$0xff] }
 0x58c   :  { %v5529_v57 = vpop.f32.mrf.mxu1  ;;  %v6749_v42 = vadd.f32 %v13086_v61, %v6683_v0  ;;  %7217 = vmatmul.msk.bf16.gmra.mxu0 %vm16250_vm9, %v5131_v9  ;;  %v6159_v37 = vpack.c.bf16 %v6111_v7, %v6028_v52  ;;  %v4958_v9 = vrot.slane %v8170_v54, 7  ;;  %v5985_v39 = vrot.slane %v8170_v54, 1  ;;  %vm16268_vm9 = vmmov %vm16252_vm4 }
 0x58d   :  { %v5530_v52 = vadd.f32 %v5529_v57, %v13519_v8  ;;  %v5986_v54 = vrot.slane %v8171_v59, 1  ;;  %vm7506_vm4 = vmpackc.low %vm16233_vm13, %vm8196_vm6 }
 0x58e   :  { %6813 = vst.msk [vmem:[%s14461_s5 + $0x90] sm:$0xff] %vm16249_vm11, %v6749_v42  ;;  %v16255_v42 = vpack.c.bf16 %v12210_v33, %v12140_v29  ;;  %v4999_v33 = vsel %vm16260_vm15, %v4957_v23, %v4958_v9  ;;  %vm16267_vm11 = vmmov %vm16256_vm1  ;;  %v6026_v8 = vsel %vm16268_vm9, %v5984_v48, %v5985_v39  ;;  %v16270_v23 = vld [vmem:[#allocation129_spill] sm:$0xff]  ;;  %vm16280_vm15 = vnez %v16279_v46 }
 0x58f   :  { %v6552_v63 = vpop.f32.mrf.mxu3  ;;  %vm16273_vm13 = vmmov %vm16256_vm1  ;;  %v16309_v46 = vpack.c.bf16 %v12355_v43, %v12359_v25  ;;  %v16313_v25 = vld [vmem:[#allocation34_spill] sm:$0xff] }
 0x590   :  { %v6553_v10 = vadd.f32 %v6552_v63, %v13504_v62  ;;  %7405 = vmatmul.msk.bf16.gmra.mxu2 %vm16256_vm1, %v6159_v37  ;;  %v16262_v63 = vld [vmem:[#allocation16_spill] sm:$0xff]  ;;  %vm16274_vm1 = vmmov %vm16257_vm10 }
 0x591   :  { %v13633_v62 = vpop.f32.mrf.mxu0  ;;  %vm16263_vm2 = vnez %v16262_v63  ;;  %vm16286_vm9 = vmmov %vm16269_vm8  ;;  %v16292_v63 = vpack.c.bf16 %v12299_v34, %v12305_v16  ;;  %v16296_v16 = vld [vmem:[#allocation29_spill] sm:$0xff] }
 0x592   :  { %v6684_v30 = vadd.f32 %v6553_v10, %v5656_v60  ;;  %v13651_v38 = vpop.f32.mrf.mxu2  ;;  %v5085_v60 = vsel %vm16263_vm2, %v5000_v21, 0.0  ;;  %v4959_v21 = vrot.slane %v8171_v59, 7 }
 0x593   :  { %v5132_v53 = vpack.c.bf16 %v4999_v33, %v5085_v60 }
 0x594   :  { %v5532_v0 = vpop.f32.mrf.mxu1  ;;  %v6750_v49 = vadd.f32 %v13086_v61, %v6684_v30  ;;  %7505 = vmatmul.msk.bf16.gmra.mxu3 %vm7503_vm0, %v16255_v42  ;;  %v16265_v30 = vld [vmem:[#allocation4_spill] sm:$0xff]  ;;  %vm16271_vm0 = vnez %v16270_v23  ;;  %v16306_v23 = vpack.c.bf16 %v12351_v24, %v12309_v58  ;;  %v16310_v58 = vld [vmem:[#allocation193_spill] sm:$0xff] }
 0x596   :  { %6814 = vst.msk [vmem:[%s14461_s5 + $0x98] sm:$0xff] %vm16257_vm10, %v6750_v49  ;;  %vm16278_vm10 = vmmov %vm16261_vm5 }
 0x597   :  { %7320 = vmatmul.msk.bf16.gmra.mxu1 %vm7318_vm3, %v16258_v12  ;;  %v6555_v6 = vpop.f32.mrf.mxu3  ;;  %v6025_v12 = vsel %vm16269_vm8, %v5985_v39, %v5986_v54  ;;  %vm7321_vm3 = vmpackc.low %vm8196_vm6, %vm16246_vm7  ;;  %v4998_v45 = vsel %vm16278_vm10, %v4958_v9, %v4959_v21 }
 0x598   :  { %v6556_v29 = vadd.f32 %v6555_v6, %v13537_v31  ;;  %v16264_v31 = vld [vmem:[#allocation62_spill] sm:$0xff]  ;;  %v6113_v6 = vsel %vm16271_vm0, %v6025_v12, 0.0  ;;  %vm16277_vm7 = vmmov %vm16261_vm5 }
 0x599   :  { %v13661_v47 = vpop.f32.mrf.mxu0  ;;  %v4568_v37 = vadd.f32 %v16265_v30, %v16264_v31  ;;  %vm16283_vm5 = vmmov %vm16274_vm1 }
 0x59a   :  { %v6685_v10 = vadd.f32 %v6556_v29, %v5657_v36  ;;  %v13675_v49 = vpop.f32.mrf.mxu2  ;;  %v6160_v36 = vpack.c.bf16 %v6113_v6, %v6026_v8  ;;  %v16281_v8 = vld [vmem:[#allocation68_spill] sm:$0xff]  ;;  %vm16300_vm10 = vmmov %vm16283_vm5 }
 0x59b   :  { %v5658_v57 = vadd.f32 %v5530_v52, %v4568_v37  ;;  %v5087_v52 = vsel %vm16280_vm15, %v4998_v45, 0.0 }
 0x59c   :  { %v5534_v32 = vpop.f32.mrf.mxu1  ;;  %v6751_v7 = vadd.f32 %v13086_v61, %v6685_v10  ;;  %7218 = vmatmul.msk.bf16.gmra.mxu0 %vm16267_vm11, %v5132_v53 }
 0x59d   :  { %v5535_v59 = vadd.f32 %v5534_v32, %v13576_v56 }
 0x59e   :  { %6815 = vst.msk [vmem:[%s14461_s5 + $0xa0] sm:$0xff] %vm16266_vm14, %v6751_v7  ;;  %vm16284_vm14 = vmmov %vm16267_vm11 }
 0x59f   :  { %v6557_v55 = vpop.f32.mrf.mxu3  ;;  %vm16285_vm11 = vmmov %vm16269_vm8 }
 0x5a0   :  { %v6558_v42 = vadd.f32 %v6557_v55, %v13561_v20  ;;  %v5533_v20 = vadd.f32 %v5532_v0, %v13547_v18  ;;  %7406 = vmatmul.msk.bf16.gmra.mxu2 %vm16273_vm13, %v6160_v36  ;;  %v8172_v18 = vld [vmem:[%s14456_s0 + $0x168] sm:$0xff]  ;;  %vm7509_vm8 = vmpackc.low %vm16254_vm12, %vm8196_vm6 }
 0x5a1   :  { %v13690_v48 = vpop.f32.mrf.mxu0  ;;  %v4960_v0 = vrot.slane %v8172_v18, 7  ;;  %v5987_v9 = vrot.slane %v8172_v18, 1  ;;  %vm16290_vm12 = vmmov %vm16273_vm13 }
 0x5a2   :  { %v6686_v28 = vadd.f32 %v6558_v42, %v5658_v57  ;;  %v13708_v2 = vpop.f32.mrf.mxu2  ;;  %v5659_v10 = vadd.f32 %v5533_v20, %v16276_v51  ;;  %v8173_v42 = vld [vmem:[%s14456_s0 + $0x170] sm:$0xff]  ;;  %vm16291_vm13 = vmmov %vm16274_vm1 }
 0x5a3   :  { %v4997_v39 = vsel %vm16277_vm7, %v4959_v21, %v4960_v0  ;;  %v5988_v12 = vrot.slane %v8173_v42, 1  ;;  %v6024_v20 = vsel %vm16286_vm9, %v5986_v54, %v5987_v9  ;;  %v4961_v51 = vrot.slane %v8173_v42, 7  ;;  %v8175_v42 = vld [vmem:[%s14456_s0 + $0x180] sm:$0xff] }
 0x5a4   :  { %v5537_v29 = vpop.f32.mrf.mxu1  ;;  %v6752_v33 = vadd.f32 %v13086_v61, %v6686_v28  ;;  %7508 = vmatmul.msk.bf16.gmra.mxu3 %vm7506_vm4, %v16272_v4  ;;  %v5133_v31 = vpack.c.bf16 %v4997_v39, %v5087_v52 }
 0x5a5   :  { %v6023_v36 = vsel %vm16285_vm11, %v5987_v9, %v5988_v12  ;;  %vm16303_vm11 = vmmov %vm16286_vm9 }
 0x5a6   :  { %6816 = vst.msk [vmem:[%s14461_s5 + $0xa8] sm:$0xff] %vm16274_vm1, %v6752_v33  ;;  %v16287_v33 = vld [vmem:[#allocation44_spill] sm:$0xff] }
 0x5a7   :  { %7323 = vmatmul.msk.bf16.gmra.mxu1 %vm7321_vm3, %v16275_v44  ;;  %v6560_v60 = vpop.f32.mrf.mxu3  ;;  %vm16288_vm4 = vnez %v16287_v33  ;;  %vm7324_vm3 = vmpackc.low %vm8196_vm6, %vm16263_vm2  ;;  %v16323_v33 = vpack.c.bf16 %v12363_v13, %v12371_v27  ;;  %v16327_v27 = vld [vmem:[#allocation23_spill] sm:$0xff] }
 0x5a8   :  { %v6561_v53 = vadd.f32 %v6560_v60, %v13594_v35  ;;  %v16282_v35 = vld [vmem:[#allocation181_spill] sm:$0xff]  ;;  %v6115_v4 = vsel %vm16288_vm4, %v6023_v36, 0.0  ;;  %v5538_v60 = vadd.f32 %v5537_v29, %v13604_v22  ;;  %vm16294_vm2 = vmmov %vm16277_vm7  ;;  %vm16297_vm7 = vnez %v16296_v16 }
 0x5a9   :  { %v13718_v37 = vpop.f32.mrf.mxu0  ;;  %v4573_v57 = vadd.f32 %v16282_v35, %v16281_v8  ;;  %v6161_v21 = vpack.c.bf16 %v6115_v4, %v6024_v20  ;;  %v8174_v22 = vld [vmem:[%s14456_s0 + $0x178] sm:$0xff]  ;;  %vm16295_vm1 = vmmov %vm16294_vm2  ;;  %v16304_v4 = vld [vmem:[#allocation143_spill] sm:$0xff]  ;;  %v16326_v16 = vpack.c.bf16 %v12327_v14, %v12375_v3 }
 0x5aa   :  { %v6687_v7 = vadd.f32 %v6561_v53, %v5659_v10  ;;  %v13732_v56 = vpop.f32.mrf.mxu2  ;;  %v4962_v29 = vrot.slane %v8174_v22, 7  ;;  %v5661_v53 = vadd.f32 %v5538_v60, %v16293_v17  ;;  %v4996_v34 = vsel %vm16295_vm1, %v4960_v0, %v4961_v51  ;;  %v16330_v3 = vld [vmem:[#allocation41_spill] sm:$0xff] }
 0x5ab   :  { %v5660_v32 = vadd.f32 %v5535_v59, %v4573_v57  ;;  %v5089_v52 = vsel %vm16297_vm7, %v4996_v34, 0.0  ;;  %v16298_v57 = vld [vmem:[#allocation74_spill] sm:$0xff]  ;;  %v5989_v0 = vrot.slane %v8174_v22, 1 }
 0x5ac   :  { %v5539_v30 = vpop.f32.mrf.mxu1  ;;  %v6753_v55 = vadd.f32 %v13086_v61, %v6687_v7  ;;  %7219 = vmatmul.msk.bf16.gmra.mxu0 %vm16284_vm14, %v5133_v31  ;;  %v4995_v45 = vsel %vm16294_vm2, %v4961_v51, %v4962_v29  ;;  %vm16302_vm14 = vmmov %vm16286_vm9  ;;  %vm16314_vm2 = vnez %v16313_v25  ;;  %v16343_v25 = vld [vmem:[#allocation210_spill] sm:$0xff] }
 0x5ad   :  { %v5134_v31 = vpack.c.bf16 %v4995_v45, %v5089_v52  ;;  %v5540_v8 = vadd.f32 %v5539_v30, %v13633_v62  ;;  %v6022_v20 = vsel %vm16303_vm11, %v5988_v12, %v5989_v0  ;;  %vm7512_vm9 = vmpackc.low %vm16271_vm0, %vm8196_vm6 }
 0x5ae   :  { %6817 = vst.msk [vmem:[%s14461_s5 + $0xb0] sm:$0xff] %vm16283_vm5, %v6753_v55  ;;  %vm16301_vm5 = vmmov %vm16290_vm12 }
 0x5af   :  { %v6562_v6 = vpop.f32.mrf.mxu3  ;;  %vm16307_vm0 = vmmov %vm16301_vm5 }
 0x5b0   :  { %v6563_v28 = vadd.f32 %v6562_v6, %v13618_v1  ;;  %7407 = vmatmul.msk.bf16.gmra.mxu2 %vm16290_vm12, %v6161_v21  ;;  %v5990_v6 = vrot.slane %v8175_v42, 1  ;;  %vm16308_vm12 = vmmov %vm16300_vm10 }
 0x5b1   :  { %v13747_v1 = vpop.f32.mrf.mxu0 }
 0x5b2   :  { %v6688_v44 = vadd.f32 %v6563_v28, %v5660_v32  ;;  %v6021_v36 = vsel %vm16302_vm14, %v5989_v0, %v5990_v6 }
 0x5b3   :  { %v13765_v50 = vpop.f32.mrf.mxu2 }
 0x5b4   :  { %v5542_v18 = vpop.f32.mrf.mxu1  ;;  %v6754_v54 = vadd.f32 %v13086_v61, %v6688_v44  ;;  %7511 = vmatmul.msk.bf16.gmra.mxu3 %vm7509_vm8, %v16289_v40  ;;  %vm16305_vm8 = vnez %v16304_v4  ;;  %v16339_v4 = vld [vmem:[#allocation202_spill] sm:$0xff] }
 0x5b5   :  { %v6117_v44 = vsel %vm16305_vm8, %v6021_v36, 0.0  ;;  %v5543_v40 = vadd.f32 %v5542_v18, %v13661_v47 }
 0x5b6   :  { %6818 = vst.msk [vmem:[%s14461_s5 + $0xb8] sm:$0xff] %vm16291_vm13, %v6754_v54  ;;  %v6162_v60 = vpack.c.bf16 %v6117_v44, %v6022_v20  ;;  %vm16312_vm13 = vmmov %vm16295_vm1 }
 0x5b7   :  { %7326 = vmatmul.msk.bf16.gmra.mxu1 %vm7324_vm3, %v16292_v63  ;;  %v6565_v10 = vpop.f32.mrf.mxu3  ;;  %vm7327_vm3 = vmpackc.low %vm8196_vm6, %vm16280_vm15  ;;  %v4963_v63 = vrot.slane %v8175_v42, 7  ;;  %v5663_v51 = vadd.f32 %v5543_v40, %v16310_v58 }
 0x5b8   :  { %v6566_v39 = vadd.f32 %v6565_v10, %v13651_v38  ;;  %v16299_v38 = vld [vmem:[#allocation72_spill] sm:$0xff]  ;;  %vm16311_vm15 = vmmov %vm16295_vm1 }
 0x5b9   :  { %v13775_v55 = vpop.f32.mrf.mxu0  ;;  %v4578_v9 = vadd.f32 %v16299_v38, %v16298_v57  ;;  %v4994_v43 = vsel %vm16312_vm13, %v4962_v29, %v4963_v63  ;;  %vm16317_vm1 = vmmov %vm16300_vm10 }
 0x5ba   :  { %v6689_v7 = vadd.f32 %v6566_v39, %v5661_v53  ;;  %v5091_v17 = vsel %vm16314_vm2, %v4994_v43, 0.0 }
 0x5bb   :  { %v13789_v62 = vpop.f32.mrf.mxu2  ;;  %v5662_v30 = vadd.f32 %v5540_v8, %v4578_v9  ;;  %v16316_v8 = vld [vmem:[#allocation195_spill] sm:$0xff] }
 0x5bc   :  { %v5544_v59 = vpop.f32.mrf.mxu1  ;;  %v6755_v35 = vadd.f32 %v13086_v61, %v6689_v7  ;;  %7220 = vmatmul.msk.bf16.gmra.mxu0 %vm16301_vm5, %v5134_v31  ;;  %v16315_v31 = vld [vmem:[#allocation80_spill] sm:$0xff]  ;;  %vm16319_vm5 = vmmov %vm16303_vm11 }
 0x5bd   :  { %v5545_v52 = vadd.f32 %v5544_v59, %v13690_v48  ;;  %v4583_v29 = vadd.f32 %v16316_v8, %v16315_v31  ;;  %v8178_v48 = vld [vmem:[%s14456_s0 + $0x190] sm:$0xff]  ;;  %vm16320_vm14 = vmmov %vm16319_vm5 }
 0x5be   :  { %6819 = vst.msk [vmem:[%s14461_s5 + $0xc0] sm:$0xff] %vm16300_vm10, %v6755_v35  ;;  %vm16318_vm10 = vmmov %vm16307_vm0  ;;  %v5992_v59 = vrot.slane %v8178_v48, 1 }
 0x5bf   :  { %v6567_v32 = vpop.f32.mrf.mxu3  ;;  %v5664_v9 = vadd.f32 %v5545_v52, %v4583_v29  ;;  %vm7515_vm11 = vmpackc.low %vm16288_vm4, %vm8196_vm6  ;;  %v16337_v29 = vld [vmem:[#allocation149_spill] sm:$0xff] }
 0x5c0   :  { %v6568_v28 = vadd.f32 %v6567_v32, %v13675_v49  ;;  %7408 = vmatmul.msk.bf16.gmra.mxu2 %vm16307_vm0, %v6162_v60  ;;  %vm16324_vm4 = vmmov %vm16307_vm0  ;;  %v4965_v60 = vrot.slane %v8178_v48, 7 }
 0x5c1   :  { %v13804_v49 = vpop.f32.mrf.mxu0  ;;  %vm16325_vm0 = vmmov %vm16317_vm1 }
 0x5c2   :  { %v6690_v21 = vadd.f32 %v6568_v28, %v5662_v30  ;;  %v16321_v30 = vld [vmem:[#allocation145_spill] sm:$0xff] }
 0x5c3   :  { %v13822_v24 = vpop.f32.mrf.mxu2 }
 0x5c4   :  { %v5547_v54 = vpop.f32.mrf.mxu1  ;;  %v6756_v12 = vadd.f32 %v13086_v61, %v6690_v21  ;;  %7514 = vmatmul.msk.bf16.gmra.mxu3 %vm7512_vm9, %v16306_v23  ;;  %v8176_v61 = vld [vmem:[%s14456_s0 + $0x188] sm:$0xff]  ;;  %vm16322_vm9 = vnez %v16321_v30 }
 0x5c5   :  { %v4964_v47 = vrot.slane %v8176_v61, 7  ;;  %v5991_v35 = vrot.slane %v8176_v61, 1  ;;  %v5548_v21 = vadd.f32 %v5547_v54, %v13718_v37  ;;  %v8179_v37 = vld [vmem:[%s14456_s0 + $0x198] sm:$0xff] }
 0x5c6   :  { %6820 = vst.msk [vmem:[%s14461_s5 + $0xc8] sm:$0xff] %vm16308_vm12, %v6756_v12  ;;  %v4966_v54 = vrot.slane %v8179_v37, 7 }
 0x5c7   :  { %7329 = vmatmul.msk.bf16.gmra.mxu1 %vm7327_vm3, %v16309_v46  ;;  %v6570_v18 = vpop.f32.mrf.mxu3  ;;  %v4993_v10 = vsel %vm16311_vm15, %v4963_v63, %v4964_v47  ;;  %v6019_v42 = vsel %vm16319_vm5, %v5991_v35, %v5992_v59  ;;  %v6020_v32 = vsel %vm16320_vm14, %v5990_v6, %v5991_v35  ;;  %vm7330_vm3 = vmpackc.low %vm8196_vm6, %vm16297_vm7  ;;  %v5665_v12 = vadd.f32 %v5548_v21, %v16327_v27 }
 0x5c8   :  { %v6571_v22 = vadd.f32 %v6570_v18, %v13708_v2  ;;  %v5135_v39 = vpack.c.bf16 %v4993_v10, %v5091_v17  ;;  %v13838_v2 = vld [vmem:[%s14458_s4 + $0x1] ss:$0 sm:$0xff]  ;;  %v6119_v28 = vsel %vm16322_vm9, %v6019_v42, 0.0  ;;  %vm16328_vm7 = vmmov %vm16312_vm13  ;;  %vm16331_vm15 = vnez %v16330_v3  ;;  %v16332_v17 = vld [vmem:[#allocation196_spill] sm:$0xff] }
 0x5c9   :  { %v13832_v34 = vpop.f32.mrf.mxu0  ;;  %v6163_v20 = vpack.c.bf16 %v6119_v28, %v6020_v32  ;;  %v4991_v46 = vsel %vm16328_vm7, %v4965_v60, %v4966_v54  ;;  %vm16329_vm12 = vmmov %vm16328_vm7  ;;  %v16340_v32 = vpack.c.bf16 %v12425_v26, %v16339_v4  ;;  %v16344_v28 = vld [vmem:[#allocation211_spill] sm:$0xff]  ;;  %v16364_v3 = vpack.c.bf16 %v12483_v19, %v12487_v41  ;;  %v16368_v41 = vld [vmem:[#allocation38_spill] sm:$0xff] }
 0x5ca   :  { %v6691_v53 = vadd.f32 %v6571_v22, %v5663_v51  ;;  %v4992_v14 = vsel %vm16329_vm12, %v4964_v47, %v4965_v60  ;;  %v8180_v22 = vld [vmem:[%s14456_s0 + $0x1a0] sm:$0xff]  ;;  %vm16334_vm13 = vmmov %vm16325_vm0 }
 0x5cb   :  { %v13851_v38 = vpop.f32.mrf.mxu2  ;;  %v5093_v63 = vsel %vm16331_vm15, %v4992_v14, 0.0  ;;  %v5994_v10 = vrot.slane %v8180_v22, 1  ;;  %vm7518_vm14 = vmpackc.low %vm16305_vm8, %vm8196_vm6  ;;  %v4967_v48 = vrot.slane %v8180_v22, 7  ;;  %v8182_v22 = vld [vmem:[%s14456_s0 + $0x1b0] sm:$0xff] }
 0x5cc   :  { %v5549_v45 = vpop.f32.mrf.mxu1  ;;  %v6757_v7 = vadd.f32 %v13838_v2, %v6691_v53  ;;  %7221 = vmatmul.msk.bf16.gmra.mxu0 %vm16318_vm10, %v5135_v39  ;;  %v5136_v18 = vpack.c.bf16 %v4991_v46, %v5093_v63  ;;  %v16333_v53 = vld [vmem:[#allocation84_spill] sm:$0xff]  ;;  %v5993_v39 = vrot.slane %v8179_v37, 1  ;;  %vm16336_vm10 = vmmov %vm16319_vm5  ;;  %v16351_v63 = vld [vmem:[#allocation198_spill] sm:$0xff] }
 0x5cd   :  { %v4588_v47 = vadd.f32 %v16333_v53, %v16332_v17 }
 0x5ce   :  { %6821 = vst.msk [vmem:[%s14461_s5 + $0xd0] sm:$0xff] %vm16317_vm1, %v6757_v7  ;;  %vm16335_vm1 = vmmov %vm16324_vm4 }
 0x5cf   :  { %v6572_v57 = vpop.f32.mrf.mxu3  ;;  %vm16341_vm8 = vmmov %vm16335_vm1 }
 0x5d0   :  { %v6573_v0 = vadd.f32 %v6572_v57, %v13732_v56  ;;  %7409 = vmatmul.msk.bf16.gmra.mxu2 %vm16324_vm4, %v6163_v20  ;;  %vm16342_vm4 = vmmov %vm16325_vm0 }
 0x5d1   :  { %v13866_v56 = vpop.f32.mrf.mxu0  ;;  %vm16353_vm12 = vmmov %vm16342_vm4 }
 0x5d2   :  { %v6692_v36 = vadd.f32 %v6573_v0, %v5664_v9 }
 0x5d3   :  { %v13884_v13 = vpop.f32.mrf.mxu2 }
 0x5d4   :  { %v5552_v44 = vpop.f32.mrf.mxu1  ;;  %v6758_v6 = vadd.f32 %v13838_v2, %v6692_v36  ;;  %7517 = vmatmul.msk.bf16.gmra.mxu3 %vm7515_vm11, %v16323_v33  ;;  %vm16338_vm11 = vnez %v16337_v29  ;;  %v16345_v36 = vpack.c.bf16 %v16343_v25, %v16344_v28 }
 0x5d5   :  { %v5553_v42 = vadd.f32 %v5552_v44, %v13775_v55  ;;  %v8181_v55 = vld [vmem:[%s14456_s0 + $0x1a8] sm:$0xff] }
 0x5d6   :  { %6822 = vst.msk [vmem:[%s14461_s5 + $0xd8] sm:$0xff] %vm16325_vm0, %v6758_v6  ;;  %v4968_v20 = vrot.slane %v8181_v55, 7  ;;  %v16347_v6 = vld [vmem:[#allocation48_spill] sm:$0xff] }
 0x5d7   :  { %7332 = vmatmul.msk.bf16.gmra.mxu1 %vm7330_vm3, %v16326_v16  ;;  %v6575_v40 = vpop.f32.mrf.mxu3  ;;  %vm7333_vm3 = vmpackc.low %vm8196_vm6, %vm16314_vm2  ;;  %vm16348_vm0 = vnez %v16347_v6  ;;  %v16349_v16 = vld [vmem:[#allocation197_spill] sm:$0xff]  ;;  %v16381_v6 = vld [vmem:[#allocation215_spill] sm:$0xff] }
 0x5d8   :  { %v6576_v23 = vadd.f32 %v6575_v40, %v13765_v50  ;;  %v5550_v50 = vadd.f32 %v5549_v45, %v13747_v1  ;;  %v6017_v1 = vsel %vm16336_vm10, %v5993_v39, %v5994_v10  ;;  %v6018_v45 = vsel %vm16319_vm5, %v5992_v59, %v5993_v39  ;;  %vm16346_vm2 = vmmov %vm16328_vm7  ;;  %v16357_v39 = vld [vmem:[#allocation25_spill] sm:$0xff] }
 0x5d9   :  { %v13894_v51 = vpop.f32.mrf.mxu0  ;;  %v6121_v35 = vsel %vm16338_vm11, %v6017_v1, 0.0  ;;  %v4990_v26 = vsel %vm16346_vm2, %v4966_v54, %v4967_v48  ;;  %v5667_v60 = vadd.f32 %v5553_v42, %v16349_v16  ;;  %vm16350_vm7 = vmmov %vm16346_vm2 }
 0x5da   :  { %v6693_v61 = vadd.f32 %v6576_v23, %v5665_v12  ;;  %v5666_v31 = vadd.f32 %v5550_v50, %v4588_v47  ;;  %v6164_v9 = vpack.c.bf16 %v6121_v35, %v6018_v45  ;;  %v5095_v33 = vsel %vm16348_vm0, %v4990_v26, 0.0  ;;  %v16359_v35 = vld [vmem:[#allocation218_spill] sm:$0xff] }
 0x5db   :  { %v13908_v7 = vpop.f32.mrf.mxu2  ;;  %v4989_v40 = vsel %vm16350_vm7, %v4967_v48, %v4968_v20  ;;  %v5996_v50 = vrot.slane %v8182_v22, 1  ;;  %v16360_v48 = vld [vmem:[#allocation212_spill] sm:$0xff] }
 0x5dc   :  { %v5554_v58 = vpop.f32.mrf.mxu1  ;;  %v6759_v43 = vadd.f32 %v13838_v2, %v6693_v61  ;;  %7222 = vmatmul.msk.bf16.gmra.mxu0 %vm16335_vm1, %v5136_v18  ;;  %v5137_v12 = vpack.c.bf16 %v4989_v40, %v5095_v33  ;;  %v16352_v61 = vld [vmem:[#allocation199_spill] sm:$0xff]  ;;  %v16361_v30 = vpack.c.bf16 %v16359_v35, %v16360_v48  ;;  %v8184_v40 = vld [vmem:[%s14456_s0 + $0x1c0] sm:$0xff] }
 0x5dd   :  { %v5555_v54 = vadd.f32 %v5554_v58, %v13804_v49  ;;  %v4593_v18 = vadd.f32 %v16352_v61, %v16351_v63  ;;  %v16375_v61 = vld [vmem:[#allocation45_spill] sm:$0xff] }
 0x5de   :  { %6823 = vst.msk [vmem:[%s14461_s5 + $0xe0] sm:$0xff] %vm16334_vm13, %v6759_v43  ;;  %vm16354_vm13 = vmmov %vm16335_vm1 }
 0x5df   :  { %v6577_v52 = vpop.f32.mrf.mxu3  ;;  %v5668_v58 = vadd.f32 %v5555_v54, %v4593_v18  ;;  %vm16355_vm1 = vmmov %vm16319_vm5 }
 0x5e0   :  { %v6578_v8 = vadd.f32 %v6577_v52, %v13789_v62  ;;  %7410 = vmatmul.msk.bf16.gmra.mxu2 %vm16341_vm8, %v6164_v9  ;;  %vm16356_vm10 = vmmov %vm16355_vm1 }
 0x5e1   :  { %v13923_v62 = vpop.f32.mrf.mxu0  ;;  %vm7521_vm5 = vmpackc.low %vm16322_vm9, %vm8196_vm6 }
 0x5e2   :  { %v6694_v57 = vadd.f32 %v6578_v8, %v5666_v31  ;;  %vm16362_vm9 = vmmov %vm16341_vm8 }
 0x5e3   :  { %v13943_v21 = vpop.f32.mrf.mxu2  ;;  %vm16363_vm8 = vmmov %vm16342_vm4 }
 0x5e4   :  { %v5557_v0 = vpop.f32.mrf.mxu1  ;;  %v6760_v59 = vadd.f32 %v13838_v2, %v6694_v57  ;;  %7520 = vmatmul.msk.bf16.gmra.mxu3 %vm7518_vm14, %v16340_v32  ;;  %vm16358_vm14 = vnez %v16357_v39  ;;  %v4969_v57 = vrot.slane %v8182_v22, 7  ;;  %vm16372_vm7 = vmmov %vm16363_vm8 }
 0x5e5   :  { %v5558_v45 = vadd.f32 %v5557_v0, %v13832_v34  ;;  %v8183_v34 = vld [vmem:[%s14456_s0 + $0x1b8] sm:$0xff] }
 0x5e6   :  { %6824 = vst.msk [vmem:[%s14461_s5 + $0xe8] sm:$0xff] %vm16342_vm4, %v6760_v59  ;;  %v4970_v9 = vrot.slane %v8183_v34, 7  ;;  %v16365_v59 = vld [vmem:[#allocation200_spill] sm:$0xff]  ;;  %vm16367_vm4 = vmmov %vm16346_vm2 }
 0x5e7   :  { %7335 = vmatmul.msk.bf16.gmra.mxu1 %vm7333_vm3, %v16345_v36  ;;  %v6580_v44 = vpop.f32.mrf.mxu3  ;;  %vm7336_vm3 = vmpackc.low %vm8196_vm6, %vm16331_vm15  ;;  %v5669_v4 = vadd.f32 %v5558_v45, %v16365_v59  ;;  %v4988_v19 = vsel %vm16367_vm4, %v4968_v20, %v4969_v57  ;;  %v5997_v20 = vrot.slane %v8183_v34, 1 }
 0x5e8   :  { %v6581_v37 = vadd.f32 %v6580_v44, %v13822_v24  ;;  %v5995_v24 = vrot.slane %v8181_v55, 1  ;;  %vm16366_vm15 = vmmov %vm16346_vm2  ;;  %vm16369_vm2 = vnez %v16368_v41  ;;  %v16402_v41 = vld [vmem:[#allocation227_spill] sm:$0xff] }
 0x5e9   :  { %v13951_v46 = vpop.f32.mrf.mxu0  ;;  %v4987_v25 = vsel %vm16366_vm15, %v4969_v57, %v4970_v9  ;;  %v5097_v28 = vsel %vm16369_vm2, %v4988_v19, 0.0  ;;  %v6014_v63 = vsel %vm16355_vm1, %v5996_v50, %v5997_v20 }
 0x5ea   :  { %v6695_v27 = vadd.f32 %v6581_v37, %v5667_v60  ;;  %v6015_v53 = vsel %vm16355_vm1, %v5995_v24, %v5996_v50  ;;  %v6016_v47 = vsel %vm16356_vm10, %v5994_v10, %v5995_v24  ;;  %v5138_v55 = vpack.c.bf16 %v4987_v25, %v5097_v28  ;;  %v16370_v60 = vld [vmem:[#allocation201_spill] sm:$0xff]  ;;  %vm7524_vm10 = vmpackc.low %vm16338_vm11, %vm8196_vm6  ;;  %v8186_v28 = vld [vmem:[%s14456_s0 + $0x1d0] sm:$0xff] }
 0x5eb   :  { %v13965_v49 = vpop.f32.mrf.mxu2  ;;  %v6123_v52 = vsel %vm16358_vm14, %v6015_v53, 0.0  ;;  %vm16379_vm11 = vmmov %vm16362_vm9  ;;  %v16382_v53 = vld [vmem:[#allocation220_spill] sm:$0xff]  ;;  %v16389_v25 = vld [vmem:[#allocation205_spill] sm:$0xff] }
 0x5ec   :  { %v5559_v23 = vpop.f32.mrf.mxu1  ;;  %v6761_v14 = vadd.f32 %v13838_v2, %v6695_v27  ;;  %7223 = vmatmul.msk.bf16.gmra.mxu0 %vm16354_vm13, %v5137_v12  ;;  %v6165_v8 = vpack.c.bf16 %v6123_v52, %v6016_v47  ;;  %v5998_v27 = vrot.slane %v8184_v40, 1  ;;  %vm16374_vm13 = vmmov %vm16355_vm1  ;;  %v16383_v47 = vpack.c.bf16 %v16381_v6, %v16382_v53 }
 0x5ed   :  { %v5560_v33 = vadd.f32 %v5559_v23, %v13866_v56  ;;  %v4971_v52 = vrot.slane %v8184_v40, 7 }
 0x5ee   :  { %6825 = vst.msk [vmem:[%s14461_s5 + $0xf0] sm:$0xff] %vm16353_vm12, %v6761_v14  ;;  %vm16373_vm12 = vmmov %vm16362_vm9  ;;  %v6013_v14 = vsel %vm16374_vm13, %v5997_v20, %v5998_v27 }
 0x5ef   :  { %v6582_v43 = vpop.f32.mrf.mxu3  ;;  %vm16394_vm13 = vmmov %vm16355_vm1 }
 0x5f0   :  { %v6583_v17 = vadd.f32 %v6582_v43, %v13851_v38  ;;  %7411 = vmatmul.msk.bf16.gmra.mxu2 %vm16362_vm9, %v6165_v8  ;;  %vm16380_vm9 = vmmov %vm16372_vm7 }
 0x5f1   :  { %v13980_v38 = vpop.f32.mrf.mxu0 }
 0x5f2   :  { %v6696_v31 = vadd.f32 %v6583_v17, %v5668_v58  ;;  %v16377_v17 = vld [vmem:[#allocation219_spill] sm:$0xff] }
 0x5f3   :  { %v13998_v42 = vpop.f32.mrf.mxu2  ;;  %v16378_v29 = vpack.c.bf16 %v12491_v15, %v16377_v17 }
 0x5f4   :  { %v5562_v1 = vpop.f32.mrf.mxu1  ;;  %v6762_v10 = vadd.f32 %v13838_v2, %v6696_v31  ;;  %7523 = vmatmul.msk.bf16.gmra.mxu3 %vm7521_vm5, %v16361_v30  ;;  %vm16376_vm5 = vnez %v16375_v61  ;;  %v16387_v30 = vld [vmem:[#allocation10_spill] sm:$0xff] }
 0x5f5   :  { %v6125_v18 = vsel %vm16376_vm5, %v6013_v14, 0.0  ;;  %v5563_v58 = vadd.f32 %v5562_v1, %v13894_v51  ;;  %v8185_v51 = vld [vmem:[%s14456_s0 + $0x1c8] sm:$0xff]  ;;  %v16384_v1 = vld [vmem:[#allocation204_spill] sm:$0xff]  ;;  %vm16388_vm15 = vnez %v16387_v30 }
 0x5f6   :  { %6826 = vst.msk [vmem:[%s14461_s5 + $0xf8] sm:$0xff] %vm16363_vm8, %v6762_v10  ;;  %v6166_v22 = vpack.c.bf16 %v6125_v18, %v6014_v63  ;;  %v4972_v31 = vrot.slane %v8185_v51, 7  ;;  %v16398_v14 = vld [vmem:[#allocation216_spill] sm:$0xff]  ;;  %v16422_v30 = vld [vmem:[#allocation103_spill] sm:$0xff] }
 0x5f7   :  { %7338 = vmatmul.msk.bf16.gmra.mxu1 %vm7336_vm3, %v16364_v3  ;;  %v6585_v0 = vpop.f32.mrf.mxu3  ;;  %vm7339_vm3 = vmpackc.low %vm8196_vm6, %vm16348_vm0  ;;  %v5671_v45 = vadd.f32 %v5563_v58, %v16384_v1  ;;  %v16403_v63 = vld [vmem:[#allocation228_spill] sm:$0xff] }
 0x5f8   :  { %v6586_v32 = vadd.f32 %v6585_v0, %v13884_v13  ;;  %v16371_v13 = vld [vmem:[#allocation203_spill] sm:$0xff]  ;;  %vm16385_vm0 = vmmov %vm16367_vm4  ;;  %v16404_v18 = vpack.c.bf16 %v16402_v41, %v16403_v63  ;;  %v16428_v41 = vld [vmem:[#allocation24_spill] sm:$0xff] }
 0x5f9   :  { %v14008_v44 = vpop.f32.mrf.mxu0  ;;  %v4598_v37 = vadd.f32 %v16371_v13, %v16370_v60  ;;  %v4985_v35 = vsel %vm16385_vm0, %v4971_v52, %v4972_v31  ;;  %vm16386_vm8 = vmmov %vm16385_vm0  ;;  %v16395_v13 = vld [vmem:[#allocation9_spill] sm:$0xff] }
 0x5fa   :  { %v6697_v36 = vadd.f32 %v6586_v32, %v5669_v4  ;;  %v4986_v48 = vsel %vm16386_vm8, %v4970_v9, %v4971_v52  ;;  %vm16391_vm4 = vmmov %vm16372_vm7  ;;  %v5999_v9 = vrot.slane %v8185_v51, 1 }
 0x5fb   :  { %v14022_v56 = vpop.f32.mrf.mxu2  ;;  %v5670_v23 = vadd.f32 %v5560_v33, %v4598_v37  ;;  %v5099_v3 = vsel %vm16388_vm15, %v4986_v48, 0.0  ;;  %v16410_v48 = vld [vmem:[#allocation208_spill] sm:$0xff]  ;;  %vm16412_vm8 = vmmov %vm16391_vm4 }
 0x5fc   :  { %v5564_v26 = vpop.f32.mrf.mxu1  ;;  %v6763_v16 = vadd.f32 %v13838_v2, %v6697_v36  ;;  %7224 = vmatmul.msk.bf16.gmra.mxu0 %vm16373_vm12, %v5138_v55  ;;  %v5139_v34 = vpack.c.bf16 %v4985_v35, %v5099_v3  ;;  %v6000_v36 = vrot.slane %v8186_v28, 1  ;;  %vm16393_vm12 = vmmov %vm16355_vm1  ;;  %v6012_v60 = vsel %vm16394_vm13, %v5998_v27, %v5999_v9 }
 0x5fd   :  { %v5565_v4 = vadd.f32 %v5564_v26, %v13923_v62  ;;  %vm7527_vm1 = vmpackc.low %vm16358_vm14, %vm8196_vm6 }
 0x5fe   :  { %6827 = vst.msk [vmem:[%s14461_s5 + $0x100] sm:$0xff] %vm16372_vm7, %v6763_v16  ;;  %vm16392_vm7 = vmmov %vm16379_vm11  ;;  %v6011_v16 = vsel %vm16393_vm12, %v5999_v9, %v6000_v36 }
 0x5ff   :  { %v6587_v12 = vpop.f32.mrf.mxu3  ;;  %vm16400_vm14 = vmmov %vm16392_vm7 }
 0x600   :  { %v6588_v54 = vadd.f32 %v6587_v12, %v13908_v7  ;;  %7412 = vmatmul.msk.bf16.gmra.mxu2 %vm16379_vm11, %v6166_v22  ;;  %vm16401_vm11 = vmmov %vm16391_vm4 }
 0x601   :  { %v14037_v7 = vpop.f32.mrf.mxu0  ;;  %vm7530_vm13 = vmpackc.low %vm16376_vm5, %vm8196_vm6 }
 0x602   :  { %v6698_v24 = vadd.f32 %v6588_v54, %v5670_v23  ;;  %v16397_v54 = vld [vmem:[#allocation226_spill] sm:$0xff] }
 0x603   :  { %v14055_v15 = vpop.f32.mrf.mxu2  ;;  %v16399_v39 = vpack.c.bf16 %v16397_v54, %v16398_v14 }
 0x604   :  { %v5567_v43 = vpop.f32.mrf.mxu1  ;;  %v6764_v50 = vadd.f32 %v13838_v2, %v6698_v24  ;;  %7526 = vmatmul.msk.bf16.gmra.mxu3 %vm7524_vm10, %v16378_v29  ;;  %vm16396_vm10 = vnez %v16395_v13  ;;  %v4973_v24 = vrot.slane %v8186_v28, 7 }
 0x605   :  { %v6127_v37 = vsel %vm16396_vm10, %v6011_v16, 0.0  ;;  %v5568_v23 = vadd.f32 %v5567_v43, %v13951_v46  ;;  %v8187_v46 = vld [vmem:[%s14456_s0 + $0x1d8] sm:$0xff] }
 0x606   :  { %6828 = vst.msk [vmem:[%s14461_s5 + $0x108] sm:$0xff] %vm16380_vm9, %v6764_v50  ;;  %v6167_v40 = vpack.c.bf16 %v6127_v37, %v6012_v60  ;;  %v4974_v22 = vrot.slane %v8187_v46, 7  ;;  %v16405_v50 = vld [vmem:[#allocation207_spill] sm:$0xff]  ;;  %vm16407_vm9 = vmmov %vm16385_vm0  ;;  %v16418_v16 = vld [vmem:[#allocation229_spill] sm:$0xff] }
 0x607   :  { %7341 = vmatmul.msk.bf16.gmra.mxu1 %vm7339_vm3, %v16383_v47  ;;  %v6590_v8 = vpop.f32.mrf.mxu3  ;;  %vm7342_vm3 = vmpackc.low %vm8196_vm6, %vm16369_vm2  ;;  %v5673_v17 = vadd.f32 %v5568_v23, %v16405_v50  ;;  %v4984_v53 = vsel %vm16407_vm9, %v4972_v31, %v4973_v24  ;;  %v16408_v47 = vld [vmem:[#allocation17_spill] sm:$0xff]  ;;  %v6001_v31 = vrot.slane %v8187_v46, 1  ;;  %v16419_v61 = vpack.c.bf16 %v12637_v5, %v16418_v16  ;;  %v16423_v60 = vld [vmem:[#allocation104_spill] sm:$0xff] }
 0x608   :  { %v6591_v10 = vadd.f32 %v6590_v8, %v13943_v21  ;;  %v16390_v21 = vld [vmem:[#allocation206_spill] sm:$0xff]  ;;  %vm16406_vm2 = vmmov %vm16385_vm0  ;;  %vm16409_vm0 = vnez %v16408_v47  ;;  %v16424_v37 = vpack.c.bf16 %v16422_v30, %v16423_v60  ;;  %v16425_v23 = vld [vmem:[#allocation213_spill] sm:$0xff] }
 0x609   :  { %v14065_v59 = vpop.f32.mrf.mxu0  ;;  %v4603_v19 = vadd.f32 %v16390_v21, %v16389_v25  ;;  %v4983_v6 = vsel %vm16406_vm2, %v4973_v24, %v4974_v22  ;;  %v5101_v52 = vsel %vm16409_vm0, %v4984_v53, 0.0  ;;  %vm16432_vm9 = vmmov %vm16412_vm8  ;;  %v8190_v53 = vld [vmem:[%s14456_s0 + $0x1f0] sm:$0xff]  ;;  %v16451_v60 = vld [vmem:[#allocation30_spill] sm:$0xff] }
 0x60a   :  { %v6699_v57 = vadd.f32 %v6591_v10, %v5671_v45  ;;  %v5140_v8 = vpack.c.bf16 %v4983_v6, %v5101_v52  ;;  %v6004_v52 = vrot.slane %v8190_v53, 1  ;;  %v16443_v47 = vld [vmem:[#allocation28_spill] sm:$0xff] }
 0x60b   :  { %v14079_v62 = vpop.f32.mrf.mxu2  ;;  %v5672_v26 = vadd.f32 %v5565_v4, %v4603_v19  ;;  %v16416_v19 = vld [vmem:[#allocation156_spill] sm:$0xff] }
 0x60c   :  { %v5569_v0 = vpop.f32.mrf.mxu1  ;;  %v6765_v32 = vadd.f32 %v13838_v2, %v6699_v57  ;;  %7225 = vmatmul.msk.bf16.gmra.mxu0 %vm16392_vm7, %v5139_v34  ;;  %v8188_v57 = vld [vmem:[%s14456_s0 + $0x1e0] sm:$0xff] }
 0x60d   :  { %v5570_v10 = vadd.f32 %v5569_v0, %v13980_v38  ;;  %v6002_v34 = vrot.slane %v8188_v57, 1 }
 0x60e   :  { %6829 = vst.msk [vmem:[%s14461_s5 + $0x110] sm:$0xff] %vm16391_vm4, %v6765_v32  ;;  %vm16413_vm4 = vmmov %vm16392_vm7 }
 0x60f   :  { %v6592_v55 = vpop.f32.mrf.mxu3  ;;  %vm16414_vm7 = vmmov %vm16393_vm12 }
 0x610   :  { %v6593_v33 = vadd.f32 %v6592_v55, %v13965_v49  ;;  %7413 = vmatmul.msk.bf16.gmra.mxu2 %vm16400_vm14, %v6167_v40  ;;  %v6009_v25 = vsel %vm16414_vm7, %v6001_v31, %v6002_v34  ;;  %vm16415_vm12 = vmmov %vm16414_vm7 }
 0x611   :  { %v14094_v49 = vpop.f32.mrf.mxu0  ;;  %v6010_v21 = vsel %vm16415_vm12, %v6000_v36, %v6001_v31  ;;  %vm16420_vm5 = vmmov %vm16413_vm4 }
 0x612   :  { %v6700_v20 = vadd.f32 %v6593_v33, %v5672_v26  ;;  %vm16421_vm14 = vmmov %vm16412_vm8 }
 0x613   :  { %v14112_v58 = vpop.f32.mrf.mxu2  ;;  %vm7533_vm12 = vmpackc.low %vm16396_vm10, %vm8196_vm6 }
 0x614   :  { %v5572_v12 = vpop.f32.mrf.mxu1  ;;  %v6766_v27 = vadd.f32 %v13838_v2, %v6700_v20  ;;  %7529 = vmatmul.msk.bf16.gmra.mxu3 %vm7527_vm1, %v16399_v39  ;;  %vm16417_vm1 = vnez %v16416_v19  ;;  %v4975_v20 = vrot.slane %v8188_v57, 7  ;;  %vm16441_vm10 = vmmov %vm16420_vm5  ;;  %v16467_v19 = vld [vmem:[#allocation125_spill] sm:$0xff] }
 0x615   :  { %v6129_v9 = vsel %vm16417_vm1, %v6009_v25, 0.0  ;;  %v5573_v33 = vadd.f32 %v5572_v12, %v14008_v44  ;;  %v8189_v44 = vld [vmem:[%s14456_s0 + $0x1e8] sm:$0xff] }
 0x616   :  { %6830 = vst.msk [vmem:[%s14461_s5 + $0x118] sm:$0xff] %vm16401_vm11, %v6766_v27  ;;  %v6168_v55 = vpack.c.bf16 %v6129_v9, %v6010_v21  ;;  %v4976_v40 = vrot.slane %v8189_v44, 7  ;;  %vm16427_vm11 = vmmov %vm16406_vm2  ;;  %v16444_v25 = vld [vmem:[#allocation235_spill] sm:$0xff] }
 0x617   :  { %7344 = vmatmul.msk.bf16.gmra.mxu1 %vm7342_vm3, %v16404_v18  ;;  %v6595_v43 = vpop.f32.mrf.mxu3  ;;  %vm7345_vm3 = vmpackc.low %vm8196_vm6, %vm16388_vm15  ;;  %v5675_v27 = vadd.f32 %v5573_v33, %v16425_v23  ;;  %v4982_v39 = vsel %vm16427_vm11, %v4974_v22, %v4975_v20  ;;  %v6003_v22 = vrot.slane %v8189_v44, 1  ;;  %v16445_v21 = vpack.c.bf16 %v16443_v47, %v16444_v25  ;;  %v16471_v47 = vld [vmem:[#allocation128_spill] sm:$0xff]  ;;  %v16472_v25 = vld [vmem:[#allocation225_spill] sm:$0xff] }
 0x618   :  { %v6596_v29 = vadd.f32 %v6595_v43, %v13998_v42  ;;  %v16411_v42 = vld [vmem:[#allocation209_spill] sm:$0xff]  ;;  %vm16426_vm15 = vmmov %vm16406_vm2  ;;  %vm16429_vm2 = vnez %v16428_v41 }
 0x619   :  { %v14122_v45 = vpop.f32.mrf.mxu0  ;;  %v4608_v3 = vadd.f32 %v16411_v42, %v16410_v48  ;;  %v4981_v14 = vsel %vm16426_vm15, %v4975_v20, %v4976_v40  ;;  %v5103_v63 = vsel %vm16429_vm2, %v4982_v39, 0.0  ;;  %v16436_v48 = vld [vmem:[#allocation21_spill] sm:$0xff]  ;;  %vm16452_vm15 = vnez %v16451_v60 }
 0x61a   :  { %v6701_v51 = vadd.f32 %v6596_v29, %v5673_v17  ;;  %v5141_v24 = vpack.c.bf16 %v4981_v14, %v5103_v63  ;;  %v16430_v29 = vld [vmem:[#allocation214_spill] sm:$0xff]  ;;  %v16481_v60 = vld [vmem:[#allocation237_spill] sm:$0xff] }
 0x61b   :  { %v14136_v38 = vpop.f32.mrf.mxu2  ;;  %v5674_v0 = vadd.f32 %v5570_v10, %v4608_v3 }
 0x61c   :  { %v5574_v1 = vpop.f32.mrf.mxu1  ;;  %v6767_v35 = vadd.f32 %v13838_v2, %v6701_v51  ;;  %7226 = vmatmul.msk.bf16.gmra.mxu0 %vm16413_vm4, %v5140_v8 }
 0x61d   :  { %v5575_v50 = vadd.f32 %v5574_v1, %v14037_v7 }
 0x61e   :  { %6831 = vst.msk [vmem:[%s14461_s5 + $0x120] sm:$0xff] %vm16412_vm8, %v6767_v35  ;;  %vm16433_vm8 = vmmov %vm16413_vm4 }
 0x61f   :  { %v6597_v4 = vpop.f32.mrf.mxu3  ;;  %vm16434_vm4 = vmmov %vm16414_vm7 }
 0x620   :  { %v6598_v32 = vadd.f32 %v6597_v4, %v14022_v56  ;;  %7414 = vmatmul.msk.bf16.gmra.mxu2 %vm16420_vm5, %v6168_v55  ;;  %v6007_v10 = vsel %vm16434_vm4, %v6003_v22, %v6004_v52  ;;  %vm16435_vm7 = vmmov %vm16434_vm4  ;;  %v16446_v55 = vld [vmem:[#allocation221_spill] sm:$0xff] }
 0x621   :  { %v14151_v56 = vpop.f32.mrf.mxu0  ;;  %v6008_v35 = vsel %vm16435_vm7, %v6002_v34, %v6003_v22  ;;  %v16439_v34 = vld [vmem:[#allocation234_spill] sm:$0xff]  ;;  %vm16442_vm5 = vmmov %vm16432_vm9 }
 0x622   :  { %v6702_v28 = vadd.f32 %v6598_v32, %v5674_v0  ;;  %v16438_v0 = vld [vmem:[#allocation232_spill] sm:$0xff]  ;;  %vm7536_vm7 = vmpackc.low %vm16417_vm1, %vm8196_vm6 }
 0x623   :  { %v14169_v5 = vpop.f32.mrf.mxu2  ;;  %v16440_v32 = vpack.c.bf16 %v16438_v0, %v16439_v34  ;;  %vm16466_vm1 = vmmov %vm16442_vm5 }
 0x624   :  { %v5577_v26 = vpop.f32.mrf.mxu1  ;;  %v6768_v36 = vadd.f32 %v13838_v2, %v6702_v28  ;;  %7532 = vmatmul.msk.bf16.gmra.mxu3 %vm7530_vm13, %v16419_v61  ;;  %vm16437_vm13 = vnez %v16436_v48  ;;  %v16480_v48 = vld [vmem:[#allocation130_spill] sm:$0xff] }
 0x625   :  { %v6131_v42 = vsel %vm16437_vm13, %v6007_v10, 0.0 }
 0x626   :  { %6832 = vst.msk [vmem:[%s14461_s5 + $0x128] sm:$0xff] %vm16421_vm14, %v6768_v36  ;;  %v6169_v31 = vpack.c.bf16 %v6131_v42, %v6008_v35  ;;  %v16447_v36 = vld [vmem:[#allocation194_spill] sm:$0xff]  ;;  %v16468_v35 = vld [vmem:[#allocation40_spill] sm:$0xff] }
 0x627   :  { %7347 = vmatmul.msk.bf16.gmra.mxu1 %vm7345_vm3, %v16424_v37  ;;  %v6600_v12 = vpop.f32.mrf.mxu3  ;;  %vm7348_vm3 = vmpackc.low %vm8196_vm6, %vm16409_vm0  ;;  %v16448_v16 = vrot.slane %v16447_v36, 7  ;;  %v16469_v41 = vpack.c.bf16 %v16467_v19, %v16468_v35 }
 0x628   :  { %v6601_v54 = vadd.f32 %v6600_v12, %v14055_v15  ;;  %v16431_v15 = vld [vmem:[#allocation217_spill] sm:$0xff]  ;;  %vm16449_vm0 = vmmov %vm16427_vm11 }
 0x629   :  { %v14179_v43 = vpop.f32.mrf.mxu0  ;;  %v4613_v6 = vadd.f32 %v16431_v15, %v16430_v29  ;;  %vm16450_vm14 = vmmov %vm16449_vm0 }
 0x62a   :  { %v6703_v18 = vadd.f32 %v6601_v54, %v5675_v27  ;;  %v16453_v54 = vld [vmem:[#allocation222_spill] sm:$0xff]  ;;  %vm16455_vm11 = vmmov %vm16442_vm5 }
 0x62b   :  { %v14193_v7 = vpop.f32.mrf.mxu2  ;;  %v5676_v8 = vadd.f32 %v5575_v50, %v4613_v6  ;;  %v16460_v6 = vld [vmem:[#allocation31_spill] sm:$0xff] }
 0x62c   :  { %v5579_v46 = vpop.f32.mrf.mxu1  ;;  %v6769_v17 = vadd.f32 %v13838_v2, %v6703_v18  ;;  %7227 = vmatmul.msk.bf16.gmra.mxu0 %vm16433_vm8, %v5141_v24 }
 0x62d   :  { %v5580_v23 = vadd.f32 %v5579_v46, %v14094_v49 }
 0x62e   :  { %6833 = vst.msk [vmem:[%s14461_s5 + $0x130] sm:$0xff] %vm16432_vm9, %v6769_v17  ;;  %vm16456_vm9 = vmmov %vm16433_vm8  ;;  %v16458_v17 = vld [vmem:[#allocation77_spill] sm:$0xff] }
 0x62f   :  { %v6602_v51 = vpop.f32.mrf.mxu3  ;;  %vm16457_vm8 = vmmov %vm16434_vm4  ;;  %v16459_v29 = vrot.slane %v16458_v17, 1 }
 0x630   :  { %v6603_v1 = vadd.f32 %v6602_v51, %v14079_v62  ;;  %v5578_v62 = vadd.f32 %v5577_v26, %v14065_v59  ;;  %7415 = vmatmul.msk.bf16.gmra.mxu2 %vm16441_vm10, %v6169_v31  ;;  %v4977_v59 = vrot.slane %v8190_v53, 7  ;;  %vm16465_vm10 = vmmov %vm16456_vm9 }
 0x631   :  { %v14213_v13 = vpop.f32.mrf.mxu0 }
 0x632   :  { %v6704_v3 = vadd.f32 %v6603_v1, %v5676_v8  ;;  %v5677_v26 = vadd.f32 %v5578_v62, %v16446_v55  ;;  %v4979_v61 = vsel %vm16449_vm0, %v4977_v59, %v16448_v16  ;;  %v4980_v30 = vsel %vm16450_vm14, %v4976_v40, %v4977_v59  ;;  %v8191_v40 = vld [vmem:[%s14456_s0 + $0x1f8] sm:$0xff]  ;;  %v16463_v1 = vld [vmem:[#allocation50_spill] sm:$0xff]  ;;  %vm7354_vm0 = vmpackc.low %vm8196_vm6, %vm16452_vm15 }
 0x633   :  { %v14223_v28 = vpop.f32.mrf.mxu2  ;;  %v5105_v37 = vsel %vm16452_vm15, %v4980_v30, 0.0  ;;  %v6005_v63 = vrot.slane %v8191_v40, 1  ;;  %v16464_v10 = vpack.c.bf16 %v16462_v11, %v16463_v1  ;;  %v16475_v30 = vld [vmem:[#allocation54_spill] sm:$0xff]  ;;  %vm16479_vm14 = vmmov %vm16466_vm1  ;;  %v16489_v11 = vld [vmem:[#allocation101_spill] sm:$0xff] }
 0x634   :  { %v5582_v57 = vpop.f32.mrf.mxu1  ;;  %v6770_v4 = vadd.f32 %v13838_v2, %v6704_v3  ;;  %7535 = vmatmul.msk.bf16.gmra.mxu3 %vm7533_vm12, %v16440_v32  ;;  %v5142_v44 = vpack.c.bf16 %v4979_v61, %v5105_v37  ;;  %vm16461_vm12 = vnez %v16460_v6  ;;  %v16474_v61 = vld [vmem:[#allocation58_spill] sm:$0xff]  ;;  %v16490_v1 = vld [vmem:[#allocation233_spill] sm:$0xff] }
 0x635   :  { %v6006_v50 = vsel %vm16457_vm8, %v6004_v52, %v6005_v63  ;;  %v6069_v15 = vsel %vm16434_vm4, %v6005_v63, %v16459_v29  ;;  %v16476_v37 = vpack.c.bf16 %v16474_v61, %v16475_v30  ;;  %vm7542_vm15 = vmpackc.low %vm16461_vm12, %vm8196_vm6 }
 0x636   :  { %6834 = vst.msk [vmem:[%s14461_s5 + $0x138] sm:$0xff] %vm16442_vm5, %v6770_v4  ;;  %v6133_v22 = vsel %vm16461_vm12, %v6069_v15, 0.0  ;;  %vm7539_vm5 = vmpackc.low %vm16437_vm13, %vm8196_vm6 }
 0x637   :  { %7350 = vmatmul.msk.bf16.gmra.mxu1 %vm7348_vm3, %v16445_v21  ;;  %v6605_v9 = vpop.f32.mrf.mxu3  ;;  %v6170_v51 = vpack.c.bf16 %v6133_v22, %v6006_v50  ;;  %vm7351_vm3 = vmpackc.low %vm8196_vm6, %vm16429_vm2  ;;  %v4623_v21 = vadd.f32 %v16472_v25, %v16471_v47 }
 0x638   :  { %v6606_v33 = vadd.f32 %v6605_v9, %v14112_v58  ;;  %v16454_v58 = vld [vmem:[#allocation223_spill] sm:$0xff]  ;;  %vm16473_vm2 = vmmov %vm16466_vm1 }
 0x639   :  { %v4618_v14 = vadd.f32 %v16454_v58, %v16453_v54  ;;  %v14243_v39 = vpop.f32.mrf.mxu0  ;;  %vm16485_vm13 = vmmov %vm16466_vm1 }
 0x63a   :  { %v6705_v20 = vadd.f32 %v6606_v33, %v5677_v26  ;;  %vm16494_vm6 = vmmov %vm16466_vm1 }
 0x63b   :  { %v6400_v18 = vpop.f32.mrf.mxu2  ;;  %v5678_v24 = vadd.f32 %v5580_v23, %v4618_v14  ;;  %vm16500_vm8 = vmmov %vm16466_vm1 }
 0x63c   :  { %v5584_v12 = vpop.f32.mrf.mxu1  ;;  %v6771_v27 = vadd.f32 %v13838_v2, %v6705_v20  ;;  %7228 = vmatmul.msk.bf16.gmra.mxu0 %vm16456_vm9, %v5142_v44  ;;  %v16478_v20 = vld [vmem:[#allocation230_spill] sm:$0xff]  ;;  %vm16497_vm9 = vmmov %vm16466_vm1 }
 0x63d   :  { %v5585_v34 = vadd.f32 %v5584_v12, %v14151_v56  ;;  %v16482_v12 = vpack.c.bf16 %v16480_v48, %v16481_v60  ;;  %vm16503_vm4 = vmmov %vm16466_vm1 }
 0x63e   :  { %6835 = vst.msk [vmem:[%s14461_s5 + $0x140] sm:$0xff] %vm16455_vm11, %v6771_v27  ;;  %vm16491_vm11 = vmmov %vm16466_vm1 }
 0x63f   :  { %v6607_v49 = vpop.f32.mrf.mxu3  ;;  %v5680_v55 = vadd.f32 %v5585_v34, %v4623_v21  ;;  %vm16509_vm12 = vmmov %vm16466_vm1 }
 0x640   :  { %v6608_v46 = vadd.f32 %v6607_v49, %v14136_v38  ;;  %v5583_v38 = vadd.f32 %v5582_v57, %v14122_v45  ;;  %7416 = vmatmul.msk.bf16.gmra.mxu2 %vm16465_vm10, %v6170_v51  ;;  %v16470_v45 = vld [vmem:[#allocation224_spill] sm:$0xff]  ;;  %vm16515_vm10 = vmmov %vm16466_vm1 }
 0x641   :  { %v5377_v62 = vpop.f32.mrf.mxu0 }
 0x642   :  { %v6706_v53 = vadd.f32 %v6608_v46, %v5678_v24  ;;  %v5679_v31 = vadd.f32 %v5583_v38, %v16470_v45  ;;  %v16483_v24 = vld [vmem:[#allocation100_spill] sm:$0xff]  ;;  %v16484_v46 = vld [vmem:[#allocation231_spill] sm:$0xff]  ;;  %v16487_v38 = vld [vmem:[#allocation238_spill] sm:$0xff] }
 0x643   :  { %v6403_v3 = vpop.f32.mrf.mxu2  ;;  %v4628_v50 = vadd.f32 %v16484_v46, %v16483_v24 }
 0x644   :  { %v5587_v8 = vpop.f32.mrf.mxu1  ;;  %v6772_v52 = vadd.f32 %v13838_v2, %v6706_v53  ;;  %7538 = vmatmul.msk.bf16.gmra.mxu3 %vm7536_vm7, %v16464_v10  ;;  %v4631_v10 = vadd.f32 %v16490_v1, %v16489_v11  ;;  %vm16506_vm7 = vmmov %vm16466_vm1 }
 0x645   :  { %v5588_v36 = vadd.f32 %v5587_v8, %v14179_v43  ;;  %v16486_v8 = vld [vmem:[#allocation127_spill] sm:$0xff] }
 0x646   :  { %6836 = vst.msk [vmem:[%s14461_s5 + $0x148] sm:$0xff] %vm16466_vm1, %v6772_v52  ;;  %v16488_v52 = vpack.c.bf16 %v16486_v8, %v16487_v38 }
 0x647   :  { %7353 = vmatmul.msk.bf16.gmra.mxu1 %vm7351_vm3, %v16469_v41  ;;  %v6610_v42 = vpop.f32.mrf.mxu3  ;;  %vm16512_vm3 = vmmov %vm16466_vm1 }
 0x648   :  { %v6611_v57 = vadd.f32 %v6610_v42, %v14169_v5 }
 0x649   :  { %v5380_v26 = vpop.f32.mrf.mxu0 }
 0x64a   :  { %v6707_v4 = vadd.f32 %v6611_v57, %v5679_v31  ;;  %v16492_v57 = vld [vmem:[#allocation102_spill] sm:$0xff] }
 0x64b   :  { %v6405_v9 = vpop.f32.mrf.mxu2 }
 0x64c   :  { %v5589_v0 = vpop.f32.mrf.mxu1  ;;  %v6773_v32 = vadd.f32 %v13838_v2, %v6707_v4  ;;  %v16493_v4 = vld [vmem:[#allocation33_spill] sm:$0xff] }
 0x64d   :  { %v5590_v40 = vadd.f32 %v5589_v0, %v14213_v13  ;;  %v4633_v0 = vadd.f32 %v16493_v4, %v16492_v57 }
 0x64e   :  { %6837 = vst.msk [vmem:[%s14461_s5 + $0x150] sm:$0xff] %vm16473_vm2, %v6773_v32  ;;  %vm16520_vm2 = vmmov %vm16466_vm1 }
 0x64f   :  { %v6612_v59 = vpop.f32.mrf.mxu3  ;;  %v5682_v29 = vadd.f32 %v5590_v40, %v4628_v50 }
 0x650   :  { %v6613_v5 = vadd.f32 %v6612_v59, %v14193_v7  ;;  %v16477_v7 = vld [vmem:[#allocation99_spill] sm:$0xff] }
 0x651   :  { %v4626_v44 = vadd.f32 %v16478_v20, %v16477_v7  ;;  %v5382_v49 = vpop.f32.mrf.mxu0  ;;  %v16498_v20 = vld [vmem:[#allocation107_spill] sm:$0xff] }
 0x652   :  { %v6708_v56 = vadd.f32 %v6613_v5, %v5680_v55  ;;  %v16495_v55 = vld [vmem:[#allocation106_spill] sm:$0xff]  ;;  %v16496_v5 = vld [vmem:[#allocation51_spill] sm:$0xff] }
 0x653   :  { %v5681_v43 = vadd.f32 %v5588_v36, %v4626_v44  ;;  %v6408_v54 = vpop.f32.mrf.mxu2  ;;  %v16499_v44 = vld [vmem:[#allocation111_spill] sm:$0xff] }
 0x654   :  { %v5592_v33 = vpop.f32.mrf.mxu1  ;;  %v6774_v16 = vadd.f32 %v13838_v2, %v6708_v56  ;;  %7541 = vmatmul.msk.bf16.gmra.mxu3 %vm7539_vm5, %v16476_v37  ;;  %v4636_v56 = vadd.f32 %v16496_v5, %v16495_v55  ;;  %v4638_v48 = vadd.f32 %v16499_v44, %v16498_v20  ;;  %vm16523_vm5 = vmmov %vm16466_vm1 }
 0x655   :  { %v5593_v53 = vadd.f32 %v5592_v33, %v14243_v39 }
 0x656   :  { %6838 = vst.msk [vmem:[%s14461_s5 + $0x158] sm:$0xff] %vm16479_vm14, %v6774_v16 }
 0x657   :  { %7356 = vmatmul.msk.bf16.gmra.mxu1 %vm7354_vm0, %v16482_v12  ;;  %v6615_v23 = vpop.f32.mrf.mxu3  ;;  %v5683_v19 = vadd.f32 %v5593_v53, %v4631_v10  ;;  %v16504_v53 = vld [vmem:[#allocation110_spill] sm:$0xff]  ;;  %vm16526_vm0 = vmmov %vm16466_vm1 }
 0x658   :  { %v6616_v27 = vadd.f32 %v6615_v23, %v14223_v28  ;;  %vm16529_vm14 = vmmov %vm16526_vm0 }
 0x65a   :  { %v6709_v58 = vadd.f32 %v6616_v27, %v5681_v43 }
 0x65b   :  { %v6410_v22 = vpop.f32.mrf.mxu2 }
 0x65c   :  { %v5594_v14 = vpop.f32.mrf.mxu1  ;;  %v6775_v63 = vadd.f32 %v13838_v2, %v6709_v58 }
 0x65d   :  { %v5595_v42 = vadd.f32 %v5594_v14, %v5377_v62 }
 0x65e   :  { %6839 = vst.msk [vmem:[%s14461_s5 + $0x160] sm:$0xff] %vm16485_vm13, %v6775_v63  ;;  %v16501_v63 = vld [vmem:[#allocation108_spill] sm:$0xff]  ;;  %vm16532_vm13 = vmmov %vm16526_vm0 }
 0x65f   :  { %v6617_v17 = vpop.f32.mrf.mxu3  ;;  %v5684_v32 = vadd.f32 %v5595_v42, %v4633_v0 }
 0x660   :  { %v6618_v15 = vadd.f32 %v6617_v17, %v6400_v18  ;;  %v5385_v18 = vpop.f32.mrf.mxu0 }
 0x662   :  { %v6710_v28 = vadd.f32 %v6618_v15, %v5682_v29 }
 0x663   :  { %v6413_v31 = vpop.f32.mrf.mxu2 }
 0x664   :  { %v5597_v13 = vpop.f32.mrf.mxu1  ;;  %v6776_v51 = vadd.f32 %v13838_v2, %v6710_v28  ;;  %7544 = vmatmul.msk.bf16.gmra.mxu3 %vm7542_vm15, %v16488_v52  ;;  %vm16535_vm15 = vmmov %vm16526_vm0 }
 0x665   :  { %v5598_v59 = vadd.f32 %v5597_v13, %v5380_v26 }
 0x666   :  { %6840 = vst.msk [vmem:[%s14461_s5 + $0x168] sm:$0xff] %vm16491_vm11, %v6776_v51  ;;  %v16505_v51 = vld [vmem:[#allocation47_spill] sm:$0xff]  ;;  %vm16538_vm11 = vmmov %vm16526_vm0 }
 0x667   :  { %v6620_v6 = vpop.f32.mrf.mxu3  ;;  %v5685_v16 = vadd.f32 %v5598_v59, %v4636_v56  ;;  %v4643_v8 = vadd.f32 %v16505_v51, %v16504_v53 }
 0x668   :  { %v6621_v35 = vadd.f32 %v6620_v6, %v6403_v3  ;;  %v5387_v25 = vpop.f32.mrf.mxu0 }
 0x66a   :  { %v6711_v41 = vadd.f32 %v6621_v35, %v5683_v19 }
 0x66b   :  { %v6415_v36 = vpop.f32.mrf.mxu2 }
 0x66c   :  { %v5599_v39 = vpop.f32.mrf.mxu1  ;;  %v6777_v45 = vadd.f32 %v13838_v2, %v6711_v41  ;;  %v16507_v41 = vld [vmem:[#allocation116_spill] sm:$0xff] }
 0x66d   :  { %v5600_v7 = vadd.f32 %v5599_v39, %v5382_v49  ;;  %v16502_v49 = vld [vmem:[#allocation236_spill] sm:$0xff]  ;;  %v16508_v39 = vld [vmem:[#allocation239_spill] sm:$0xff] }
 0x66e   :  { %6841 = vst.msk [vmem:[%s14461_s5 + $0x170] sm:$0xff] %vm16494_vm6, %v6777_v45  ;;  %v4641_v24 = vadd.f32 %v16502_v49, %v16501_v63  ;;  %v4646_v42 = vadd.f32 %v16508_v39, %v16507_v41  ;;  %vm16541_vm6 = vmmov %vm16526_vm0 }
 0x66f   :  { %v6622_v34 = vpop.f32.mrf.mxu3  ;;  %v5686_v12 = vadd.f32 %v5600_v7, %v4638_v48 }
 0x670   :  { %v6623_v47 = vadd.f32 %v6622_v34, %v6405_v9  ;;  %v5390_v9 = vpop.f32.mrf.mxu0 }
 0x672   :  { %v6712_v21 = vadd.f32 %v6623_v47, %v5684_v32 }
 0x673   :  { %v6418_v43 = vpop.f32.mrf.mxu2 }
 0x674   :  { %v5602_v3 = vpop.f32.mrf.mxu1  ;;  %v6778_v62 = vadd.f32 %v13838_v2, %v6712_v21  ;;  %v16511_v21 = vld [vmem:[#allocation131_spill] sm:$0xff] }
 0x675   :  { %v5603_v58 = vadd.f32 %v5602_v3, %v5385_v18 }
 0x676   :  { %6842 = vst.msk [vmem:[%s14461_s5 + $0x178] sm:$0xff] %vm16497_vm9, %v6778_v62  ;;  %vm16542_vm9 = vmmov %vm16526_vm0 }
 0x677   :  { %v6625_v33 = vpop.f32.mrf.mxu3  ;;  %v5687_v50 = vadd.f32 %v5603_v58, %v4641_v24 }
 0x678   :  { %v6626_v61 = vadd.f32 %v6625_v33, %v6408_v54  ;;  %v5392_v40 = vpop.f32.mrf.mxu0 }
 0x67a   :  { %v6713_v30 = vadd.f32 %v6626_v61, %v5685_v16 }
 0x67b   :  { %v6420_v28 = vpop.f32.mrf.mxu2 }
 0x67c   :  { %v5604_v37 = vpop.f32.mrf.mxu1  ;;  %v6779_v26 = vadd.f32 %v13838_v2, %v6713_v30  ;;  %v16513_v30 = vld [vmem:[#allocation121_spill] sm:$0xff] }
 0x67d   :  { %v5605_v13 = vadd.f32 %v5604_v37, %v5387_v25  ;;  %v16510_v25 = vld [vmem:[#allocation118_spill] sm:$0xff] }
 0x67e   :  { %6843 = vst.msk [vmem:[%s14461_s5 + $0x180] sm:$0xff] %vm16500_vm8, %v6779_v26  ;;  %v4648_v3 = vadd.f32 %v16511_v21, %v16510_v25 }
 0x67f   :  { %v6627_v60 = vpop.f32.mrf.mxu3  ;;  %v5688_v11 = vadd.f32 %v5605_v13, %v4643_v8 }
 0x680   :  { %v6628_v23 = vadd.f32 %v6627_v60, %v6410_v22  ;;  %v5395_v38 = vpop.f32.mrf.mxu0 }
 0x682   :  { %v6714_v27 = vadd.f32 %v6628_v23, %v5686_v12 }
 0x683   :  { %v6423_v35 = vpop.f32.mrf.mxu2 }
 0x684   :  { %v5607_v54 = vpop.f32.mrf.mxu1  ;;  %v6780_v14 = vadd.f32 %v13838_v2, %v6714_v27  ;;  %v16516_v27 = vld [vmem:[#allocation122_spill] sm:$0xff] }
 0x685   :  { %v5608_v6 = vadd.f32 %v5607_v54, %v5390_v9  ;;  %v16514_v9 = vld [vmem:[#allocation49_spill] sm:$0xff]  ;;  %v16517_v54 = vld [vmem:[#allocation64_spill] sm:$0xff] }
 0x686   :  { %6844 = vst.msk [vmem:[%s14461_s5 + $0x188] sm:$0xff] %vm16503_vm4, %v6780_v14  ;;  %v4651_v37 = vadd.f32 %v16514_v9, %v16513_v30  ;;  %v4653_v58 = vadd.f32 %v16517_v54, %v16516_v27 }
 0x687   :  { %v6630_v46 = vpop.f32.mrf.mxu3 }
 0x688   :  { %v6631_v17 = vadd.f32 %v6630_v46, %v6413_v31  ;;  %v5689_v31 = vadd.f32 %v5608_v6, %v4646_v42  ;;  %v5397_v4 = vpop.f32.mrf.mxu0 }
 0x68a   :  { %v6715_v29 = vadd.f32 %v6631_v17, %v5687_v50  ;;  %v16518_v17 = vld [vmem:[#allocation124_spill] sm:$0xff] }
 0x68b   :  { %v6425_v62 = vpop.f32.mrf.mxu2 }
 0x68c   :  { %v5609_v15 = vpop.f32.mrf.mxu1  ;;  %v6781_v22 = vadd.f32 %v13838_v2, %v6715_v29  ;;  %v16519_v29 = vld [vmem:[#allocation137_spill] sm:$0xff] }
 0x68d   :  { %v5610_v32 = vadd.f32 %v5609_v15, %v5392_v40  ;;  %v4656_v15 = vadd.f32 %v16519_v29, %v16518_v17 }
 0x68e   :  { %6845 = vst.msk [vmem:[%s14461_s5 + $0x190] sm:$0xff] %vm16506_vm7, %v6781_v22 }
 0x68f   :  { %v6632_v52 = vpop.f32.mrf.mxu3  ;;  %v5690_v55 = vadd.f32 %v5610_v32, %v4648_v3 }
 0x690   :  { %v6633_v1 = vadd.f32 %v6632_v52, %v6415_v36  ;;  %v5400_v33 = vpop.f32.mrf.mxu0 }
 0x692   :  { %v6716_v10 = vadd.f32 %v6633_v1, %v5688_v11  ;;  %v16521_v1 = vld [vmem:[#allocation126_spill] sm:$0xff] }
 0x693   :  { %v6428_v44 = vpop.f32.mrf.mxu2 }
 0x694   :  { %v5612_v18 = vpop.f32.mrf.mxu1  ;;  %v6782_v19 = vadd.f32 %v13838_v2, %v6716_v10  ;;  %v16522_v10 = vld [vmem:[#allocation138_spill] sm:$0xff] }
 0x695   :  { %v5613_v16 = vadd.f32 %v5612_v18, %v5395_v38  ;;  %v4658_v18 = vadd.f32 %v16522_v10, %v16521_v1 }
 0x696   :  { %6846 = vst.msk [vmem:[%s14461_s5 + $0x198] sm:$0xff] %vm16509_vm12, %v6782_v19 }
 0x697   :  { %v6635_v45 = vpop.f32.mrf.mxu3  ;;  %v5691_v26 = vadd.f32 %v5613_v16, %v4651_v37 }
 0x698   :  { %v6636_v57 = vadd.f32 %v6635_v45, %v6418_v43  ;;  %v5402_v23 = vpop.f32.mrf.mxu0 }
 0x69a   :  { %v6717_v0 = vadd.f32 %v6636_v57, %v5689_v31  ;;  %v16524_v57 = vld [vmem:[#allocation11_spill] sm:$0xff] }
 0x69b   :  { %v6430_v24 = vpop.f32.mrf.mxu2 }
 0x69c   :  { %v5614_v34 = vpop.f32.mrf.mxu1  ;;  %v6783_v47 = vadd.f32 %v13838_v2, %v6717_v0 }
 0x69d   :  { %v5615_v60 = vadd.f32 %v5614_v34, %v5397_v4  ;;  %v16525_v4 = vld [vmem:[#allocation139_spill] sm:$0xff] }
 0x69e   :  { %6847 = vst.msk [vmem:[%s14461_s5 + $0x1a0] sm:$0xff] %vm16512_vm3, %v6783_v47  ;;  %v4661_v0 = vadd.f32 %v16525_v4, %v16524_v57 }
 0x69f   :  { %v6637_v59 = vpop.f32.mrf.mxu3  ;;  %v5692_v40 = vadd.f32 %v5615_v60, %v4653_v58 }
 0x6a0   :  { %v6638_v5 = vadd.f32 %v6637_v59, %v6420_v28  ;;  %v5405_v28 = vpop.f32.mrf.mxu0 }
 0x6a2   :  { %v6718_v56 = vadd.f32 %v6638_v5, %v5690_v55  ;;  %v16527_v5 = vld [vmem:[#allocation132_spill] sm:$0xff] }
 0x6a3   :  { %v6433_v11 = vpop.f32.mrf.mxu2 }
 0x6a4   :  { %v5617_v36 = vpop.f32.mrf.mxu1  ;;  %v6784_v61 = vadd.f32 %v13838_v2, %v6718_v56  ;;  %v16528_v56 = vld [vmem:[#allocation2_spill] sm:$0xff] }
 0x6a5   :  { %v5618_v46 = vadd.f32 %v5617_v36, %v5400_v33  ;;  %v4663_v33 = vadd.f32 %v16528_v56, %v16527_v5 }
 0x6a6   :  { %6848 = vst.msk [vmem:[%s14461_s5 + $0x1a8] sm:$0xff] %vm16515_vm10, %v6784_v61 }
 0x6a7   :  { %v6640_v7 = vpop.f32.mrf.mxu3  ;;  %v5693_v53 = vadd.f32 %v5618_v46, %v4656_v15 }
 0x6a8   :  { %v6641_v20 = vadd.f32 %v6640_v7, %v6423_v35  ;;  %v5407_v35 = vpop.f32.mrf.mxu0 }
 0x6aa   :  { %v6719_v48 = vadd.f32 %v6641_v20, %v5691_v26 }
 0x6ab   :  { %v6435_v34 = vpop.f32.mrf.mxu2 }
 0x6ac   :  { %v6785_v12 = vadd.f32 %v13838_v2, %v6719_v48  ;;  %v5619_v43 = vpop.f32.mrf.mxu1  ;;  %v16531_v48 = vld [vmem:[#allocation70_spill] sm:$0xff] }
 0x6ad   :  { %v5620_v38 = vadd.f32 %v5619_v43, %v5402_v23 }
 0x6ae   :  { %6849 = vst.msk [vmem:[%s14461_s5 + $0x1b0] sm:$0xff] %vm16466_vm1, %v6785_v12 }
 0x6af   :  { %v6642_v14 = vpop.f32.mrf.mxu3  ;;  %v5694_v19 = vadd.f32 %v5620_v38, %v4658_v18 }
 0x6b0   :  { %v6643_v63 = vadd.f32 %v6642_v14, %v6425_v62  ;;  %v5410_v21 = vpop.f32.mrf.mxu0 }
 0x6b2   :  { %v6720_v49 = vadd.f32 %v6643_v63, %v5692_v40  ;;  %v16533_v40 = vld [vmem:[#allocation136_spill] sm:$0xff] }
 0x6b3   :  { %v6438_v30 = vpop.f32.mrf.mxu2  ;;  %v16534_v63 = vld [vmem:[#allocation140_spill] sm:$0xff] }
 0x6b4   :  { %v6786_v50 = vadd.f32 %v13838_v2, %v6720_v49  ;;  %v5622_v13 = vpop.f32.mrf.mxu1  ;;  %v4668_v49 = vadd.f32 %v16534_v63, %v16533_v40 }
 0x6b5   :  { %v5623_v45 = vadd.f32 %v5622_v13, %v5405_v28 }
 0x6b6   :  { %6850 = vst.msk [vmem:[%s14461_s5 + $0x1b8] sm:$0xff] %vm16520_vm2, %v6786_v50 }
 0x6b7   :  { %v6645_v22 = vpop.f32.mrf.mxu3  ;;  %v5695_v47 = vadd.f32 %v5623_v45, %v4661_v0 }
 0x6b8   :  { %v6646_v51 = vadd.f32 %v6645_v22, %v6428_v44  ;;  %v5412_v7 = vpop.f32.mrf.mxu0  ;;  %v16530_v44 = vld [vmem:[#allocation133_spill] sm:$0xff] }
 0x6b9   :  { %v4666_v60 = vadd.f32 %v16531_v48, %v16530_v44 }
 0x6ba   :  { %v6721_v8 = vadd.f32 %v6646_v51, %v5693_v53  ;;  %v16536_v53 = vld [vmem:[#allocation144_spill] sm:$0xff]  ;;  %v16537_v51 = vld [vmem:[#allocation141_spill] sm:$0xff] }
 0x6bb   :  { %v6440_v54 = vpop.f32.mrf.mxu2 }
 0x6bc   :  { %v6787_v52 = vadd.f32 %v13838_v2, %v6721_v8  ;;  %v5624_v39 = vpop.f32.mrf.mxu1  ;;  %v4671_v8 = vadd.f32 %v16537_v51, %v16536_v53 }
 0x6bd   :  { %v5625_v62 = vadd.f32 %v5624_v39, %v5407_v35  ;;  %v16539_v35 = vld [vmem:[#allocation146_spill] sm:$0xff] }
 0x6be   :  { %6851 = vst.msk [vmem:[%s14461_s5 + $0x1c0] sm:$0xff] %vm16523_vm5, %v6787_v52 }
 0x6bf   :  { %v6647_v6 = vpop.f32.mrf.mxu3  ;;  %v5696_v16 = vadd.f32 %v5625_v62, %v4663_v33 }
 0x6c0   :  { %v6648_v41 = vadd.f32 %v6647_v6, %v6430_v24  ;;  %v5415_v24 = vpop.f32.mrf.mxu0 }
 0x6c2   :  { %v6722_v42 = vadd.f32 %v6648_v41, %v5694_v19  ;;  %v16540_v41 = vld [vmem:[#allocation134_spill] sm:$0xff] }
 0x6c3   :  { %v6443_v22 = vpop.f32.mrf.mxu2  ;;  %v4673_v39 = vadd.f32 %v16540_v41, %v16539_v35 }
 0x6c4   :  { %v6788_v31 = vadd.f32 %v13838_v2, %v6722_v42  ;;  %v5627_v59 = vpop.f32.mrf.mxu1 }
 0x6c5   :  { %v5628_v37 = vadd.f32 %v5627_v59, %v5410_v21 }
 0x6c6   :  { %6852 = vst.msk [vmem:[%s14461_s5 + $0x1c8] sm:$0xff] %vm16526_vm0, %v6788_v31 }
 0x6c7   :  { %v6650_v32 = vpop.f32.mrf.mxu3  ;;  %v5697_v23 = vadd.f32 %v5628_v37, %v4666_v60 }
 0x6c8   :  { %v6651_v25 = vadd.f32 %v6650_v32, %v6433_v11  ;;  %v5417_v1 = vpop.f32.mrf.mxu0 }
 0x6ca   :  { %v6723_v3 = vadd.f32 %v6651_v25, %v5695_v47 }
 0x6cb   :  { %v6445_v42 = vpop.f32.mrf.mxu2 }
 0x6cc   :  { %v6789_v55 = vadd.f32 %v13838_v2, %v6723_v3  ;;  %v5629_v20 = vpop.f32.mrf.mxu1 }
 0x6cd   :  { %v5630_v58 = vadd.f32 %v5629_v20, %v5412_v7 }
 0x6ce   :  { %6853 = vst.msk [vmem:[%s14461_s5 + $0x1d0] sm:$0xff] %vm16529_vm14, %v6789_v55 }
 0x6cf   :  { %v6652_v36 = vpop.f32.mrf.mxu3  ;;  %v5698_v17 = vadd.f32 %v5630_v58, %v4668_v49 }
 0x6d0   :  { %v6653_v61 = vadd.f32 %v6652_v36, %v6435_v34 }
 0x6d2   :  { %v6724_v9 = vadd.f32 %v6653_v61, %v5696_v16 }
 0x6d4   :  { %v6790_v26 = vadd.f32 %v13838_v2, %v6724_v9  ;;  %v5632_v46 = vpop.f32.mrf.mxu1 }
 0x6d5   :  { %v5633_v28 = vadd.f32 %v5632_v46, %v5415_v24 }
 0x6d6   :  { %6854 = vst.msk [vmem:[%s14461_s5 + $0x1d8] sm:$0xff] %vm16532_vm13, %v6790_v26 }
 0x6d7   :  { %v6655_v12 = vpop.f32.mrf.mxu3  ;;  %v5699_v52 = vadd.f32 %v5633_v28, %v4671_v8 }
 0x6d8   :  { %v6656_v43 = vadd.f32 %v6655_v12, %v6438_v30 }
 0x6da   :  { %v6725_v27 = vadd.f32 %v6656_v43, %v5697_v23 }
 0x6dc   :  { %v6791_v14 = vadd.f32 %v13838_v2, %v6725_v27  ;;  %v5634_v10 = vpop.f32.mrf.mxu1 }
 0x6dd   :  { %v5635_v6 = vadd.f32 %v5634_v10, %v5417_v1 }
 0x6de   :  { %6855 = vst.msk [vmem:[%s14461_s5 + $0x1e0] sm:$0xff] %vm16535_vm15, %v6791_v14 }
 0x6df   :  { %v6657_v50 = vpop.f32.mrf.mxu3  ;;  %v5700_v31 = vadd.f32 %v5635_v6, %v4673_v39 }
 0x6e0   :  { %v6658_v29 = vadd.f32 %v6657_v50, %v6440_v54 }
 0x6e2   :  { %v6726_v15 = vadd.f32 %v6658_v29, %v5698_v17 }
 0x6e4   :  { %v6792_v13 = vadd.f32 %v13838_v2, %v6726_v15  ;;  %v8192_v2 = vld [vmem:[%s14458_s4 + $0x1] ss:$0 sm:$0xff] }
 0x6e6   :  { %6856 = vst.msk [vmem:[%s14461_s5 + $0x1e8] sm:$0xff] %vm16538_vm11, %v6792_v13 }
 0x6e7   :  { %v6660_v38 = vpop.f32.mrf.mxu3 }
 0x6e8   :  { %v6661_v11 = vadd.f32 %v6660_v38, %v6443_v22 }
 0x6ea   :  { %v6727_v18 = vadd.f32 %v6661_v11, %v5699_v52 }
 0x6ec   :  { %v6793_v19 = vadd.f32 %v8192_v2, %v6727_v18 }
 0x6ee   :  { %6857 = vst.msk [vmem:[%s14461_s5 + $0x1f0] sm:$0xff] %vm16541_vm6, %v6793_v19 }
 0x6ef   :  { %v6662_v45 = vpop.f32.mrf.mxu3 }
 0x6f0   :  { %v6663_v57 = vadd.f32 %v6662_v45, %v6445_v42 }
 0x6f2   :  { %v6728_v4 = vadd.f32 %v6663_v57, %v5700_v31 }
 0x6f4   :  { %v6794_v0 = vadd.f32 %v8192_v2, %v6728_v4 }
 0x6f6   :  { %6858 = vst.msk [vmem:[%s14461_s5 + $0x1f8] sm:$0xff] %vm16542_vm9, %v6794_v0 }

</bundles_post_ra>
